<compile_context>
chip_gen: v6e
topology: v6e:2x2x1
jax: 0.10.0
libtpu: 0.0.40
codegen_flags: <defaults>
</compile_context>

<pallas_src>
import math

import jax
import jax.numpy as jnp
import numpy as np
from jax.experimental import pallas as pl
from jax.experimental.pallas import tpu as pltpu


# ----------------------------------------------------------------------------
# shared math helpers (used both inside the Pallas kernel and by the reference)
# ----------------------------------------------------------------------------
_GELU_C = 0.7978845608028654  # sqrt(2 / pi)


def _gelu(x):
    return 0.5 * x * (1.0 + jnp.tanh(_GELU_C * (x + 0.044715 * x * x * x)))


def _layer_norm(x, gamma, beta, eps=1e-12):
    mu = jnp.mean(x, axis=-1, keepdims=True)
    xc = x - mu
    var = jnp.mean(xc * xc, axis=-1, keepdims=True)
    return xc * jax.lax.rsqrt(var + eps) * gamma + beta


def _softmax_last(s):
    m = jnp.max(s, axis=-1, keepdims=True)
    p = jnp.exp(s - m)
    return p / jnp.sum(p, axis=-1, keepdims=True)


# ----------------------------------------------------------------------------
# Pallas kernel: all BERT layers + masked mean pool + last_fc for one batch tile
# ----------------------------------------------------------------------------
def bert_decoder_kernel(hs_ref, ext_ref, msk_ref,
                        wq_ref, bq_ref, wk_ref, bk_ref, wv_ref, bv_ref,
                        woa_ref, boa_ref, g1_ref, be1_ref,
                        wi_ref, bi_ref, wof_ref, bof_ref, g2_ref, be2_ref,
                        wl_ref, bl_ref,
                        out_ref):
    tb, seq, hid = hs_ref.shape                 # batch tile, seq len, hidden
    nlayer, nhead, _, dhead = wq_ref.shape
    n = tb * seq
    f32 = jnp.float32

    # tokens of the whole batch tile processed together: [tb*seq, hid]
    x = hs_ref[...].reshape(n, hid)
    ext = ext_ref[...]                          # [tb, 1, seq] additive mask

    for l in range(nlayer):
        # ---- multi-head self-attention (per-head weights, exact decomposition)
        # residual + attention-output bias seed the accumulator
        acc = x + boa_ref[l]
        for h in range(nhead):
            # 1/sqrt(d_head) is folded into wq/bq by the wrapper.
            q = jnp.dot(x, wq_ref[l, h], preferred_element_type=f32) + bq_ref[l, h]
            k = jnp.dot(x, wk_ref[l, h], preferred_element_type=f32) + bk_ref[l, h]
            v = jnp.dot(x, wv_ref[l, h], preferred_element_type=f32) + bv_ref[l, h]
            q3 = q.reshape(tb, seq, dhead)
            k3 = k.reshape(tb, seq, dhead)
            v3 = v.reshape(tb, seq, dhead)
            s = jnp.einsum("bqd,bkd->bqk", q3, k3,
                           preferred_element_type=f32)           # [tb, seq, seq]
            probs = _softmax_last(s + ext)                       # additive mask
            ctx = jnp.einsum("bqk,bkd->bqd", probs, v3,
                             preferred_element_type=f32)         # [tb, seq, dhead]
            # output projection decomposed as a sum over heads (exact)
            acc = acc + jnp.dot(ctx.reshape(n, dhead), woa_ref[l, h],
                                preferred_element_type=f32)
        attn_out = _layer_norm(acc, g1_ref[l], be1_ref[l])

        # ---- feed-forward block
        inter = _gelu(jnp.dot(attn_out, wi_ref[l], preferred_element_type=f32)
                      + bi_ref[l])
        ffn = jnp.dot(inter, wof_ref[l], preferred_element_type=f32) + bof_ref[l]
        x = _layer_norm(ffn + attn_out, g2_ref[l], be2_ref[l])

    # ---- masked mean pooling over the sequence axis
    x3 = x.reshape(tb, seq, hid)
    m3 = msk_ref[...]                           # [tb, seq, 1]
    pooled_sum = jnp.sum(x3 * m3, axis=1)       # [tb, hid]
    msum = jnp.sum(m3, axis=1)                  # [tb, 1]
    # guard only matters for padded grid rows; identical to sum/msum for real rows
    pooled = jnp.where(msum > 0.0, pooled_sum / msum, 0.0)

    # ---- last_fc (output_activation == Identity)
    out_ref[...] = (jnp.dot(pooled, wl_ref[...], preferred_element_type=f32)
                    + bl_ref[...])


# ----------------------------------------------------------------------------
# Wrapper: packs per-head weights, builds the grid and BlockSpecs
# ----------------------------------------------------------------------------
def bert_decoder_forward(params, hidden_states, attention_mask, *,
                         num_heads, tile_b=8):
    B, S, H = hidden_states.shape
    L = params["wq"].shape[0]
    I = params["wi"].shape[-1]
    O = params["w_last"].shape[-1]
    nH = num_heads
    dH = H // nH
    assert nH * dH == H

    f32 = jnp.float32
    hidden_states = hidden_states.astype(f32)
    attention_mask = attention_mask.astype(f32)

    # bidirection == 1: additive attention mask, pad positions -> -10000
    ext_mask = ((1.0 - attention_mask) * -10000.0)[:, None, :]    # [B, 1, S]
    mask3 = attention_mask[:, :, None]                            # [B, S, 1]

    # ---- pack weights per head (exact split of the fused projections) ----
    inv_sqrt_dh = 1.0 / math.sqrt(dH)
    # fold 1/sqrt(dH) into the Q projection (exact: (s*q)·k == s*(q·k))
    wq_p = (params["wq"] * inv_sqrt_dh).reshape(L, H, nH, dH).transpose(0, 2, 1, 3)
    wk_p = params["wk"].reshape(L, H, nH, dH).transpose(0, 2, 1, 3)
    wv_p = params["wv"].reshape(L, H, nH, dH).transpose(0, 2, 1, 3)
    bq_p = (params["bq"] * inv_sqrt_dh).reshape(L, nH, 1, dH)
    bk_p = params["bk"].reshape(L, nH, 1, dH)
    bv_p = params["bv"].reshape(L, nH, 1, dH)
    woa_p = params["wo_attn"].reshape(L, nH, dH, H)                   # [L,nH,dH,H]
    boa_p = params["bo_attn"].reshape(L, 1, H)
    g1_p = params["ln1_g"].reshape(L, 1, H)
    be1_p = params["ln1_b"].reshape(L, 1, H)
    wi_p = params["wi"]                                               # [L,H,I]
    bi_p = params["bi"].reshape(L, 1, I)
    wof_p = params["wo_ffn"]                                          # [L,I,H]
    bof_p = params["bo_ffn"].reshape(L, 1, H)
    g2_p = params["ln2_g"].reshape(L, 1, H)
    be2_p = params["ln2_b"].reshape(L, 1, H)
    wl_p = params["w_last"]                                           # [H,O]
    bl_p = params["b_last"].reshape(1, O)

    weights = (wq_p, bq_p, wk_p, bk_p, wv_p, bv_p,
               woa_p, boa_p, g1_p, be1_p,
               wi_p, bi_p, wof_p, bof_p, g2_p, be2_p,
               wl_p, bl_p)

    tile_b = min(tile_b, B)
    grid = (pl.cdiv(B, tile_b),)

    def batched(shape):                 # activation tiles: walk the batch axis
        blk = (tile_b,) + tuple(shape[1:])
        rank = len(shape)
        return pl.BlockSpec(blk, lambda i: (i,) + (0,) * (rank - 1))

    def resident(shape):                # weights: constant block -> stay in VMEM
        rank = len(shape)
        return pl.BlockSpec(tuple(shape), lambda i: (0,) * rank)

    in_specs = ([batched(hidden_states.shape),
                 batched(ext_mask.shape),
                 batched(mask3.shape)]
                + [resident(w.shape) for w in weights])
    out_specs = pl.BlockSpec((tile_b, O), lambda i: (i, 0))

    # advisory cost estimate for the XLA scheduler
    flops = B * (L * (8 * S * H * H + 4 * S * S * H + 4 * S * H * I) + 2 * H * O)
    transcendentals = B * L * (nH * S * S + S * I + 2 * S)
    weight_bytes = sum(int(np.prod(w.shape)) for w in weights) * 4
    bytes_accessed = 4 * (B * S * H + 2 * B * S + B * O) + weight_bytes
    cost = pl.CostEstimate(flops=flops, transcendentals=transcendentals,
                           bytes_accessed=bytes_accessed)

    out = pl.pallas_call(
        bert_decoder_kernel,
        out_shape=jax.ShapeDtypeStruct((B, O), f32),
        grid=grid,
        in_specs=in_specs,
        out_specs=out_specs,
        compiler_params=pltpu.CompilerParams(
            dimension_semantics=("parallel",),
            vmem_limit_bytes=64 * 1024 * 1024),
        cost_estimate=cost,
    )(hidden_states, ext_mask, mask3, *weights)
    return out


# ----------------------------------------------------------------------------
# Pure-JAX reference (standard fused-projection BERT layer formulation)
# ----------------------------------------------------------------------------
def bert_decoder_ref(params, hidden_states, attention_mask, *, num_heads):
    x = hidden_states.astype(jnp.float32)
    mask = attention_mask.astype(jnp.float32)
    B, S, H = x.shape
    L = params["wq"].shape[0]
    dH = H // num_heads

    ext = (1.0 - mask)[:, None, None, :] * -10000.0          # [B,1,1,S]

    def split_heads(t):
        return t.reshape(B, S, num_heads, dH).transpose(0, 2, 1, 3)

    for l in range(L):
        q = split_heads(x @ params["wq"][l] + params["bq"][l])
        k = split_heads(x @ params["wk"][l] + params["bk"][l])
        v = split_heads(x @ params["wv"][l] + params["bv"][l])
        s = jnp.einsum("bhqd,bhkd->bhqk", q, k) / math.sqrt(dH) + ext
        probs = _softmax_last(s)
        ctx = jnp.einsum("bhqk,bhkd->bhqd", probs, v)
        ctx = ctx.transpose(0, 2, 1, 3).reshape(B, S, H)
        attn = ctx @ params["wo_attn"][l] + params["bo_attn"][l]
        attn_out = _layer_norm(attn + x, params["ln1_g"][l], params["ln1_b"][l])
        inter = _gelu(attn_out @ params["wi"][l] + params["bi"][l])
        ffn = inter @ params["wo_ffn"][l] + params["bo_ffn"][l]
        x = _layer_norm(ffn + attn_out, params["ln2_g"][l], params["ln2_b"][l])

    pooled = (x * mask[:, :, None]).sum(axis=1) / mask.sum(axis=1, keepdims=True)
    return pooled @ params["w_last"] + params["b_last"]


# ----------------------------------------------------------------------------
# Deterministic parameter construction (weights already in x @ W layout)
# ----------------------------------------------------------------------------
def init_bert_decoder_params(key, *, num_layers, hidden_size, intermediate_size,
                             output_size, init_w=0.003):
    L, H, I, O = num_layers, hidden_size, intermediate_size, output_size
    ks = jax.random.split(key, 14)

    def w(k, shape, std=0.02):
        return std * jax.random.normal(k, shape, jnp.float32)

    return {
        "wq": w(ks[0], (L, H, H)), "bq": w(ks[1], (L, H)),
        "wk": w(ks[2], (L, H, H)), "bk": w(ks[3], (L, H)),
        "wv": w(ks[4], (L, H, H)), "bv": w(ks[5], (L, H)),
        "wo_attn": w(ks[6], (L, H, H)), "bo_attn": w(ks[7], (L, H)),
        "ln1_g": jnp.ones((L, H), jnp.float32),
        "ln1_b": jnp.zeros((L, H), jnp.float32),
        "wi": w(ks[8], (L, H, I)), "bi": w(ks[9], (L, I)),
        "wo_ffn": w(ks[10], (L, I, H)), "bo_ffn": w(ks[11], (L, H)),
        "ln2_g": jnp.ones((L, H), jnp.float32),
        "ln2_b": jnp.zeros((L, H), jnp.float32),
        # last_fc: uniform(-init_w, init_w), as in the module
        "w_last": jax.random.uniform(ks[12], (H, O), jnp.float32, -init_w, init_w),
        "b_last": jax.random.uniform(ks[13], (O,), jnp.float32, -init_w, init_w),
    }


if __name__ == "__main__":
    # small shapes consistent with the module: batch=16, seq=8, hidden=32,
    # 4 heads, FFN=64, 2 layers, output_size=8
    B, S, H, NH, I, L, O = 16, 8, 32, 4, 64, 2, 8

    key = jax.random.PRNGKey(0)
    kp, kh, km = jax.random.split(key, 3)

    params = init_bert_decoder_params(kp, num_layers=L, hidden_size=H,
                                      intermediate_size=I, output_size=O)
    hidden_states = jax.random.normal(kh, (B, S, H), jnp.float32)
    lengths = jax.random.randint(km, (B,), 3, S + 1)
    attention_mask = (jnp.arange(S)[None, :] < lengths[:, None]).astype(jnp.float32)

    out = bert_decoder_forward(params, hidden_states, attention_mask,
                               num_heads=NH, tile_b=8)
    jax.block_until_ready(out)

    ref = bert_decoder_ref(params, hidden_states, attention_mask, num_heads=NH)
    np.testing.assert_allclose(np.asarray(out), np.asarray(ref),
                               rtol=1e-4, atol=1e-5)
    print("KERNEL_OK")
</pallas_src>

<mosaic_0001>
module attributes {stable_mosaic.version = 11 : i64} {
  func.func @bert_decoder_kernel(%arg0: i32, %arg1: memref<8x8x32xf32, #tpu.memory_space<vmem>>, %arg2: memref<8x1x8xf32, #tpu.memory_space<vmem>>, %arg3: memref<8x8x1xf32, #tpu.memory_space<vmem>>, %arg4: memref<2x4x32x8xf32, #tpu.memory_space<vmem>>, %arg5: memref<2x4x1x8xf32, #tpu.memory_space<vmem>>, %arg6: memref<2x4x32x8xf32, #tpu.memory_space<vmem>>, %arg7: memref<2x4x1x8xf32, #tpu.memory_space<vmem>>, %arg8: memref<2x4x32x8xf32, #tpu.memory_space<vmem>>, %arg9: memref<2x4x1x8xf32, #tpu.memory_space<vmem>>, %arg10: memref<2x4x8x32xf32, #tpu.memory_space<vmem>>, %arg11: memref<2x1x32xf32, #tpu.memory_space<vmem>>, %arg12: memref<2x1x32xf32, #tpu.memory_space<vmem>>, %arg13: memref<2x1x32xf32, #tpu.memory_space<vmem>>, %arg14: memref<2x32x64xf32, #tpu.memory_space<vmem>>, %arg15: memref<2x1x64xf32, #tpu.memory_space<vmem>>, %arg16: memref<2x64x32xf32, #tpu.memory_space<vmem>>, %arg17: memref<2x1x32xf32, #tpu.memory_space<vmem>>, %arg18: memref<2x1x32xf32, #tpu.memory_space<vmem>>, %arg19: memref<2x1x32xf32, #tpu.memory_space<vmem>>, %arg20: memref<32x8xf32, #tpu.memory_space<vmem>>, %arg21: memref<1x8xf32, #tpu.memory_space<vmem>>, %arg22: memref<8x8xf32, #tpu.memory_space<vmem>>) attributes {dimension_semantics = [#tpu.dimension_semantics<parallel>], iteration_bounds = array<i64: 2>, scalar_prefetch = 0 : i64, scratch_operands = 0 : i64, tpu.core_type = #tpu.core_type<tc>, window_params = [{transform_indices = @transform_0, window_bounds = array<i64: 8, 8, 32>}, {transform_indices = @transform_1, window_bounds = array<i64: 8, 1, 8>}, {transform_indices = @transform_2, window_bounds = array<i64: 8, 8, 1>}, {pipeline_mode = #tpu.pipeline_mode<synchronous>, transform_indices = @transform_3, window_bounds = array<i64: 2, 4, 32, 8>}, {pipeline_mode = #tpu.pipeline_mode<synchronous>, transform_indices = @transform_4, window_bounds = array<i64: 2, 4, 1, 8>}, {pipeline_mode = #tpu.pipeline_mode<synchronous>, transform_indices = @transform_5, window_bounds = array<i64: 2, 4, 32, 8>}, {pipeline_mode = #tpu.pipeline_mode<synchronous>, transform_indices = @transform_6, window_bounds = array<i64: 2, 4, 1, 8>}, {pipeline_mode = #tpu.pipeline_mode<synchronous>, transform_indices = @transform_7, window_bounds = array<i64: 2, 4, 32, 8>}, {pipeline_mode = #tpu.pipeline_mode<synchronous>, transform_indices = @transform_8, window_bounds = array<i64: 2, 4, 1, 8>}, {pipeline_mode = #tpu.pipeline_mode<synchronous>, transform_indices = @transform_9, window_bounds = array<i64: 2, 4, 8, 32>}, {pipeline_mode = #tpu.pipeline_mode<synchronous>, transform_indices = @transform_10, window_bounds = array<i64: 2, 1, 32>}, {pipeline_mode = #tpu.pipeline_mode<synchronous>, transform_indices = @transform_11, window_bounds = array<i64: 2, 1, 32>}, {pipeline_mode = #tpu.pipeline_mode<synchronous>, transform_indices = @transform_12, window_bounds = array<i64: 2, 1, 32>}, {pipeline_mode = #tpu.pipeline_mode<synchronous>, transform_indices = @transform_13, window_bounds = array<i64: 2, 32, 64>}, {pipeline_mode = #tpu.pipeline_mode<synchronous>, transform_indices = @transform_14, window_bounds = array<i64: 2, 1, 64>}, {pipeline_mode = #tpu.pipeline_mode<synchronous>, transform_indices = @transform_15, window_bounds = array<i64: 2, 64, 32>}, {pipeline_mode = #tpu.pipeline_mode<synchronous>, transform_indices = @transform_16, window_bounds = array<i64: 2, 1, 32>}, {pipeline_mode = #tpu.pipeline_mode<synchronous>, transform_indices = @transform_17, window_bounds = array<i64: 2, 1, 32>}, {pipeline_mode = #tpu.pipeline_mode<synchronous>, transform_indices = @transform_18, window_bounds = array<i64: 2, 1, 32>}, {pipeline_mode = #tpu.pipeline_mode<synchronous>, transform_indices = @transform_19, window_bounds = array<i64: 32, 8>}, {pipeline_mode = #tpu.pipeline_mode<synchronous>, transform_indices = @transform_20, window_bounds = array<i64: 1, 8>}, {transform_indices = @transform_21, window_bounds = array<i64: 8, 8>}]} {
    %c0 = arith.constant 0 : index
    %c0_0 = arith.constant 0 : index
    %c0_1 = arith.constant 0 : index
    %0 = vector.load %arg1[%c0, %c0_0, %c0_1] : memref<8x8x32xf32, #tpu.memory_space<vmem>>, vector<8x8x32xf32>
    %1 = vector.shape_cast %0 : vector<8x8x32xf32> to vector<64x32xf32>
    %c0_2 = arith.constant 0 : index
    %c0_3 = arith.constant 0 : index
    %c0_4 = arith.constant 0 : index
    %2 = vector.load %arg2[%c0_2, %c0_3, %c0_4] : memref<8x1x8xf32, #tpu.memory_space<vmem>>, vector<8x1x8xf32>
    %c0_5 = arith.constant 0 : index
    %c0_6 = arith.constant 0 : index
    %c0_7 = arith.constant 0 : index
    %3 = vector.load %arg11[%c0_5, %c0_6, %c0_7] : memref<2x1x32xf32, #tpu.memory_space<vmem>>, vector<1x1x32xf32>
    %4 = vector.shape_cast %3 : vector<1x1x32xf32> to vector<1x32xf32>
    %5 = vector.broadcast %4 : vector<1x32xf32> to vector<64x32xf32>
    %6 = arith.addf %1, %5 : vector<64x32xf32>
    %c0_8 = arith.constant 0 : index
    %c0_9 = arith.constant 0 : index
    %c0_10 = arith.constant 0 : index
    %c0_11 = arith.constant 0 : index
    %7 = vector.load %arg4[%c0_8, %c0_9, %c0_10, %c0_11] : memref<2x4x32x8xf32, #tpu.memory_space<vmem>>, vector<1x1x32x8xf32>
    %8 = vector.shape_cast %7 : vector<1x1x32x8xf32> to vector<32x8xf32>
    %cst = arith.constant dense<0.000000e+00> : vector<64x8xf32>
    %9 = tpu.matmul %1, %8, %cst {dimension_numbers = #tpu.dot_dimension_numbers<[1], [0], [0], [1], [0, 0, 1, 1], [], []>} : vector<64x32xf32>, vector<32x8xf32>, vector<64x8xf32> -> vector<64x8xf32>
    %c0_12 = arith.constant 0 : index
    %c0_13 = arith.constant 0 : index
    %c0_14 = arith.constant 0 : index
    %c0_15 = arith.constant 0 : index
    %10 = vector.load %arg5[%c0_12, %c0_13, %c0_14, %c0_15] : memref<2x4x1x8xf32, #tpu.memory_space<vmem>>, vector<1x1x1x8xf32>
    %11 = vector.shape_cast %10 : vector<1x1x1x8xf32> to vector<1x8xf32>
    %12 = vector.broadcast %11 : vector<1x8xf32> to vector<64x8xf32>
    %13 = arith.addf %9, %12 : vector<64x8xf32>
    %c0_16 = arith.constant 0 : index
    %c0_17 = arith.constant 0 : index
    %c0_18 = arith.constant 0 : index
    %c0_19 = arith.constant 0 : index
    %14 = vector.load %arg6[%c0_16, %c0_17, %c0_18, %c0_19] : memref<2x4x32x8xf32, #tpu.memory_space<vmem>>, vector<1x1x32x8xf32>
    %15 = vector.shape_cast %14 : vector<1x1x32x8xf32> to vector<32x8xf32>
    %cst_20 = arith.constant dense<0.000000e+00> : vector<64x8xf32>
    %16 = tpu.matmul %1, %15, %cst_20 {dimension_numbers = #tpu.dot_dimension_numbers<[1], [0], [0], [1], [0, 0, 1, 1], [], []>} : vector<64x32xf32>, vector<32x8xf32>, vector<64x8xf32> -> vector<64x8xf32>
    %c0_21 = arith.constant 0 : index
    %c0_22 = arith.constant 0 : index
    %c0_23 = arith.constant 0 : index
    %c0_24 = arith.constant 0 : index
    %17 = vector.load %arg7[%c0_21, %c0_22, %c0_23, %c0_24] : memref<2x4x1x8xf32, #tpu.memory_space<vmem>>, vector<1x1x1x8xf32>
    %18 = vector.shape_cast %17 : vector<1x1x1x8xf32> to vector<1x8xf32>
    %19 = vector.broadcast %18 : vector<1x8xf32> to vector<64x8xf32>
    %20 = arith.addf %16, %19 : vector<64x8xf32>
    %c0_25 = arith.constant 0 : index
    %c0_26 = arith.constant 0 : index
    %c0_27 = arith.constant 0 : index
    %c0_28 = arith.constant 0 : index
    %21 = vector.load %arg8[%c0_25, %c0_26, %c0_27, %c0_28] : memref<2x4x32x8xf32, #tpu.memory_space<vmem>>, vector<1x1x32x8xf32>
    %22 = vector.shape_cast %21 : vector<1x1x32x8xf32> to vector<32x8xf32>
    %cst_29 = arith.constant dense<0.000000e+00> : vector<64x8xf32>
    %23 = tpu.matmul %1, %22, %cst_29 {dimension_numbers = #tpu.dot_dimension_numbers<[1], [0], [0], [1], [0, 0, 1, 1], [], []>} : vector<64x32xf32>, vector<32x8xf32>, vector<64x8xf32> -> vector<64x8xf32>
    %c0_30 = arith.constant 0 : index
    %c0_31 = arith.constant 0 : index
    %c0_32 = arith.constant 0 : index
    %c0_33 = arith.constant 0 : index
    %24 = vector.load %arg9[%c0_30, %c0_31, %c0_32, %c0_33] : memref<2x4x1x8xf32, #tpu.memory_space<vmem>>, vector<1x1x1x8xf32>
    %25 = vector.shape_cast %24 : vector<1x1x1x8xf32> to vector<1x8xf32>
    %26 = vector.broadcast %25 : vector<1x8xf32> to vector<64x8xf32>
    %27 = arith.addf %23, %26 : vector<64x8xf32>
    %28 = vector.shape_cast %13 : vector<64x8xf32> to vector<8x8x8xf32>
    %29 = vector.shape_cast %20 : vector<64x8xf32> to vector<8x8x8xf32>
    %30 = vector.shape_cast %27 : vector<64x8xf32> to vector<8x8x8xf32>
    "tpu.trace_start"() <{level = 10 : i32, message = "bqd,bkd->bqk"}> : () -> ()
    %cst_34 = arith.constant dense<0.000000e+00> : vector<8x8x8xf32>
    %31 = tpu.matmul %28, %29, %cst_34 {dimension_numbers = #tpu.dot_dimension_numbers<[2], [2], [1], [1], [0, 0, 0, 1, 1, 1], [0], [0]>} : vector<8x8x8xf32>, vector<8x8x8xf32>, vector<8x8x8xf32> -> vector<8x8x8xf32>
    "tpu.trace_stop"() : () -> ()
    %32 = vector.broadcast %2 : vector<8x1x8xf32> to vector<8x8x8xf32>
    %33 = arith.addf %31, %32 : vector<8x8x8xf32>
    %cst_35 = arith.constant dense<0xFF800000> : vector<8x8xf32>
    %34 = vector.multi_reduction <maximumf>, %33, %cst_35 [2] : vector<8x8x8xf32> to vector<8x8xf32>
    %35 = vector.shape_cast %34 : vector<8x8xf32> to vector<8x8x1xf32>
    %36 = vector.broadcast %35 : vector<8x8x1xf32> to vector<8x8x8xf32>
    %37 = arith.subf %33, %36 : vector<8x8x8xf32>
    %38 = math.exp %37 : vector<8x8x8xf32>
    %cst_36 = arith.constant dense<0.000000e+00> : vector<8x8xf32>
    %39 = vector.multi_reduction <add>, %38, %cst_36 [2] : vector<8x8x8xf32> to vector<8x8xf32>
    %40 = vector.shape_cast %39 : vector<8x8xf32> to vector<8x8x1xf32>
    %41 = vector.broadcast %40 : vector<8x8x1xf32> to vector<8x8x8xf32>
    %42 = arith.divf %38, %41 : vector<8x8x8xf32>
    "tpu.trace_start"() <{level = 10 : i32, message = "bqk,bkd->bqd"}> : () -> ()
    %cst_37 = arith.constant dense<0.000000e+00> : vector<8x8x8xf32>
    %43 = tpu.matmul %42, %30, %cst_37 {dimension_numbers = #tpu.dot_dimension_numbers<[2], [1], [1], [2], [0, 0, 0, 1, 1, 2], [0], [0]>} : vector<8x8x8xf32>, vector<8x8x8xf32>, vector<8x8x8xf32> -> vector<8x8x8xf32>
    "tpu.trace_stop"() : () -> ()
    %44 = vector.shape_cast %43 : vector<8x8x8xf32> to vector<64x8xf32>
    %c0_38 = arith.constant 0 : index
    %c0_39 = arith.constant 0 : index
    %c0_40 = arith.constant 0 : index
    %c0_41 = arith.constant 0 : index
    %45 = vector.load %arg10[%c0_38, %c0_39, %c0_40, %c0_41] : memref<2x4x8x32xf32, #tpu.memory_space<vmem>>, vector<1x1x8x32xf32>
    %46 = vector.shape_cast %45 : vector<1x1x8x32xf32> to vector<8x32xf32>
    %cst_42 = arith.constant dense<0.000000e+00> : vector<64x32xf32>
    %47 = tpu.matmul %44, %46, %cst_42 {dimension_numbers = #tpu.dot_dimension_numbers<[1], [0], [0], [1], [0, 0, 1, 1], [], []>} : vector<64x8xf32>, vector<8x32xf32>, vector<64x32xf32> -> vector<64x32xf32>
    %48 = arith.addf %6, %47 : vector<64x32xf32>
    %c0_43 = arith.constant 0 : index
    %c1 = arith.constant 1 : index
    %c0_44 = arith.constant 0 : index
    %c0_45 = arith.constant 0 : index
    %49 = vector.load %arg4[%c0_43, %c1, %c0_44, %c0_45] : memref<2x4x32x8xf32, #tpu.memory_space<vmem>>, vector<1x1x32x8xf32>
    %50 = vector.shape_cast %49 : vector<1x1x32x8xf32> to vector<32x8xf32>
    %cst_46 = arith.constant dense<0.000000e+00> : vector<64x8xf32>
    %51 = tpu.matmul %1, %50, %cst_46 {dimension_numbers = #tpu.dot_dimension_numbers<[1], [0], [0], [1], [0, 0, 1, 1], [], []>} : vector<64x32xf32>, vector<32x8xf32>, vector<64x8xf32> -> vector<64x8xf32>
    %c0_47 = arith.constant 0 : index
    %c1_48 = arith.constant 1 : index
    %c0_49 = arith.constant 0 : index
    %c0_50 = arith.constant 0 : index
    %52 = vector.load %arg5[%c0_47, %c1_48, %c0_49, %c0_50] : memref<2x4x1x8xf32, #tpu.memory_space<vmem>>, vector<1x1x1x8xf32>
    %53 = vector.shape_cast %52 : vector<1x1x1x8xf32> to vector<1x8xf32>
    %54 = vector.broadcast %53 : vector<1x8xf32> to vector<64x8xf32>
    %55 = arith.addf %51, %54 : vector<64x8xf32>
    %c0_51 = arith.constant 0 : index
    %c1_52 = arith.constant 1 : index
    %c0_53 = arith.constant 0 : index
    %c0_54 = arith.constant 0 : index
    %56 = vector.load %arg6[%c0_51, %c1_52, %c0_53, %c0_54] : memref<2x4x32x8xf32, #tpu.memory_space<vmem>>, vector<1x1x32x8xf32>
    %57 = vector.shape_cast %56 : vector<1x1x32x8xf32> to vector<32x8xf32>
    %cst_55 = arith.constant dense<0.000000e+00> : vector<64x8xf32>
    %58 = tpu.matmul %1, %57, %cst_55 {dimension_numbers = #tpu.dot_dimension_numbers<[1], [0], [0], [1], [0, 0, 1, 1], [], []>} : vector<64x32xf32>, vector<32x8xf32>, vector<64x8xf32> -> vector<64x8xf32>
    %c0_56 = arith.constant 0 : index
    %c1_57 = arith.constant 1 : index
    %c0_58 = arith.constant 0 : index
    %c0_59 = arith.constant 0 : index
    %59 = vector.load %arg7[%c0_56, %c1_57, %c0_58, %c0_59] : memref<2x4x1x8xf32, #tpu.memory_space<vmem>>, vector<1x1x1x8xf32>
    %60 = vector.shape_cast %59 : vector<1x1x1x8xf32> to vector<1x8xf32>
    %61 = vector.broadcast %60 : vector<1x8xf32> to vector<64x8xf32>
    %62 = arith.addf %58, %61 : vector<64x8xf32>
    %c0_60 = arith.constant 0 : index
    %c1_61 = arith.constant 1 : index
    %c0_62 = arith.constant 0 : index
    %c0_63 = arith.constant 0 : index
    %63 = vector.load %arg8[%c0_60, %c1_61, %c0_62, %c0_63] : memref<2x4x32x8xf32, #tpu.memory_space<vmem>>, vector<1x1x32x8xf32>
    %64 = vector.shape_cast %63 : vector<1x1x32x8xf32> to vector<32x8xf32>
    %cst_64 = arith.constant dense<0.000000e+00> : vector<64x8xf32>
    %65 = tpu.matmul %1, %64, %cst_64 {dimension_numbers = #tpu.dot_dimension_numbers<[1], [0], [0], [1], [0, 0, 1, 1], [], []>} : vector<64x32xf32>, vector<32x8xf32>, vector<64x8xf32> -> vector<64x8xf32>
    %c0_65 = arith.constant 0 : index
    %c1_66 = arith.constant 1 : index
    %c0_67 = arith.constant 0 : index
    %c0_68 = arith.constant 0 : index
    %66 = vector.load %arg9[%c0_65, %c1_66, %c0_67, %c0_68] : memref<2x4x1x8xf32, #tpu.memory_space<vmem>>, vector<1x1x1x8xf32>
    %67 = vector.shape_cast %66 : vector<1x1x1x8xf32> to vector<1x8xf32>
    %68 = vector.broadcast %67 : vector<1x8xf32> to vector<64x8xf32>
    %69 = arith.addf %65, %68 : vector<64x8xf32>
    %70 = vector.shape_cast %55 : vector<64x8xf32> to vector<8x8x8xf32>
    %71 = vector.shape_cast %62 : vector<64x8xf32> to vector<8x8x8xf32>
    %72 = vector.shape_cast %69 : vector<64x8xf32> to vector<8x8x8xf32>
    "tpu.trace_start"() <{level = 10 : i32, message = "bqd,bkd->bqk"}> : () -> ()
    %cst_69 = arith.constant dense<0.000000e+00> : vector<8x8x8xf32>
    %73 = tpu.matmul %70, %71, %cst_69 {dimension_numbers = #tpu.dot_dimension_numbers<[2], [2], [1], [1], [0, 0, 0, 1, 1, 1], [0], [0]>} : vector<8x8x8xf32>, vector<8x8x8xf32>, vector<8x8x8xf32> -> vector<8x8x8xf32>
    "tpu.trace_stop"() : () -> ()
    %74 = vector.broadcast %2 : vector<8x1x8xf32> to vector<8x8x8xf32>
    %75 = arith.addf %73, %74 : vector<8x8x8xf32>
    %cst_70 = arith.constant dense<0xFF800000> : vector<8x8xf32>
    %76 = vector.multi_reduction <maximumf>, %75, %cst_70 [2] : vector<8x8x8xf32> to vector<8x8xf32>
    %77 = vector.shape_cast %76 : vector<8x8xf32> to vector<8x8x1xf32>
    %78 = vector.broadcast %77 : vector<8x8x1xf32> to vector<8x8x8xf32>
    %79 = arith.subf %75, %78 : vector<8x8x8xf32>
    %80 = math.exp %79 : vector<8x8x8xf32>
    %cst_71 = arith.constant dense<0.000000e+00> : vector<8x8xf32>
    %81 = vector.multi_reduction <add>, %80, %cst_71 [2] : vector<8x8x8xf32> to vector<8x8xf32>
    %82 = vector.shape_cast %81 : vector<8x8xf32> to vector<8x8x1xf32>
    %83 = vector.broadcast %82 : vector<8x8x1xf32> to vector<8x8x8xf32>
    %84 = arith.divf %80, %83 : vector<8x8x8xf32>
    "tpu.trace_start"() <{level = 10 : i32, message = "bqk,bkd->bqd"}> : () -> ()
    %cst_72 = arith.constant dense<0.000000e+00> : vector<8x8x8xf32>
    %85 = tpu.matmul %84, %72, %cst_72 {dimension_numbers = #tpu.dot_dimension_numbers<[2], [1], [1], [2], [0, 0, 0, 1, 1, 2], [0], [0]>} : vector<8x8x8xf32>, vector<8x8x8xf32>, vector<8x8x8xf32> -> vector<8x8x8xf32>
    "tpu.trace_stop"() : () -> ()
    %86 = vector.shape_cast %85 : vector<8x8x8xf32> to vector<64x8xf32>
    %c0_73 = arith.constant 0 : index
    %c1_74 = arith.constant 1 : index
    %c0_75 = arith.constant 0 : index
    %c0_76 = arith.constant 0 : index
    %87 = vector.load %arg10[%c0_73, %c1_74, %c0_75, %c0_76] : memref<2x4x8x32xf32, #tpu.memory_space<vmem>>, vector<1x1x8x32xf32>
    %88 = vector.shape_cast %87 : vector<1x1x8x32xf32> to vector<8x32xf32>
    %cst_77 = arith.constant dense<0.000000e+00> : vector<64x32xf32>
    %89 = tpu.matmul %86, %88, %cst_77 {dimension_numbers = #tpu.dot_dimension_numbers<[1], [0], [0], [1], [0, 0, 1, 1], [], []>} : vector<64x8xf32>, vector<8x32xf32>, vector<64x32xf32> -> vector<64x32xf32>
    %90 = arith.addf %48, %89 : vector<64x32xf32>
    %c0_78 = arith.constant 0 : index
    %c2 = arith.constant 2 : index
    %c0_79 = arith.constant 0 : index
    %c0_80 = arith.constant 0 : index
    %91 = vector.load %arg4[%c0_78, %c2, %c0_79, %c0_80] : memref<2x4x32x8xf32, #tpu.memory_space<vmem>>, vector<1x1x32x8xf32>
    %92 = vector.shape_cast %91 : vector<1x1x32x8xf32> to vector<32x8xf32>
    %cst_81 = arith.constant dense<0.000000e+00> : vector<64x8xf32>
    %93 = tpu.matmul %1, %92, %cst_81 {dimension_numbers = #tpu.dot_dimension_numbers<[1], [0], [0], [1], [0, 0, 1, 1], [], []>} : vector<64x32xf32>, vector<32x8xf32>, vector<64x8xf32> -> vector<64x8xf32>
    %c0_82 = arith.constant 0 : index
    %c2_83 = arith.constant 2 : index
    %c0_84 = arith.constant 0 : index
    %c0_85 = arith.constant 0 : index
    %94 = vector.load %arg5[%c0_82, %c2_83, %c0_84, %c0_85] : memref<2x4x1x8xf32, #tpu.memory_space<vmem>>, vector<1x1x1x8xf32>
    %95 = vector.shape_cast %94 : vector<1x1x1x8xf32> to vector<1x8xf32>
    %96 = vector.broadcast %95 : vector<1x8xf32> to vector<64x8xf32>
    %97 = arith.addf %93, %96 : vector<64x8xf32>
    %c0_86 = arith.constant 0 : index
    %c2_87 = arith.constant 2 : index
    %c0_88 = arith.constant 0 : index
    %c0_89 = arith.constant 0 : index
    %98 = vector.load %arg6[%c0_86, %c2_87, %c0_88, %c0_89] : memref<2x4x32x8xf32, #tpu.memory_space<vmem>>, vector<1x1x32x8xf32>
    %99 = vector.shape_cast %98 : vector<1x1x32x8xf32> to vector<32x8xf32>
    %cst_90 = arith.constant dense<0.000000e+00> : vector<64x8xf32>
    %100 = tpu.matmul %1, %99, %cst_90 {dimension_numbers = #tpu.dot_dimension_numbers<[1], [0], [0], [1], [0, 0, 1, 1], [], []>} : vector<64x32xf32>, vector<32x8xf32>, vector<64x8xf32> -> vector<64x8xf32>
    %c0_91 = arith.constant 0 : index
    %c2_92 = arith.constant 2 : index
    %c0_93 = arith.constant 0 : index
    %c0_94 = arith.constant 0 : index
    %101 = vector.load %arg7[%c0_91, %c2_92, %c0_93, %c0_94] : memref<2x4x1x8xf32, #tpu.memory_space<vmem>>, vector<1x1x1x8xf32>
    %102 = vector.shape_cast %101 : vector<1x1x1x8xf32> to vector<1x8xf32>
    %103 = vector.broadcast %102 : vector<1x8xf32> to vector<64x8xf32>
    %104 = arith.addf %100, %103 : vector<64x8xf32>
    %c0_95 = arith.constant 0 : index
    %c2_96 = arith.constant 2 : index
    %c0_97 = arith.constant 0 : index
    %c0_98 = arith.constant 0 : index
    %105 = vector.load %arg8[%c0_95, %c2_96, %c0_97, %c0_98] : memref<2x4x32x8xf32, #tpu.memory_space<vmem>>, vector<1x1x32x8xf32>
    %106 = vector.shape_cast %105 : vector<1x1x32x8xf32> to vector<32x8xf32>
    %cst_99 = arith.constant dense<0.000000e+00> : vector<64x8xf32>
    %107 = tpu.matmul %1, %106, %cst_99 {dimension_numbers = #tpu.dot_dimension_numbers<[1], [0], [0], [1], [0, 0, 1, 1], [], []>} : vector<64x32xf32>, vector<32x8xf32>, vector<64x8xf32> -> vector<64x8xf32>
    %c0_100 = arith.constant 0 : index
    %c2_101 = arith.constant 2 : index
    %c0_102 = arith.constant 0 : index
    %c0_103 = arith.constant 0 : index
    %108 = vector.load %arg9[%c0_100, %c2_101, %c0_102, %c0_103] : memref<2x4x1x8xf32, #tpu.memory_space<vmem>>, vector<1x1x1x8xf32>
    %109 = vector.shape_cast %108 : vector<1x1x1x8xf32> to vector<1x8xf32>
    %110 = vector.broadcast %109 : vector<1x8xf32> to vector<64x8xf32>
    %111 = arith.addf %107, %110 : vector<64x8xf32>
    %112 = vector.shape_cast %97 : vector<64x8xf32> to vector<8x8x8xf32>
    %113 = vector.shape_cast %104 : vector<64x8xf32> to vector<8x8x8xf32>
    %114 = vector.shape_cast %111 : vector<64x8xf32> to vector<8x8x8xf32>
    "tpu.trace_start"() <{level = 10 : i32, message = "bqd,bkd->bqk"}> : () -> ()
    %cst_104 = arith.constant dense<0.000000e+00> : vector<8x8x8xf32>
    %115 = tpu.matmul %112, %113, %cst_104 {dimension_numbers = #tpu.dot_dimension_numbers<[2], [2], [1], [1], [0, 0, 0, 1, 1, 1], [0], [0]>} : vector<8x8x8xf32>, vector<8x8x8xf32>, vector<8x8x8xf32> -> vector<8x8x8xf32>
    "tpu.trace_stop"() : () -> ()
    %116 = vector.broadcast %2 : vector<8x1x8xf32> to vector<8x8x8xf32>
    %117 = arith.addf %115, %116 : vector<8x8x8xf32>
    %cst_105 = arith.constant dense<0xFF800000> : vector<8x8xf32>
    %118 = vector.multi_reduction <maximumf>, %117, %cst_105 [2] : vector<8x8x8xf32> to vector<8x8xf32>
    %119 = vector.shape_cast %118 : vector<8x8xf32> to vector<8x8x1xf32>
    %120 = vector.broadcast %119 : vector<8x8x1xf32> to vector<8x8x8xf32>
    %121 = arith.subf %117, %120 : vector<8x8x8xf32>
    %122 = math.exp %121 : vector<8x8x8xf32>
    %cst_106 = arith.constant dense<0.000000e+00> : vector<8x8xf32>
    %123 = vector.multi_reduction <add>, %122, %cst_106 [2] : vector<8x8x8xf32> to vector<8x8xf32>
    %124 = vector.shape_cast %123 : vector<8x8xf32> to vector<8x8x1xf32>
    %125 = vector.broadcast %124 : vector<8x8x1xf32> to vector<8x8x8xf32>
    %126 = arith.divf %122, %125 : vector<8x8x8xf32>
    "tpu.trace_start"() <{level = 10 : i32, message = "bqk,bkd->bqd"}> : () -> ()
    %cst_107 = arith.constant dense<0.000000e+00> : vector<8x8x8xf32>
    %127 = tpu.matmul %126, %114, %cst_107 {dimension_numbers = #tpu.dot_dimension_numbers<[2], [1], [1], [2], [0, 0, 0, 1, 1, 2], [0], [0]>} : vector<8x8x8xf32>, vector<8x8x8xf32>, vector<8x8x8xf32> -> vector<8x8x8xf32>
    "tpu.trace_stop"() : () -> ()
    %128 = vector.shape_cast %127 : vector<8x8x8xf32> to vector<64x8xf32>
    %c0_108 = arith.constant 0 : index
    %c2_109 = arith.constant 2 : index
    %c0_110 = arith.constant 0 : index
    %c0_111 = arith.constant 0 : index
    %129 = vector.load %arg10[%c0_108, %c2_109, %c0_110, %c0_111] : memref<2x4x8x32xf32, #tpu.memory_space<vmem>>, vector<1x1x8x32xf32>
    %130 = vector.shape_cast %129 : vector<1x1x8x32xf32> to vector<8x32xf32>
    %cst_112 = arith.constant dense<0.000000e+00> : vector<64x32xf32>
    %131 = tpu.matmul %128, %130, %cst_112 {dimension_numbers = #tpu.dot_dimension_numbers<[1], [0], [0], [1], [0, 0, 1, 1], [], []>} : vector<64x8xf32>, vector<8x32xf32>, vector<64x32xf32> -> vector<64x32xf32>
    %132 = arith.addf %90, %131 : vector<64x32xf32>
    %c0_113 = arith.constant 0 : index
    %c3 = arith.constant 3 : index
    %c0_114 = arith.constant 0 : index
    %c0_115 = arith.constant 0 : index
    %133 = vector.load %arg4[%c0_113, %c3, %c0_114, %c0_115] : memref<2x4x32x8xf32, #tpu.memory_space<vmem>>, vector<1x1x32x8xf32>
    %134 = vector.shape_cast %133 : vector<1x1x32x8xf32> to vector<32x8xf32>
    %cst_116 = arith.constant dense<0.000000e+00> : vector<64x8xf32>
    %135 = tpu.matmul %1, %134, %cst_116 {dimension_numbers = #tpu.dot_dimension_numbers<[1], [0], [0], [1], [0, 0, 1, 1], [], []>} : vector<64x32xf32>, vector<32x8xf32>, vector<64x8xf32> -> vector<64x8xf32>
    %c0_117 = arith.constant 0 : index
    %c3_118 = arith.constant 3 : index
    %c0_119 = arith.constant 0 : index
    %c0_120 = arith.constant 0 : index
    %136 = vector.load %arg5[%c0_117, %c3_118, %c0_119, %c0_120] : memref<2x4x1x8xf32, #tpu.memory_space<vmem>>, vector<1x1x1x8xf32>
    %137 = vector.shape_cast %136 : vector<1x1x1x8xf32> to vector<1x8xf32>
    %138 = vector.broadcast %137 : vector<1x8xf32> to vector<64x8xf32>
    %139 = arith.addf %135, %138 : vector<64x8xf32>
    %c0_121 = arith.constant 0 : index
    %c3_122 = arith.constant 3 : index
    %c0_123 = arith.constant 0 : index
    %c0_124 = arith.constant 0 : index
    %140 = vector.load %arg6[%c0_121, %c3_122, %c0_123, %c0_124] : memref<2x4x32x8xf32, #tpu.memory_space<vmem>>, vector<1x1x32x8xf32>
    %141 = vector.shape_cast %140 : vector<1x1x32x8xf32> to vector<32x8xf32>
    %cst_125 = arith.constant dense<0.000000e+00> : vector<64x8xf32>
    %142 = tpu.matmul %1, %141, %cst_125 {dimension_numbers = #tpu.dot_dimension_numbers<[1], [0], [0], [1], [0, 0, 1, 1], [], []>} : vector<64x32xf32>, vector<32x8xf32>, vector<64x8xf32> -> vector<64x8xf32>
    %c0_126 = arith.constant 0 : index
    %c3_127 = arith.constant 3 : index
    %c0_128 = arith.constant 0 : index
    %c0_129 = arith.constant 0 : index
    %143 = vector.load %arg7[%c0_126, %c3_127, %c0_128, %c0_129] : memref<2x4x1x8xf32, #tpu.memory_space<vmem>>, vector<1x1x1x8xf32>
    %144 = vector.shape_cast %143 : vector<1x1x1x8xf32> to vector<1x8xf32>
    %145 = vector.broadcast %144 : vector<1x8xf32> to vector<64x8xf32>
    %146 = arith.addf %142, %145 : vector<64x8xf32>
    %c0_130 = arith.constant 0 : index
    %c3_131 = arith.constant 3 : index
    %c0_132 = arith.constant 0 : index
    %c0_133 = arith.constant 0 : index
    %147 = vector.load %arg8[%c0_130, %c3_131, %c0_132, %c0_133] : memref<2x4x32x8xf32, #tpu.memory_space<vmem>>, vector<1x1x32x8xf32>
    %148 = vector.shape_cast %147 : vector<1x1x32x8xf32> to vector<32x8xf32>
    %cst_134 = arith.constant dense<0.000000e+00> : vector<64x8xf32>
    %149 = tpu.matmul %1, %148, %cst_134 {dimension_numbers = #tpu.dot_dimension_numbers<[1], [0], [0], [1], [0, 0, 1, 1], [], []>} : vector<64x32xf32>, vector<32x8xf32>, vector<64x8xf32> -> vector<64x8xf32>
    %c0_135 = arith.constant 0 : index
    %c3_136 = arith.constant 3 : index
    %c0_137 = arith.constant 0 : index
    %c0_138 = arith.constant 0 : index
    %150 = vector.load %arg9[%c0_135, %c3_136, %c0_137, %c0_138] : memref<2x4x1x8xf32, #tpu.memory_space<vmem>>, vector<1x1x1x8xf32>
    %151 = vector.shape_cast %150 : vector<1x1x1x8xf32> to vector<1x8xf32>
    %152 = vector.broadcast %151 : vector<1x8xf32> to vector<64x8xf32>
    %153 = arith.addf %149, %152 : vector<64x8xf32>
    %154 = vector.shape_cast %139 : vector<64x8xf32> to vector<8x8x8xf32>
    %155 = vector.shape_cast %146 : vector<64x8xf32> to vector<8x8x8xf32>
    %156 = vector.shape_cast %153 : vector<64x8xf32> to vector<8x8x8xf32>
    "tpu.trace_start"() <{level = 10 : i32, message = "bqd,bkd->bqk"}> : () -> ()
    %cst_139 = arith.constant dense<0.000000e+00> : vector<8x8x8xf32>
    %157 = tpu.matmul %154, %155, %cst_139 {dimension_numbers = #tpu.dot_dimension_numbers<[2], [2], [1], [1], [0, 0, 0, 1, 1, 1], [0], [0]>} : vector<8x8x8xf32>, vector<8x8x8xf32>, vector<8x8x8xf32> -> vector<8x8x8xf32>
    "tpu.trace_stop"() : () -> ()
    %158 = vector.broadcast %2 : vector<8x1x8xf32> to vector<8x8x8xf32>
    %159 = arith.addf %157, %158 : vector<8x8x8xf32>
    %cst_140 = arith.constant dense<0xFF800000> : vector<8x8xf32>
    %160 = vector.multi_reduction <maximumf>, %159, %cst_140 [2] : vector<8x8x8xf32> to vector<8x8xf32>
    %161 = vector.shape_cast %160 : vector<8x8xf32> to vector<8x8x1xf32>
    %162 = vector.broadcast %161 : vector<8x8x1xf32> to vector<8x8x8xf32>
    %163 = arith.subf %159, %162 : vector<8x8x8xf32>
    %164 = math.exp %163 : vector<8x8x8xf32>
    %cst_141 = arith.constant dense<0.000000e+00> : vector<8x8xf32>
    %165 = vector.multi_reduction <add>, %164, %cst_141 [2] : vector<8x8x8xf32> to vector<8x8xf32>
    %166 = vector.shape_cast %165 : vector<8x8xf32> to vector<8x8x1xf32>
    %167 = vector.broadcast %166 : vector<8x8x1xf32> to vector<8x8x8xf32>
    %168 = arith.divf %164, %167 : vector<8x8x8xf32>
    "tpu.trace_start"() <{level = 10 : i32, message = "bqk,bkd->bqd"}> : () -> ()
    %cst_142 = arith.constant dense<0.000000e+00> : vector<8x8x8xf32>
    %169 = tpu.matmul %168, %156, %cst_142 {dimension_numbers = #tpu.dot_dimension_numbers<[2], [1], [1], [2], [0, 0, 0, 1, 1, 2], [0], [0]>} : vector<8x8x8xf32>, vector<8x8x8xf32>, vector<8x8x8xf32> -> vector<8x8x8xf32>
    "tpu.trace_stop"() : () -> ()
    %170 = vector.shape_cast %169 : vector<8x8x8xf32> to vector<64x8xf32>
    %c0_143 = arith.constant 0 : index
    %c3_144 = arith.constant 3 : index
    %c0_145 = arith.constant 0 : index
    %c0_146 = arith.constant 0 : index
    %171 = vector.load %arg10[%c0_143, %c3_144, %c0_145, %c0_146] : memref<2x4x8x32xf32, #tpu.memory_space<vmem>>, vector<1x1x8x32xf32>
    %172 = vector.shape_cast %171 : vector<1x1x8x32xf32> to vector<8x32xf32>
    %cst_147 = arith.constant dense<0.000000e+00> : vector<64x32xf32>
    %173 = tpu.matmul %170, %172, %cst_147 {dimension_numbers = #tpu.dot_dimension_numbers<[1], [0], [0], [1], [0, 0, 1, 1], [], []>} : vector<64x8xf32>, vector<8x32xf32>, vector<64x32xf32> -> vector<64x32xf32>
    %174 = arith.addf %132, %173 : vector<64x32xf32>
    %c0_148 = arith.constant 0 : index
    %c0_149 = arith.constant 0 : index
    %c0_150 = arith.constant 0 : index
    %175 = vector.load %arg12[%c0_148, %c0_149, %c0_150] : memref<2x1x32xf32, #tpu.memory_space<vmem>>, vector<1x1x32xf32>
    %176 = vector.shape_cast %175 : vector<1x1x32xf32> to vector<1x32xf32>
    %c0_151 = arith.constant 0 : index
    %c0_152 = arith.constant 0 : index
    %c0_153 = arith.constant 0 : index
    %177 = vector.load %arg13[%c0_151, %c0_152, %c0_153] : memref<2x1x32xf32, #tpu.memory_space<vmem>>, vector<1x1x32xf32>
    %178 = vector.shape_cast %177 : vector<1x1x32xf32> to vector<1x32xf32>
    %cst_154 = arith.constant dense<0.000000e+00> : vector<64xf32>
    %179 = vector.multi_reduction <add>, %174, %cst_154 [1] : vector<64x32xf32> to vector<64xf32>
    %180 = vector.shape_cast %179 : vector<64xf32> to vector<64x1xf32>
    %cst_155 = arith.constant 3.200000e+01 : f32
    %181 = vector.broadcast %cst_155 : f32 to vector<64x1xf32>
    %182 = arith.divf %180, %181 : vector<64x1xf32>
    %183 = vector.broadcast %182 : vector<64x1xf32> to vector<64x32xf32>
    %184 = arith.subf %174, %183 : vector<64x32xf32>
    %185 = arith.mulf %184, %184 : vector<64x32xf32>
    %cst_156 = arith.constant dense<0.000000e+00> : vector<64xf32>
    %186 = vector.multi_reduction <add>, %185, %cst_156 [1] : vector<64x32xf32> to vector<64xf32>
    %187 = vector.shape_cast %186 : vector<64xf32> to vector<64x1xf32>
    %cst_157 = arith.constant 3.200000e+01 : f32
    %188 = vector.broadcast %cst_157 : f32 to vector<64x1xf32>
    %189 = arith.divf %187, %188 : vector<64x1xf32>
    %cst_158 = arith.constant 9.99999996E-13 : f32
    %190 = vector.broadcast %cst_158 : f32 to vector<64x1xf32>
    %191 = arith.addf %189, %190 : vector<64x1xf32>
    %192 = math.rsqrt %191 : vector<64x1xf32>
    %193 = vector.broadcast %192 : vector<64x1xf32> to vector<64x32xf32>
    %194 = arith.mulf %184, %193 : vector<64x32xf32>
    %195 = vector.broadcast %176 : vector<1x32xf32> to vector<64x32xf32>
    %196 = arith.mulf %194, %195 : vector<64x32xf32>
    %197 = vector.broadcast %178 : vector<1x32xf32> to vector<64x32xf32>
    %198 = arith.addf %196, %197 : vector<64x32xf32>
    %c0_159 = arith.constant 0 : index
    %c0_160 = arith.constant 0 : index
    %c0_161 = arith.constant 0 : index
    %199 = vector.load %arg14[%c0_159, %c0_160, %c0_161] : memref<2x32x64xf32, #tpu.memory_space<vmem>>, vector<1x32x64xf32>
    %200 = vector.shape_cast %199 : vector<1x32x64xf32> to vector<32x64xf32>
    %cst_162 = arith.constant dense<0.000000e+00> : vector<64x64xf32>
    %201 = tpu.matmul %198, %200, %cst_162 {dimension_numbers = #tpu.dot_dimension_numbers<[1], [0], [0], [1], [0, 0, 1, 1], [], []>} : vector<64x32xf32>, vector<32x64xf32>, vector<64x64xf32> -> vector<64x64xf32>
    %c0_163 = arith.constant 0 : index
    %c0_164 = arith.constant 0 : index
    %c0_165 = arith.constant 0 : index
    %202 = vector.load %arg15[%c0_163, %c0_164, %c0_165] : memref<2x1x64xf32, #tpu.memory_space<vmem>>, vector<1x1x64xf32>
    %203 = vector.shape_cast %202 : vector<1x1x64xf32> to vector<1x64xf32>
    %204 = vector.broadcast %203 : vector<1x64xf32> to vector<64x64xf32>
    %205 = arith.addf %201, %204 : vector<64x64xf32>
    %cst_166 = arith.constant 5.000000e-01 : f32
    %206 = vector.broadcast %cst_166 : f32 to vector<64x64xf32>
    %207 = arith.mulf %206, %205 : vector<64x64xf32>
    %cst_167 = arith.constant 4.471500e-02 : f32
    %208 = vector.broadcast %cst_167 : f32 to vector<64x64xf32>
    %209 = arith.mulf %208, %205 : vector<64x64xf32>
    %210 = arith.mulf %209, %205 : vector<64x64xf32>
    %211 = arith.mulf %210, %205 : vector<64x64xf32>
    %212 = arith.addf %205, %211 : vector<64x64xf32>
    %cst_168 = arith.constant 0.797884583 : f32
    %213 = vector.broadcast %cst_168 : f32 to vector<64x64xf32>
    %214 = arith.mulf %213, %212 : vector<64x64xf32>
    %215 = math.tanh %214 : vector<64x64xf32>
    %cst_169 = arith.constant 1.000000e+00 : f32
    %216 = vector.broadcast %cst_169 : f32 to vector<64x64xf32>
    %217 = arith.addf %216, %215 : vector<64x64xf32>
    %218 = arith.mulf %207, %217 : vector<64x64xf32>
    %c0_170 = arith.constant 0 : index
    %c0_171 = arith.constant 0 : index
    %c0_172 = arith.constant 0 : index
    %219 = vector.load %arg16[%c0_170, %c0_171, %c0_172] : memref<2x64x32xf32, #tpu.memory_space<vmem>>, vector<1x64x32xf32>
    %220 = vector.shape_cast %219 : vector<1x64x32xf32> to vector<64x32xf32>
    %cst_173 = arith.constant dense<0.000000e+00> : vector<64x32xf32>
    %221 = tpu.matmul %218, %220, %cst_173 {dimension_numbers = #tpu.dot_dimension_numbers<[1], [0], [0], [1], [0, 0, 1, 1], [], []>} : vector<64x64xf32>, vector<64x32xf32>, vector<64x32xf32> -> vector<64x32xf32>
    %c0_174 = arith.constant 0 : index
    %c0_175 = arith.constant 0 : index
    %c0_176 = arith.constant 0 : index
    %222 = vector.load %arg17[%c0_174, %c0_175, %c0_176] : memref<2x1x32xf32, #tpu.memory_space<vmem>>, vector<1x1x32xf32>
    %223 = vector.shape_cast %222 : vector<1x1x32xf32> to vector<1x32xf32>
    %224 = vector.broadcast %223 : vector<1x32xf32> to vector<64x32xf32>
    %225 = arith.addf %221, %224 : vector<64x32xf32>
    %226 = arith.addf %225, %198 : vector<64x32xf32>
    %c0_177 = arith.constant 0 : index
    %c0_178 = arith.constant 0 : index
    %c0_179 = arith.constant 0 : index
    %227 = vector.load %arg18[%c0_177, %c0_178, %c0_179] : memref<2x1x32xf32, #tpu.memory_space<vmem>>, vector<1x1x32xf32>
    %228 = vector.shape_cast %227 : vector<1x1x32xf32> to vector<1x32xf32>
    %c0_180 = arith.constant 0 : index
    %c0_181 = arith.constant 0 : index
    %c0_182 = arith.constant 0 : index
    %229 = vector.load %arg19[%c0_180, %c0_181, %c0_182] : memref<2x1x32xf32, #tpu.memory_space<vmem>>, vector<1x1x32xf32>
    %230 = vector.shape_cast %229 : vector<1x1x32xf32> to vector<1x32xf32>
    %cst_183 = arith.constant dense<0.000000e+00> : vector<64xf32>
    %231 = vector.multi_reduction <add>, %226, %cst_183 [1] : vector<64x32xf32> to vector<64xf32>
    %232 = vector.shape_cast %231 : vector<64xf32> to vector<64x1xf32>
    %cst_184 = arith.constant 3.200000e+01 : f32
    %233 = vector.broadcast %cst_184 : f32 to vector<64x1xf32>
    %234 = arith.divf %232, %233 : vector<64x1xf32>
    %235 = vector.broadcast %234 : vector<64x1xf32> to vector<64x32xf32>
    %236 = arith.subf %226, %235 : vector<64x32xf32>
    %237 = arith.mulf %236, %236 : vector<64x32xf32>
    %cst_185 = arith.constant dense<0.000000e+00> : vector<64xf32>
    %238 = vector.multi_reduction <add>, %237, %cst_185 [1] : vector<64x32xf32> to vector<64xf32>
    %239 = vector.shape_cast %238 : vector<64xf32> to vector<64x1xf32>
    %cst_186 = arith.constant 3.200000e+01 : f32
    %240 = vector.broadcast %cst_186 : f32 to vector<64x1xf32>
    %241 = arith.divf %239, %240 : vector<64x1xf32>
    %cst_187 = arith.constant 9.99999996E-13 : f32
    %242 = vector.broadcast %cst_187 : f32 to vector<64x1xf32>
    %243 = arith.addf %241, %242 : vector<64x1xf32>
    %244 = math.rsqrt %243 : vector<64x1xf32>
    %245 = vector.broadcast %244 : vector<64x1xf32> to vector<64x32xf32>
    %246 = arith.mulf %236, %245 : vector<64x32xf32>
    %247 = vector.broadcast %228 : vector<1x32xf32> to vector<64x32xf32>
    %248 = arith.mulf %246, %247 : vector<64x32xf32>
    %249 = vector.broadcast %230 : vector<1x32xf32> to vector<64x32xf32>
    %250 = arith.addf %248, %249 : vector<64x32xf32>
    %c1_188 = arith.constant 1 : index
    %c0_189 = arith.constant 0 : index
    %c0_190 = arith.constant 0 : index
    %251 = vector.load %arg11[%c1_188, %c0_189, %c0_190] : memref<2x1x32xf32, #tpu.memory_space<vmem>>, vector<1x1x32xf32>
    %252 = vector.shape_cast %251 : vector<1x1x32xf32> to vector<1x32xf32>
    %253 = vector.broadcast %252 : vector<1x32xf32> to vector<64x32xf32>
    %254 = arith.addf %250, %253 : vector<64x32xf32>
    %c1_191 = arith.constant 1 : index
    %c0_192 = arith.constant 0 : index
    %c0_193 = arith.constant 0 : index
    %c0_194 = arith.constant 0 : index
    %255 = vector.load %arg4[%c1_191, %c0_192, %c0_193, %c0_194] : memref<2x4x32x8xf32, #tpu.memory_space<vmem>>, vector<1x1x32x8xf32>
    %256 = vector.shape_cast %255 : vector<1x1x32x8xf32> to vector<32x8xf32>
    %cst_195 = arith.constant dense<0.000000e+00> : vector<64x8xf32>
    %257 = tpu.matmul %250, %256, %cst_195 {dimension_numbers = #tpu.dot_dimension_numbers<[1], [0], [0], [1], [0, 0, 1, 1], [], []>} : vector<64x32xf32>, vector<32x8xf32>, vector<64x8xf32> -> vector<64x8xf32>
    %c1_196 = arith.constant 1 : index
    %c0_197 = arith.constant 0 : index
    %c0_198 = arith.constant 0 : index
    %c0_199 = arith.constant 0 : index
    %258 = vector.load %arg5[%c1_196, %c0_197, %c0_198, %c0_199] : memref<2x4x1x8xf32, #tpu.memory_space<vmem>>, vector<1x1x1x8xf32>
    %259 = vector.shape_cast %258 : vector<1x1x1x8xf32> to vector<1x8xf32>
    %260 = vector.broadcast %259 : vector<1x8xf32> to vector<64x8xf32>
    %261 = arith.addf %257, %260 : vector<64x8xf32>
    %c1_200 = arith.constant 1 : index
    %c0_201 = arith.constant 0 : index
    %c0_202 = arith.constant 0 : index
    %c0_203 = arith.constant 0 : index
    %262 = vector.load %arg6[%c1_200, %c0_201, %c0_202, %c0_203] : memref<2x4x32x8xf32, #tpu.memory_space<vmem>>, vector<1x1x32x8xf32>
    %263 = vector.shape_cast %262 : vector<1x1x32x8xf32> to vector<32x8xf32>
    %cst_204 = arith.constant dense<0.000000e+00> : vector<64x8xf32>
    %264 = tpu.matmul %250, %263, %cst_204 {dimension_numbers = #tpu.dot_dimension_numbers<[1], [0], [0], [1], [0, 0, 1, 1], [], []>} : vector<64x32xf32>, vector<32x8xf32>, vector<64x8xf32> -> vector<64x8xf32>
    %c1_205 = arith.constant 1 : index
    %c0_206 = arith.constant 0 : index
    %c0_207 = arith.constant 0 : index
    %c0_208 = arith.constant 0 : index
    %265 = vector.load %arg7[%c1_205, %c0_206, %c0_207, %c0_208] : memref<2x4x1x8xf32, #tpu.memory_space<vmem>>, vector<1x1x1x8xf32>
    %266 = vector.shape_cast %265 : vector<1x1x1x8xf32> to vector<1x8xf32>
    %267 = vector.broadcast %266 : vector<1x8xf32> to vector<64x8xf32>
    %268 = arith.addf %264, %267 : vector<64x8xf32>
    %c1_209 = arith.constant 1 : index
    %c0_210 = arith.constant 0 : index
    %c0_211 = arith.constant 0 : index
    %c0_212 = arith.constant 0 : index
    %269 = vector.load %arg8[%c1_209, %c0_210, %c0_211, %c0_212] : memref<2x4x32x8xf32, #tpu.memory_space<vmem>>, vector<1x1x32x8xf32>
    %270 = vector.shape_cast %269 : vector<1x1x32x8xf32> to vector<32x8xf32>
    %cst_213 = arith.constant dense<0.000000e+00> : vector<64x8xf32>
    %271 = tpu.matmul %250, %270, %cst_213 {dimension_numbers = #tpu.dot_dimension_numbers<[1], [0], [0], [1], [0, 0, 1, 1], [], []>} : vector<64x32xf32>, vector<32x8xf32>, vector<64x8xf32> -> vector<64x8xf32>
    %c1_214 = arith.constant 1 : index
    %c0_215 = arith.constant 0 : index
    %c0_216 = arith.constant 0 : index
    %c0_217 = arith.constant 0 : index
    %272 = vector.load %arg9[%c1_214, %c0_215, %c0_216, %c0_217] : memref<2x4x1x8xf32, #tpu.memory_space<vmem>>, vector<1x1x1x8xf32>
    %273 = vector.shape_cast %272 : vector<1x1x1x8xf32> to vector<1x8xf32>
    %274 = vector.broadcast %273 : vector<1x8xf32> to vector<64x8xf32>
    %275 = arith.addf %271, %274 : vector<64x8xf32>
    %276 = vector.shape_cast %261 : vector<64x8xf32> to vector<8x8x8xf32>
    %277 = vector.shape_cast %268 : vector<64x8xf32> to vector<8x8x8xf32>
    %278 = vector.shape_cast %275 : vector<64x8xf32> to vector<8x8x8xf32>
    "tpu.trace_start"() <{level = 10 : i32, message = "bqd,bkd->bqk"}> : () -> ()
    %cst_218 = arith.constant dense<0.000000e+00> : vector<8x8x8xf32>
    %279 = tpu.matmul %276, %277, %cst_218 {dimension_numbers = #tpu.dot_dimension_numbers<[2], [2], [1], [1], [0, 0, 0, 1, 1, 1], [0], [0]>} : vector<8x8x8xf32>, vector<8x8x8xf32>, vector<8x8x8xf32> -> vector<8x8x8xf32>
    "tpu.trace_stop"() : () -> ()
    %280 = vector.broadcast %2 : vector<8x1x8xf32> to vector<8x8x8xf32>
    %281 = arith.addf %279, %280 : vector<8x8x8xf32>
    %cst_219 = arith.constant dense<0xFF800000> : vector<8x8xf32>
    %282 = vector.multi_reduction <maximumf>, %281, %cst_219 [2] : vector<8x8x8xf32> to vector<8x8xf32>
    %283 = vector.shape_cast %282 : vector<8x8xf32> to vector<8x8x1xf32>
    %284 = vector.broadcast %283 : vector<8x8x1xf32> to vector<8x8x8xf32>
    %285 = arith.subf %281, %284 : vector<8x8x8xf32>
    %286 = math.exp %285 : vector<8x8x8xf32>
    %cst_220 = arith.constant dense<0.000000e+00> : vector<8x8xf32>
    %287 = vector.multi_reduction <add>, %286, %cst_220 [2] : vector<8x8x8xf32> to vector<8x8xf32>
    %288 = vector.shape_cast %287 : vector<8x8xf32> to vector<8x8x1xf32>
    %289 = vector.broadcast %288 : vector<8x8x1xf32> to vector<8x8x8xf32>
    %290 = arith.divf %286, %289 : vector<8x8x8xf32>
    "tpu.trace_start"() <{level = 10 : i32, message = "bqk,bkd->bqd"}> : () -> ()
    %cst_221 = arith.constant dense<0.000000e+00> : vector<8x8x8xf32>
    %291 = tpu.matmul %290, %278, %cst_221 {dimension_numbers = #tpu.dot_dimension_numbers<[2], [1], [1], [2], [0, 0, 0, 1, 1, 2], [0], [0]>} : vector<8x8x8xf32>, vector<8x8x8xf32>, vector<8x8x8xf32> -> vector<8x8x8xf32>
    "tpu.trace_stop"() : () -> ()
    %292 = vector.shape_cast %291 : vector<8x8x8xf32> to vector<64x8xf32>
    %c1_222 = arith.constant 1 : index
    %c0_223 = arith.constant 0 : index
    %c0_224 = arith.constant 0 : index
    %c0_225 = arith.constant 0 : index
    %293 = vector.load %arg10[%c1_222, %c0_223, %c0_224, %c0_225] : memref<2x4x8x32xf32, #tpu.memory_space<vmem>>, vector<1x1x8x32xf32>
    %294 = vector.shape_cast %293 : vector<1x1x8x32xf32> to vector<8x32xf32>
    %cst_226 = arith.constant dense<0.000000e+00> : vector<64x32xf32>
    %295 = tpu.matmul %292, %294, %cst_226 {dimension_numbers = #tpu.dot_dimension_numbers<[1], [0], [0], [1], [0, 0, 1, 1], [], []>} : vector<64x8xf32>, vector<8x32xf32>, vector<64x32xf32> -> vector<64x32xf32>
    %296 = arith.addf %254, %295 : vector<64x32xf32>
    %c1_227 = arith.constant 1 : index
    %c1_228 = arith.constant 1 : index
    %c0_229 = arith.constant 0 : index
    %c0_230 = arith.constant 0 : index
    %297 = vector.load %arg4[%c1_227, %c1_228, %c0_229, %c0_230] : memref<2x4x32x8xf32, #tpu.memory_space<vmem>>, vector<1x1x32x8xf32>
    %298 = vector.shape_cast %297 : vector<1x1x32x8xf32> to vector<32x8xf32>
    %cst_231 = arith.constant dense<0.000000e+00> : vector<64x8xf32>
    %299 = tpu.matmul %250, %298, %cst_231 {dimension_numbers = #tpu.dot_dimension_numbers<[1], [0], [0], [1], [0, 0, 1, 1], [], []>} : vector<64x32xf32>, vector<32x8xf32>, vector<64x8xf32> -> vector<64x8xf32>
    %c1_232 = arith.constant 1 : index
    %c1_233 = arith.constant 1 : index
    %c0_234 = arith.constant 0 : index
    %c0_235 = arith.constant 0 : index
    %300 = vector.load %arg5[%c1_232, %c1_233, %c0_234, %c0_235] : memref<2x4x1x8xf32, #tpu.memory_space<vmem>>, vector<1x1x1x8xf32>
    %301 = vector.shape_cast %300 : vector<1x1x1x8xf32> to vector<1x8xf32>
    %302 = vector.broadcast %301 : vector<1x8xf32> to vector<64x8xf32>
    %303 = arith.addf %299, %302 : vector<64x8xf32>
    %c1_236 = arith.constant 1 : index
    %c1_237 = arith.constant 1 : index
    %c0_238 = arith.constant 0 : index
    %c0_239 = arith.constant 0 : index
    %304 = vector.load %arg6[%c1_236, %c1_237, %c0_238, %c0_239] : memref<2x4x32x8xf32, #tpu.memory_space<vmem>>, vector<1x1x32x8xf32>
    %305 = vector.shape_cast %304 : vector<1x1x32x8xf32> to vector<32x8xf32>
    %cst_240 = arith.constant dense<0.000000e+00> : vector<64x8xf32>
    %306 = tpu.matmul %250, %305, %cst_240 {dimension_numbers = #tpu.dot_dimension_numbers<[1], [0], [0], [1], [0, 0, 1, 1], [], []>} : vector<64x32xf32>, vector<32x8xf32>, vector<64x8xf32> -> vector<64x8xf32>
    %c1_241 = arith.constant 1 : index
    %c1_242 = arith.constant 1 : index
    %c0_243 = arith.constant 0 : index
    %c0_244 = arith.constant 0 : index
    %307 = vector.load %arg7[%c1_241, %c1_242, %c0_243, %c0_244] : memref<2x4x1x8xf32, #tpu.memory_space<vmem>>, vector<1x1x1x8xf32>
    %308 = vector.shape_cast %307 : vector<1x1x1x8xf32> to vector<1x8xf32>
    %309 = vector.broadcast %308 : vector<1x8xf32> to vector<64x8xf32>
    %310 = arith.addf %306, %309 : vector<64x8xf32>
    %c1_245 = arith.constant 1 : index
    %c1_246 = arith.constant 1 : index
    %c0_247 = arith.constant 0 : index
    %c0_248 = arith.constant 0 : index
    %311 = vector.load %arg8[%c1_245, %c1_246, %c0_247, %c0_248] : memref<2x4x32x8xf32, #tpu.memory_space<vmem>>, vector<1x1x32x8xf32>
    %312 = vector.shape_cast %311 : vector<1x1x32x8xf32> to vector<32x8xf32>
    %cst_249 = arith.constant dense<0.000000e+00> : vector<64x8xf32>
    %313 = tpu.matmul %250, %312, %cst_249 {dimension_numbers = #tpu.dot_dimension_numbers<[1], [0], [0], [1], [0, 0, 1, 1], [], []>} : vector<64x32xf32>, vector<32x8xf32>, vector<64x8xf32> -> vector<64x8xf32>
    %c1_250 = arith.constant 1 : index
    %c1_251 = arith.constant 1 : index
    %c0_252 = arith.constant 0 : index
    %c0_253 = arith.constant 0 : index
    %314 = vector.load %arg9[%c1_250, %c1_251, %c0_252, %c0_253] : memref<2x4x1x8xf32, #tpu.memory_space<vmem>>, vector<1x1x1x8xf32>
    %315 = vector.shape_cast %314 : vector<1x1x1x8xf32> to vector<1x8xf32>
    %316 = vector.broadcast %315 : vector<1x8xf32> to vector<64x8xf32>
    %317 = arith.addf %313, %316 : vector<64x8xf32>
    %318 = vector.shape_cast %303 : vector<64x8xf32> to vector<8x8x8xf32>
    %319 = vector.shape_cast %310 : vector<64x8xf32> to vector<8x8x8xf32>
    %320 = vector.shape_cast %317 : vector<64x8xf32> to vector<8x8x8xf32>
    "tpu.trace_start"() <{level = 10 : i32, message = "bqd,bkd->bqk"}> : () -> ()
    %cst_254 = arith.constant dense<0.000000e+00> : vector<8x8x8xf32>
    %321 = tpu.matmul %318, %319, %cst_254 {dimension_numbers = #tpu.dot_dimension_numbers<[2], [2], [1], [1], [0, 0, 0, 1, 1, 1], [0], [0]>} : vector<8x8x8xf32>, vector<8x8x8xf32>, vector<8x8x8xf32> -> vector<8x8x8xf32>
    "tpu.trace_stop"() : () -> ()
    %322 = vector.broadcast %2 : vector<8x1x8xf32> to vector<8x8x8xf32>
    %323 = arith.addf %321, %322 : vector<8x8x8xf32>
    %cst_255 = arith.constant dense<0xFF800000> : vector<8x8xf32>
    %324 = vector.multi_reduction <maximumf>, %323, %cst_255 [2] : vector<8x8x8xf32> to vector<8x8xf32>
    %325 = vector.shape_cast %324 : vector<8x8xf32> to vector<8x8x1xf32>
    %326 = vector.broadcast %325 : vector<8x8x1xf32> to vector<8x8x8xf32>
    %327 = arith.subf %323, %326 : vector<8x8x8xf32>
    %328 = math.exp %327 : vector<8x8x8xf32>
    %cst_256 = arith.constant dense<0.000000e+00> : vector<8x8xf32>
    %329 = vector.multi_reduction <add>, %328, %cst_256 [2] : vector<8x8x8xf32> to vector<8x8xf32>
    %330 = vector.shape_cast %329 : vector<8x8xf32> to vector<8x8x1xf32>
    %331 = vector.broadcast %330 : vector<8x8x1xf32> to vector<8x8x8xf32>
    %332 = arith.divf %328, %331 : vector<8x8x8xf32>
    "tpu.trace_start"() <{level = 10 : i32, message = "bqk,bkd->bqd"}> : () -> ()
    %cst_257 = arith.constant dense<0.000000e+00> : vector<8x8x8xf32>
    %333 = tpu.matmul %332, %320, %cst_257 {dimension_numbers = #tpu.dot_dimension_numbers<[2], [1], [1], [2], [0, 0, 0, 1, 1, 2], [0], [0]>} : vector<8x8x8xf32>, vector<8x8x8xf32>, vector<8x8x8xf32> -> vector<8x8x8xf32>
    "tpu.trace_stop"() : () -> ()
    %334 = vector.shape_cast %333 : vector<8x8x8xf32> to vector<64x8xf32>
    %c1_258 = arith.constant 1 : index
    %c1_259 = arith.constant 1 : index
    %c0_260 = arith.constant 0 : index
    %c0_261 = arith.constant 0 : index
    %335 = vector.load %arg10[%c1_258, %c1_259, %c0_260, %c0_261] : memref<2x4x8x32xf32, #tpu.memory_space<vmem>>, vector<1x1x8x32xf32>
    %336 = vector.shape_cast %335 : vector<1x1x8x32xf32> to vector<8x32xf32>
    %cst_262 = arith.constant dense<0.000000e+00> : vector<64x32xf32>
    %337 = tpu.matmul %334, %336, %cst_262 {dimension_numbers = #tpu.dot_dimension_numbers<[1], [0], [0], [1], [0, 0, 1, 1], [], []>} : vector<64x8xf32>, vector<8x32xf32>, vector<64x32xf32> -> vector<64x32xf32>
    %338 = arith.addf %296, %337 : vector<64x32xf32>
    %c1_263 = arith.constant 1 : index
    %c2_264 = arith.constant 2 : index
    %c0_265 = arith.constant 0 : index
    %c0_266 = arith.constant 0 : index
    %339 = vector.load %arg4[%c1_263, %c2_264, %c0_265, %c0_266] : memref<2x4x32x8xf32, #tpu.memory_space<vmem>>, vector<1x1x32x8xf32>
    %340 = vector.shape_cast %339 : vector<1x1x32x8xf32> to vector<32x8xf32>
    %cst_267 = arith.constant dense<0.000000e+00> : vector<64x8xf32>
    %341 = tpu.matmul %250, %340, %cst_267 {dimension_numbers = #tpu.dot_dimension_numbers<[1], [0], [0], [1], [0, 0, 1, 1], [], []>} : vector<64x32xf32>, vector<32x8xf32>, vector<64x8xf32> -> vector<64x8xf32>
    %c1_268 = arith.constant 1 : index
    %c2_269 = arith.constant 2 : index
    %c0_270 = arith.constant 0 : index
    %c0_271 = arith.constant 0 : index
    %342 = vector.load %arg5[%c1_268, %c2_269, %c0_270, %c0_271] : memref<2x4x1x8xf32, #tpu.memory_space<vmem>>, vector<1x1x1x8xf32>
    %343 = vector.shape_cast %342 : vector<1x1x1x8xf32> to vector<1x8xf32>
    %344 = vector.broadcast %343 : vector<1x8xf32> to vector<64x8xf32>
    %345 = arith.addf %341, %344 : vector<64x8xf32>
    %c1_272 = arith.constant 1 : index
    %c2_273 = arith.constant 2 : index
    %c0_274 = arith.constant 0 : index
    %c0_275 = arith.constant 0 : index
    %346 = vector.load %arg6[%c1_272, %c2_273, %c0_274, %c0_275] : memref<2x4x32x8xf32, #tpu.memory_space<vmem>>, vector<1x1x32x8xf32>
    %347 = vector.shape_cast %346 : vector<1x1x32x8xf32> to vector<32x8xf32>
    %cst_276 = arith.constant dense<0.000000e+00> : vector<64x8xf32>
    %348 = tpu.matmul %250, %347, %cst_276 {dimension_numbers = #tpu.dot_dimension_numbers<[1], [0], [0], [1], [0, 0, 1, 1], [], []>} : vector<64x32xf32>, vector<32x8xf32>, vector<64x8xf32> -> vector<64x8xf32>
    %c1_277 = arith.constant 1 : index
    %c2_278 = arith.constant 2 : index
    %c0_279 = arith.constant 0 : index
    %c0_280 = arith.constant 0 : index
    %349 = vector.load %arg7[%c1_277, %c2_278, %c0_279, %c0_280] : memref<2x4x1x8xf32, #tpu.memory_space<vmem>>, vector<1x1x1x8xf32>
    %350 = vector.shape_cast %349 : vector<1x1x1x8xf32> to vector<1x8xf32>
    %351 = vector.broadcast %350 : vector<1x8xf32> to vector<64x8xf32>
    %352 = arith.addf %348, %351 : vector<64x8xf32>
    %c1_281 = arith.constant 1 : index
    %c2_282 = arith.constant 2 : index
    %c0_283 = arith.constant 0 : index
    %c0_284 = arith.constant 0 : index
    %353 = vector.load %arg8[%c1_281, %c2_282, %c0_283, %c0_284] : memref<2x4x32x8xf32, #tpu.memory_space<vmem>>, vector<1x1x32x8xf32>
    %354 = vector.shape_cast %353 : vector<1x1x32x8xf32> to vector<32x8xf32>
    %cst_285 = arith.constant dense<0.000000e+00> : vector<64x8xf32>
    %355 = tpu.matmul %250, %354, %cst_285 {dimension_numbers = #tpu.dot_dimension_numbers<[1], [0], [0], [1], [0, 0, 1, 1], [], []>} : vector<64x32xf32>, vector<32x8xf32>, vector<64x8xf32> -> vector<64x8xf32>
    %c1_286 = arith.constant 1 : index
    %c2_287 = arith.constant 2 : index
    %c0_288 = arith.constant 0 : index
    %c0_289 = arith.constant 0 : index
    %356 = vector.load %arg9[%c1_286, %c2_287, %c0_288, %c0_289] : memref<2x4x1x8xf32, #tpu.memory_space<vmem>>, vector<1x1x1x8xf32>
    %357 = vector.shape_cast %356 : vector<1x1x1x8xf32> to vector<1x8xf32>
    %358 = vector.broadcast %357 : vector<1x8xf32> to vector<64x8xf32>
    %359 = arith.addf %355, %358 : vector<64x8xf32>
    %360 = vector.shape_cast %345 : vector<64x8xf32> to vector<8x8x8xf32>
    %361 = vector.shape_cast %352 : vector<64x8xf32> to vector<8x8x8xf32>
    %362 = vector.shape_cast %359 : vector<64x8xf32> to vector<8x8x8xf32>
    "tpu.trace_start"() <{level = 10 : i32, message = "bqd,bkd->bqk"}> : () -> ()
    %cst_290 = arith.constant dense<0.000000e+00> : vector<8x8x8xf32>
    %363 = tpu.matmul %360, %361, %cst_290 {dimension_numbers = #tpu.dot_dimension_numbers<[2], [2], [1], [1], [0, 0, 0, 1, 1, 1], [0], [0]>} : vector<8x8x8xf32>, vector<8x8x8xf32>, vector<8x8x8xf32> -> vector<8x8x8xf32>
    "tpu.trace_stop"() : () -> ()
    %364 = vector.broadcast %2 : vector<8x1x8xf32> to vector<8x8x8xf32>
    %365 = arith.addf %363, %364 : vector<8x8x8xf32>
    %cst_291 = arith.constant dense<0xFF800000> : vector<8x8xf32>
    %366 = vector.multi_reduction <maximumf>, %365, %cst_291 [2] : vector<8x8x8xf32> to vector<8x8xf32>
    %367 = vector.shape_cast %366 : vector<8x8xf32> to vector<8x8x1xf32>
    %368 = vector.broadcast %367 : vector<8x8x1xf32> to vector<8x8x8xf32>
    %369 = arith.subf %365, %368 : vector<8x8x8xf32>
    %370 = math.exp %369 : vector<8x8x8xf32>
    %cst_292 = arith.constant dense<0.000000e+00> : vector<8x8xf32>
    %371 = vector.multi_reduction <add>, %370, %cst_292 [2] : vector<8x8x8xf32> to vector<8x8xf32>
    %372 = vector.shape_cast %371 : vector<8x8xf32> to vector<8x8x1xf32>
    %373 = vector.broadcast %372 : vector<8x8x1xf32> to vector<8x8x8xf32>
    %374 = arith.divf %370, %373 : vector<8x8x8xf32>
    "tpu.trace_start"() <{level = 10 : i32, message = "bqk,bkd->bqd"}> : () -> ()
    %cst_293 = arith.constant dense<0.000000e+00> : vector<8x8x8xf32>
    %375 = tpu.matmul %374, %362, %cst_293 {dimension_numbers = #tpu.dot_dimension_numbers<[2], [1], [1], [2], [0, 0, 0, 1, 1, 2], [0], [0]>} : vector<8x8x8xf32>, vector<8x8x8xf32>, vector<8x8x8xf32> -> vector<8x8x8xf32>
    "tpu.trace_stop"() : () -> ()
    %376 = vector.shape_cast %375 : vector<8x8x8xf32> to vector<64x8xf32>
    %c1_294 = arith.constant 1 : index
    %c2_295 = arith.constant 2 : index
    %c0_296 = arith.constant 0 : index
    %c0_297 = arith.constant 0 : index
    %377 = vector.load %arg10[%c1_294, %c2_295, %c0_296, %c0_297] : memref<2x4x8x32xf32, #tpu.memory_space<vmem>>, vector<1x1x8x32xf32>
    %378 = vector.shape_cast %377 : vector<1x1x8x32xf32> to vector<8x32xf32>
    %cst_298 = arith.constant dense<0.000000e+00> : vector<64x32xf32>
    %379 = tpu.matmul %376, %378, %cst_298 {dimension_numbers = #tpu.dot_dimension_numbers<[1], [0], [0], [1], [0, 0, 1, 1], [], []>} : vector<64x8xf32>, vector<8x32xf32>, vector<64x32xf32> -> vector<64x32xf32>
    %380 = arith.addf %338, %379 : vector<64x32xf32>
    %c1_299 = arith.constant 1 : index
    %c3_300 = arith.constant 3 : index
    %c0_301 = arith.constant 0 : index
    %c0_302 = arith.constant 0 : index
    %381 = vector.load %arg4[%c1_299, %c3_300, %c0_301, %c0_302] : memref<2x4x32x8xf32, #tpu.memory_space<vmem>>, vector<1x1x32x8xf32>
    %382 = vector.shape_cast %381 : vector<1x1x32x8xf32> to vector<32x8xf32>
    %cst_303 = arith.constant dense<0.000000e+00> : vector<64x8xf32>
    %383 = tpu.matmul %250, %382, %cst_303 {dimension_numbers = #tpu.dot_dimension_numbers<[1], [0], [0], [1], [0, 0, 1, 1], [], []>} : vector<64x32xf32>, vector<32x8xf32>, vector<64x8xf32> -> vector<64x8xf32>
    %c1_304 = arith.constant 1 : index
    %c3_305 = arith.constant 3 : index
    %c0_306 = arith.constant 0 : index
    %c0_307 = arith.constant 0 : index
    %384 = vector.load %arg5[%c1_304, %c3_305, %c0_306, %c0_307] : memref<2x4x1x8xf32, #tpu.memory_space<vmem>>, vector<1x1x1x8xf32>
    %385 = vector.shape_cast %384 : vector<1x1x1x8xf32> to vector<1x8xf32>
    %386 = vector.broadcast %385 : vector<1x8xf32> to vector<64x8xf32>
    %387 = arith.addf %383, %386 : vector<64x8xf32>
    %c1_308 = arith.constant 1 : index
    %c3_309 = arith.constant 3 : index
    %c0_310 = arith.constant 0 : index
    %c0_311 = arith.constant 0 : index
    %388 = vector.load %arg6[%c1_308, %c3_309, %c0_310, %c0_311] : memref<2x4x32x8xf32, #tpu.memory_space<vmem>>, vector<1x1x32x8xf32>
    %389 = vector.shape_cast %388 : vector<1x1x32x8xf32> to vector<32x8xf32>
    %cst_312 = arith.constant dense<0.000000e+00> : vector<64x8xf32>
    %390 = tpu.matmul %250, %389, %cst_312 {dimension_numbers = #tpu.dot_dimension_numbers<[1], [0], [0], [1], [0, 0, 1, 1], [], []>} : vector<64x32xf32>, vector<32x8xf32>, vector<64x8xf32> -> vector<64x8xf32>
    %c1_313 = arith.constant 1 : index
    %c3_314 = arith.constant 3 : index
    %c0_315 = arith.constant 0 : index
    %c0_316 = arith.constant 0 : index
    %391 = vector.load %arg7[%c1_313, %c3_314, %c0_315, %c0_316] : memref<2x4x1x8xf32, #tpu.memory_space<vmem>>, vector<1x1x1x8xf32>
    %392 = vector.shape_cast %391 : vector<1x1x1x8xf32> to vector<1x8xf32>
    %393 = vector.broadcast %392 : vector<1x8xf32> to vector<64x8xf32>
    %394 = arith.addf %390, %393 : vector<64x8xf32>
    %c1_317 = arith.constant 1 : index
    %c3_318 = arith.constant 3 : index
    %c0_319 = arith.constant 0 : index
    %c0_320 = arith.constant 0 : index
    %395 = vector.load %arg8[%c1_317, %c3_318, %c0_319, %c0_320] : memref<2x4x32x8xf32, #tpu.memory_space<vmem>>, vector<1x1x32x8xf32>
    %396 = vector.shape_cast %395 : vector<1x1x32x8xf32> to vector<32x8xf32>
    %cst_321 = arith.constant dense<0.000000e+00> : vector<64x8xf32>
    %397 = tpu.matmul %250, %396, %cst_321 {dimension_numbers = #tpu.dot_dimension_numbers<[1], [0], [0], [1], [0, 0, 1, 1], [], []>} : vector<64x32xf32>, vector<32x8xf32>, vector<64x8xf32> -> vector<64x8xf32>
    %c1_322 = arith.constant 1 : index
    %c3_323 = arith.constant 3 : index
    %c0_324 = arith.constant 0 : index
    %c0_325 = arith.constant 0 : index
    %398 = vector.load %arg9[%c1_322, %c3_323, %c0_324, %c0_325] : memref<2x4x1x8xf32, #tpu.memory_space<vmem>>, vector<1x1x1x8xf32>
    %399 = vector.shape_cast %398 : vector<1x1x1x8xf32> to vector<1x8xf32>
    %400 = vector.broadcast %399 : vector<1x8xf32> to vector<64x8xf32>
    %401 = arith.addf %397, %400 : vector<64x8xf32>
    %402 = vector.shape_cast %387 : vector<64x8xf32> to vector<8x8x8xf32>
    %403 = vector.shape_cast %394 : vector<64x8xf32> to vector<8x8x8xf32>
    %404 = vector.shape_cast %401 : vector<64x8xf32> to vector<8x8x8xf32>
    "tpu.trace_start"() <{level = 10 : i32, message = "bqd,bkd->bqk"}> : () -> ()
    %cst_326 = arith.constant dense<0.000000e+00> : vector<8x8x8xf32>
    %405 = tpu.matmul %402, %403, %cst_326 {dimension_numbers = #tpu.dot_dimension_numbers<[2], [2], [1], [1], [0, 0, 0, 1, 1, 1], [0], [0]>} : vector<8x8x8xf32>, vector<8x8x8xf32>, vector<8x8x8xf32> -> vector<8x8x8xf32>
    "tpu.trace_stop"() : () -> ()
    %406 = vector.broadcast %2 : vector<8x1x8xf32> to vector<8x8x8xf32>
    %407 = arith.addf %405, %406 : vector<8x8x8xf32>
    %cst_327 = arith.constant dense<0xFF800000> : vector<8x8xf32>
    %408 = vector.multi_reduction <maximumf>, %407, %cst_327 [2] : vector<8x8x8xf32> to vector<8x8xf32>
    %409 = vector.shape_cast %408 : vector<8x8xf32> to vector<8x8x1xf32>
    %410 = vector.broadcast %409 : vector<8x8x1xf32> to vector<8x8x8xf32>
    %411 = arith.subf %407, %410 : vector<8x8x8xf32>
    %412 = math.exp %411 : vector<8x8x8xf32>
    %cst_328 = arith.constant dense<0.000000e+00> : vector<8x8xf32>
    %413 = vector.multi_reduction <add>, %412, %cst_328 [2] : vector<8x8x8xf32> to vector<8x8xf32>
    %414 = vector.shape_cast %413 : vector<8x8xf32> to vector<8x8x1xf32>
    %415 = vector.broadcast %414 : vector<8x8x1xf32> to vector<8x8x8xf32>
    %416 = arith.divf %412, %415 : vector<8x8x8xf32>
    "tpu.trace_start"() <{level = 10 : i32, message = "bqk,bkd->bqd"}> : () -> ()
    %cst_329 = arith.constant dense<0.000000e+00> : vector<8x8x8xf32>
    %417 = tpu.matmul %416, %404, %cst_329 {dimension_numbers = #tpu.dot_dimension_numbers<[2], [1], [1], [2], [0, 0, 0, 1, 1, 2], [0], [0]>} : vector<8x8x8xf32>, vector<8x8x8xf32>, vector<8x8x8xf32> -> vector<8x8x8xf32>
    "tpu.trace_stop"() : () -> ()
    %418 = vector.shape_cast %417 : vector<8x8x8xf32> to vector<64x8xf32>
    %c1_330 = arith.constant 1 : index
    %c3_331 = arith.constant 3 : index
    %c0_332 = arith.constant 0 : index
    %c0_333 = arith.constant 0 : index
    %419 = vector.load %arg10[%c1_330, %c3_331, %c0_332, %c0_333] : memref<2x4x8x32xf32, #tpu.memory_space<vmem>>, vector<1x1x8x32xf32>
    %420 = vector.shape_cast %419 : vector<1x1x8x32xf32> to vector<8x32xf32>
    %cst_334 = arith.constant dense<0.000000e+00> : vector<64x32xf32>
    %421 = tpu.matmul %418, %420, %cst_334 {dimension_numbers = #tpu.dot_dimension_numbers<[1], [0], [0], [1], [0, 0, 1, 1], [], []>} : vector<64x8xf32>, vector<8x32xf32>, vector<64x32xf32> -> vector<64x32xf32>
    %422 = arith.addf %380, %421 : vector<64x32xf32>
    %c1_335 = arith.constant 1 : index
    %c0_336 = arith.constant 0 : index
    %c0_337 = arith.constant 0 : index
    %423 = vector.load %arg12[%c1_335, %c0_336, %c0_337] : memref<2x1x32xf32, #tpu.memory_space<vmem>>, vector<1x1x32xf32>
    %424 = vector.shape_cast %423 : vector<1x1x32xf32> to vector<1x32xf32>
    %c1_338 = arith.constant 1 : index
    %c0_339 = arith.constant 0 : index
    %c0_340 = arith.constant 0 : index
    %425 = vector.load %arg13[%c1_338, %c0_339, %c0_340] : memref<2x1x32xf32, #tpu.memory_space<vmem>>, vector<1x1x32xf32>
    %426 = vector.shape_cast %425 : vector<1x1x32xf32> to vector<1x32xf32>
    %cst_341 = arith.constant dense<0.000000e+00> : vector<64xf32>
    %427 = vector.multi_reduction <add>, %422, %cst_341 [1] : vector<64x32xf32> to vector<64xf32>
    %428 = vector.shape_cast %427 : vector<64xf32> to vector<64x1xf32>
    %cst_342 = arith.constant 3.200000e+01 : f32
    %429 = vector.broadcast %cst_342 : f32 to vector<64x1xf32>
    %430 = arith.divf %428, %429 : vector<64x1xf32>
    %431 = vector.broadcast %430 : vector<64x1xf32> to vector<64x32xf32>
    %432 = arith.subf %422, %431 : vector<64x32xf32>
    %433 = arith.mulf %432, %432 : vector<64x32xf32>
    %cst_343 = arith.constant dense<0.000000e+00> : vector<64xf32>
    %434 = vector.multi_reduction <add>, %433, %cst_343 [1] : vector<64x32xf32> to vector<64xf32>
    %435 = vector.shape_cast %434 : vector<64xf32> to vector<64x1xf32>
    %cst_344 = arith.constant 3.200000e+01 : f32
    %436 = vector.broadcast %cst_344 : f32 to vector<64x1xf32>
    %437 = arith.divf %435, %436 : vector<64x1xf32>
    %cst_345 = arith.constant 9.99999996E-13 : f32
    %438 = vector.broadcast %cst_345 : f32 to vector<64x1xf32>
    %439 = arith.addf %437, %438 : vector<64x1xf32>
    %440 = math.rsqrt %439 : vector<64x1xf32>
    %441 = vector.broadcast %440 : vector<64x1xf32> to vector<64x32xf32>
    %442 = arith.mulf %432, %441 : vector<64x32xf32>
    %443 = vector.broadcast %424 : vector<1x32xf32> to vector<64x32xf32>
    %444 = arith.mulf %442, %443 : vector<64x32xf32>
    %445 = vector.broadcast %426 : vector<1x32xf32> to vector<64x32xf32>
    %446 = arith.addf %444, %445 : vector<64x32xf32>
    %c1_346 = arith.constant 1 : index
    %c0_347 = arith.constant 0 : index
    %c0_348 = arith.constant 0 : index
    %447 = vector.load %arg14[%c1_346, %c0_347, %c0_348] : memref<2x32x64xf32, #tpu.memory_space<vmem>>, vector<1x32x64xf32>
    %448 = vector.shape_cast %447 : vector<1x32x64xf32> to vector<32x64xf32>
    %cst_349 = arith.constant dense<0.000000e+00> : vector<64x64xf32>
    %449 = tpu.matmul %446, %448, %cst_349 {dimension_numbers = #tpu.dot_dimension_numbers<[1], [0], [0], [1], [0, 0, 1, 1], [], []>} : vector<64x32xf32>, vector<32x64xf32>, vector<64x64xf32> -> vector<64x64xf32>
    %c1_350 = arith.constant 1 : index
    %c0_351 = arith.constant 0 : index
    %c0_352 = arith.constant 0 : index
    %450 = vector.load %arg15[%c1_350, %c0_351, %c0_352] : memref<2x1x64xf32, #tpu.memory_space<vmem>>, vector<1x1x64xf32>
    %451 = vector.shape_cast %450 : vector<1x1x64xf32> to vector<1x64xf32>
    %452 = vector.broadcast %451 : vector<1x64xf32> to vector<64x64xf32>
    %453 = arith.addf %449, %452 : vector<64x64xf32>
    %cst_353 = arith.constant 5.000000e-01 : f32
    %454 = vector.broadcast %cst_353 : f32 to vector<64x64xf32>
    %455 = arith.mulf %454, %453 : vector<64x64xf32>
    %cst_354 = arith.constant 4.471500e-02 : f32
    %456 = vector.broadcast %cst_354 : f32 to vector<64x64xf32>
    %457 = arith.mulf %456, %453 : vector<64x64xf32>
    %458 = arith.mulf %457, %453 : vector<64x64xf32>
    %459 = arith.mulf %458, %453 : vector<64x64xf32>
    %460 = arith.addf %453, %459 : vector<64x64xf32>
    %cst_355 = arith.constant 0.797884583 : f32
    %461 = vector.broadcast %cst_355 : f32 to vector<64x64xf32>
    %462 = arith.mulf %461, %460 : vector<64x64xf32>
    %463 = math.tanh %462 : vector<64x64xf32>
    %cst_356 = arith.constant 1.000000e+00 : f32
    %464 = vector.broadcast %cst_356 : f32 to vector<64x64xf32>
    %465 = arith.addf %464, %463 : vector<64x64xf32>
    %466 = arith.mulf %455, %465 : vector<64x64xf32>
    %c1_357 = arith.constant 1 : index
    %c0_358 = arith.constant 0 : index
    %c0_359 = arith.constant 0 : index
    %467 = vector.load %arg16[%c1_357, %c0_358, %c0_359] : memref<2x64x32xf32, #tpu.memory_space<vmem>>, vector<1x64x32xf32>
    %468 = vector.shape_cast %467 : vector<1x64x32xf32> to vector<64x32xf32>
    %cst_360 = arith.constant dense<0.000000e+00> : vector<64x32xf32>
    %469 = tpu.matmul %466, %468, %cst_360 {dimension_numbers = #tpu.dot_dimension_numbers<[1], [0], [0], [1], [0, 0, 1, 1], [], []>} : vector<64x64xf32>, vector<64x32xf32>, vector<64x32xf32> -> vector<64x32xf32>
    %c1_361 = arith.constant 1 : index
    %c0_362 = arith.constant 0 : index
    %c0_363 = arith.constant 0 : index
    %470 = vector.load %arg17[%c1_361, %c0_362, %c0_363] : memref<2x1x32xf32, #tpu.memory_space<vmem>>, vector<1x1x32xf32>
    %471 = vector.shape_cast %470 : vector<1x1x32xf32> to vector<1x32xf32>
    %472 = vector.broadcast %471 : vector<1x32xf32> to vector<64x32xf32>
    %473 = arith.addf %469, %472 : vector<64x32xf32>
    %474 = arith.addf %473, %446 : vector<64x32xf32>
    %c1_364 = arith.constant 1 : index
    %c0_365 = arith.constant 0 : index
    %c0_366 = arith.constant 0 : index
    %475 = vector.load %arg18[%c1_364, %c0_365, %c0_366] : memref<2x1x32xf32, #tpu.memory_space<vmem>>, vector<1x1x32xf32>
    %476 = vector.shape_cast %475 : vector<1x1x32xf32> to vector<1x32xf32>
    %c1_367 = arith.constant 1 : index
    %c0_368 = arith.constant 0 : index
    %c0_369 = arith.constant 0 : index
    %477 = vector.load %arg19[%c1_367, %c0_368, %c0_369] : memref<2x1x32xf32, #tpu.memory_space<vmem>>, vector<1x1x32xf32>
    %478 = vector.shape_cast %477 : vector<1x1x32xf32> to vector<1x32xf32>
    %cst_370 = arith.constant dense<0.000000e+00> : vector<64xf32>
    %479 = vector.multi_reduction <add>, %474, %cst_370 [1] : vector<64x32xf32> to vector<64xf32>
    %480 = vector.shape_cast %479 : vector<64xf32> to vector<64x1xf32>
    %cst_371 = arith.constant 3.200000e+01 : f32
    %481 = vector.broadcast %cst_371 : f32 to vector<64x1xf32>
    %482 = arith.divf %480, %481 : vector<64x1xf32>
    %483 = vector.broadcast %482 : vector<64x1xf32> to vector<64x32xf32>
    %484 = arith.subf %474, %483 : vector<64x32xf32>
    %485 = arith.mulf %484, %484 : vector<64x32xf32>
    %cst_372 = arith.constant dense<0.000000e+00> : vector<64xf32>
    %486 = vector.multi_reduction <add>, %485, %cst_372 [1] : vector<64x32xf32> to vector<64xf32>
    %487 = vector.shape_cast %486 : vector<64xf32> to vector<64x1xf32>
    %cst_373 = arith.constant 3.200000e+01 : f32
    %488 = vector.broadcast %cst_373 : f32 to vector<64x1xf32>
    %489 = arith.divf %487, %488 : vector<64x1xf32>
    %cst_374 = arith.constant 9.99999996E-13 : f32
    %490 = vector.broadcast %cst_374 : f32 to vector<64x1xf32>
    %491 = arith.addf %489, %490 : vector<64x1xf32>
    %492 = math.rsqrt %491 : vector<64x1xf32>
    %493 = vector.broadcast %492 : vector<64x1xf32> to vector<64x32xf32>
    %494 = arith.mulf %484, %493 : vector<64x32xf32>
    %495 = vector.broadcast %476 : vector<1x32xf32> to vector<64x32xf32>
    %496 = arith.mulf %494, %495 : vector<64x32xf32>
    %497 = vector.broadcast %478 : vector<1x32xf32> to vector<64x32xf32>
    %498 = arith.addf %496, %497 : vector<64x32xf32>
    %499 = vector.shape_cast %498 : vector<64x32xf32> to vector<8x8x32xf32>
    %c0_375 = arith.constant 0 : index
    %c0_376 = arith.constant 0 : index
    %c0_377 = arith.constant 0 : index
    %500 = vector.load %arg3[%c0_375, %c0_376, %c0_377] : memref<8x8x1xf32, #tpu.memory_space<vmem>>, vector<8x8x1xf32>
    %501 = vector.broadcast %500 : vector<8x8x1xf32> to vector<8x8x32xf32>
    %502 = arith.mulf %499, %501 : vector<8x8x32xf32>
    %cst_378 = arith.constant dense<0.000000e+00> : vector<8x32xf32>
    %503 = vector.multi_reduction <add>, %502, %cst_378 [1] : vector<8x8x32xf32> to vector<8x32xf32>
    %cst_379 = arith.constant dense<0.000000e+00> : vector<8x1xf32>
    %504 = vector.multi_reduction <add>, %500, %cst_379 [1] : vector<8x8x1xf32> to vector<8x1xf32>
    %cst_380 = arith.constant 0.000000e+00 : f32
    %505 = vector.broadcast %cst_380 : f32 to vector<8x1xf32>
    %506 = arith.cmpf ogt, %504, %505 : vector<8x1xf32>
    %507 = vector.broadcast %504 : vector<8x1xf32> to vector<8x32xf32>
    %508 = arith.divf %503, %507 : vector<8x32xf32>
    %cst_381 = arith.constant 0.000000e+00 : f32
    %509 = vector.shape_cast %506 : vector<8x1xi1> to vector<8x1xi1>
    %510 = vector.broadcast %509 : vector<8x1xi1> to vector<8x32xi1>
    %511 = vector.broadcast %cst_381 : f32 to vector<8x32xf32>
    %512 = arith.select %510, %508, %511 : vector<8x32xi1>, vector<8x32xf32>
    %c0_382 = arith.constant 0 : index
    %c0_383 = arith.constant 0 : index
    %513 = vector.load %arg20[%c0_382, %c0_383] : memref<32x8xf32, #tpu.memory_space<vmem>>, vector<32x8xf32>
    %cst_384 = arith.constant dense<0.000000e+00> : vector<8x8xf32>
    %514 = tpu.matmul %512, %513, %cst_384 {dimension_numbers = #tpu.dot_dimension_numbers<[1], [0], [0], [1], [0, 0, 1, 1], [], []>} : vector<8x32xf32>, vector<32x8xf32>, vector<8x8xf32> -> vector<8x8xf32>
    %c0_385 = arith.constant 0 : index
    %c0_386 = arith.constant 0 : index
    %515 = vector.load %arg21[%c0_385, %c0_386] : memref<1x8xf32, #tpu.memory_space<vmem>>, vector<1x8xf32>
    %516 = vector.broadcast %515 : vector<1x8xf32> to vector<8x8xf32>
    %517 = arith.addf %514, %516 : vector<8x8xf32>
    %c0_387 = arith.constant 0 : index
    %c0_388 = arith.constant 0 : index
    %518 = vector.load %arg22[%c0_387, %c0_388] : memref<8x8xf32, #tpu.memory_space<vmem>>, vector<8x8xf32>
    tpu.vector_store %arg22[%c0_387, %c0_388], %517 {strides = array<i32>} : memref<8x8xf32, #tpu.memory_space<vmem>>, vector<8x8xf32>,
    return
  }
  func.func @transform_0(%arg0: i32) -> (i32, i32, i32) {
    %c0_i32 = arith.constant 0 : i32
    %c0_i32_0 = arith.constant 0 : i32
    %c0_i32_1 = arith.constant 0 : i32
    return %arg0, %c0_i32, %c0_i32_0 : i32, i32, i32
  }
  func.func @transform_1(%arg0: i32) -> (i32, i32, i32) {
    %c0_i32 = arith.constant 0 : i32
    %c0_i32_0 = arith.constant 0 : i32
    %c0_i32_1 = arith.constant 0 : i32
    return %arg0, %c0_i32, %c0_i32_0 : i32, i32, i32
  }
  func.func @transform_2(%arg0: i32) -> (i32, i32, i32) {
    %c0_i32 = arith.constant 0 : i32
    %c0_i32_0 = arith.constant 0 : i32
    %c0_i32_1 = arith.constant 0 : i32
    return %arg0, %c0_i32, %c0_i32_0 : i32, i32, i32
  }
  func.func @transform_3(%arg0: i32) -> (i32, i32, i32, i32) {
    %c0_i32 = arith.constant 0 : i32
    %c0_i32_0 = arith.constant 0 : i32
    %c0_i32_1 = arith.constant 0 : i32
    %c0_i32_2 = arith.constant 0 : i32
    %c0_i32_3 = arith.constant 0 : i32
    return %c0_i32, %c0_i32_0, %c0_i32_1, %c0_i32_2 : i32, i32, i32, i32
  }
  func.func @transform_4(%arg0: i32) -> (i32, i32, i32, i32) {
    %c0_i32 = arith.constant 0 : i32
    %c0_i32_0 = arith.constant 0 : i32
    %c0_i32_1 = arith.constant 0 : i32
    %c0_i32_2 = arith.constant 0 : i32
    %c0_i32_3 = arith.constant 0 : i32
    return %c0_i32, %c0_i32_0, %c0_i32_1, %c0_i32_2 : i32, i32, i32, i32
  }
  func.func @transform_5(%arg0: i32) -> (i32, i32, i32, i32) {
    %c0_i32 = arith.constant 0 : i32
    %c0_i32_0 = arith.constant 0 : i32
    %c0_i32_1 = arith.constant 0 : i32
    %c0_i32_2 = arith.constant 0 : i32
    %c0_i32_3 = arith.constant 0 : i32
    return %c0_i32, %c0_i32_0, %c0_i32_1, %c0_i32_2 : i32, i32, i32, i32
  }
  func.func @transform_6(%arg0: i32) -> (i32, i32, i32, i32) {
    %c0_i32 = arith.constant 0 : i32
    %c0_i32_0 = arith.constant 0 : i32
    %c0_i32_1 = arith.constant 0 : i32
    %c0_i32_2 = arith.constant 0 : i32
    %c0_i32_3 = arith.constant 0 : i32
    return %c0_i32, %c0_i32_0, %c0_i32_1, %c0_i32_2 : i32, i32, i32, i32
  }
  func.func @transform_7(%arg0: i32) -> (i32, i32, i32, i32) {
    %c0_i32 = arith.constant 0 : i32
    %c0_i32_0 = arith.constant 0 : i32
    %c0_i32_1 = arith.constant 0 : i32
    %c0_i32_2 = arith.constant 0 : i32
    %c0_i32_3 = arith.constant 0 : i32
    return %c0_i32, %c0_i32_0, %c0_i32_1, %c0_i32_2 : i32, i32, i32, i32
  }
  func.func @transform_8(%arg0: i32) -> (i32, i32, i32, i32) {
    %c0_i32 = arith.constant 0 : i32
    %c0_i32_0 = arith.constant 0 : i32
    %c0_i32_1 = arith.constant 0 : i32
    %c0_i32_2 = arith.constant 0 : i32
    %c0_i32_3 = arith.constant 0 : i32
    return %c0_i32, %c0_i32_0, %c0_i32_1, %c0_i32_2 : i32, i32, i32, i32
  }
  func.func @transform_9(%arg0: i32) -> (i32, i32, i32, i32) {
    %c0_i32 = arith.constant 0 : i32
    %c0_i32_0 = arith.constant 0 : i32
    %c0_i32_1 = arith.constant 0 : i32
    %c0_i32_2 = arith.constant 0 : i32
    %c0_i32_3 = arith.constant 0 : i32
    return %c0_i32, %c0_i32_0, %c0_i32_1, %c0_i32_2 : i32, i32, i32, i32
  }
  func.func @transform_10(%arg0: i32) -> (i32, i32, i32) {
    %c0_i32 = arith.constant 0 : i32
    %c0_i32_0 = arith.constant 0 : i32
    %c0_i32_1 = arith.constant 0 : i32
    %c0_i32_2 = arith.constant 0 : i32
    return %c0_i32, %c0_i32_0, %c0_i32_1 : i32, i32, i32
  }
  func.func @transform_11(%arg0: i32) -> (i32, i32, i32) {
    %c0_i32 = arith.constant 0 : i32
    %c0_i32_0 = arith.constant 0 : i32
    %c0_i32_1 = arith.constant 0 : i32
    %c0_i32_2 = arith.constant 0 : i32
    return %c0_i32, %c0_i32_0, %c0_i32_1 : i32, i32, i32
  }
  func.func @transform_12(%arg0: i32) -> (i32, i32, i32) {
    %c0_i32 = arith.constant 0 : i32
    %c0_i32_0 = arith.constant 0 : i32
    %c0_i32_1 = arith.constant 0 : i32
    %c0_i32_2 = arith.constant 0 : i32
    return %c0_i32, %c0_i32_0, %c0_i32_1 : i32, i32, i32
  }
  func.func @transform_13(%arg0: i32) -> (i32, i32, i32) {
    %c0_i32 = arith.constant 0 : i32
    %c0_i32_0 = arith.constant 0 : i32
    %c0_i32_1 = arith.constant 0 : i32
    %c0_i32_2 = arith.constant 0 : i32
    return %c0_i32, %c0_i32_0, %c0_i32_1 : i32, i32, i32
  }
  func.func @transform_14(%arg0: i32) -> (i32, i32, i32) {
    %c0_i32 = arith.constant 0 : i32
    %c0_i32_0 = arith.constant 0 : i32
    %c0_i32_1 = arith.constant 0 : i32
    %c0_i32_2 = arith.constant 0 : i32
    return %c0_i32, %c0_i32_0, %c0_i32_1 : i32, i32, i32
  }
  func.func @transform_15(%arg0: i32) -> (i32, i32, i32) {
    %c0_i32 = arith.constant 0 : i32
    %c0_i32_0 = arith.constant 0 : i32
    %c0_i32_1 = arith.constant 0 : i32
    %c0_i32_2 = arith.constant 0 : i32
    return %c0_i32, %c0_i32_0, %c0_i32_1 : i32, i32, i32
  }
  func.func @transform_16(%arg0: i32) -> (i32, i32, i32) {
    %c0_i32 = arith.constant 0 : i32
    %c0_i32_0 = arith.constant 0 : i32
    %c0_i32_1 = arith.constant 0 : i32
    %c0_i32_2 = arith.constant 0 : i32
    return %c0_i32, %c0_i32_0, %c0_i32_1 : i32, i32, i32
  }
  func.func @transform_17(%arg0: i32) -> (i32, i32, i32) {
    %c0_i32 = arith.constant 0 : i32
    %c0_i32_0 = arith.constant 0 : i32
    %c0_i32_1 = arith.constant 0 : i32
    %c0_i32_2 = arith.constant 0 : i32
    return %c0_i32, %c0_i32_0, %c0_i32_1 : i32, i32, i32
  }
  func.func @transform_18(%arg0: i32) -> (i32, i32, i32) {
    %c0_i32 = arith.constant 0 : i32
    %c0_i32_0 = arith.constant 0 : i32
    %c0_i32_1 = arith.constant 0 : i32
    %c0_i32_2 = arith.constant 0 : i32
    return %c0_i32, %c0_i32_0, %c0_i32_1 : i32, i32, i32
  }
  func.func @transform_19(%arg0: i32) -> (i32, i32) {
    %c0_i32 = arith.constant 0 : i32
    %c0_i32_0 = arith.constant 0 : i32
    %c0_i32_1 = arith.constant 0 : i32
    return %c0_i32, %c0_i32_0 : i32, i32
  }
  func.func @transform_20(%arg0: i32) -> (i32, i32) {
    %c0_i32 = arith.constant 0 : i32
    %c0_i32_0 = arith.constant 0 : i32
    %c0_i32_1 = arith.constant 0 : i32
    return %c0_i32, %c0_i32_0 : i32, i32
  }
  func.func @transform_21(%arg0: i32) -> (i32, i32) {
    %c0_i32 = arith.constant 0 : i32
    %c0_i32_0 = arith.constant 0 : i32
    return %arg0, %c0_i32 : i32, i32
  }
}

</mosaic_0001>

<bundles_post_ra>
// kernel: tpu_custom_call.1
= control target key start
LH: loop header
LB: loop body
LE: loop exit
PB: predicated region body
PF: predicated region fallthrough
CT: control target
= control target key end

     0   :  { %s22928_s0 = inlined_call_operand.vmem [shape: f32[16,8,32], index: 0, kind: input, shape index: {}]   ;;  %s22929_s1 = inlined_call_operand.vmem [shape: f32[16,1,8], index: 1, kind: input, shape index: {}]   ;;  %s22930_s2 = inlined_call_operand.vmem [shape: f32[16,8,1], index: 2, kind: input, shape index: {}]   ;;  %s22931_s3 = inlined_call_operand.vmem [shape: f32[2,4,32,8], index: 3, kind: input, shape index: {}]   ;;  %s22932_s4 = inlined_call_operand.vmem [shape: f32[2,4,1,8], index: 4, kind: input, shape index: {}]   ;;  %s22933_s5 = inlined_call_operand.vmem [shape: f32[2,4,32,8], index: 5, kind: input, shape index: {}]   ;;  %s22934_s6 = inlined_call_operand.vmem [shape: f32[2,4,1,8], index: 6, kind: input, shape index: {}]   ;;  %s22935_s7 = inlined_call_operand.vmem [shape: f32[2,4,32,8], index: 7, kind: input, shape index: {}]   ;;  %s22936_s8 = inlined_call_operand.vmem [shape: f32[2,4,1,8], index: 8, kind: input, shape index: {}]   ;;  %s22937_s9 = inlined_call_operand.vmem [shape: f32[2,4,8,32], index: 9, kind: input, shape index: {}]   ;;  %s22938_s10 = inlined_call_operand.vmem [shape: f32[2,1,32], index: 10, kind: input, shape index: {}]   ;;  %s22939_s11 = inlined_call_operand.vmem [shape: f32[2,1,32], index: 11, kind: input, shape index: {}]   ;;  %s22940_s12 = inlined_call_operand.vmem [shape: f32[2,1,32], index: 12, kind: input, shape index: {}]   ;;  %s22941_s13 = inlined_call_operand.vmem [shape: f32[2,32,64], index: 13, kind: input, shape index: {}]   ;;  %s22942_s14 = inlined_call_operand.vmem [shape: f32[2,1,64], index: 14, kind: input, shape index: {}]   ;;  %s22943_s15 = inlined_call_operand.vmem [shape: f32[2,64,32], index: 15, kind: input, shape index: {}]   ;;  %s22944_s16 = inlined_call_operand.vmem [shape: f32[2,1,32], index: 16, kind: input, shape index: {}]   ;;  %s22945_s17 = inlined_call_operand.vmem [shape: f32[2,1,32], index: 17, kind: input, shape index: {}]   ;;  %s22946_s18 = inlined_call_operand.vmem [shape: f32[2,1,32], index: 18, kind: input, shape index: {}]   ;;  %s22947_s19 = inlined_call_operand.vmem [shape: f32[32,8], index: 19, kind: input, shape index: {}]   ;;  %s22948_s20 = inlined_call_operand.vmem [shape: f32[1,8], index: 20, kind: input, shape index: {}]   ;;  %s22949_s21 = inlined_call_operand.vmem [shape: f32[16,8], index: 21, kind: output, shape index: {}]  }
   0x1   :  { %22955 = sst [smem:[#allocation3_spill]] %s22928_s0 }
   0x2   :  { %22956 = sst [smem:[#allocation4_spill]] %s22929_s1 }
   0x3   :  { %22957 = sst [smem:[#allocation5_spill]] %s22930_s2  ;;  %s19982_s2 = smov 0  }
   0x4   :  { %22958 = sst [smem:[#allocation6_spill]] %s22931_s3 }
   0x5   :  { %22959 = sst [smem:[#allocation7_spill]] %s22932_s4 }
   0x6   :  { %22960 = sst [smem:[#allocation8_spill]] %s22933_s5 }
   0x7   :  { %22961 = sst [smem:[#allocation9_spill]] %s22949_s21 }
   0x8 LB: > { %22962 = sst [smem:[#allocation2_spill]] %s19867_s2  ;;  %s19988_s25 = sadd.s32 4294967295, %s19867_s2   ;;  %s19867_s2 = sphi %s19982_s2, %s31_s2  }
   0x9   : > { %p16759_p0 = scmp.ge.s32.totalorder %s19867_s2, 1  ;;  %p609_p1 = scmp.lt.s32.totalorder %s19867_s2, 3 }
   0xb   : > { %p610_p2 = pnand %p16759_p0, %p609_p1 }
   0xc   : > { %s22963_s3 = sld [smem:[#allocation8_spill]] (!%p610_p2)  ;;  %s16760_s5 = sshll.u32 (!%p610_p2), %s19988_s25, 3 }
   0xd   : > { %613 = sbr.rel (%p610_p2) target bundleno = 10077 (0x275d), region = 104  ;;  %s22964_s0 = sld [smem:[#allocation6_spill]] (!%p610_p2) }
   0xe   : > { %p678_p3 = scmp.lt.s32.totalorder (!%p610_p2), %s16760_s5, 15  ;;  %s22965_s24 = sld [smem:[#allocation3_spill]] (!%p610_p2) }
   0xf   : > { %s22966_s30 = sld [smem:[#allocation7_spill]] (!%p610_p2)  ;;  %p694_p4 = scmp.lt.s32.totalorder (!%p610_p2), %s19988_s25, 1 }
  0x10   : > { %s22967_s28 = sld [smem:[#allocation4_spill]] (!%p610_p2) }
  0x12   : > { %v873_v0 = vld [vmem:[%s22963_s3 + $0x18] sm:$0xff]  ;;  %v872_v2 = vld [vmem:[%s22963_s3 + $0x10] sm:$0xff]  ;;  %v871_v4 = vld [vmem:[%s22963_s3 + $0x8] sm:$0xff]  ;;  %s22973_s5 = smov (!%p678_p3, %s16760_s5), 15  ;;  %vm740_vm0 = vcmask 261120   ;;  %v19869_v20 = vmov 0.0  }
  0x13   : > { %v732_v1 = vld [vmem:[%s22964_s0 + $0x18] sm:$0xff]  ;;  %18124 = vmatprep.subr.mxu1 %v873_v0  ;;  %v731_v3 = vld [vmem:[%s22964_s0 + $0x10] sm:$0xff]  ;;  %v730_v5 = vld [vmem:[%s22964_s0 + $0x8] sm:$0xff]  ;;  %s22953_s22 = sshll.u32 %s22973_s5, 3  ;;  %vm19870_vm1 = vmmov 0   ;;  %vm1150_vm2 = vcmask 64512  }
  0x14   : > { %18104 = vmatprep.subr.mxu0 %v732_v1  ;;  %18125 = vmatpush3.msra.mxu1 %v873_v0  ;;  %v870_v6 = vld [vmem:[%s22963_s3] sm:$0xff]  ;;  %s20025_s26 = scalar_lea.vmem %s22965_s24, %s22953_s22  ;;  %v989_v11 = vld [vmem:[%s22935_s7 + $0x18] sm:$0xff]  ;;  %v988_v14 = vld [vmem:[%s22935_s7 + $0x10] sm:$0xff]  ;;  %vm8250_vm3 = vcmask 523264   ;;  %s22969_s24 = sld [smem:[#allocation5_spill]]  ;;  %vm16406_vm4 = vcmask 7168  }
  0x15   : > { %18105 = vmatpush3.msra.mxu0 %v732_v1  ;;  %18126 = vmatprep.subr.mxu1 %v872_v2  ;;  %v729_v7 = vld [vmem:[%s22964_s0] sm:$0xff]  ;;  %v20031_v9 = vld [vmem:[%s20025_s26 + $0x8] sm:$0xff]  ;;  %v20036_v10 = vld [vmem:[%s20025_s26 + $0x10] sm:$0xff]  ;;  %vm16594_vm13 = vcmask 1041409   ;;  %vm16596_vm14 = vcmask 1042434   ;;  %s22975_s25 = smov (!%p694_p4, %s19988_s25), 1 }
  0x16   : > { %18106 = vmatprep.subr.mxu0 %v731_v3  ;;  %18127 = vmatpush3.msra.mxu1 %v872_v2  ;;  %v20028_v8 = vld [vmem:[%s20025_s26] sm:$0xff]  ;;  %v20050_v12 = vld [vmem:[%s20025_s26 + $0x18] sm:$0xff]  ;;  %v20067_v15 = vld [vmem:[%s20025_s26 + $0x28] sm:$0xff]  ;;  %s20209_s29 = scalar_lea.vmem %s22967_s28, %s22973_s5 }
  0x17   : > { %18107 = vmatpush3.msra.mxu0 %v731_v3  ;;  %18128 = vmatprep.subr.mxu1 %v871_v4  ;;  %v20055_v13 = vld [vmem:[%s20025_s26 + $0x20] sm:$0xff]  ;;  %v20072_v16 = vld [vmem:[%s20025_s26 + $0x30] sm:$0xff]  ;;  %v987_v17 = vld [vmem:[%s22935_s7 + $0x8] sm:$0xff] }
  0x18   : > { %18108 = vmatprep.subr.mxu0 %v730_v5  ;;  %18129 = vmatpush3.msra.mxu1 %v871_v4  ;;  %v20084_v18 = vld [vmem:[%s20025_s26 + $0x38] sm:$0xff]  ;;  %v986_v19 = vld [vmem:[%s22935_s7] sm:$0xff] }
  0x19   : > { %18109 = vmatpush3.msra.mxu0 %v730_v5  ;;  %18130 = vmatprep.subr.mxu1 %v870_v6  ;;  %v20120_v23 = vld [vmem:[%s22934_s6] ss:$0 sm:$0xff] }
  0x1a   : > { %18110 = vmatprep.subr.mxu0 %v729_v7  ;;  %18131 = vmatpush3.msra.mxu1 %v870_v6  ;;  %v20125_v26 = vld [vmem:[%s22966_s30] ss:$0 sm:$0xff] }
  0x1b   : > { %18132 = vmatprep.mubr.msk.f32.mxu1 %vm740_vm0, %v20028_v8  ;;  %18111 = vmatpush3.msra.mxu0 %v729_v7  ;;  %v20157_v51 = vld [vmem:[%s22936_s8] ss:$0 sm:$0xff] }
  0x1c   : > { %18112 = vmatprep.mubr.msk.f32.mxu0 %vm740_vm0, %v20028_v8  ;;  %18133 = vmatmul.mubr.msk.f32.vlgmr.msra.gmra.mxu1 %vm740_vm0, %v20031_v9  ;;  %v20212_v4 = vld [vmem:[%s20209_s29] ss:$0 sm:$0xff] }
  0x1d   : > { %18113 = vmatmul.mubr.msk.f32.vlgmr.msra.gmra.mxu0 %vm740_vm0, %v20031_v9  ;;  %18135 = vmatprep.mubr.msk.f32.mxu1 %vm740_vm0, %v20036_v10 }
  0x1e   : > { %18115 = vmatprep.mubr.msk.f32.mxu0 %vm740_vm0, %v20036_v10  ;;  %18144 = vmatprep.subr.mxu0 %v989_v11 }
  0x1f   : > { %18145 = vmatpush3.msra.mxu0 %v989_v11  ;;  %18164 = vmatprep.subr.mxu1 %v19869_v20  ;;  %v20216_v11 = vld [vmem:[%s20209_s29 + $0x1] ss:$0 sm:$0xff] }
  0x20   : > { %18136 = vmatmul.mubr.msk.f32.gmra.mxu1 %vm740_vm0, %v20050_v12  ;;  %18146 = vmatprep.subr.mxu0 %v988_v14 }
  0x21   : > { %18116 = vmatmul.mubr.msk.f32.gmra.mxu0 %vm740_vm0, %v20050_v12  ;;  %18138 = vmatprep.mubr.msk.f32.mxu1 %vm740_vm0, %v20055_v13 }
  0x22   : > { %18118 = vmatprep.mubr.msk.f32.mxu0 %vm740_vm0, %v20055_v13  ;;  %18147 = vmatpush3.msra.mxu0 %v988_v14 }
  0x23   : > { %18148 = vmatprep.subr.mxu0 %v987_v17 }
  0x24   : > { %18139 = vmatmul.mubr.msk.f32.gmra.mxu1 %vm740_vm0, %v20067_v15  ;;  %18149 = vmatpush3.msra.mxu0 %v987_v17 }
  0x25   : > { %18119 = vmatmul.mubr.msk.f32.gmra.mxu0 %vm740_vm0, %v20067_v15  ;;  %18141 = vmatprep.mubr.msk.f32.mxu1 %vm740_vm0, %v20072_v16 }
  0x26   : > { %18121 = vmatprep.mubr.msk.f32.mxu0 %vm740_vm0, %v20072_v16  ;;  %18150 = vmatprep.subr.mxu0 %v986_v19 }
  0x27   : > { %18151 = vmatpush3.msra.mxu0 %v986_v19 }
  0x28   : > { %18142 = vmatmul.mubr.msk.f32.gmra.mxu1 %vm740_vm0, %v20084_v18  ;;  %18184 = vmatprep.subr.mxu0 %v19869_v20 }
  0x29   : > { %18122 = vmatmul.mubr.msk.f32.gmra.mxu0 %vm740_vm0, %v20084_v18  ;;  %18166 = vmatprep.mubr.msk.f32.mxu1 %vm19870_vm1, %v19869_v20 }
  0x2a   : > { %18152 = vmatprep.mubr.msk.f32.mxu0 %vm740_vm0, %v20028_v8 }
  0x2d   : > { %18153 = vmatmul.mubr.msk.f32.vlgmr.msra.gmra.mxu0 %vm740_vm0, %v20031_v9 }
  0x2e   : > { %18155 = vmatprep.mubr.msk.f32.mxu0 %vm740_vm0, %v20036_v10 }
  0x31   : > { %18156 = vmatmul.mubr.msk.f32.gmra.mxu0 %vm740_vm0, %v20050_v12 }
  0x32   : > { %18158 = vmatprep.mubr.msk.f32.mxu0 %vm740_vm0, %v20055_v13 }
  0x35   : > { %18159 = vmatmul.mubr.msk.f32.gmra.mxu0 %vm740_vm0, %v20067_v15 }
  0x36   : > { %18161 = vmatprep.mubr.msk.f32.mxu0 %vm740_vm0, %v20072_v16 }
  0x39   : > { %18162 = vmatmul.mubr.msk.f32.gmra.mxu0 %vm740_vm0, %v20084_v18 }
  0x3a   : > { %18186 = vmatprep.mubr.msk.f32.mxu0 %vm19870_vm1, %v19869_v20 }
  0xdc   : > { %v18134_v21 = vpop.f32.mrf.mxu1 }
  0xdd   : > { %v18114_v22 = vpop.f32.mrf.mxu0  ;;  %v953_v33 = vadd.f32 %v18134_v21, %v20120_v23 }
  0xde   : > { %v947_v24 = vpop.f32.mrf.mxu1  ;;  %v837_v36 = vadd.f32 %v18114_v22, %v20125_v26 }
  0xdf   : > { %v831_v25 = vpop.f32.mrf.mxu0  ;;  %v948_v27 = vadd.f32 %v20120_v23, %v947_v24  ;;  %v20226_v24 = vld [vmem:[%s20209_s29 + $0x2] ss:$0 sm:$0xff] }
  0xe0   : > { %v18137_v28 = vpop.f32.mrf.mxu1  ;;  %v832_v30 = vadd.f32 %v20125_v26, %v831_v25 }
  0xe1   : > { %v18117_v29 = vpop.f32.mrf.mxu0  ;;  %18165 = vmatpush3.xpose.msk.msra.mxu1 %vm1150_vm2, %v948_v27  ;;  %v963_v47 = vadd.f32 %v18137_v28, %v20120_v23 }
  0xe2   : > { %v957_v31 = vpop.f32.mrf.mxu1  ;;  %18169 = vmatprep.subr.mxu1 %v19869_v20  ;;  %v847_v52 = vadd.f32 %v18117_v29, %v20125_v26 }
  0xe3   : > { %v841_v32 = vpop.f32.mrf.mxu0  ;;  %v958_v39 = vadd.f32 %v20120_v23, %v957_v31 }
  0xe4   : > { %v18140_v34 = vpop.f32.mrf.mxu1  ;;  %18167 = vmatmul.mubr.msk.f32.vlgmr.msra.gmra.mxu1 %vm1150_vm2, %v832_v30  ;;  %v842_v44 = vadd.f32 %v20125_v26, %v841_v32  ;;  %v20232_v32 = vld [vmem:[%s20209_s29 + $0x6] ss:$0 sm:$0xff] }
  0xe5   : > { %v18120_v35 = vpop.f32.mrf.mxu0  ;;  %18170 = vmatpush3.xpose.msk.msra.mxu1 %vm1150_vm2, %v953_v33  ;;  %18171 = vmatprep.mubr.msk.f32.mxu1 %vm19870_vm1, %v19869_v20  ;;  %v973_v54 = vadd.f32 %v18140_v34, %v20120_v23  ;;  %v20235_v33 = vld [vmem:[%s20209_s29 + $0x3] ss:$0 sm:$0xff] }
  0xe6   : > { %v967_v37 = vpop.f32.mrf.mxu1  ;;  %18174 = vmatprep.subr.mxu1 %v19869_v20  ;;  %v857_v58 = vadd.f32 %v18120_v35, %v20125_v26 }
  0xe7   : > { %v851_v38 = vpop.f32.mrf.mxu0  ;;  %v968_v40 = vadd.f32 %v20120_v23, %v967_v37 }
  0xe8   : > { %v18143_v41 = vpop.f32.mrf.mxu1  ;;  %18172 = vmatmul.mubr.msk.f32.vlgmr.msra.gmra.mxu1 %vm1150_vm2, %v837_v36  ;;  %v852_v42 = vadd.f32 %v20125_v26, %v851_v38 }
  0xe9   : > { %v18123_v43 = vpop.f32.mrf.mxu0  ;;  %18175 = vmatpush3.xpose.msk.msra.mxu1 %vm1150_vm2, %v958_v39  ;;  %18185 = vmatpush3.xpose.msk.msra.mxu0 %vm1150_vm2, %v968_v40  ;;  %v983_v60 = vadd.f32 %v18143_v41, %v20120_v23  ;;  %v20242_v41 = vld [vmem:[%s20209_s29 + $0x5] ss:$0 sm:$0xff] }
  0xea   : > { %v977_v45 = vpop.f32.mrf.mxu1  ;;  %18176 = vmatprep.mubr.msk.f32.mxu1 %vm19870_vm1, %v19869_v20  ;;  %18179 = vmatprep.subr.mxu1 %v19869_v20  ;;  %v867_v0 = vadd.f32 %v18123_v43, %v20125_v26 }
  0xeb   : > { %v861_v46 = vpop.f32.mrf.mxu0  ;;  %v978_v48 = vadd.f32 %v20120_v23, %v977_v45  ;;  %18194 = vmatprep.subr.mxu0 %v19869_v20  ;;  %v20223_v23 = vld [vmem:[%s20209_s29 + $0x4] ss:$0 sm:$0xff] }
  0xec   : > { %18177 = vmatmul.mubr.msk.f32.vlgmr.msra.gmra.mxu1 %vm1150_vm2, %v842_v44  ;;  %18187 = vmatmul.mubr.msk.f32.vlgmr.msra.gmra.mxu0 %vm1150_vm2, %v852_v42  ;;  %v862_v49 = vadd.f32 %v20125_v26, %v861_v46 }
  0xed   : > { %v18154_v50 = vpop.f32.mrf.mxu0  ;;  %18180 = vmatpush3.xpose.msk.msra.mxu1 %vm1150_vm2, %v963_v47  ;;  %18195 = vmatpush3.xpose.msk.msra.mxu0 %vm1150_vm2, %v978_v48  ;;  %v20248_v48 = vld [vmem:[%s20209_s29 + $0x7] ss:$0 sm:$0xff] }
  0xee   : > { %18181 = vmatprep.mubr.msk.f32.mxu1 %vm19870_vm1, %v19869_v20  ;;  %18196 = vmatprep.mubr.msk.f32.mxu0 %vm19870_vm1, %v19869_v20  ;;  %v1069_v62 = vadd.f32 %v18154_v50, %v20157_v51 }
  0xef   : > { %v1063_v53 = vpop.f32.mrf.mxu0  ;;  %18189 = vmatprep.subr.mxu1 %v19869_v20  ;;  %18204 = vmatprep.subr.mxu0 %v19869_v20 }
  0xf0   : > { %v1064_v55 = vadd.f32 %v20157_v51, %v1063_v53  ;;  %18182 = vmatmul.mubr.msk.f32.vlgmr.msra.gmra.mxu1 %vm1150_vm2, %v847_v52  ;;  %18197 = vmatmul.mubr.msk.f32.vlgmr.msra.gmra.mxu0 %vm1150_vm2, %v862_v49 }
  0xf1   : > { %v18157_v56 = vpop.f32.mrf.mxu0  ;;  %18190 = vmatpush3.xpose.msk.msra.mxu1 %vm1150_vm2, %v973_v54  ;;  %18191 = vmatprep.mubr.msk.f32.mxu1 %vm19870_vm1, %v19869_v20 }
  0xf2   : > { %v20176_v57 = vadd.f32 %v18157_v56, %v20157_v51  ;;  %18199 = vmatprep.subr.mxu1 %v19869_v20  ;;  %18205 = vmatpush3.msra.mxu0 %v1064_v55 }
  0xf3   : > { %v20180_v59 = vpop.f32.mrf.mxu0  ;;  %18206 = vmatprep.mubr.msk.f32.mxu0 %vm19870_vm1, %v19869_v20  ;;  %18214 = vmatprep.subr.mxu0 %v19869_v20 }
  0xf4   : > { %18192 = vmatmul.mubr.msk.f32.vlgmr.msra.gmra.mxu1 %vm1150_vm2, %v857_v58 }
  0xf5   : > { %v18160_v61 = vpop.f32.mrf.mxu0  ;;  %18200 = vmatpush3.xpose.msk.msra.mxu1 %vm1150_vm2, %v983_v60  ;;  %18201 = vmatprep.mubr.msk.f32.mxu1 %vm19870_vm1, %v19869_v20 }
  0xf6   : > { %v20192_v63 = vadd.f32 %v18160_v61, %v20157_v51  ;;  %18209 = vmatprep.subr.mxu1 %v19869_v20 }
  0xf7   : > { %v20200_v1 = vpop.f32.mrf.mxu0 }
  0xf8   : > { %18202 = vmatmul.mubr.msk.f32.vlgmr.msra.gmra.mxu1 %vm1150_vm2, %v867_v0 }
  0xf9   : > { %18210 = vmatpush3.msra.mxu1 %v1069_v62  ;;  %18211 = vmatprep.mubr.msk.f32.mxu1 %vm19870_vm1, %v19869_v20  ;;  %v18163_v2 = vpop.f32.mrf.mxu0 }
  0xfa   : > { %18219 = vmatprep.subr.mxu1 %v19869_v20  ;;  %v20203_v3 = vadd.f32 %v18163_v2, %v20157_v51 }
  0xfb   : > { %v20219_v19 = vpop.f32.mrf.mxu0 }
 0x1a4   : > { %v1223_v5 = vpop.f32.mrf.mxu1 }
 0x1a5   : > { %v1224_v6 = vadd.f32 %v20212_v4, %v1223_v5 }
 0x1a6   : > { %v18168_v7 = vpop.f32.mrf.mxu1 }
 0x1a7   : > { %v1759_v14 = vsel %vm1150_vm2, %v1224_v6, -inf }
 0x1a8   : > { %1760 = vmax.xlane.f32.xlu0 %v1759_v14  ;;  %v1299_v17 = vpop.f32.mrf.mxu1 }
 0x1a9   : > { %v1300_v21 = vadd.f32 %v20216_v11, %v1299_v17 }
 0x1aa   : > { %v18173_v22 = vpop.f32.mrf.mxu1 }
 0x1ab   : > { %v1762_v25 = vsel %vm1150_vm2, %v1300_v21, -inf }
 0x1ac   : > { %v1527_v26 = vpop.f32.mrf.mxu0  ;;  %1763 = vmax.xlane.f32.xlu0 %v1762_v25  ;;  %v1375_v27 = vpop.f32.mrf.mxu1 }
 0x1ad   : > { %v1528_v28 = vadd.f32 %v20223_v23, %v1527_v26  ;;  %v1376_v29 = vadd.f32 %v20226_v24, %v1375_v27 }
 0x1ae   : > { %v18178_v30 = vpop.f32.mrf.mxu1  ;;  %v18188_v31 = vpop.f32.mrf.mxu0 }
 0x1af   : > { %v1771_v34 = vsel %vm1150_vm2, %v1528_v28, -inf  ;;  %v1765_v35 = vsel %vm1150_vm2, %v1376_v29, -inf }
 0x1b0   : > { %v1679_v36 = vpop.f32.mrf.mxu0  ;;  %1772 = vmax.xlane.f32.xlu0 %v1771_v34  ;;  %1766 = vmax.xlane.f32.xlu1 %v1765_v35  ;;  %v1451_v37 = vpop.f32.mrf.mxu1 }
 0x1b1   : > { %v1680_v38 = vadd.f32 %v20232_v32, %v1679_v36  ;;  %v1452_v39 = vadd.f32 %v20235_v33, %v1451_v37 }
 0x1b2   : > { %v18183_v40 = vpop.f32.mrf.mxu1  ;;  %v18198_v42 = vpop.f32.mrf.mxu0 }
 0x1b3   : > { %v1777_v43 = vsel %vm1150_vm2, %v1680_v38, -inf  ;;  %v1768_v44 = vsel %vm1150_vm2, %v1452_v39, -inf }
 0x1b4   : > { %1778 = vmax.xlane.f32.xlu0 %v1777_v43  ;;  %1769 = vmax.xlane.f32.xlu1 %v1768_v44  ;;  %v1603_v45 = vpop.f32.mrf.mxu1 }
 0x1b5   : > { %v1604_v46 = vadd.f32 %v20242_v41, %v1603_v45 }
 0x1b6   : > { %v18193_v47 = vpop.f32.mrf.mxu1 }
 0x1b7   : > { %v1774_v49 = vsel %vm1150_vm2, %v1604_v46, -inf }
 0x1b8   : > { %1775 = vmax.xlane.f32.xlu1 %v1774_v49  ;;  %v1755_v50 = vpop.f32.mrf.mxu1 }
 0x1b9   : > { %v1756_v52 = vadd.f32 %v20248_v48, %v1755_v50 }
 0x1ba   : > { %v18203_v53 = vpop.f32.mrf.mxu1 }
 0x1bb   : > { %v1780_v54 = vsel %vm1150_vm2, %v1756_v52, -inf }
 0x1bc   : > { %1781 = vmax.xlane.f32.xlu1 %v1780_v54 }
 0x231   : > { %v1761_v55 = vpop.xlane.xlu0 %1760 }
 0x232   : > { %v1783_v56 = vsub.f32 %v1224_v6, %v1761_v55 }
 0x234   : > { %v1791_v58 = vmul.f32 1.442695, %v1783_v56 }
 0x235   : > { %v1764_v60 = vpop.xlane.xlu0 %1763 }
 0x236   : > { %19456 = vpow2.f32 %v1791_v58  ;;  %v1784_v61 = vsub.f32 %v1300_v21, %v1764_v60 }
 0x238   : > { %v1793_v62 = vmul.f32 1.442695, %v1784_v61 }
 0x239   : > { %v1773_v0 = vpop.xlane.xlu0 %1772  ;;  %v1767_v2 = vpop.xlane.xlu1 %1766 }
 0x23a   : > { %19458 = vpow2.f32 %v1793_v62  ;;  %v1787_v5 = vsub.f32 %v1528_v28, %v1773_v0  ;;  %v1785_v7 = vsub.f32 %v1376_v29, %v1767_v2  ;;  %v1074_v2 = vadd.f32 %v20157_v51, %v20180_v59 }
 0x23c   : > { %v1795_v14 = vmul.f32 1.442695, %v1785_v7  ;;  %v1799_v17 = vmul.f32 1.442695, %v1787_v5 }
 0x23d   : > { %v1779_v22 = vpop.xlane.xlu0 %1778  ;;  %v1770_v25 = vpop.xlane.xlu1 %1769 }
 0x23e   : > { %v1789_v26 = vsub.f32 %v1680_v38, %v1779_v22  ;;  %v1786_v27 = vsub.f32 %v1452_v39, %v1770_v25  ;;  %19460 = vpow2.f32 %v1795_v14 }
 0x23f   : > { %19462 = vpow2.f32 %v1799_v17 }
 0x240   : > { %v1797_v30 = vmul.f32 1.442695, %v1786_v27  ;;  %v1803_v6 = vmul.f32 1.442695, %v1789_v26  ;;  %v1084_v26 = vadd.f32 %v20157_v51, %v20200_v1 }
 0x241   : > { %v1776_v31 = vpop.xlane.xlu1 %1775 }
 0x242   : > { %v1788_v34 = vsub.f32 %v1604_v46, %v1776_v31  ;;  %19464 = vpow2.f32 %v1797_v30 }
 0x243   : > { %v19457_v35 = vpop.eup %19456  ;;  %19466 = vpow2.f32 %v1803_v6  ;;  %v1094_v6 = vadd.f32 %v20157_v51, %v20219_v19 }
 0x244   : > { %v1801_v21 = vmul.f32 1.442695, %v1788_v34  ;;  %v1807_v36 = vsel %vm1150_vm2, %v19457_v35, 0.0 }
 0x245   : > { %1808 = vadd.xlane.f32.xlu0 %v1807_v36  ;;  %v1782_v28 = vpop.xlane.xlu1 %1781  ;;  %v16851_v36 = vld [vmem:[%s22963_s3 + $0x38] sm:$0xff] }
 0x246   : > { %19468 = vpow2.f32 %v1801_v21  ;;  %v1790_v29 = vsub.f32 %v1756_v52, %v1782_v28  ;;  %v2431_v21 = vld [vmem:[%s22937_s9] sm:$0xff]  ;;  %v16836_v28 = vld [vmem:[%s22964_s0 + $0x30] sm:$0xff] }
 0x247   : > { %v19459_v37 = vpop.eup %19458 }
 0x248   : > { %v1805_v40 = vmul.f32 1.442695, %v1790_v29  ;;  %v1810_v38 = vsel %vm1150_vm2, %v19459_v37, 0.0  ;;  %v16835_v29 = vld [vmem:[%s22964_s0 + $0x28] sm:$0xff] }
 0x249   : > { %1811 = vadd.xlane.f32.xlu1 %v1810_v38 }
 0x24a   : > { %19470 = vpow2.f32 %v1805_v40 }
 0x24b   : > { %v19461_v39 = vpop.eup %19460 }
 0x24c   : > { %v1813_v42 = vsel %vm1150_vm2, %v19461_v39, 0.0  ;;  %v19463_v43 = vpop.eup %19462 }
 0x24d   : > { %1814 = vadd.xlane.f32.xlu0 %v1813_v42  ;;  %v1819_v45 = vsel %vm1150_vm2, %v19463_v43, 0.0  ;;  %v16850_v42 = vld [vmem:[%s22963_s3 + $0x30] sm:$0xff] }
 0x24f   : > { %v19465_v44 = vpop.eup %19464 }
 0x250   : > { %v1816_v46 = vsel %vm1150_vm2, %v19465_v44, 0.0  ;;  %v19467_v47 = vpop.eup %19466 }
 0x251   : > { %1820 = vadd.xlane.f32.xlu0 %v1819_v45  ;;  %1817 = vadd.xlane.f32.xlu1 %v1816_v46  ;;  %v1825_v52 = vsel %vm1150_vm2, %v19467_v47, 0.0  ;;  %v16848_v45 = vld [vmem:[%s22963_s3 + $0x20] sm:$0xff] }
 0x253   : > { %v19469_v49 = vpop.eup %19468 }
 0x254   : > { %v1822_v50 = vsel %vm1150_vm2, %v19469_v49, 0.0 }
 0x255   : > { %1826 = vadd.xlane.f32.xlu0 %v1825_v52  ;;  %1823 = vadd.xlane.f32.xlu1 %v1822_v50 }
 0x257   : > { %v19471_v53 = vpop.eup %19470 }
 0x258   : > { %v1828_v54 = vsel %vm1150_vm2, %v19471_v53, 0.0 }
 0x259   : > { %1829 = vadd.xlane.f32.xlu1 %v1828_v54 }
 0x2ce   : > { %v1809_v55 = vpop.xlane.xlu0 %1808 }
 0x2cf   : > { %19472 = vrcp.f32 %v1809_v55 }
 0x2d2   : > { %v1812_v56 = vpop.xlane.xlu1 %1811 }
 0x2d3   : > { %19474 = vrcp.f32 %v1812_v56 }
 0x2d6   : > { %v1815_v58 = vpop.xlane.xlu0 %1814 }
 0x2d7   : > { %19476 = vrcp.f32 %v1815_v58 }
 0x2da   : > { %v1821_v60 = vpop.xlane.xlu0 %1820  ;;  %v1818_v61 = vpop.xlane.xlu1 %1817 }
 0x2db   : > { %19478 = vrcp.f32 %v1821_v60 }
 0x2dc   : > { %v19473_v62 = vpop.eup %19472  ;;  %19480 = vrcp.f32 %v1818_v61 }
 0x2dd   : > { %v1832_v0 = vmul.f32 %v19473_v62, %v19457_v35  ;;  %v16864_v62 = vld [vmem:[%s22935_s7 + $0x30] sm:$0xff] }
 0x2de   : > { %v1827_v5 = vpop.xlane.xlu0 %1826  ;;  %v1824_v7 = vpop.xlane.xlu1 %1823 }
 0x2df   : > { %18207 = vmatmul.mubr.msk.f32.vlgmr.msra.gmra.mxu0 %vm1150_vm2, %v1832_v0  ;;  %19482 = vrcp.f32 %v1827_v5  ;;  %v16863_v0 = vld [vmem:[%s22935_s7 + $0x28] sm:$0xff] }
 0x2e0   : > { %v19475_v14 = vpop.eup %19474  ;;  %18215 = vmatpush3.msra.mxu0 %v1074_v2  ;;  %18216 = vmatprep.mubr.msk.f32.mxu0 %vm19870_vm1, %v19869_v20  ;;  %19484 = vrcp.f32 %v1824_v7  ;;  %v16862_v2 = vld [vmem:[%s22935_s7 + $0x20] sm:$0xff] }
 0x2e1   : > { %v1834_v17 = vmul.f32 %v19475_v14, %v19459_v37  ;;  %18224 = vmatprep.subr.mxu0 %v19869_v20  ;;  %v16834_v37 = vld [vmem:[%s22964_s0 + $0x20] sm:$0xff] }
 0x2e2   : > { %v1830_v22 = vpop.xlane.xlu1 %1829 }
 0x2e3   : > { %18212 = vmatmul.mubr.msk.f32.vlgmr.msra.gmra.mxu1 %vm1150_vm2, %v1834_v17  ;;  %19486 = vrcp.f32 %v1830_v22 }
 0x2e4   : > { %18220 = vmatpush3.msra.mxu1 %v20176_v57  ;;  %18221 = vmatprep.mubr.msk.f32.mxu1 %vm19870_vm1, %v19869_v20  ;;  %v19477_v59 = vpop.eup %19476 }
 0x2e5   : > { %18229 = vmatprep.subr.mxu1 %v19869_v20  ;;  %v1836_v25 = vmul.f32 %v19477_v59, %v19461_v39 }
 0x2e7   : > { %18217 = vmatmul.mubr.msk.f32.vlgmr.msra.gmra.mxu0 %vm1150_vm2, %v1836_v25 }
 0x2e8   : > { %v19479_v27 = vpop.eup %19478  ;;  %18225 = vmatpush3.msra.mxu0 %v1084_v26  ;;  %18226 = vmatprep.mubr.msk.f32.mxu0 %vm19870_vm1, %v19869_v20  ;;  %v16853_v26 = vld [vmem:[%s22934_s6 + $0x1] ss:$0 sm:$0xff] }
 0x2e9   : > { %v19481_v30 = vpop.eup %19480  ;;  %18234 = vmatprep.subr.mxu0 %v19869_v20  ;;  %v1840_v57 = vmul.f32 %v19479_v27, %v19463_v43 }
 0x2ea   : > { %v1838_v31 = vmul.f32 %v19481_v30, %v19465_v44  ;;  %v16849_v44 = vld [vmem:[%s22963_s3 + $0x28] sm:$0xff]  ;;  %v16839_v30 = vld [vmem:[%s22966_s30 + $0x1] ss:$0 sm:$0xff] }
 0x2eb   : > { %18227 = vmatmul.mubr.msk.f32.vlgmr.msra.gmra.mxu0 %vm1150_vm2, %v1840_v57 }
 0x2ec   : > { %v19483_v34 = vpop.eup %19482  ;;  %18222 = vmatmul.mubr.msk.f32.vlgmr.msra.gmra.mxu1 %vm1150_vm2, %v1838_v31  ;;  %18235 = vmatpush3.msra.mxu0 %v1094_v6 }
 0x2ed   : > { %v19485_v1 = vpop.eup %19484  ;;  %18230 = vmatpush3.msra.mxu1 %v20192_v63  ;;  %18231 = vmatprep.mubr.msk.f32.mxu1 %vm19870_vm1, %v19869_v20  ;;  %v1844_v35 = vmul.f32 %v19483_v34, %v19467_v47 }
 0x2ee   : > { %18236 = vmatprep.mubr.msk.f32.mxu0 %vm19870_vm1, %v19869_v20  ;;  %18239 = vmatprep.subr.mxu1 %v19869_v20  ;;  %v1842_v51 = vmul.f32 %v19485_v1, %v19469_v49 }
 0x2ef   : > { %18237 = vmatmul.mubr.msk.f32.vlgmr.msra.gmra.mxu0 %vm1150_vm2, %v1844_v35  ;;  %18244 = vmatprep.subr.mxu0 %v2431_v21 }
 0x2f0   : > { %v19487_v19 = vpop.eup %19486  ;;  %18232 = vmatmul.mubr.msk.f32.vlgmr.msra.gmra.mxu1 %vm1150_vm2, %v1842_v51  ;;  %18245 = vmatpush3.msra.mxu0 %v2431_v21 }
 0x2f1   : > { %18240 = vmatpush3.msra.mxu1 %v20203_v3  ;;  %18241 = vmatprep.mubr.msk.f32.mxu1 %vm19870_vm1, %v19869_v20  ;;  %v1846_v63 = vmul.f32 %v19487_v19, %v19471_v53  ;;  %v16837_v3 = vld [vmem:[%s22964_s0 + $0x38] sm:$0xff] }
 0x2f2   : > { %18278 = vmatprep.subr.mxu0 %v16851_v36  ;;  %18258 = vmatprep.subr.mxu1 %v16837_v3 }
 0x2f4   : > { %18242 = vmatmul.mubr.msk.f32.vlgmr.msra.gmra.mxu1 %vm1150_vm2, %v1846_v63 }
 0x2f5   : > { %18266 = vmatprep.mubr.msk.f32.mxu1 %vm740_vm0, %v20028_v8  ;;  %18259 = vmatpush3.msra.mxu1 %v16837_v3 }
 0x2f6   : > { %18260 = vmatprep.subr.mxu1 %v16836_v28 }
 0x2f7   : > { %18261 = vmatpush3.msra.mxu1 %v16836_v28 }
 0x2f8   : > { %18262 = vmatprep.subr.mxu1 %v16835_v29 }
 0x2f9   : > { %18263 = vmatpush3.msra.mxu1 %v16835_v29 }
 0x2fa   : > { %18264 = vmatprep.subr.mxu1 %v16834_v37 }
 0x2fb   : > { %18265 = vmatpush3.msra.mxu1 %v16834_v37 }
 0x2fc   : > { %18267 = vmatmul.mubr.msk.f32.vlgmr.msra.gmra.mxu1 %vm740_vm0, %v20031_v9 }
 0x2fd   : > { %18269 = vmatprep.mubr.msk.f32.mxu1 %vm740_vm0, %v20036_v10 }
 0x300   : > { %18270 = vmatmul.mubr.msk.f32.gmra.mxu1 %vm740_vm0, %v20050_v12 }
 0x301   : > { %18272 = vmatprep.mubr.msk.f32.mxu1 %vm740_vm0, %v20055_v13 }
 0x304   : > { %18273 = vmatmul.mubr.msk.f32.gmra.mxu1 %vm740_vm0, %v20067_v15 }
 0x305   : > { %18275 = vmatprep.mubr.msk.f32.mxu1 %vm740_vm0, %v20072_v16 }
 0x308   : > { %18276 = vmatmul.mubr.msk.f32.gmra.mxu1 %vm740_vm0, %v20084_v18 }
 0x309   : > { %18306 = vmatprep.mubr.msk.f32.mxu1 %vm740_vm0, %v20028_v8 }
 0x39f   : > { %v1916_v40 = vpop.f32.mrf.mxu0 }
 0x3a0   : > { %18246 = vmatprep.mubr.msk.f32.mxu0 %vm1150_vm2, %v1916_v40 }
 0x3a1   : > { %v18208_v38 = vpop.f32.mrf.mxu0 }
 0x3a3   : > { %v1989_v39 = vpop.f32.mrf.mxu1 }
 0x3a4   : > { %18247 = vmatmul.mubr.msk.f32.vlgmr.msra.gmra.mxu0 %vm1150_vm2, %v1989_v39 }
 0x3a5   : > { %v18213_v43 = vpop.f32.mrf.mxu1  ;;  %18279 = vmatpush3.msra.mxu0 %v16851_v36 }
 0x3a6   : > { %18280 = vmatprep.subr.mxu0 %v16850_v42 }
 0x3a7   : > { %18281 = vmatpush3.msra.mxu0 %v16850_v42  ;;  %v2062_v46 = vpop.f32.mrf.mxu0 }
 0x3a8   : > { %18282 = vmatprep.subr.mxu0 %v16849_v44  ;;  %18249 = vmatprep.mubr.msk.f32.mxu0 %vm1150_vm2, %v2062_v46 }
 0x3a9   : > { %18283 = vmatpush3.msra.mxu0 %v16849_v44  ;;  %v18218_v47 = vpop.f32.mrf.mxu0 }
 0x3aa   : > { %18284 = vmatprep.subr.mxu0 %v16848_v45 }
 0x3ab   : > { %18285 = vmatpush3.msra.mxu0 %v16848_v45  ;;  %v2208_v49 = vpop.f32.mrf.mxu0 }
 0x3ac   : > { %18318 = vmatprep.subr.mxu0 %v19869_v20  ;;  %v2135_v50 = vpop.f32.mrf.mxu1 }
 0x3ad   : > { %18250 = vmatmul.mubr.msk.f32.gmra.mxu0 %vm1150_vm2, %v2135_v50  ;;  %v18228_v52 = vpop.f32.mrf.mxu0  ;;  %v20460_v50 = vld [vmem:[%s22936_s8 + $0x1] ss:$0 sm:$0xff] }
 0x3ae   : > { %v18223_v53 = vpop.f32.mrf.mxu1  ;;  %18252 = vmatprep.mubr.msk.f32.mxu0 %vm1150_vm2, %v2208_v49 }
 0x3af   : > { %v2354_v54 = vpop.f32.mrf.mxu0 }
 0x3b0   : > { %v2281_v55 = vpop.f32.mrf.mxu1 }
 0x3b1   : > { %18253 = vmatmul.mubr.msk.f32.gmra.mxu0 %vm1150_vm2, %v2281_v55  ;;  %v18238_v56 = vpop.f32.mrf.mxu0 }
 0x3b2   : > { %v18233_v58 = vpop.f32.mrf.mxu1  ;;  %18255 = vmatprep.mubr.msk.f32.mxu0 %vm1150_vm2, %v2354_v54 }
 0x3b4   : > { %v2427_v60 = vpop.f32.mrf.mxu1 }
 0x3b5   : > { %18256 = vmatmul.mubr.msk.f32.gmra.mxu0 %vm1150_vm2, %v2427_v60 }
 0x3b6   : > { %v18243_v61 = vpop.f32.mrf.mxu1  ;;  %18286 = vmatprep.mubr.msk.f32.mxu0 %vm740_vm0, %v20028_v8  ;;  %v16865_v8 = vld [vmem:[%s22935_s7 + $0x38] sm:$0xff] }
 0x3b7   : > { %18298 = vmatprep.subr.mxu1 %v16865_v8 }
 0x3b8   : > { %18299 = vmatpush3.msra.mxu1 %v16865_v8 }
 0x3b9   : > { %18287 = vmatmul.mubr.msk.f32.vlgmr.msra.gmra.mxu0 %vm740_vm0, %v20031_v9  ;;  %18300 = vmatprep.subr.mxu1 %v16864_v62 }
 0x3ba   : > { %18289 = vmatprep.mubr.msk.f32.mxu0 %vm740_vm0, %v20036_v10  ;;  %18301 = vmatpush3.msra.mxu1 %v16864_v62 }
 0x3bb   : > { %18302 = vmatprep.subr.mxu1 %v16863_v0 }
 0x3bc   : > { %18303 = vmatpush3.msra.mxu1 %v16863_v0 }
 0x3bd   : > { %18290 = vmatmul.mubr.msk.f32.gmra.mxu0 %vm740_vm0, %v20050_v12  ;;  %18304 = vmatprep.subr.mxu1 %v16862_v2 }
 0x3be   : > { %18292 = vmatprep.mubr.msk.f32.mxu0 %vm740_vm0, %v20055_v13  ;;  %18305 = vmatpush3.msra.mxu1 %v16862_v2 }
 0x3bf   : > { %18307 = vmatmul.mubr.msk.f32.vlgmr.msra.gmra.mxu1 %vm740_vm0, %v20031_v9  ;;  %18328 = vmatprep.subr.mxu1 %v19869_v20 }
 0x3c0   : > { %18309 = vmatprep.mubr.msk.f32.mxu1 %vm740_vm0, %v20036_v10 }
 0x3c1   : > { %18293 = vmatmul.mubr.msk.f32.gmra.mxu0 %vm740_vm0, %v20067_v15 }
 0x3c2   : > { %18295 = vmatprep.mubr.msk.f32.mxu0 %vm740_vm0, %v20072_v16 }
 0x3c3   : > { %18310 = vmatmul.mubr.msk.f32.gmra.mxu1 %vm740_vm0, %v20050_v12  ;;  %v18268_v12 = vpop.f32.mrf.mxu1 }
 0x3c4   : > { %18312 = vmatprep.mubr.msk.f32.mxu1 %vm740_vm0, %v20055_v13  ;;  %v2654_v36 = vadd.f32 %v18268_v12, %v16839_v30 }
 0x3c5   : > { %18296 = vmatmul.mubr.msk.f32.gmra.mxu0 %vm740_vm0, %v20084_v18  ;;  %v2648_v7 = vpop.f32.mrf.mxu1 }
 0x3c6   : > { %18320 = vmatprep.mubr.msk.f32.mxu0 %vm19870_vm1, %v19869_v20  ;;  %v2649_v34 = vadd.f32 %v16839_v30, %v2648_v7 }
 0x3c7   : > { %18313 = vmatmul.mubr.msk.f32.gmra.mxu1 %vm740_vm0, %v20067_v15  ;;  %v18271_v14 = vpop.f32.mrf.mxu1 }
 0x3c8   : > { %18315 = vmatprep.mubr.msk.f32.mxu1 %vm740_vm0, %v20072_v16  ;;  %v2664_v39 = vadd.f32 %v18271_v14, %v16839_v30 }
 0x3cb   : > { %18316 = vmatmul.mubr.msk.f32.gmra.mxu1 %vm740_vm0, %v20084_v18  ;;  %v2658_v18 = vpop.f32.mrf.mxu1 }
 0x3cc   : > { %18330 = vmatprep.mubr.msk.f32.mxu1 %vm19870_vm1, %v19869_v20  ;;  %v2659_v63 = vadd.f32 %v16839_v30, %v2658_v18 }
 0x3cd   : > { %v18274_v25 = vpop.f32.mrf.mxu1 }
 0x3ce   : > { %v2674_v46 = vadd.f32 %v18274_v25, %v16839_v30 }
 0x3cf   : > { %v2668_v31 = vpop.f32.mrf.mxu1 }
 0x3d0   : > { %v2669_v40 = vadd.f32 %v16839_v30, %v2668_v31 }
 0x3d1   : > { %v18277_v21 = vpop.f32.mrf.mxu1 }
 0x3d2   : > { %v2684_v49 = vadd.f32 %v18277_v21, %v16839_v30 }
 0x3d3   : > { %v2678_v38 = vpop.f32.mrf.mxu1 }
 0x3d4   : > { %v2679_v45 = vadd.f32 %v16839_v30, %v2678_v38 }
 0x464   : > { %v20395_v9 = vpop.f32.mrf.mxu0 }
 0x466   : > { %v20397_v10 = vpop.f32.mrf.mxu0 }
 0x46d   : > { %v20399_v5 = vpop.f32.mrf.mxu0 }
 0x46f   : > { %v20401_v13 = vpop.f32.mrf.mxu0 }
 0x471   : > { %v20403_v15 = vpop.f32.mrf.mxu0 }
 0x473   : > { %v20405_v16 = vpop.f32.mrf.mxu0 }
 0x475   : > { %v20407_v17 = vpop.f32.mrf.mxu0 }
 0x477   : > { %v20409_v22 = vpop.f32.mrf.mxu0 }
 0x479   : > { %v18288_v59 = vpop.f32.mrf.mxu0 }
 0x47a   : > { %v2772_v35 = vadd.f32 %v18288_v59, %v16853_v26 }
 0x47b   : > { %v2766_v27 = vpop.f32.mrf.mxu0 }
 0x47c   : > { %v2767_v57 = vadd.f32 %v16853_v26, %v2766_v27 }
 0x47d   : > { %v18291_v6 = vpop.f32.mrf.mxu0 }
 0x47e   : > { %18319 = vmatpush3.xpose.msk.msra.mxu0 %vm1150_vm2, %v2767_v57  ;;  %v2782_v28 = vadd.f32 %v18291_v6, %v16853_v26 }
 0x47f   : > { %v2776_v1 = vpop.f32.mrf.mxu0  ;;  %18323 = vmatprep.subr.mxu0 %v19869_v20  ;;  %v18308_v52 = vpop.f32.mrf.mxu1 }
 0x480   : > { %v2777_v51 = vadd.f32 %v16853_v26, %v2776_v1  ;;  %v2890_v53 = vadd.f32 %v18308_v52, %v20460_v50 }
 0x481   : > { %v18294_v19 = vpop.f32.mrf.mxu0  ;;  %18321 = vmatmul.mubr.msk.f32.vlgmr.msra.gmra.mxu0 %vm1150_vm2, %v2649_v34  ;;  %v2884_v54 = vpop.f32.mrf.mxu1 }
 0x482   : > { %18324 = vmatpush3.xpose.msk.msra.mxu0 %vm1150_vm2, %v2772_v35  ;;  %18329 = vmatpush3.xpose.msk.msra.mxu1 %vm1150_vm2, %v2777_v51  ;;  %v2792_v43 = vadd.f32 %v18294_v19, %v16853_v26  ;;  %v2885_v55 = vadd.f32 %v20460_v50, %v2884_v54 }
 0x483   : > { %v2786_v3 = vpop.f32.mrf.mxu0  ;;  %18325 = vmatprep.mubr.msk.f32.mxu0 %vm19870_vm1, %v19869_v20  ;;  %18333 = vmatprep.subr.mxu0 %v19869_v20  ;;  %v18311_v56 = vpop.f32.mrf.mxu1 }
 0x484   : > { %v2787_v29 = vadd.f32 %v16853_v26, %v2786_v3  ;;  %18338 = vmatprep.subr.mxu1 %v19869_v20  ;;  %v20466_v58 = vadd.f32 %v18311_v56, %v20460_v50 }
 0x485   : > { %v18297_v37 = vpop.f32.mrf.mxu0  ;;  %18326 = vmatmul.mubr.msk.f32.vlgmr.msra.gmra.mxu0 %vm1150_vm2, %v2654_v36  ;;  %18331 = vmatmul.mubr.msk.f32.vlgmr.msra.gmra.mxu1 %vm1150_vm2, %v2659_v63  ;;  %v20468_v60 = vpop.f32.mrf.mxu1 }
 0x486   : > { %18334 = vmatpush3.xpose.msk.msra.mxu0 %vm1150_vm2, %v2782_v28  ;;  %18339 = vmatpush3.xpose.msk.msra.mxu1 %vm1150_vm2, %v2787_v29  ;;  %v2802_v47 = vadd.f32 %v18297_v37, %v16853_v26 }
 0x487   : > { %v2796_v42 = vpop.f32.mrf.mxu0  ;;  %18335 = vmatprep.mubr.msk.f32.mxu0 %vm19870_vm1, %v19869_v20  ;;  %18340 = vmatprep.mubr.msk.f32.mxu1 %vm19870_vm1, %v19869_v20  ;;  %v18314_v61 = vpop.f32.mrf.mxu1 }
 0x488   : > { %v2797_v44 = vadd.f32 %v16853_v26, %v2796_v42  ;;  %18343 = vmatprep.subr.mxu0 %v19869_v20  ;;  %18348 = vmatprep.subr.mxu1 %v19869_v20  ;;  %v20472_v8 = vadd.f32 %v18314_v61, %v20460_v50 }
 0x489   : > { %18336 = vmatmul.mubr.msk.f32.vlgmr.msra.gmra.mxu0 %vm1150_vm2, %v2664_v39  ;;  %18341 = vmatmul.mubr.msk.f32.vlgmr.msra.gmra.mxu1 %vm1150_vm2, %v2669_v40  ;;  %v20474_v62 = vpop.f32.mrf.mxu1 }
 0x48a   : > { %18344 = vmatpush3.xpose.msk.msra.mxu0 %vm1150_vm2, %v2792_v43  ;;  %18349 = vmatpush3.xpose.msk.msra.mxu1 %vm1150_vm2, %v2797_v44 }
 0x48b   : > { %18345 = vmatprep.mubr.msk.f32.mxu0 %vm19870_vm1, %v19869_v20  ;;  %18350 = vmatprep.mubr.msk.f32.mxu1 %vm19870_vm1, %v19869_v20  ;;  %v18317_v0 = vpop.f32.mrf.mxu1 }
 0x48c   : > { %18353 = vmatprep.subr.mxu0 %v19869_v20  ;;  %18358 = vmatprep.subr.mxu1 %v19869_v20  ;;  %v20477_v2 = vadd.f32 %v18317_v0, %v20460_v50 }
 0x48d   : > { %18346 = vmatmul.mubr.msk.f32.vlgmr.msra.gmra.mxu0 %vm1150_vm2, %v2674_v46  ;;  %18351 = vmatmul.mubr.msk.f32.vlgmr.msra.gmra.mxu1 %vm1150_vm2, %v2679_v45  ;;  %v20479_v7 = vpop.f32.mrf.mxu1 }
 0x48e   : > { %18354 = vmatpush3.xpose.msk.msra.mxu0 %vm1150_vm2, %v2802_v47  ;;  %18355 = vmatprep.mubr.msk.f32.mxu0 %vm19870_vm1, %v19869_v20 }
 0x48f   : > { %18363 = vmatprep.subr.mxu0 %v19869_v20  ;;  %18360 = vmatprep.mubr.msk.f32.mxu1 %vm19870_vm1, %v19869_v20 }
 0x490   : > { %18359 = vmatpush3.msra.mxu1 %v2885_v55 }
 0x491   : > { %18356 = vmatmul.mubr.msk.f32.vlgmr.msra.gmra.mxu0 %vm1150_vm2, %v2684_v49  ;;  %18368 = vmatprep.subr.mxu1 %v19869_v20 }
 0x492   : > { %18365 = vmatprep.mubr.msk.f32.mxu0 %vm19870_vm1, %v19869_v20  ;;  %18364 = vmatpush3.msra.mxu0 %v2890_v53 }
 0x493   : > { %18373 = vmatprep.subr.mxu0 %v19869_v20 }
 0x541   : > { %v2995_v12 = vpop.f32.mrf.mxu0 }
 0x542   : > { %v2996_v14 = vadd.f32 %v20212_v4, %v2995_v12 }
 0x543   : > { %v18322_v18 = vpop.f32.mrf.mxu0 }
 0x544   : > { %v3531_v59 = vsel %vm1150_vm2, %v2996_v14, -inf }
 0x545   : > { %v3147_v25 = vpop.f32.mrf.mxu1  ;;  %3532 = vmax.xlane.f32.xlu0 %v3531_v59  ;;  %v3071_v26 = vpop.f32.mrf.mxu0 }
 0x546   : > { %v3148_v27 = vadd.f32 %v20226_v24, %v3147_v25  ;;  %v3072_v30 = vadd.f32 %v20216_v11, %v3071_v26 }
 0x547   : > { %v18327_v57 = vpop.f32.mrf.mxu0  ;;  %v18332_v6 = vpop.f32.mrf.mxu1 }
 0x548   : > { %v3537_v31 = vsel %vm1150_vm2, %v3148_v27, -inf  ;;  %v3534_v34 = vsel %vm1150_vm2, %v3072_v30, -inf }
 0x549   : > { %v3299_v1 = vpop.f32.mrf.mxu1  ;;  %3538 = vmax.xlane.f32.xlu0 %v3537_v31  ;;  %3535 = vmax.xlane.f32.xlu1 %v3534_v34  ;;  %v3223_v4 = vpop.f32.mrf.mxu0 }
 0x54a   : > { %v3300_v35 = vadd.f32 %v20223_v23, %v3299_v1  ;;  %v3224_v51 = vadd.f32 %v20235_v33, %v3223_v4 }
 0x54b   : > { %v18337_v19 = vpop.f32.mrf.mxu0  ;;  %v18342_v63 = vpop.f32.mrf.mxu1 }
 0x54c   : > { %v3543_v24 = vsel %vm1150_vm2, %v3300_v35, -inf  ;;  %v3540_v11 = vsel %vm1150_vm2, %v3224_v51, -inf }
 0x54d   : > { %v3451_v21 = vpop.f32.mrf.mxu1  ;;  %3544 = vmax.xlane.f32.xlu0 %v3543_v24  ;;  %3541 = vmax.xlane.f32.xlu1 %v3540_v11  ;;  %v3375_v36 = vpop.f32.mrf.mxu0 }
 0x54e   : > { %v3452_v3 = vadd.f32 %v20232_v32, %v3451_v21  ;;  %v3376_v28 = vadd.f32 %v20242_v41, %v3375_v36 }
 0x54f   : > { %v18347_v29 = vpop.f32.mrf.mxu0  ;;  %v18352_v37 = vpop.f32.mrf.mxu1 }
 0x550   : > { %v3549_v23 = vsel %vm1150_vm2, %v3452_v3, -inf  ;;  %v3546_v33 = vsel %vm1150_vm2, %v3376_v28, -inf }
 0x551   : > { %3550 = vmax.xlane.f32.xlu0 %v3549_v23  ;;  %3547 = vmax.xlane.f32.xlu1 %v3546_v33  ;;  %v3527_v40 = vpop.f32.mrf.mxu0 }
 0x552   : > { %v3528_v38 = vadd.f32 %v20248_v48, %v3527_v40 }
 0x553   : > { %v18357_v39 = vpop.f32.mrf.mxu0 }
 0x554   : > { %v3552_v42 = vsel %vm1150_vm2, %v3528_v38, -inf }
 0x555   : > { %3553 = vmax.xlane.f32.xlu1 %v3552_v42 }
 0x5ce   : > { %v3533_v43 = vpop.xlane.xlu0 %3532 }
 0x5cf   : > { %v3555_v44 = vsub.f32 %v2996_v14, %v3533_v43 }
 0x5d1   : > { %v3563_v32 = vmul.f32 1.442695, %v3555_v44  ;;  %v2895_v44 = vadd.f32 %v20460_v50, %v20468_v60 }
 0x5d2   : > { %v3539_v45 = vpop.xlane.xlu0 %3538  ;;  %v3536_v41 = vpop.xlane.xlu1 %3535 }
 0x5d3   : > { %19488 = vpow2.f32 %v3563_v32  ;;  %v3557_v46 = vsub.f32 %v3148_v27, %v3539_v45  ;;  %v3556_v47 = vsub.f32 %v3072_v30, %v3536_v41 }
 0x5d5   : > { %v3567_v49 = vmul.f32 1.442695, %v3557_v46  ;;  %v3565_v52 = vmul.f32 1.442695, %v3556_v47  ;;  %v2905_v47 = vadd.f32 %v20460_v50, %v20474_v62 }
 0x5d6   : > { %v3545_v53 = vpop.xlane.xlu0 %3544  ;;  %v3542_v54 = vpop.xlane.xlu1 %3541 }
 0x5d7   : > { %19490 = vpow2.f32 %v3567_v49  ;;  %v3559_v55 = vsub.f32 %v3300_v35, %v3545_v53  ;;  %v3558_v56 = vsub.f32 %v3224_v51, %v3542_v54  ;;  %v2915_v54 = vadd.f32 %v20460_v50, %v20479_v7 }
 0x5d8   : > { %19492 = vpow2.f32 %v3565_v52 }
 0x5d9   : > { %v3571_v48 = vmul.f32 1.442695, %v3559_v55  ;;  %v3569_v61 = vmul.f32 1.442695, %v3558_v56 }
 0x5da   : > { %v3551_v0 = vpop.xlane.xlu0 %3550  ;;  %v3548_v12 = vpop.xlane.xlu1 %3547 }
 0x5db   : > { %19494 = vpow2.f32 %v3571_v48  ;;  %v3561_v14 = vsub.f32 %v3452_v3, %v3551_v0  ;;  %v3560_v18 = vsub.f32 %v3376_v28, %v3548_v12  ;;  %v20539_v48 = vld [vmem:[%s20025_s26] sm:$0xff]  ;;  %v16912_v0 = vld [vmem:[%s22964_s0 + $0x58] sm:$0xff]  ;;  %v16911_v12 = vld [vmem:[%s22964_s0 + $0x50] sm:$0xff] }
 0x5dc   : > { %19496 = vpow2.f32 %v3569_v61  ;;  %v16900_v61 = vld [vmem:[%s22937_s9 + $0x8] sm:$0xff] }
 0x5dd   : > { %v3575_v59 = vmul.f32 1.442695, %v3561_v14  ;;  %v3573_v25 = vmul.f32 1.442695, %v3560_v18  ;;  %v16910_v14 = vld [vmem:[%s22964_s0 + $0x48] sm:$0xff]  ;;  %v16909_v18 = vld [vmem:[%s22964_s0 + $0x40] sm:$0xff] }
 0x5de   : > { %v3554_v26 = vpop.xlane.xlu1 %3553 }
 0x5df   : > { %19498 = vpow2.f32 %v3575_v59  ;;  %v3562_v27 = vsub.f32 %v3528_v38, %v3554_v26  ;;  %v20562_v59 = vld [vmem:[%s20025_s26 + $0x8] sm:$0xff]  ;;  %v20572_v26 = vld [vmem:[%s20025_s26 + $0x18] sm:$0xff] }
 0x5e0   : > { %v19489_v30 = vpop.eup %19488  ;;  %19500 = vpow2.f32 %v3573_v25  ;;  %v20567_v25 = vld [vmem:[%s20025_s26 + $0x10] sm:$0xff] }
 0x5e1   : > { %v3577_v57 = vmul.f32 1.442695, %v3562_v27  ;;  %v3579_v6 = vsel %vm1150_vm2, %v19489_v30, 0.0  ;;  %v20577_v27 = vld [vmem:[%s20025_s26 + $0x20] sm:$0xff] }
 0x5e2   : > { %3580 = vadd.xlane.f32.xlu0 %v3579_v6  ;;  %v20592_v6 = vld [vmem:[%s20025_s26 + $0x38] sm:$0xff] }
 0x5e3   : > { %19502 = vpow2.f32 %v3577_v57  ;;  %v20587_v57 = vld [vmem:[%s20025_s26 + $0x30] sm:$0xff] }
 0x5e4   : > { %v19491_v31 = vpop.eup %19490 }
 0x5e5   : > { %v19493_v34 = vpop.eup %19492  ;;  %v3585_v1 = vsel %vm1150_vm2, %v19491_v31, 0.0 }
 0x5e6   : > { %3586 = vadd.xlane.f32.xlu0 %v3585_v1  ;;  %v3582_v4 = vsel %vm1150_vm2, %v19493_v34, 0.0 }
 0x5e7   : > { %3583 = vadd.xlane.f32.xlu1 %v3582_v4 }
 0x5e8   : > { %v19495_v35 = vpop.eup %19494 }
 0x5e9   : > { %v19497_v51 = vpop.eup %19496  ;;  %v3591_v19 = vsel %vm1150_vm2, %v19495_v35, 0.0 }
 0x5ea   : > { %3592 = vadd.xlane.f32.xlu0 %v3591_v19  ;;  %v3588_v63 = vsel %vm1150_vm2, %v19497_v51, 0.0 }
 0x5eb   : > { %3589 = vadd.xlane.f32.xlu1 %v3588_v63  ;;  %v16924_v63 = vld [vmem:[%s22963_s3 + $0x48] sm:$0xff] }
 0x5ec   : > { %v19499_v24 = vpop.eup %19498 }
 0x5ed   : > { %v19501_v11 = vpop.eup %19500  ;;  %v3597_v21 = vsel %vm1150_vm2, %v19499_v24, 0.0 }
 0x5ee   : > { %3598 = vadd.xlane.f32.xlu0 %v3597_v21  ;;  %v3594_v36 = vsel %vm1150_vm2, %v19501_v11, 0.0  ;;  %v16923_v21 = vld [vmem:[%s22963_s3 + $0x40] sm:$0xff] }
 0x5ef   : > { %3595 = vadd.xlane.f32.xlu1 %v3594_v36 }
 0x5f0   : > { %v19503_v3 = vpop.eup %19502 }
 0x5f1   : > { %v3600_v28 = vsel %vm1150_vm2, %v19503_v3, 0.0 }
 0x5f3   : > { %3601 = vadd.xlane.f32.xlu1 %v3600_v28 }
 0x66b   : > { %v3581_v29 = vpop.xlane.xlu0 %3580 }
 0x66c   : > { %19504 = vrcp.f32 %v3581_v29 }
 0x66f   : > { %v3587_v37 = vpop.xlane.xlu0 %3586 }
 0x670   : > { %19506 = vrcp.f32 %v3587_v37  ;;  %v3584_v23 = vpop.xlane.xlu1 %3583 }
 0x671   : > { %19508 = vrcp.f32 %v3584_v23 }
 0x673   : > { %v3593_v33 = vpop.xlane.xlu0 %3592 }
 0x674   : > { %19510 = vrcp.f32 %v3593_v33  ;;  %v3590_v40 = vpop.xlane.xlu1 %3589 }
 0x675   : > { %19512 = vrcp.f32 %v3590_v40 }
 0x677   : > { %v3599_v38 = vpop.xlane.xlu0 %3598 }
 0x678   : > { %19514 = vrcp.f32 %v3599_v38  ;;  %v3596_v39 = vpop.xlane.xlu1 %3595  ;;  %v16940_v38 = vld [vmem:[%s22935_s7 + $0x58] sm:$0xff] }
 0x679   : > { %v19505_v42 = vpop.eup %19504  ;;  %19516 = vrcp.f32 %v3596_v39  ;;  %v16939_v39 = vld [vmem:[%s22935_s7 + $0x50] sm:$0xff] }
 0x67a   : > { %v3604_v43 = vmul.f32 %v19505_v42, %v19489_v30  ;;  %v20582_v30 = vld [vmem:[%s20025_s26 + $0x28] sm:$0xff] }
 0x67b   : > { %v16938_v42 = vld [vmem:[%s22935_s7 + $0x48] sm:$0xff] }
 0x67c   : > { %v3602_v32 = vpop.xlane.xlu1 %3601  ;;  %18361 = vmatmul.mubr.msk.f32.vlgmr.msra.gmra.mxu1 %vm1150_vm2, %v3604_v43  ;;  %v16937_v43 = vld [vmem:[%s22935_s7 + $0x40] sm:$0xff] }
 0x67d   : > { %v19507_v45 = vpop.eup %19506  ;;  %19518 = vrcp.f32 %v3602_v32  ;;  %18369 = vmatpush3.msra.mxu1 %v2895_v44  ;;  %18370 = vmatprep.mubr.msk.f32.mxu1 %vm19870_vm1, %v19869_v20  ;;  %v16766_v44 = vld [vmem:[%s22938_s10] ss:$0 sm:$0xff] }
 0x67e   : > { %v19509_v41 = vpop.eup %19508  ;;  %18378 = vmatprep.subr.mxu1 %v19869_v20  ;;  %v3608_v46 = vmul.f32 %v19507_v45, %v19491_v31  ;;  %v722_v32 = vadd.f32 %v20562_v59, %v16766_v44 }
 0x67f   : > { %v3606_v49 = vmul.f32 %v19509_v41, %v19493_v34  ;;  %v724_v41 = vadd.f32 %v20572_v26, %v16766_v44 }
 0x680   : > { %18371 = vmatmul.mubr.msk.f32.vlgmr.msra.gmra.mxu1 %vm1150_vm2, %v3608_v46  ;;  %v2562_v45 = vadd.f32 %v20395_v9, %v722_v32  ;;  %v728_v9 = vadd.f32 %v20592_v6, %v16766_v44 }
 0x681   : > { %v19511_v60 = vpop.eup %19510  ;;  %18366 = vmatmul.mubr.msk.f32.vlgmr.msra.gmra.mxu0 %vm1150_vm2, %v3606_v49  ;;  %18379 = vmatpush3.msra.mxu1 %v2905_v47 }
 0x682   : > { %v19513_v52 = vpop.eup %19512  ;;  %18374 = vmatpush3.msra.mxu0 %v20466_v58  ;;  %18375 = vmatprep.mubr.msk.f32.mxu0 %vm19870_vm1, %v19869_v20  ;;  %v3612_v53 = vmul.f32 %v19511_v60, %v19495_v35  ;;  %v16925_v35 = vld [vmem:[%s22963_s3 + $0x50] sm:$0xff]  ;;  %v2564_v60 = vadd.f32 %v20399_v5, %v724_v41  ;;  %v2568_v5 = vadd.f32 %v20407_v17, %v728_v9 }
 0x683   : > { %18380 = vmatprep.mubr.msk.f32.mxu1 %vm19870_vm1, %v19869_v20  ;;  %18383 = vmatprep.subr.mxu0 %v19869_v20  ;;  %v3610_v62 = vmul.f32 %v19513_v52, %v19497_v51  ;;  %v726_v52 = vadd.f32 %v20582_v30, %v16766_v44 }
 0x684   : > { %18388 = vmatprep.subr.mxu1 %v19869_v20  ;;  %18381 = vmatmul.mubr.msk.f32.vlgmr.msra.gmra.mxu1 %vm1150_vm2, %v3612_v53 }
 0x685   : > { %v19515_v55 = vpop.eup %19514  ;;  %18376 = vmatmul.mubr.msk.f32.vlgmr.msra.gmra.mxu0 %vm1150_vm2, %v3610_v62  ;;  %18389 = vmatpush3.msra.mxu1 %v2915_v54 }
 0x686   : > { %v19517_v58 = vpop.eup %19516  ;;  %18384 = vmatpush3.msra.mxu0 %v20472_v8  ;;  %18385 = vmatprep.mubr.msk.f32.mxu0 %vm19870_vm1, %v19869_v20  ;;  %v3616_v50 = vmul.f32 %v19515_v55, %v19499_v24 }
 0x687   : > { %18390 = vmatprep.mubr.msk.f32.mxu1 %vm19870_vm1, %v19869_v20  ;;  %18393 = vmatprep.subr.mxu0 %v19869_v20  ;;  %v3614_v7 = vmul.f32 %v19517_v58, %v19501_v11  ;;  %v2566_v58 = vadd.f32 %v20403_v15, %v726_v52  ;;  %v16928_v15 = vld [vmem:[%s22934_s6 + $0x2] ss:$0 sm:$0xff] }
 0x688   : > { %18391 = vmatmul.mubr.msk.f32.vlgmr.msra.gmra.mxu1 %vm1150_vm2, %v3616_v50  ;;  %18398 = vmatprep.subr.mxu1 %v16900_v61 }
 0x689   : > { %18386 = vmatmul.mubr.msk.f32.vlgmr.msra.gmra.mxu0 %vm1150_vm2, %v3614_v7  ;;  %18399 = vmatpush3.msra.mxu1 %v16900_v61 }
 0x68a   : > { %v19519_v56 = vpop.eup %19518  ;;  %18394 = vmatpush3.msra.mxu0 %v20477_v2  ;;  %18395 = vmatprep.mubr.msk.f32.mxu0 %vm19870_vm1, %v19869_v20  ;;  %v16926_v2 = vld [vmem:[%s22963_s3 + $0x58] sm:$0xff] }
 0x68b   : > { %v3618_v8 = vmul.f32 %v19519_v56, %v19503_v3  ;;  %18432 = vmatprep.subr.mxu1 %v16926_v2  ;;  %18412 = vmatprep.subr.mxu0 %v16912_v0 }
 0x68d   : > { %18396 = vmatmul.mubr.msk.f32.vlgmr.msra.gmra.mxu0 %vm1150_vm2, %v3618_v8 }
 0x68e   : > { %18420 = vmatprep.mubr.msk.f32.mxu0 %vm740_vm0, %v20539_v48  ;;  %18413 = vmatpush3.msra.mxu0 %v16912_v0 }
 0x68f   : > { %18414 = vmatprep.subr.mxu0 %v16911_v12 }
 0x690   : > { %18415 = vmatpush3.msra.mxu0 %v16911_v12 }
 0x691   : > { %18416 = vmatprep.subr.mxu0 %v16910_v14 }
 0x692   : > { %18417 = vmatpush3.msra.mxu0 %v16910_v14 }
 0x693   : > { %18418 = vmatprep.subr.mxu0 %v16909_v18 }
 0x694   : > { %18419 = vmatpush3.msra.mxu0 %v16909_v18 }
 0x695   : > { %18421 = vmatmul.mubr.msk.f32.vlgmr.msra.gmra.mxu0 %vm740_vm0, %v20562_v59  ;;  %18452 = vmatprep.subr.mxu0 %v16940_v38 }
 0x696   : > { %18423 = vmatprep.mubr.msk.f32.mxu0 %vm740_vm0, %v20567_v25  ;;  %18453 = vmatpush3.msra.mxu0 %v16940_v38 }
 0x697   : > { %18454 = vmatprep.subr.mxu0 %v16939_v39 }
 0x698   : > { %18455 = vmatpush3.msra.mxu0 %v16939_v39 }
 0x699   : > { %18424 = vmatmul.mubr.msk.f32.gmra.mxu0 %vm740_vm0, %v20572_v26  ;;  %18456 = vmatprep.subr.mxu0 %v16938_v42 }
 0x69a   : > { %18426 = vmatprep.mubr.msk.f32.mxu0 %vm740_vm0, %v20577_v27  ;;  %18457 = vmatpush3.msra.mxu0 %v16938_v42 }
 0x69b   : > { %18458 = vmatprep.subr.mxu0 %v16937_v43 }
 0x69c   : > { %18459 = vmatpush3.msra.mxu0 %v16937_v43 }
 0x69d   : > { %18427 = vmatmul.mubr.msk.f32.gmra.mxu0 %vm740_vm0, %v20582_v30  ;;  %18482 = vmatprep.subr.mxu0 %v19869_v20 }
 0x69e   : > { %18429 = vmatprep.mubr.msk.f32.mxu0 %vm740_vm0, %v20587_v57 }
 0x6a1   : > { %18430 = vmatmul.mubr.msk.f32.gmra.mxu0 %vm740_vm0, %v20592_v6 }
 0x6a2   : > { %18460 = vmatprep.mubr.msk.f32.mxu0 %vm740_vm0, %v20539_v48 }
 0x6a5   : > { %18461 = vmatmul.mubr.msk.f32.vlgmr.msra.gmra.mxu0 %vm740_vm0, %v20562_v59 }
 0x6a6   : > { %18463 = vmatprep.mubr.msk.f32.mxu0 %vm740_vm0, %v20567_v25 }
 0x6a9   : > { %18464 = vmatmul.mubr.msk.f32.gmra.mxu0 %vm740_vm0, %v20572_v26 }
 0x6aa   : > { %18466 = vmatprep.mubr.msk.f32.mxu0 %vm740_vm0, %v20577_v27 }
 0x6ad   : > { %18467 = vmatmul.mubr.msk.f32.gmra.mxu0 %vm740_vm0, %v20582_v30 }
 0x6ae   : > { %18469 = vmatprep.mubr.msk.f32.mxu0 %vm740_vm0, %v20587_v57 }
 0x6b1   : > { %18470 = vmatmul.mubr.msk.f32.gmra.mxu0 %vm740_vm0, %v20592_v6 }
 0x6b2   : > { %18484 = vmatprep.mubr.msk.f32.mxu0 %vm19870_vm1, %v19869_v20 }
 0x73c   : > { %v3688_v31 = vpop.f32.mrf.mxu1 }
 0x73d   : > { %18400 = vmatprep.mubr.msk.f32.mxu1 %vm1150_vm2, %v3688_v31 }
 0x73e   : > { %v18362_v34 = vpop.f32.mrf.mxu1 }
 0x740   : > { %v3834_v1 = vpop.f32.mrf.mxu1 }
 0x741   : > { %v3761_v4 = vpop.f32.mrf.mxu0 }
 0x742   : > { %18401 = vmatmul.mubr.msk.f32.vlgmr.msra.gmra.mxu1 %vm1150_vm2, %v3761_v4  ;;  %v18372_v51 = vpop.f32.mrf.mxu1 }
 0x743   : > { %v18367_v19 = vpop.f32.mrf.mxu0  ;;  %18403 = vmatprep.mubr.msk.f32.mxu1 %vm1150_vm2, %v3834_v1  ;;  %18433 = vmatpush3.msra.mxu1 %v16926_v2  ;;  %v16914_v1 = vld [vmem:[%s22966_s30 + $0x2] ss:$0 sm:$0xff] }
 0x744   : > { %v3980_v24 = vpop.f32.mrf.mxu1  ;;  %18434 = vmatprep.subr.mxu1 %v16925_v35 }
 0x745   : > { %v3907_v11 = vpop.f32.mrf.mxu0  ;;  %18435 = vmatpush3.msra.mxu1 %v16925_v35 }
 0x746   : > { %18404 = vmatmul.mubr.msk.f32.gmra.mxu1 %vm1150_vm2, %v3907_v11  ;;  %v18382_v36 = vpop.f32.mrf.mxu1  ;;  %18436 = vmatprep.subr.mxu1 %v16924_v63 }
 0x747   : > { %v18377_v3 = vpop.f32.mrf.mxu0  ;;  %18406 = vmatprep.mubr.msk.f32.mxu1 %vm1150_vm2, %v3980_v24  ;;  %18437 = vmatpush3.msra.mxu1 %v16924_v63 }
 0x748   : > { %v4126_v28 = vpop.f32.mrf.mxu1  ;;  %18438 = vmatprep.subr.mxu1 %v16923_v21 }
 0x749   : > { %v4053_v29 = vpop.f32.mrf.mxu0  ;;  %18439 = vmatpush3.msra.mxu1 %v16923_v21 }
 0x74a   : > { %18407 = vmatmul.mubr.msk.f32.gmra.mxu1 %vm1150_vm2, %v4053_v29  ;;  %v18392_v37 = vpop.f32.mrf.mxu1  ;;  %18472 = vmatprep.subr.mxu1 %v19869_v20 }
 0x74b   : > { %v18387_v23 = vpop.f32.mrf.mxu0  ;;  %18409 = vmatprep.mubr.msk.f32.mxu1 %vm1150_vm2, %v4126_v28 }
 0x74d   : > { %v4199_v33 = vpop.f32.mrf.mxu0 }
 0x74e   : > { %18410 = vmatmul.mubr.msk.f32.gmra.mxu1 %vm1150_vm2, %v4199_v33 }
 0x74f   : > { %v18397_v40 = vpop.f32.mrf.mxu0  ;;  %18440 = vmatprep.mubr.msk.f32.mxu1 %vm740_vm0, %v20539_v48 }
 0x752   : > { %18441 = vmatmul.mubr.msk.f32.vlgmr.msra.gmra.mxu1 %vm740_vm0, %v20562_v59 }
 0x753   : > { %18443 = vmatprep.mubr.msk.f32.mxu1 %vm740_vm0, %v20567_v25 }
 0x755   : > { %v18422_v53 = vpop.f32.mrf.mxu0 }
 0x756   : > { %18444 = vmatmul.mubr.msk.f32.gmra.mxu1 %vm740_vm0, %v20572_v26  ;;  %v4427_v3 = vadd.f32 %v18422_v53, %v16914_v1 }
 0x757   : > { %18446 = vmatprep.mubr.msk.f32.mxu1 %vm740_vm0, %v20577_v27  ;;  %v4421_v50 = vpop.f32.mrf.mxu0 }
 0x758   : > { %v4422_v51 = vadd.f32 %v16914_v1, %v4421_v50 }
 0x759   : > { %v18425_v8 = vpop.f32.mrf.mxu0 }
 0x75a   : > { %18447 = vmatmul.mubr.msk.f32.gmra.mxu1 %vm740_vm0, %v20582_v30  ;;  %v4437_v38 = vadd.f32 %v18425_v8, %v16914_v1 }
 0x75b   : > { %18449 = vmatprep.mubr.msk.f32.mxu1 %vm740_vm0, %v20587_v57  ;;  %v4431_v12 = vpop.f32.mrf.mxu0 }
 0x75c   : > { %v4432_v21 = vadd.f32 %v16914_v1, %v4431_v12 }
 0x75d   : > { %v18428_v31 = vpop.f32.mrf.mxu0 }
 0x75e   : > { %18450 = vmatmul.mubr.msk.f32.gmra.mxu1 %vm740_vm0, %v20592_v6  ;;  %v4447_v32 = vadd.f32 %v18428_v31, %v16914_v1 }
 0x75f   : > { %18474 = vmatprep.mubr.msk.f32.mxu1 %vm19870_vm1, %v19869_v20  ;;  %v4441_v17 = vpop.f32.mrf.mxu0 }
 0x760   : > { %v4442_v33 = vadd.f32 %v16914_v1, %v4441_v17 }
 0x761   : > { %v18431_v36 = vpop.f32.mrf.mxu0 }
 0x762   : > { %v4457_v41 = vadd.f32 %v18431_v36, %v16914_v1 }
 0x763   : > { %v4451_v40 = vpop.f32.mrf.mxu0 }
 0x764   : > { %v4452_v44 = vadd.f32 %v16914_v1, %v4451_v40 }
 0x802   : > { %v18402_v46 = vpop.f32.mrf.mxu1 }
 0x803   : > { %v20669_v47 = vadd.f32 %v18402_v46, %v2562_v45  ;;  %v20739_v46 = vld [vmem:[%s22936_s8 + $0x2] ss:$0 sm:$0xff] }
 0x804   : > { %v20671_v49 = vpop.f32.mrf.mxu1 }
 0x806   : > { %v18405_v54 = vpop.f32.mrf.mxu1 }
 0x807   : > { %v20675_v62 = vadd.f32 %v18405_v54, %v2564_v60  ;;  %v18462_v60 = vpop.f32.mrf.mxu0 }
 0x808   : > { %v20677_v55 = vpop.f32.mrf.mxu1  ;;  %v4663_v52 = vadd.f32 %v18462_v60, %v20739_v46  ;;  %v20790_v60 = vld [vmem:[%s20209_s29 + $0x5] ss:$0 sm:$0xff] }
 0x809   : > { %v4657_v53 = vpop.f32.mrf.mxu0 }
 0x80a   : > { %v18408_v7 = vpop.f32.mrf.mxu1  ;;  %v4658_v54 = vadd.f32 %v20739_v46, %v4657_v53 }
 0x80b   : > { %v20681_v56 = vadd.f32 %v18408_v7, %v2566_v58  ;;  %v18465_v58 = vpop.f32.mrf.mxu0 }
 0x80c   : > { %v20683_v61 = vpop.f32.mrf.mxu1  ;;  %v20745_v9 = vadd.f32 %v18465_v58, %v20739_v46 }
 0x80d   : > { %v20747_v50 = vpop.f32.mrf.mxu0 }
 0x80e   : > { %v18411_v2 = vpop.f32.mrf.mxu1 }
 0x80f   : > { %v20686_v0 = vadd.f32 %v18411_v2, %v2568_v5  ;;  %v18468_v7 = vpop.f32.mrf.mxu0 }
 0x810   : > { %v20688_v14 = vpop.f32.mrf.mxu1  ;;  %v20751_v8 = vadd.f32 %v18468_v7, %v20739_v46 }
 0x811   : > { %v20753_v5 = vpop.f32.mrf.mxu0 }
 0x812   : > { %v18442_v18 = vpop.f32.mrf.mxu1 }
 0x813   : > { %v4545_v63 = vadd.f32 %v18442_v18, %v16928_v15  ;;  %v18471_v2 = vpop.f32.mrf.mxu0 }
 0x814   : > { %v4539_v34 = vpop.f32.mrf.mxu1  ;;  %v20756_v12 = vadd.f32 %v18471_v2, %v20739_v46 }
 0x815   : > { %v4540_v4 = vadd.f32 %v16928_v15, %v4539_v34  ;;  %v20758_v31 = vpop.f32.mrf.mxu0 }
 0x816   : > { %v18445_v35 = vpop.f32.mrf.mxu1 }
 0x817   : > { %18473 = vmatpush3.xpose.msk.msra.mxu1 %vm1150_vm2, %v4540_v4  ;;  %v4555_v29 = vadd.f32 %v18445_v35, %v16928_v15 }
 0x818   : > { %v4549_v19 = vpop.f32.mrf.mxu1  ;;  %18477 = vmatprep.subr.mxu1 %v19869_v20 }
 0x819   : > { %v4550_v24 = vadd.f32 %v16928_v15, %v4549_v19 }
 0x81a   : > { %v18448_v11 = vpop.f32.mrf.mxu1  ;;  %18475 = vmatmul.mubr.msk.f32.vlgmr.msra.gmra.mxu1 %vm1150_vm2, %v4422_v51  ;;  %v20766_v51 = vld [vmem:[%s20209_s29 + $0x2] ss:$0 sm:$0xff] }
 0x81b   : > { %18478 = vmatpush3.xpose.msk.msra.mxu1 %vm1150_vm2, %v4545_v63  ;;  %18483 = vmatpush3.xpose.msk.msra.mxu0 %vm1150_vm2, %v4550_v24  ;;  %v4565_v42 = vadd.f32 %v18448_v11, %v16928_v15  ;;  %v20770_v63 = vld [vmem:[%s20209_s29 + $0x1] ss:$0 sm:$0xff] }
 0x81c   : > { %v4559_v28 = vpop.f32.mrf.mxu1  ;;  %18479 = vmatprep.mubr.msk.f32.mxu1 %vm19870_vm1, %v19869_v20  ;;  %18487 = vmatprep.subr.mxu1 %v19869_v20 }
 0x81d   : > { %v4560_v37 = vadd.f32 %v16928_v15, %v4559_v28  ;;  %18492 = vmatprep.subr.mxu0 %v19869_v20 }
 0x81e   : > { %v18451_v23 = vpop.f32.mrf.mxu1  ;;  %18480 = vmatmul.mubr.msk.f32.vlgmr.msra.gmra.mxu1 %vm1150_vm2, %v4427_v3  ;;  %18485 = vmatmul.mubr.msk.f32.vlgmr.msra.gmra.mxu0 %vm1150_vm2, %v4432_v21 }
 0x81f   : > { %18488 = vmatpush3.xpose.msk.msra.mxu1 %vm1150_vm2, %v4555_v29  ;;  %18493 = vmatpush3.xpose.msk.msra.mxu0 %vm1150_vm2, %v4560_v37  ;;  %v4575_v45 = vadd.f32 %v18451_v23, %v16928_v15  ;;  %v20776_v37 = vld [vmem:[%s20209_s29 + $0x4] ss:$0 sm:$0xff] }
 0x820   : > { %v4569_v39 = vpop.f32.mrf.mxu1  ;;  %18489 = vmatprep.mubr.msk.f32.mxu1 %vm19870_vm1, %v19869_v20  ;;  %18494 = vmatprep.mubr.msk.f32.mxu0 %vm19870_vm1, %v19869_v20 }
 0x821   : > { %v4570_v43 = vadd.f32 %v16928_v15, %v4569_v39  ;;  %18497 = vmatprep.subr.mxu1 %v19869_v20  ;;  %18502 = vmatprep.subr.mxu0 %v19869_v20  ;;  %v20761_v15 = vld [vmem:[%s20209_s29] ss:$0 sm:$0xff] }
 0x822   : > { %18490 = vmatmul.mubr.msk.f32.vlgmr.msra.gmra.mxu1 %vm1150_vm2, %v4437_v38  ;;  %18495 = vmatmul.mubr.msk.f32.vlgmr.msra.gmra.mxu0 %vm1150_vm2, %v4442_v33  ;;  %v20780_v33 = vld [vmem:[%s20209_s29 + $0x3] ss:$0 sm:$0xff] }
 0x823   : > { %18498 = vmatpush3.xpose.msk.msra.mxu1 %vm1150_vm2, %v4565_v42  ;;  %18503 = vmatpush3.xpose.msk.msra.mxu0 %vm1150_vm2, %v4570_v43 }
 0x824   : > { %18499 = vmatprep.mubr.msk.f32.mxu1 %vm19870_vm1, %v19869_v20  ;;  %18504 = vmatprep.mubr.msk.f32.mxu0 %vm19870_vm1, %v19869_v20 }
 0x825   : > { %18507 = vmatprep.subr.mxu1 %v19869_v20  ;;  %18512 = vmatprep.subr.mxu0 %v19869_v20 }
 0x826   : > { %18500 = vmatmul.mubr.msk.f32.vlgmr.msra.gmra.mxu1 %vm1150_vm2, %v4447_v32  ;;  %18505 = vmatmul.mubr.msk.f32.vlgmr.msra.gmra.mxu0 %vm1150_vm2, %v4452_v44 }
 0x827   : > { %18508 = vmatpush3.xpose.msk.msra.mxu1 %vm1150_vm2, %v4575_v45  ;;  %18509 = vmatprep.mubr.msk.f32.mxu1 %vm19870_vm1, %v19869_v20  ;;  %v20786_v45 = vld [vmem:[%s20209_s29 + $0x6] ss:$0 sm:$0xff] }
 0x828   : > { %18517 = vmatprep.subr.mxu1 %v19869_v20  ;;  %18514 = vmatprep.mubr.msk.f32.mxu0 %vm19870_vm1, %v19869_v20 }
 0x829   : > { %18513 = vmatpush3.msra.mxu0 %v4658_v54 }
 0x82a   : > { %18510 = vmatmul.mubr.msk.f32.vlgmr.msra.gmra.mxu1 %vm1150_vm2, %v4457_v41  ;;  %18522 = vmatprep.subr.mxu0 %v19869_v20 }
 0x82b   : > { %18519 = vmatprep.mubr.msk.f32.mxu1 %vm19870_vm1, %v19869_v20  ;;  %18518 = vmatpush3.msra.mxu1 %v4663_v52 }
 0x82c   : > { %18527 = vmatprep.subr.mxu1 %v19869_v20 }
 0x8da   : > { %v4768_v18 = vpop.f32.mrf.mxu1 }
 0x8db   : > { %v4769_v34 = vadd.f32 %v20761_v15, %v4768_v18  ;;  %v20796_v18 = vld [vmem:[%s20209_s29 + $0x7] ss:$0 sm:$0xff] }
 0x8dc   : > { %v18476_v1 = vpop.f32.mrf.mxu1 }
 0x8dd   : > { %v5304_v4 = vsel %vm1150_vm2, %v4769_v34, -inf }
 0x8de   : > { %v4920_v35 = vpop.f32.mrf.mxu0  ;;  %5305 = vmax.xlane.f32.xlu0 %v5304_v4  ;;  %v4844_v17 = vpop.f32.mrf.mxu1 }
 0x8df   : > { %v4921_v19 = vadd.f32 %v20766_v51, %v4920_v35  ;;  %v4845_v24 = vadd.f32 %v20770_v63, %v4844_v17 }
 0x8e0   : > { %v18481_v11 = vpop.f32.mrf.mxu1  ;;  %v18486_v21 = vpop.f32.mrf.mxu0 }
 0x8e1   : > { %v5310_v36 = vsel %vm1150_vm2, %v4921_v19, -inf  ;;  %v5307_v3 = vsel %vm1150_vm2, %v4845_v24, -inf }
 0x8e2   : > { %v5072_v28 = vpop.f32.mrf.mxu0  ;;  %5311 = vmax.xlane.f32.xlu0 %v5310_v36  ;;  %5308 = vmax.xlane.f32.xlu1 %v5307_v3  ;;  %v4996_v29 = vpop.f32.mrf.mxu1 }
 0x8e3   : > { %v5073_v23 = vadd.f32 %v20776_v37, %v5072_v28  ;;  %v4997_v40 = vadd.f32 %v20780_v33, %v4996_v29 }
 0x8e4   : > { %v18491_v38 = vpop.f32.mrf.mxu1  ;;  %v18496_v39 = vpop.f32.mrf.mxu0 }
 0x8e5   : > { %v5316_v42 = vsel %vm1150_vm2, %v5073_v23, -inf  ;;  %v5313_v43 = vsel %vm1150_vm2, %v4997_v40, -inf }
 0x8e6   : > { %v5224_v44 = vpop.f32.mrf.mxu0  ;;  %5317 = vmax.xlane.f32.xlu0 %v5316_v42  ;;  %5314 = vmax.xlane.f32.xlu1 %v5313_v43  ;;  %v5148_v32 = vpop.f32.mrf.mxu1 }
 0x8e7   : > { %v5225_v41 = vadd.f32 %v20786_v45, %v5224_v44  ;;  %v5149_v52 = vadd.f32 %v20790_v60, %v5148_v32 }
 0x8e8   : > { %v18501_v53 = vpop.f32.mrf.mxu1  ;;  %v18506_v54 = vpop.f32.mrf.mxu0 }
 0x8e9   : > { %v5322_v58 = vsel %vm1150_vm2, %v5225_v41, -inf  ;;  %v5319_v7 = vsel %vm1150_vm2, %v5149_v52, -inf }
 0x8ea   : > { %5323 = vmax.xlane.f32.xlu0 %v5322_v58  ;;  %5320 = vmax.xlane.f32.xlu1 %v5319_v7  ;;  %v5300_v2 = vpop.f32.mrf.mxu1 }
 0x8eb   : > { %v5301_v1 = vadd.f32 %v20796_v18, %v5300_v2 }
 0x8ec   : > { %v18511_v4 = vpop.f32.mrf.mxu1 }
 0x8ed   : > { %v5325_v35 = vsel %vm1150_vm2, %v5301_v1, -inf }
 0x8ee   : > { %5326 = vmax.xlane.f32.xlu1 %v5325_v35 }
 0x967   : > { %v5306_v17 = vpop.xlane.xlu0 %5305 }
 0x968   : > { %v5328_v11 = vsub.f32 %v4769_v34, %v5306_v17 }
 0x96a   : > { %v5336_v21 = vmul.f32 1.442695, %v5328_v11 }
 0x96b   : > { %v5312_v36 = vpop.xlane.xlu0 %5311  ;;  %v5309_v3 = vpop.xlane.xlu1 %5308 }
 0x96c   : > { %19520 = vpow2.f32 %v5336_v21  ;;  %v5330_v28 = vsub.f32 %v4921_v19, %v5312_v36  ;;  %v5329_v29 = vsub.f32 %v4845_v24, %v5309_v3 }
 0x96e   : > { %v5340_v38 = vmul.f32 1.442695, %v5330_v28  ;;  %v5338_v39 = vmul.f32 1.442695, %v5329_v29 }
 0x96f   : > { %v5318_v42 = vpop.xlane.xlu0 %5317  ;;  %v5315_v43 = vpop.xlane.xlu1 %5314 }
 0x970   : > { %19522 = vpow2.f32 %v5340_v38  ;;  %v5332_v44 = vsub.f32 %v5073_v23, %v5318_v42  ;;  %v5331_v32 = vsub.f32 %v4997_v40, %v5315_v43 }
 0x971   : > { %19524 = vpow2.f32 %v5338_v39 }
 0x972   : > { %v5344_v53 = vmul.f32 1.442695, %v5332_v44  ;;  %v5342_v54 = vmul.f32 1.442695, %v5331_v32 }
 0x973   : > { %v5324_v58 = vpop.xlane.xlu0 %5323  ;;  %v5321_v7 = vpop.xlane.xlu1 %5320 }
 0x974   : > { %19526 = vpow2.f32 %v5344_v53  ;;  %v5334_v34 = vsub.f32 %v5225_v41, %v5324_v58  ;;  %v5333_v2 = vsub.f32 %v5149_v52, %v5321_v7 }
 0x975   : > { %19528 = vpow2.f32 %v5342_v54 }
 0x976   : > { %v5348_v4 = vmul.f32 1.442695, %v5334_v34  ;;  %v5346_v35 = vmul.f32 1.442695, %v5333_v2 }
 0x977   : > { %v5327_v19 = vpop.xlane.xlu1 %5326 }
 0x978   : > { %19530 = vpow2.f32 %v5348_v4  ;;  %v5335_v24 = vsub.f32 %v5301_v1, %v5327_v19  ;;  %v4668_v19 = vadd.f32 %v20739_v46, %v20747_v50 }
 0x979   : > { %v19521_v17 = vpop.eup %19520  ;;  %19532 = vpow2.f32 %v5346_v35 }
 0x97a   : > { %v5350_v11 = vmul.f32 1.442695, %v5335_v24  ;;  %v5352_v23 = vsel %vm1150_vm2, %v19521_v17, 0.0 }
 0x97b   : > { %5353 = vadd.xlane.f32.xlu0 %v5352_v23 }
 0x97c   : > { %19534 = vpow2.f32 %v5350_v11 }
 0x97d   : > { %v19523_v40 = vpop.eup %19522 }
 0x97e   : > { %v19525_v21 = vpop.eup %19524  ;;  %v5358_v36 = vsel %vm1150_vm2, %v19523_v40, 0.0 }
 0x97f   : > { %5359 = vadd.xlane.f32.xlu0 %v5358_v36  ;;  %v5355_v41 = vsel %vm1150_vm2, %v19525_v21, 0.0 }
 0x980   : > { %5356 = vadd.xlane.f32.xlu1 %v5355_v41  ;;  %v4678_v41 = vadd.f32 %v20739_v46, %v20753_v5 }
 0x981   : > { %v19527_v52 = vpop.eup %19526 }
 0x982   : > { %v19529_v3 = vpop.eup %19528  ;;  %v5364_v28 = vsel %vm1150_vm2, %v19527_v52, 0.0 }
 0x983   : > { %5365 = vadd.xlane.f32.xlu0 %v5364_v28  ;;  %v5361_v1 = vsel %vm1150_vm2, %v19529_v3, 0.0 }
 0x984   : > { %5362 = vadd.xlane.f32.xlu1 %v5361_v1 }
 0x985   : > { %v19531_v29 = vpop.eup %19530 }
 0x986   : > { %v19533_v38 = vpop.eup %19532  ;;  %v5370_v39 = vsel %vm1150_vm2, %v19531_v29, 0.0 }
 0x987   : > { %5371 = vadd.xlane.f32.xlu0 %v5370_v39  ;;  %v5367_v42 = vsel %vm1150_vm2, %v19533_v38, 0.0  ;;  %v16985_v39 = vld [vmem:[%s22964_s0 + $0x68] sm:$0xff] }
 0x988   : > { %5368 = vadd.xlane.f32.xlu1 %v5367_v42  ;;  %v16984_v42 = vld [vmem:[%s22964_s0 + $0x60] sm:$0xff] }
 0x989   : > { %v19535_v43 = vpop.eup %19534 }
 0x98a   : > { %v5373_v44 = vsel %vm1150_vm2, %v19535_v43, 0.0 }
 0x98c   : > { %5374 = vadd.xlane.f32.xlu1 %v5373_v44 }
 0xa04   : > { %v5354_v32 = vpop.xlane.xlu0 %5353 }
 0xa05   : > { %19536 = vrcp.f32 %v5354_v32 }
 0xa08   : > { %v5360_v53 = vpop.xlane.xlu0 %5359 }
 0xa09   : > { %19538 = vrcp.f32 %v5360_v53  ;;  %v5357_v54 = vpop.xlane.xlu1 %5356 }
 0xa0a   : > { %19540 = vrcp.f32 %v5357_v54  ;;  %v17000_v54 = vld [vmem:[%s22963_s3 + $0x70] sm:$0xff] }
 0xa0c   : > { %v5366_v58 = vpop.xlane.xlu0 %5365 }
 0xa0d   : > { %19542 = vrcp.f32 %v5366_v58  ;;  %v5363_v7 = vpop.xlane.xlu1 %5362 }
 0xa0e   : > { %19544 = vrcp.f32 %v5363_v7 }
 0xa10   : > { %v5372_v34 = vpop.xlane.xlu0 %5371 }
 0xa11   : > { %19546 = vrcp.f32 %v5372_v34  ;;  %v5369_v2 = vpop.xlane.xlu1 %5368  ;;  %v16999_v34 = vld [vmem:[%s22963_s3 + $0x68] sm:$0xff] }
 0xa12   : > { %v19537_v4 = vpop.eup %19536  ;;  %19548 = vrcp.f32 %v5369_v2 }
 0xa13   : > { %v5377_v35 = vmul.f32 %v19537_v4, %v19521_v17 }
 0xa15   : > { %v5375_v24 = vpop.xlane.xlu1 %5374  ;;  %18515 = vmatmul.mubr.msk.f32.vlgmr.msra.gmra.mxu0 %vm1150_vm2, %v5377_v35  ;;  %v16998_v35 = vld [vmem:[%s22963_s3 + $0x60] sm:$0xff] }
 0xa16   : > { %v19539_v11 = vpop.eup %19538  ;;  %19550 = vrcp.f32 %v5375_v24  ;;  %18523 = vmatpush3.msra.mxu0 %v4668_v19  ;;  %18524 = vmatprep.mubr.msk.f32.mxu0 %vm19870_vm1, %v19869_v20 }
 0xa17   : > { %v19541_v23 = vpop.eup %19540  ;;  %18532 = vmatprep.subr.mxu0 %v19869_v20  ;;  %v5381_v36 = vmul.f32 %v19539_v11, %v19523_v40  ;;  %v4688_v40 = vadd.f32 %v20739_v46, %v20758_v31 }
 0xa18   : > { %v5379_v17 = vmul.f32 %v19541_v23, %v19525_v21 }
 0xa19   : > { %18525 = vmatmul.mubr.msk.f32.vlgmr.msra.gmra.mxu0 %vm1150_vm2, %v5381_v36 }
 0xa1a   : > { %v19543_v50 = vpop.eup %19542  ;;  %18520 = vmatmul.mubr.msk.f32.vlgmr.msra.gmra.mxu1 %vm1150_vm2, %v5379_v17  ;;  %18533 = vmatpush3.msra.mxu0 %v4678_v41 }
 0xa1b   : > { %v19545_v28 = vpop.eup %19544  ;;  %18528 = vmatpush3.msra.mxu1 %v20745_v9  ;;  %18529 = vmatprep.mubr.msk.f32.mxu1 %vm19870_vm1, %v19869_v20  ;;  %v5385_v1 = vmul.f32 %v19543_v50, %v19527_v52 }
 0xa1c   : > { %18534 = vmatprep.mubr.msk.f32.mxu0 %vm19870_vm1, %v19869_v20  ;;  %18537 = vmatprep.subr.mxu1 %v19869_v20  ;;  %v5383_v5 = vmul.f32 %v19545_v28, %v19529_v3  ;;  %v16975_v3 = vld [vmem:[%s22937_s9 + $0x10] sm:$0xff] }
 0xa1d   : > { %18542 = vmatprep.subr.mxu0 %v19869_v20  ;;  %18535 = vmatmul.mubr.msk.f32.vlgmr.msra.gmra.mxu0 %vm1150_vm2, %v5385_v1  ;;  %v17014_v28 = vld [vmem:[%s22935_s7 + $0x70] sm:$0xff]  ;;  %v17013_v1 = vld [vmem:[%s22935_s7 + $0x68] sm:$0xff] }
 0xa1e   : > { %v19547_v21 = vpop.eup %19546  ;;  %18530 = vmatmul.mubr.msk.f32.vlgmr.msra.gmra.mxu1 %vm1150_vm2, %v5383_v5  ;;  %18543 = vmatpush3.msra.mxu0 %v4688_v40  ;;  %v17012_v40 = vld [vmem:[%s22935_s7 + $0x60] sm:$0xff] }
 0xa1f   : > { %v19549_v9 = vpop.eup %19548  ;;  %18538 = vmatpush3.msra.mxu1 %v20751_v8  ;;  %18539 = vmatprep.mubr.msk.f32.mxu1 %vm19870_vm1, %v19869_v20  ;;  %v5389_v46 = vmul.f32 %v19547_v21, %v19531_v29  ;;  %v17001_v29 = vld [vmem:[%s22963_s3 + $0x78] sm:$0xff] }
 0xa20   : > { %18544 = vmatprep.mubr.msk.f32.mxu0 %vm19870_vm1, %v19869_v20  ;;  %18547 = vmatprep.subr.mxu1 %v19869_v20  ;;  %v5387_v31 = vmul.f32 %v19549_v9, %v19533_v38  ;;  %v16986_v38 = vld [vmem:[%s22964_s0 + $0x70] sm:$0xff] }
 0xa21   : > { %18545 = vmatmul.mubr.msk.f32.vlgmr.msra.gmra.mxu0 %vm1150_vm2, %v5389_v46  ;;  %18552 = vmatprep.subr.mxu0 %v16975_v3 }
 0xa22   : > { %18540 = vmatmul.mubr.msk.f32.vlgmr.msra.gmra.mxu1 %vm1150_vm2, %v5387_v31  ;;  %18553 = vmatpush3.msra.mxu0 %v16975_v3 }
 0xa23   : > { %v19551_v52 = vpop.eup %19550  ;;  %18548 = vmatpush3.msra.mxu1 %v20756_v12  ;;  %18549 = vmatprep.mubr.msk.f32.mxu1 %vm19870_vm1, %v19869_v20  ;;  %v16987_v12 = vld [vmem:[%s22964_s0 + $0x78] sm:$0xff] }
 0xa24   : > { %v5391_v8 = vmul.f32 %v19551_v52, %v19535_v43  ;;  %18586 = vmatprep.subr.mxu0 %v17001_v29  ;;  %18566 = vmatprep.subr.mxu1 %v16987_v12 }
 0xa26   : > { %18550 = vmatmul.mubr.msk.f32.vlgmr.msra.gmra.mxu1 %vm1150_vm2, %v5391_v8 }
 0xa27   : > { %18574 = vmatprep.mubr.msk.f32.mxu1 %vm740_vm0, %v20539_v48  ;;  %18567 = vmatpush3.msra.mxu1 %v16987_v12  ;;  %v17003_v12 = vld [vmem:[%s22934_s6 + $0x3] ss:$0 sm:$0xff] }
 0xa28   : > { %18568 = vmatprep.subr.mxu1 %v16986_v38 }
 0xa29   : > { %18569 = vmatpush3.msra.mxu1 %v16986_v38 }
 0xa2a   : > { %18570 = vmatprep.subr.mxu1 %v16985_v39 }
 0xa2b   : > { %18571 = vmatpush3.msra.mxu1 %v16985_v39 }
 0xa2c   : > { %18572 = vmatprep.subr.mxu1 %v16984_v42 }
 0xa2d   : > { %18573 = vmatpush3.msra.mxu1 %v16984_v42 }
 0xa2e   : > { %18575 = vmatmul.mubr.msk.f32.vlgmr.msra.gmra.mxu1 %vm740_vm0, %v20562_v59 }
 0xa2f   : > { %18577 = vmatprep.mubr.msk.f32.mxu1 %vm740_vm0, %v20567_v25 }
 0xa32   : > { %18578 = vmatmul.mubr.msk.f32.gmra.mxu1 %vm740_vm0, %v20572_v26 }
 0xa33   : > { %18580 = vmatprep.mubr.msk.f32.mxu1 %vm740_vm0, %v20577_v27 }
 0xa36   : > { %18581 = vmatmul.mubr.msk.f32.gmra.mxu1 %vm740_vm0, %v20582_v30 }
 0xa37   : > { %18583 = vmatprep.mubr.msk.f32.mxu1 %vm740_vm0, %v20587_v57 }
 0xa3a   : > { %18584 = vmatmul.mubr.msk.f32.gmra.mxu1 %vm740_vm0, %v20592_v6 }
 0xa3b   : > { %18614 = vmatprep.mubr.msk.f32.mxu1 %vm740_vm0, %v20539_v48 }
 0xad5   : > { %v5461_v43 = vpop.f32.mrf.mxu0 }
 0xad6   : > { %18554 = vmatprep.mubr.msk.f32.mxu0 %vm1150_vm2, %v5461_v43 }
 0xad7   : > { %v18516_v44 = vpop.f32.mrf.mxu0 }
 0xad9   : > { %v5607_v32 = vpop.f32.mrf.mxu0 }
 0xada   : > { %v5534_v53 = vpop.f32.mrf.mxu1 }
 0xadb   : > { %18555 = vmatmul.mubr.msk.f32.vlgmr.msra.gmra.mxu0 %vm1150_vm2, %v5534_v53  ;;  %v18526_v58 = vpop.f32.mrf.mxu0 }
 0xadc   : > { %v18521_v7 = vpop.f32.mrf.mxu1  ;;  %18557 = vmatprep.mubr.msk.f32.mxu0 %vm1150_vm2, %v5607_v32  ;;  %18587 = vmatpush3.msra.mxu0 %v17001_v29 }
 0xadd   : > { %v5753_v2 = vpop.f32.mrf.mxu0  ;;  %18588 = vmatprep.subr.mxu0 %v17000_v54 }
 0xade   : > { %v5680_v4 = vpop.f32.mrf.mxu1  ;;  %18589 = vmatpush3.msra.mxu0 %v17000_v54 }
 0xadf   : > { %18558 = vmatmul.mubr.msk.f32.gmra.mxu0 %vm1150_vm2, %v5680_v4  ;;  %v18536_v19 = vpop.f32.mrf.mxu0  ;;  %18590 = vmatprep.subr.mxu0 %v16999_v34 }
 0xae0   : > { %v18531_v24 = vpop.f32.mrf.mxu1  ;;  %18560 = vmatprep.mubr.msk.f32.mxu0 %vm1150_vm2, %v5753_v2  ;;  %18591 = vmatpush3.msra.mxu0 %v16999_v34 }
 0xae1   : > { %v5899_v11 = vpop.f32.mrf.mxu0  ;;  %18592 = vmatprep.subr.mxu0 %v16998_v35 }
 0xae2   : > { %v5826_v23 = vpop.f32.mrf.mxu1  ;;  %18593 = vmatpush3.msra.mxu0 %v16998_v35 }
 0xae3   : > { %18561 = vmatmul.mubr.msk.f32.gmra.mxu0 %vm1150_vm2, %v5826_v23  ;;  %v18546_v36 = vpop.f32.mrf.mxu0  ;;  %18626 = vmatprep.subr.mxu0 %v19869_v20 }
 0xae4   : > { %v18541_v41 = vpop.f32.mrf.mxu1  ;;  %18563 = vmatprep.mubr.msk.f32.mxu0 %vm1150_vm2, %v5899_v11 }
 0xae6   : > { %v5972_v17 = vpop.f32.mrf.mxu1 }
 0xae7   : > { %18564 = vmatmul.mubr.msk.f32.gmra.mxu0 %vm1150_vm2, %v5972_v17 }
 0xae8   : > { %v18551_v50 = vpop.f32.mrf.mxu1  ;;  %18594 = vmatprep.mubr.msk.f32.mxu0 %vm740_vm0, %v20539_v48  ;;  %v17015_v48 = vld [vmem:[%s22935_s7 + $0x78] sm:$0xff] }
 0xae9   : > { %18606 = vmatprep.subr.mxu1 %v17015_v48 }
 0xaea   : > { %18607 = vmatpush3.msra.mxu1 %v17015_v48 }
 0xaeb   : > { %18595 = vmatmul.mubr.msk.f32.vlgmr.msra.gmra.mxu0 %vm740_vm0, %v20562_v59  ;;  %18608 = vmatprep.subr.mxu1 %v17014_v28 }
 0xaec   : > { %18597 = vmatprep.mubr.msk.f32.mxu0 %vm740_vm0, %v20567_v25  ;;  %18609 = vmatpush3.msra.mxu1 %v17014_v28 }
 0xaed   : > { %18610 = vmatprep.subr.mxu1 %v17013_v1 }
 0xaee   : > { %18611 = vmatpush3.msra.mxu1 %v17013_v1  ;;  %v18576_v5 = vpop.f32.mrf.mxu1 }
 0xaef   : > { %18598 = vmatmul.mubr.msk.f32.gmra.mxu0 %vm740_vm0, %v20572_v26  ;;  %18612 = vmatprep.subr.mxu1 %v17012_v40 }
 0xaf0   : > { %18600 = vmatprep.mubr.msk.f32.mxu0 %vm740_vm0, %v20577_v27  ;;  %18613 = vmatpush3.msra.mxu1 %v17012_v40  ;;  %v21011_v40 = vld [vmem:[%s22936_s8 + $0x3] ss:$0 sm:$0xff] }
 0xaf1   : > { %18615 = vmatmul.mubr.msk.f32.vlgmr.msra.gmra.mxu1 %vm740_vm0, %v20562_v59  ;;  %18636 = vmatprep.subr.mxu1 %v19869_v20 }
 0xaf2   : > { %18617 = vmatprep.mubr.msk.f32.mxu1 %vm740_vm0, %v20567_v25 }
 0xaf3   : > { %18601 = vmatmul.mubr.msk.f32.gmra.mxu0 %vm740_vm0, %v20582_v30 }
 0xaf4   : > { %18603 = vmatprep.mubr.msk.f32.mxu0 %vm740_vm0, %v20587_v57 }
 0xaf5   : > { %18618 = vmatmul.mubr.msk.f32.gmra.mxu1 %vm740_vm0, %v20572_v26 }
 0xaf6   : > { %18620 = vmatprep.mubr.msk.f32.mxu1 %vm740_vm0, %v20577_v27 }
 0xaf7   : > { %18604 = vmatmul.mubr.msk.f32.gmra.mxu0 %vm740_vm0, %v20592_v6 }
 0xaf8   : > { %18628 = vmatprep.mubr.msk.f32.mxu0 %vm19870_vm1, %v19869_v20 }
 0xaf9   : > { %18621 = vmatmul.mubr.msk.f32.gmra.mxu1 %vm740_vm0, %v20582_v30 }
 0xafa   : > { %18623 = vmatprep.mubr.msk.f32.mxu1 %vm740_vm0, %v20587_v57  ;;  %v6194_v57 = vpop.f32.mrf.mxu1 }
 0xafc   : > { %v18579_v46 = vpop.f32.mrf.mxu1 }
 0xafd   : > { %18624 = vmatmul.mubr.msk.f32.gmra.mxu1 %vm740_vm0, %v20592_v6 }
 0xafe   : > { %18638 = vmatprep.mubr.msk.f32.mxu1 %vm19870_vm1, %v19869_v20  ;;  %v6204_v8 = vpop.f32.mrf.mxu1 }
 0xb9b   : > { %v18556_v59 = vpop.f32.mrf.mxu0 }
 0xb9c   : > { %v20943_v25 = vadd.f32 %v18556_v59, %v20669_v47 }
 0xb9d   : > { %v20945_v26 = vpop.f32.mrf.mxu0 }
 0xb9f   : > { %v18559_v27 = vpop.f32.mrf.mxu0 }
 0xba0   : > { %v20948_v21 = vadd.f32 %v18559_v27, %v20675_v62  ;;  %v18582_v62 = vpop.f32.mrf.mxu1 }
 0xba1   : > { %v20950_v30 = vpop.f32.mrf.mxu0 }
 0xba3   : > { %v18562_v9 = vpop.f32.mrf.mxu0 }
 0xba4   : > { %v20953_v6 = vadd.f32 %v18562_v9, %v20681_v56  ;;  %v16989_v56 = vld [vmem:[%s22966_s30 + $0x3] ss:$0 sm:$0xff] }
 0xba5   : > { %v20955_v31 = vpop.f32.mrf.mxu0  ;;  %v6195_v43 = vadd.f32 %v16989_v56, %v6194_v57  ;;  %v6205_v58 = vadd.f32 %v16989_v56, %v6204_v8  ;;  %v6200_v2 = vadd.f32 %v18576_v5, %v16989_v56  ;;  %v6210_v19 = vadd.f32 %v18579_v46, %v16989_v56 }
 0xba6   : > { %v6220_v50 = vadd.f32 %v18582_v62, %v16989_v56 }
 0xba7   : > { %v18565_v52 = vpop.f32.mrf.mxu0 }
 0xba8   : > { %v20958_v47 = vadd.f32 %v18565_v52, %v20686_v0  ;;  %v6214_v0 = vpop.f32.mrf.mxu1 }
 0xba9   : > { %v20960_v3 = vpop.f32.mrf.mxu0  ;;  %v6215_v11 = vadd.f32 %v16989_v56, %v6214_v0 }
 0xbaa   : > { %v18585_v34 = vpop.f32.mrf.mxu1 }
 0xbab   : > { %v18596_v29 = vpop.f32.mrf.mxu0  ;;  %v6230_v1 = vadd.f32 %v18585_v34, %v16989_v56 }
 0xbac   : > { %v6318_v32 = vadd.f32 %v18596_v29, %v17003_v12  ;;  %v6224_v36 = vpop.f32.mrf.mxu1 }
 0xbad   : > { %v6312_v38 = vpop.f32.mrf.mxu0  ;;  %v6225_v48 = vadd.f32 %v16989_v56, %v6224_v36 }
 0xbae   : > { %v6313_v39 = vadd.f32 %v17003_v12, %v6312_v38 }
 0xbaf   : > { %v18599_v42 = vpop.f32.mrf.mxu0 }
 0xbb0   : > { %18627 = vmatpush3.xpose.msk.msra.mxu0 %vm1150_vm2, %v6313_v39  ;;  %v6328_v7 = vadd.f32 %v18599_v42, %v17003_v12 }
 0xbb1   : > { %v6322_v44 = vpop.f32.mrf.mxu0  ;;  %18631 = vmatprep.subr.mxu0 %v19869_v20  ;;  %v18616_v59 = vpop.f32.mrf.mxu1 }
 0xbb2   : > { %v6323_v53 = vadd.f32 %v17003_v12, %v6322_v44  ;;  %v6436_v5 = vadd.f32 %v18616_v59, %v21011_v40 }
 0xbb3   : > { %v18602_v54 = vpop.f32.mrf.mxu0  ;;  %18629 = vmatmul.mubr.msk.f32.vlgmr.msra.gmra.mxu0 %vm1150_vm2, %v6195_v43  ;;  %v6430_v27 = vpop.f32.mrf.mxu1 }
 0xbb4   : > { %18632 = vmatpush3.xpose.msk.msra.mxu0 %vm1150_vm2, %v6318_v32  ;;  %18637 = vmatpush3.xpose.msk.msra.mxu1 %vm1150_vm2, %v6323_v53  ;;  %v6338_v23 = vadd.f32 %v18602_v54, %v17003_v12  ;;  %v6431_v57 = vadd.f32 %v21011_v40, %v6430_v27 }
 0xbb5   : > { %v6332_v4 = vpop.f32.mrf.mxu0  ;;  %18633 = vmatprep.mubr.msk.f32.mxu0 %vm19870_vm1, %v19869_v20  ;;  %18641 = vmatprep.subr.mxu0 %v19869_v20  ;;  %v18619_v9 = vpop.f32.mrf.mxu1 }
 0xbb6   : > { %v6333_v35 = vadd.f32 %v17003_v12, %v6332_v4  ;;  %18646 = vmatprep.subr.mxu1 %v19869_v20  ;;  %v21017_v46 = vadd.f32 %v18619_v9, %v21011_v40 }
 0xbb7   : > { %v18605_v24 = vpop.f32.mrf.mxu0  ;;  %18634 = vmatmul.mubr.msk.f32.vlgmr.msra.gmra.mxu0 %vm1150_vm2, %v6200_v2  ;;  %18639 = vmatmul.mubr.msk.f32.vlgmr.msra.gmra.mxu1 %vm1150_vm2, %v6205_v58  ;;  %v21019_v52 = vpop.f32.mrf.mxu1 }
 0xbb8   : > { %18642 = vmatpush3.xpose.msk.msra.mxu0 %vm1150_vm2, %v6328_v7  ;;  %18647 = vmatpush3.xpose.msk.msra.mxu1 %vm1150_vm2, %v6333_v35  ;;  %v6348_v28 = vadd.f32 %v18605_v24, %v17003_v12 }
 0xbb9   : > { %v6342_v41 = vpop.f32.mrf.mxu0  ;;  %18643 = vmatprep.mubr.msk.f32.mxu0 %vm19870_vm1, %v19869_v20  ;;  %18648 = vmatprep.mubr.msk.f32.mxu1 %vm19870_vm1, %v19869_v20  ;;  %v18622_v8 = vpop.f32.mrf.mxu1 }
 0xbba   : > { %v6343_v17 = vadd.f32 %v17003_v12, %v6342_v41  ;;  %18651 = vmatprep.subr.mxu0 %v19869_v20  ;;  %18656 = vmatprep.subr.mxu1 %v19869_v20  ;;  %v21023_v29 = vadd.f32 %v18622_v8, %v21011_v40 }
 0xbbb   : > { %18644 = vmatmul.mubr.msk.f32.vlgmr.msra.gmra.mxu0 %vm1150_vm2, %v6210_v19  ;;  %18649 = vmatmul.mubr.msk.f32.vlgmr.msra.gmra.mxu1 %vm1150_vm2, %v6215_v11  ;;  %v21025_v62 = vpop.f32.mrf.mxu1 }
 0xbbc   : > { %18652 = vmatpush3.xpose.msk.msra.mxu0 %vm1150_vm2, %v6338_v23  ;;  %18657 = vmatpush3.xpose.msk.msra.mxu1 %vm1150_vm2, %v6343_v17 }
 0xbbd   : > { %18653 = vmatprep.mubr.msk.f32.mxu0 %vm19870_vm1, %v19869_v20  ;;  %18658 = vmatprep.mubr.msk.f32.mxu1 %vm19870_vm1, %v19869_v20  ;;  %v18625_v12 = vpop.f32.mrf.mxu1 }
 0xbbe   : > { %18661 = vmatprep.subr.mxu0 %v19869_v20  ;;  %18666 = vmatprep.subr.mxu1 %v19869_v20  ;;  %v21028_v38 = vadd.f32 %v18625_v12, %v21011_v40 }
 0xbbf   : > { %18654 = vmatmul.mubr.msk.f32.vlgmr.msra.gmra.mxu0 %vm1150_vm2, %v6220_v50  ;;  %18659 = vmatmul.mubr.msk.f32.vlgmr.msra.gmra.mxu1 %vm1150_vm2, %v6225_v48  ;;  %v21030_v39 = vpop.f32.mrf.mxu1 }
 0xbc0   : > { %18662 = vmatpush3.xpose.msk.msra.mxu0 %vm1150_vm2, %v6348_v28  ;;  %18663 = vmatprep.mubr.msk.f32.mxu0 %vm19870_vm1, %v19869_v20 }
 0xbc1   : > { %18671 = vmatprep.subr.mxu0 %v19869_v20  ;;  %18668 = vmatprep.mubr.msk.f32.mxu1 %vm19870_vm1, %v19869_v20 }
 0xbc2   : > { %18667 = vmatpush3.msra.mxu1 %v6431_v57 }
 0xbc3   : > { %18664 = vmatmul.mubr.msk.f32.vlgmr.msra.gmra.mxu0 %vm1150_vm2, %v6230_v1  ;;  %18676 = vmatprep.subr.mxu1 %v19869_v20 }
 0xbc4   : > { %18673 = vmatprep.mubr.msk.f32.mxu0 %vm19870_vm1, %v19869_v20  ;;  %18672 = vmatpush3.msra.mxu0 %v6436_v5 }
 0xbc5   : > { %18681 = vmatprep.subr.mxu0 %v19869_v20 }
 0xc73   : > { %v6541_v56 = vpop.f32.mrf.mxu0 }
 0xc74   : > { %v6542_v42 = vadd.f32 %v20761_v15, %v6541_v56 }
 0xc75   : > { %v18630_v0 = vpop.f32.mrf.mxu0 }
 0xc76   : > { %v7077_v43 = vsel %vm1150_vm2, %v6542_v42, -inf }
 0xc77   : > { %v6693_v44 = vpop.f32.mrf.mxu1  ;;  %7078 = vmax.xlane.f32.xlu0 %v7077_v43  ;;  %v6617_v32 = vpop.f32.mrf.mxu0 }
 0xc78   : > { %v6694_v53 = vadd.f32 %v20766_v51, %v6693_v44  ;;  %v6618_v54 = vadd.f32 %v20770_v63, %v6617_v32 }
 0xc79   : > { %v18635_v58 = vpop.f32.mrf.mxu0  ;;  %v18640_v7 = vpop.f32.mrf.mxu1 }
 0xc7a   : > { %v7083_v34 = vsel %vm1150_vm2, %v6694_v53, -inf  ;;  %v7080_v2 = vsel %vm1150_vm2, %v6618_v54, -inf }
 0xc7b   : > { %v6845_v4 = vpop.f32.mrf.mxu1  ;;  %7084 = vmax.xlane.f32.xlu0 %v7083_v34  ;;  %7081 = vmax.xlane.f32.xlu1 %v7080_v2  ;;  %v6769_v15 = vpop.f32.mrf.mxu0 }
 0xc7c   : > { %v6846_v35 = vadd.f32 %v20776_v37, %v6845_v4  ;;  %v6770_v19 = vadd.f32 %v20780_v33, %v6769_v15 }
 0xc7d   : > { %v18645_v24 = vpop.f32.mrf.mxu0  ;;  %v18650_v11 = vpop.f32.mrf.mxu1 }
 0xc7e   : > { %v7089_v51 = vsel %vm1150_vm2, %v6846_v35, -inf  ;;  %v7086_v63 = vsel %vm1150_vm2, %v6770_v19, -inf }
 0xc7f   : > { %v6997_v23 = vpop.f32.mrf.mxu1  ;;  %7090 = vmax.xlane.f32.xlu0 %v7089_v51  ;;  %7087 = vmax.xlane.f32.xlu1 %v7086_v63  ;;  %v6921_v36 = vpop.f32.mrf.mxu0 }
 0xc80   : > { %v6998_v41 = vadd.f32 %v20786_v45, %v6997_v23  ;;  %v6922_v17 = vadd.f32 %v20790_v60, %v6921_v36 }
 0xc81   : > { %v18655_v50 = vpop.f32.mrf.mxu0  ;;  %v18660_v48 = vpop.f32.mrf.mxu1 }
 0xc82   : > { %v7095_v37 = vsel %vm1150_vm2, %v6998_v41, -inf  ;;  %v7092_v33 = vsel %vm1150_vm2, %v6922_v17, -inf }
 0xc83   : > { %7096 = vmax.xlane.f32.xlu0 %v7095_v37  ;;  %7093 = vmax.xlane.f32.xlu1 %v7092_v33  ;;  %v7073_v28 = vpop.f32.mrf.mxu0 }
 0xc84   : > { %v7074_v1 = vadd.f32 %v20796_v18, %v7073_v28 }
 0xc85   : > { %v18665_v59 = vpop.f32.mrf.mxu0 }
 0xc86   : > { %v7098_v5 = vsel %vm1150_vm2, %v7074_v1, -inf }
 0xc87   : > { %7099 = vmax.xlane.f32.xlu1 %v7098_v5 }
 0xd00   : > { %v7079_v27 = vpop.xlane.xlu0 %7078 }
 0xd01   : > { %v7101_v57 = vsub.f32 %v6542_v42, %v7079_v27 }
 0xd03   : > { %v7109_v45 = vmul.f32 1.442695, %v7101_v57 }
 0xd04   : > { %v7085_v9 = vpop.xlane.xlu0 %7084  ;;  %v7082_v60 = vpop.xlane.xlu1 %7081 }
 0xd05   : > { %19552 = vpow2.f32 %v7109_v45  ;;  %v7103_v8 = vsub.f32 %v6694_v53, %v7085_v9  ;;  %v7102_v12 = vsub.f32 %v6618_v54, %v7082_v60 }
 0xd07   : > { %v7113_v56 = vmul.f32 1.442695, %v7103_v8  ;;  %v7111_v0 = vmul.f32 1.442695, %v7102_v12 }
 0xd08   : > { %v7091_v43 = vpop.xlane.xlu0 %7090  ;;  %v7088_v44 = vpop.xlane.xlu1 %7087 }
 0xd09   : > { %19554 = vpow2.f32 %v7113_v56  ;;  %v7105_v32 = vsub.f32 %v6846_v35, %v7091_v43  ;;  %v7104_v58 = vsub.f32 %v6770_v19, %v7088_v44  ;;  %v6441_v43 = vadd.f32 %v21011_v40, %v21019_v52 }
 0xd0a   : > { %19556 = vpow2.f32 %v7111_v0 }
 0xd0b   : > { %v7117_v18 = vmul.f32 1.442695, %v7105_v32  ;;  %v7115_v7 = vmul.f32 1.442695, %v7104_v58 }
 0xd0c   : > { %v7097_v34 = vpop.xlane.xlu0 %7096  ;;  %v7094_v2 = vpop.xlane.xlu1 %7093 }
 0xd0d   : > { %19558 = vpow2.f32 %v7117_v18  ;;  %v7107_v42 = vsub.f32 %v6998_v41, %v7097_v34  ;;  %v7106_v4 = vsub.f32 %v6922_v17, %v7094_v2 }
 0xd0e   : > { %19560 = vpow2.f32 %v7115_v7  ;;  %v6451_v7 = vadd.f32 %v21011_v40, %v21025_v62 }
 0xd0f   : > { %v7121_v15 = vmul.f32 1.442695, %v7107_v42  ;;  %v7119_v24 = vmul.f32 1.442695, %v7106_v4  ;;  %v6461_v4 = vadd.f32 %v21011_v40, %v21030_v39 }
 0xd10   : > { %v7100_v53 = vpop.xlane.xlu1 %7099 }
 0xd11   : > { %19562 = vpow2.f32 %v7121_v15  ;;  %v7108_v54 = vsub.f32 %v7074_v1, %v7100_v53  ;;  %v17050_v53 = vld [vmem:[%s22937_s9 + $0x18] sm:$0xff] }
 0xd12   : > { %v19553_v11 = vpop.eup %19552  ;;  %19564 = vpow2.f32 %v7119_v24 }
 0xd13   : > { %v7123_v51 = vmul.f32 1.442695, %v7108_v54  ;;  %v7125_v35 = vsel %vm1150_vm2, %v19553_v11, 0.0 }
 0xd14   : > { %7126 = vadd.xlane.f32.xlu0 %v7125_v35 }
 0xd15   : > { %19566 = vpow2.f32 %v7123_v51 }
 0xd16   : > { %v19555_v19 = vpop.eup %19554 }
 0xd17   : > { %v19557_v63 = vpop.eup %19556  ;;  %v7131_v23 = vsel %vm1150_vm2, %v19555_v19, 0.0 }
 0xd18   : > { %7132 = vadd.xlane.f32.xlu0 %v7131_v23  ;;  %v7128_v36 = vsel %vm1150_vm2, %v19557_v63, 0.0 }
 0xd19   : > { %7129 = vadd.xlane.f32.xlu1 %v7128_v36 }
 0xd1a   : > { %v19559_v41 = vpop.eup %19558 }
 0xd1b   : > { %v19561_v17 = vpop.eup %19560  ;;  %v7137_v50 = vsel %vm1150_vm2, %v19559_v41, 0.0 }
 0xd1c   : > { %7138 = vadd.xlane.f32.xlu0 %v7137_v50  ;;  %v7134_v48 = vsel %vm1150_vm2, %v19561_v17, 0.0 }
 0xd1d   : > { %7135 = vadd.xlane.f32.xlu1 %v7134_v48 }
 0xd1e   : > { %v19563_v37 = vpop.eup %19562 }
 0xd1f   : > { %v19565_v33 = vpop.eup %19564  ;;  %v7143_v28 = vsel %vm1150_vm2, %v19563_v37, 0.0 }
 0xd20   : > { %7144 = vadd.xlane.f32.xlu0 %v7143_v28  ;;  %v7140_v1 = vsel %vm1150_vm2, %v19565_v33, 0.0 }
 0xd21   : > { %7141 = vadd.xlane.f32.xlu1 %v7140_v1  ;;  %v19840_v1 = vld [vmem:[%s20025_s26] sm:$0xff] }
 0xd22   : > { %v19567_v59 = vpop.eup %19566 }
 0xd23   : > { %v7146_v5 = vsel %vm1150_vm2, %v19567_v59, 0.0 }
 0xd25   : > { %7147 = vadd.xlane.f32.xlu1 %v7146_v5 }
 0xd9d   : > { %v7127_v27 = vpop.xlane.xlu0 %7126 }
 0xd9e   : > { %19568 = vrcp.f32 %v7127_v27 }
 0xda1   : > { %v7133_v57 = vpop.xlane.xlu0 %7132 }
 0xda2   : > { %19570 = vrcp.f32 %v7133_v57  ;;  %v7130_v45 = vpop.xlane.xlu1 %7129  ;;  %v19842_v57 = vld [vmem:[%s20025_s26 + $0x10] sm:$0xff] }
 0xda3   : > { %19572 = vrcp.f32 %v7130_v45 }
 0xda5   : > { %v7139_v9 = vpop.xlane.xlu0 %7138 }
 0xda6   : > { %19574 = vrcp.f32 %v7139_v9  ;;  %v7136_v60 = vpop.xlane.xlu1 %7135 }
 0xda7   : > { %19576 = vrcp.f32 %v7136_v60 }
 0xda9   : > { %v7145_v8 = vpop.xlane.xlu0 %7144 }
 0xdaa   : > { %19578 = vrcp.f32 %v7145_v8  ;;  %v7142_v12 = vpop.xlane.xlu1 %7141 }
 0xdab   : > { %v19569_v56 = vpop.eup %19568  ;;  %19580 = vrcp.f32 %v7142_v12  ;;  %v19843_v12 = vld [vmem:[%s20025_s26 + $0x20] sm:$0xff] }
 0xdac   : > { %v7150_v0 = vmul.f32 %v19569_v56, %v19553_v11 }
 0xdae   : > { %v7148_v44 = vpop.xlane.xlu1 %7147  ;;  %18669 = vmatmul.mubr.msk.f32.vlgmr.msra.gmra.mxu1 %vm1150_vm2, %v7150_v0 }
 0xdaf   : > { %v19571_v32 = vpop.eup %19570  ;;  %19582 = vrcp.f32 %v7148_v44  ;;  %18677 = vmatpush3.msra.mxu1 %v6441_v43  ;;  %18678 = vmatprep.mubr.msk.f32.mxu1 %vm19870_vm1, %v19869_v20 }
 0xdb0   : > { %v19573_v58 = vpop.eup %19572  ;;  %v7154_v18 = vmul.f32 %v19571_v32, %v19555_v19  ;;  %18686 = vmatprep.subr.mxu1 %v19869_v20 }
 0xdb1   : > { %v7152_v34 = vmul.f32 %v19573_v58, %v19557_v63 }
 0xdb2   : > { %18679 = vmatmul.mubr.msk.f32.vlgmr.msra.gmra.mxu1 %vm1150_vm2, %v7154_v18 }
 0xdb3   : > { %v19575_v52 = vpop.eup %19574  ;;  %18674 = vmatmul.mubr.msk.f32.vlgmr.msra.gmra.mxu0 %vm1150_vm2, %v7152_v34  ;;  %18687 = vmatpush3.msra.mxu1 %v6451_v7 }
 0xdb4   : > { %v19577_v2 = vpop.eup %19576  ;;  %v7158_v42 = vmul.f32 %v19575_v52, %v19559_v41  ;;  %18682 = vmatpush3.msra.mxu0 %v21017_v46  ;;  %18683 = vmatprep.mubr.msk.f32.mxu0 %vm19870_vm1, %v19869_v20 }
 0xdb5   : > { %v7156_v15 = vmul.f32 %v19577_v2, %v19561_v17  ;;  %18688 = vmatprep.mubr.msk.f32.mxu1 %vm19870_vm1, %v19869_v20  ;;  %18691 = vmatprep.subr.mxu0 %v19869_v20 }
 0xdb6   : > { %18696 = vmatprep.subr.mxu1 %v19869_v20  ;;  %18689 = vmatmul.mubr.msk.f32.vlgmr.msra.gmra.mxu1 %vm1150_vm2, %v7158_v42 }
 0xdb7   : > { %v19579_v62 = vpop.eup %19578  ;;  %18684 = vmatmul.mubr.msk.f32.vlgmr.msra.gmra.mxu0 %vm1150_vm2, %v7156_v15  ;;  %18697 = vmatpush3.msra.mxu1 %v6461_v4 }
 0xdb8   : > { %v19581_v46 = vpop.eup %19580  ;;  %v7162_v24 = vmul.f32 %v19579_v62, %v19563_v37  ;;  %18692 = vmatpush3.msra.mxu0 %v21023_v29  ;;  %18693 = vmatprep.mubr.msk.f32.mxu0 %vm19870_vm1, %v19869_v20 }
 0xdb9   : > { %v7160_v40 = vmul.f32 %v19581_v46, %v19565_v33  ;;  %18698 = vmatprep.mubr.msk.f32.mxu1 %vm19870_vm1, %v19869_v20  ;;  %18701 = vmatprep.subr.mxu0 %v19869_v20 }
 0xdba   : > { %18699 = vmatmul.mubr.msk.f32.vlgmr.msra.gmra.mxu1 %vm1150_vm2, %v7162_v24  ;;  %18706 = vmatprep.subr.mxu1 %v17050_v53 }
 0xdbb   : > { %18694 = vmatmul.mubr.msk.f32.vlgmr.msra.gmra.mxu0 %vm1150_vm2, %v7160_v40  ;;  %18707 = vmatpush3.msra.mxu1 %v17050_v53 }
 0xdbc   : > { %v19583_v39 = vpop.eup %19582  ;;  %18702 = vmatpush3.msra.mxu0 %v21028_v38  ;;  %18703 = vmatprep.mubr.msk.f32.mxu0 %vm19870_vm1, %v19869_v20 }
 0xdbd   : > { %v7164_v29 = vmul.f32 %v19583_v39, %v19567_v59  ;;  %v19841_v59 = vld [vmem:[%s22938_s10] ss:$0 sm:$0xff] }
 0xdbe   : > { %v721_v5 = vadd.f32 %v19841_v59, %v19840_v1  ;;  %v723_v45 = vadd.f32 %v19842_v57, %v19841_v59  ;;  %v725_v56 = vadd.f32 %v19843_v12, %v19841_v59 }
 0xdbf   : > { %18704 = vmatmul.mubr.msk.f32.vlgmr.msra.gmra.mxu0 %vm1150_vm2, %v7164_v29 }
 0xdc0   : > { %v2561_v27 = vadd.f32 %v20397_v10, %v721_v5  ;;  %v2563_v8 = vadd.f32 %v20401_v13, %v723_v45  ;;  %v19844_v10 = vld [vmem:[%s20025_s26 + $0x30] sm:$0xff]  ;;  %s22970_s26 = sld [smem:[#allocation9_spill]] }
 0xdc1   : > { %v727_v7 = vadd.f32 %v19844_v10, %v19841_v59 }
 0xdc2   : > { %v4334_v9 = vadd.f32 %v20671_v49, %v2561_v27  ;;  %v4336_v32 = vadd.f32 %v20677_v55, %v2563_v8  ;;  %v2565_v49 = vadd.f32 %v20405_v16, %v725_v56 }
 0xdc3   : > { %v2567_v15 = vadd.f32 %v20409_v22, %v727_v7 }
 0xdc4   : > { %v6107_v0 = vadd.f32 %v20945_v26, %v4334_v9  ;;  %v6109_v13 = vadd.f32 %v20950_v30, %v4336_v32 }
 0xdc5   : > { %v4340_v46 = vadd.f32 %v20688_v14, %v2567_v15 }
 0xdc7   : > { %v6113_v39 = vadd.f32 %v20960_v3, %v4340_v46 }
 0xe6e   : > { %v7234_v54 = vpop.f32.mrf.mxu1 }
 0xe6f   : > { %18708 = vmatprep.mubr.msk.f32.mxu1 %vm1150_vm2, %v7234_v54 }
 0xe70   : > { %v18670_v11 = vpop.f32.mrf.mxu1 }
 0xe72   : > { %v7380_v51 = vpop.f32.mrf.mxu1 }
 0xe73   : > { %v7307_v35 = vpop.f32.mrf.mxu0 }
 0xe74   : > { %18709 = vmatmul.mubr.msk.f32.vlgmr.msra.gmra.mxu1 %vm1150_vm2, %v7307_v35  ;;  %v18680_v38 = vpop.f32.mrf.mxu1 }
 0xe75   : > { %v18675_v19 = vpop.f32.mrf.mxu0  ;;  %18711 = vmatprep.mubr.msk.f32.mxu1 %vm1150_vm2, %v7380_v51 }
 0xe76   : > { %v7526_v63 = vpop.f32.mrf.mxu1 }
 0xe77   : > { %v7453_v23 = vpop.f32.mrf.mxu0 }
 0xe78   : > { %18712 = vmatmul.mubr.msk.f32.gmra.mxu1 %vm1150_vm2, %v7453_v23  ;;  %v18690_v36 = vpop.f32.mrf.mxu1 }
 0xe79   : > { %v18685_v41 = vpop.f32.mrf.mxu0  ;;  %18714 = vmatprep.mubr.msk.f32.mxu1 %vm1150_vm2, %v7526_v63 }
 0xe7a   : > { %v7672_v17 = vpop.f32.mrf.mxu1 }
 0xe7b   : > { %v7599_v50 = vpop.f32.mrf.mxu0 }
 0xe7c   : > { %18715 = vmatmul.mubr.msk.f32.gmra.mxu1 %vm1150_vm2, %v7599_v50  ;;  %v18700_v48 = vpop.f32.mrf.mxu1 }
 0xe7d   : > { %v18695_v37 = vpop.f32.mrf.mxu0  ;;  %18717 = vmatprep.mubr.msk.f32.mxu1 %vm1150_vm2, %v7672_v17 }
 0xe7f   : > { %v7745_v33 = vpop.f32.mrf.mxu0 }
 0xe80   : > { %18718 = vmatmul.mubr.msk.f32.gmra.mxu1 %vm1150_vm2, %v7745_v33 }
 0xe81   : > { %v18705_v28 = vpop.f32.mrf.mxu0 }
 0xf34   : > { %v18710_v60 = vpop.f32.mrf.mxu1 }
 0xf35   : > { %v7881_v43 = vadd.f32 %v18710_v60, %v20943_v25  ;;  %v4338_v25 = vadd.f32 %v20683_v61, %v2565_v49 }
 0xf36   : > { %v7841_v44 = vpop.f32.mrf.mxu1 }
 0xf37   : > { %v7880_v58 = vadd.f32 %v7841_v44, %v6107_v0  ;;  %v7893_v18 = vsel %vm740_vm0, %v7881_v43, 0.0  ;;  %v6111_v62 = vadd.f32 %v20955_v31, %v4338_v25  ;;  %v8023_v25 = vld [vmem:[%s22941_s13] sm:$0xff] }
 0xf38   : > { %7894 = vadd.xlane.f32.xlu1 %v7893_v18  ;;  %v18713_v34 = vpop.f32.mrf.mxu1 }
 0xf39   : > { %v7883_v52 = vadd.f32 %v18713_v34, %v20948_v21  ;;  %v7890_v26 = vsel %vm740_vm0, %v7880_v58, 0.0 }
 0xf3a   : > { %v7851_v2 = vpop.f32.mrf.mxu1  ;;  %7891 = vadd.xlane.f32.xlu0 %v7890_v26  ;;  %v8025_v26 = vld [vmem:[%s22941_s13 + $0x10] sm:$0xff] }
 0xf3b   : > { %v7882_v55 = vadd.f32 %v7851_v2, %v6109_v13  ;;  %v7899_v42 = vsel %vm740_vm0, %v7883_v52, 0.0  ;;  %v8024_v2 = vld [vmem:[%s22941_s13 + $0x8] sm:$0xff] }
 0xf3c   : > { %7900 = vadd.xlane.f32.xlu1 %v7899_v42  ;;  %v18716_v4 = vpop.f32.mrf.mxu1 }
 0xf3d   : > { %v7885_v16 = vadd.f32 %v18716_v4, %v20953_v6  ;;  %v7896_v30 = vsel %vm740_vm0, %v7882_v55, 0.0 }
 0xf3e   : > { %v7861_v21 = vpop.f32.mrf.mxu1  ;;  %7897 = vadd.xlane.f32.xlu0 %v7896_v30 }
 0xf3f   : > { %v7884_v24 = vadd.f32 %v7861_v21, %v6111_v62  ;;  %v7905_v61 = vsel %vm740_vm0, %v7885_v16, 0.0 }
 0xf40   : > { %7906 = vadd.xlane.f32.xlu1 %v7905_v61  ;;  %v18719_v40 = vpop.f32.mrf.mxu1 }
 0xf41   : > { %v7887_v29 = vadd.f32 %v18719_v40, %v20958_v47  ;;  %v7902_v22 = vsel %vm740_vm0, %v7884_v24, 0.0 }
 0xf42   : > { %v7871_v31 = vpop.f32.mrf.mxu1  ;;  %7903 = vadd.xlane.f32.xlu0 %v7902_v22 }
 0xf43   : > { %v7886_v6 = vadd.f32 %v7871_v31, %v6113_v39  ;;  %v7911_v53 = vsel %vm740_vm0, %v7887_v29, 0.0 }
 0xf44   : > { %7912 = vadd.xlane.f32.xlu1 %v7911_v53 }
 0xf45   : > { %v7908_v54 = vsel %vm740_vm0, %v7886_v6, 0.0 }
 0xf46   : > { %7909 = vadd.xlane.f32.xlu0 %v7908_v54 }
 0xfc1   : > { %v7895_v14 = vpop.xlane.xlu1 %7894 }
 0xfc2   : > { %v7916_v11 = vmul.f32 0.03125, %v7895_v14 }
 0xfc3   : > { %v7892_v51 = vpop.xlane.xlu0 %7891 }
 0xfc4   : > { %v21131_v35 = vsub.f32 %v7881_v43, %v7916_v11  ;;  %v7915_v38 = vmul.f32 0.03125, %v7892_v51 }
 0xfc5   : > { %v7901_v3 = vpop.xlane.xlu1 %7900 }
 0xfc6   : > { %v21133_v19 = vsub.f32 %v7880_v58, %v7915_v38  ;;  %v7918_v47 = vmul.f32 0.03125, %v7901_v3  ;;  %v7932_v63 = vmul.f32 %v21131_v35, %v21131_v35 }
 0xfc7   : > { %v7898_v23 = vpop.xlane.xlu0 %7897 }
 0xfc8   : > { %v21137_v36 = vsub.f32 %v7883_v52, %v7918_v47  ;;  %v7917_v41 = vmul.f32 0.03125, %v7898_v23  ;;  %v7942_v17 = vsel %vm740_vm0, %v7932_v63, 0.0  ;;  %v7931_v50 = vmul.f32 %v21133_v19, %v21133_v19  ;;  %v8026_v52 = vld [vmem:[%s22941_s13 + $0x18] sm:$0xff]  ;;  %v17059_v63 = vld [vmem:[%s22939_s11] ss:$0 sm:$0xff] }
 0xfc9   : > { %v7907_v48 = vpop.xlane.xlu1 %7906  ;;  %7943 = vadd.xlane.f32.xlu1 %v7942_v17  ;;  %18720 = vmatprep.subr.mxu0 %v8026_v52 }
 0xfca   : > { %v21142_v37 = vsub.f32 %v7882_v55, %v7917_v41  ;;  %v7920_v33 = vmul.f32 0.03125, %v7907_v48  ;;  %v7939_v28 = vsel %vm740_vm0, %v7931_v50, 0.0  ;;  %v7934_v1 = vmul.f32 %v21137_v36, %v21137_v36  ;;  %18721 = vmatpush3.msra.mxu0 %v8026_v52  ;;  %v8241_v52 = vld [vmem:[%s22943_s15 + $0x30] sm:$0xff] }
 0xfcb   : > { %7940 = vadd.xlane.f32.xlu0 %v7939_v28  ;;  %v7904_v59 = vpop.xlane.xlu0 %7903  ;;  %18722 = vmatprep.subr.mxu0 %v8025_v26 }
 0xfcc   : > { %v21147_v5 = vsub.f32 %v7885_v16, %v7920_v33  ;;  %v7919_v27 = vmul.f32 0.03125, %v7904_v59  ;;  %v7948_v57 = vsel %vm740_vm0, %v7934_v1, 0.0  ;;  %v7933_v45 = vmul.f32 %v21142_v37, %v21142_v37  ;;  %18723 = vmatpush3.msra.mxu0 %v8025_v26  ;;  %v17060_v33 = vld [vmem:[%s22940_s12] ss:$0 sm:$0xff]  ;;  %v8240_v26 = vld [vmem:[%s22943_s15 + $0x28] sm:$0xff] }
 0xfcd   : > { %7949 = vadd.xlane.f32.xlu1 %v7948_v57  ;;  %v7913_v9 = vpop.xlane.xlu1 %7912  ;;  %18724 = vmatprep.subr.mxu0 %v8024_v2 }
 0xfce   : > { %v21152_v60 = vsub.f32 %v7884_v24, %v7919_v27  ;;  %v7922_v8 = vmul.f32 0.03125, %v7913_v9  ;;  %v7945_v12 = vsel %vm740_vm0, %v7933_v45, 0.0  ;;  %v7936_v56 = vmul.f32 %v21147_v5, %v21147_v5  ;;  %18725 = vmatpush3.msra.mxu0 %v8024_v2  ;;  %v8239_v2 = vld [vmem:[%s22943_s15 + $0x20] sm:$0xff] }
 0xfcf   : > { %7946 = vadd.xlane.f32.xlu0 %v7945_v12  ;;  %v7910_v0 = vpop.xlane.xlu0 %7909  ;;  %18726 = vmatprep.subr.mxu0 %v8023_v25 }
 0xfd0   : > { %v21157_v43 = vsub.f32 %v7887_v29, %v7922_v8  ;;  %v7921_v44 = vmul.f32 0.03125, %v7910_v0  ;;  %v7954_v32 = vsel %vm740_vm0, %v7936_v56, 0.0  ;;  %v7935_v58 = vmul.f32 %v21152_v60, %v21152_v60  ;;  %18727 = vmatpush3.msra.mxu0 %v8023_v25  ;;  %v8238_v25 = vld [vmem:[%s22943_s15 + $0x18] sm:$0xff] }
 0xfd1   : > { %7955 = vadd.xlane.f32.xlu1 %v7954_v32 }
 0xfd2   : > { %v21162_v18 = vsub.f32 %v7886_v6, %v7921_v44  ;;  %v7951_v10 = vsel %vm740_vm0, %v7935_v58, 0.0  ;;  %v7938_v7 = vmul.f32 %v21157_v43, %v21157_v43 }
 0xfd3   : > { %7952 = vadd.xlane.f32.xlu0 %v7951_v10 }
 0xfd4   : > { %v7960_v34 = vsel %vm740_vm0, %v7938_v7, 0.0  ;;  %v7937_v49 = vmul.f32 %v21162_v18, %v21162_v18 }
 0xfd5   : > { %7961 = vadd.xlane.f32.xlu1 %v7960_v34 }
 0xfd6   : > { %v7957_v13 = vsel %vm740_vm0, %v7937_v49, 0.0 }
 0xfd7   : > { %7958 = vadd.xlane.f32.xlu0 %v7957_v13 }
0x1052   : > { %v7944_v55 = vpop.xlane.xlu1 %7943 }
0x1053   : > { %v7964_v42 = vmul.f32 0.03125, %v7944_v55  ;;  %v8237_v55 = vld [vmem:[%s22943_s15 + $0x10] sm:$0xff] }
0x1054   : > { %v7941_v4 = vpop.xlane.xlu0 %7940 }
0x1055   : > { %v7972_v15 = vadd.f32 1e-12, %v7964_v42  ;;  %v7963_v62 = vmul.f32 0.03125, %v7941_v4  ;;  %v8236_v42 = vld [vmem:[%s22943_s15 + $0x8] sm:$0xff]  ;;  %v8235_v4 = vld [vmem:[%s22943_s15] sm:$0xff] }
0x1056   : > { %v7950_v16 = vpop.xlane.xlu1 %7949 }
0x1057   : > { %19584 = vrsqrt.f32 %v7972_v15  ;;  %v7971_v30 = vadd.f32 1e-12, %v7963_v62  ;;  %v7966_v21 = vmul.f32 0.03125, %v7950_v16  ;;  %v17061_v15 = vld [vmem:[%s22942_s14] ss:$0 sm:$0xff] }
0x1058   : > { %v7947_v46 = vpop.xlane.xlu0 %7946 }
0x1059   : > { %19586 = vrsqrt.f32 %v7971_v30  ;;  %v7974_v24 = vadd.f32 1e-12, %v7966_v21  ;;  %v7965_v61 = vmul.f32 0.03125, %v7947_v46 }
0x105a   : > { %v7956_v40 = vpop.xlane.xlu1 %7955 }
0x105b   : > { %19588 = vrsqrt.f32 %v7974_v24  ;;  %v7973_v39 = vadd.f32 1e-12, %v7965_v61  ;;  %v7968_v29 = vmul.f32 0.03125, %v7956_v40 }
0x105c   : > { %v7953_v22 = vpop.xlane.xlu0 %7952 }
0x105d   : > { %19590 = vrsqrt.f32 %v7973_v39  ;;  %v7976_v31 = vadd.f32 1e-12, %v7968_v29  ;;  %v7967_v6 = vmul.f32 0.03125, %v7953_v22 }
0x105e   : > { %v7962_v53 = vpop.xlane.xlu1 %7961 }
0x105f   : > { %19592 = vrsqrt.f32 %v7976_v31  ;;  %v7975_v54 = vadd.f32 1e-12, %v7967_v6  ;;  %v7970_v14 = vmul.f32 0.03125, %v7962_v53 }
0x1060   : > { %v7959_v11 = vpop.xlane.xlu0 %7958 }
0x1061   : > { %19594 = vrsqrt.f32 %v7975_v54  ;;  %v7978_v51 = vadd.f32 1e-12, %v7970_v14  ;;  %v7969_v38 = vmul.f32 0.03125, %v7959_v11 }
0x1063   : > { %19596 = vrsqrt.f32 %v7978_v51  ;;  %v7977_v3 = vadd.f32 1e-12, %v7969_v38 }
0x1064   : > { %v19585_v47 = vpop.eup %19584 }
0x1065   : > { %v7988_v23 = vmul.f32 %v19585_v47, %v21131_v35  ;;  %19598 = vrsqrt.f32 %v7977_v3 }
0x1066   : > { %v19587_v41 = vpop.eup %19586 }
0x1067   : > { %v7987_v17 = vmul.f32 %v19587_v41, %v21133_v19  ;;  %v8002_v48 = vmul.f32 %v17059_v63, %v7988_v23 }
0x1068   : > { %v19589_v50 = vpop.eup %19588 }
0x1069   : > { %v8001_v28 = vmul.f32 %v17059_v63, %v7987_v17  ;;  %v7990_v1 = vmul.f32 %v19589_v50, %v21137_v36  ;;  %v21195_v35 = vadd.f32 %v17060_v33, %v8002_v48 }
0x106a   : > { %v19591_v59 = vpop.eup %19590 }
0x106b   : > { %v21192_v27 = vadd.f32 %v17060_v33, %v8001_v28  ;;  %v7989_v57 = vmul.f32 %v19591_v59, %v21142_v37  ;;  %v8004_v9 = vmul.f32 %v17059_v63, %v7990_v1 }
0x106c   : > { %v19593_v45 = vpop.eup %19592 }
0x106d   : > { %18728 = vmatprep.mubr.msk.f32.mxu0 %vm740_vm0, %v21192_v27  ;;  %v8003_v19 = vmul.f32 %v17059_v63, %v7989_v57  ;;  %v7992_v8 = vmul.f32 %v19593_v45, %v21147_v5  ;;  %v21205_v37 = vadd.f32 %v17060_v33, %v8004_v9 }
0x106e   : > { %v19595_v12 = vpop.eup %19594  ;;  %18729 = vmatmul.mubr.msk.f32.vlgmr.msra.gmra.mxu0 %vm740_vm0, %v21195_v35 }
0x106f   : > { %v21202_v36 = vadd.f32 %v17060_v33, %v8003_v19  ;;  %v7991_v56 = vmul.f32 %v19595_v12, %v21152_v60  ;;  %v8006_v44 = vmul.f32 %v17059_v63, %v7992_v8 }
0x1070   : > { %v19597_v0 = vpop.eup %19596 }
0x1071   : > { %18731 = vmatprep.mubr.msk.f32.mxu0 %vm740_vm0, %v21202_v36  ;;  %v8005_v32 = vmul.f32 %v17059_v63, %v7991_v56  ;;  %v7994_v58 = vmul.f32 %v19597_v0, %v21157_v43  ;;  %v21215_v34 = vadd.f32 %v17060_v33, %v8006_v44 }
0x1072   : > { %v19599_v10 = vpop.eup %19598  ;;  %18732 = vmatmul.mubr.msk.f32.gmra.mxu0 %vm740_vm0, %v21205_v37 }
0x1073   : > { %v21212_v5 = vadd.f32 %v17060_v33, %v8005_v32  ;;  %v7993_v7 = vmul.f32 %v19599_v10, %v21162_v18  ;;  %v8008_v60 = vmul.f32 %v17059_v63, %v7994_v58  ;;  %v8242_v18 = vld [vmem:[%s22943_s15 + $0x38] sm:$0xff] }
0x1074   : > { %18740 = vmatprep.subr.mxu1 %v8242_v18 }
0x1075   : > { %18734 = vmatprep.mubr.msk.f32.mxu0 %vm740_vm0, %v21212_v5  ;;  %v8007_v49 = vmul.f32 %v17059_v63, %v7993_v7  ;;  %v21223_v43 = vadd.f32 %v17060_v33, %v8008_v60  ;;  %18741 = vmatpush3.msra.mxu1 %v8242_v18 }
0x1076   : > { %18735 = vmatmul.mubr.msk.f32.gmra.mxu0 %vm740_vm0, %v21215_v34  ;;  %18742 = vmatprep.subr.mxu1 %v8241_v52 }
0x1077   : > { %v21221_v13 = vadd.f32 %v17060_v33, %v8007_v49  ;;  %18743 = vmatpush3.msra.mxu1 %v8241_v52 }
0x1078   : > { %18744 = vmatprep.subr.mxu1 %v8240_v26 }
0x1079   : > { %18737 = vmatprep.mubr.msk.f32.mxu0 %vm740_vm0, %v21221_v13  ;;  %18745 = vmatpush3.msra.mxu1 %v8240_v26 }
0x107a   : > { %18738 = vmatmul.mubr.msk.f32.gmra.mxu0 %vm740_vm0, %v21223_v43  ;;  %18746 = vmatprep.subr.mxu1 %v8239_v2 }
0x107b   : > { %18747 = vmatpush3.msra.mxu1 %v8239_v2 }
0x107c   : > { %18748 = vmatprep.subr.mxu1 %v8238_v25 }
0x107d   : > { %18749 = vmatpush3.msra.mxu1 %v8238_v25 }
0x107e   : > { %18750 = vmatprep.subr.mxu1 %v8237_v55 }
0x107f   : > { %18751 = vmatpush3.msra.mxu1 %v8237_v55 }
0x1080   : > { %18752 = vmatprep.subr.mxu1 %v8236_v42 }
0x1081   : > { %18753 = vmatpush3.msra.mxu1 %v8236_v42 }
0x1082   : > { %18754 = vmatprep.subr.mxu1 %v8235_v4 }
0x1083   : > { %18755 = vmatpush3.msra.mxu1 %v8235_v4 }
0x112e   : > { %v18730_v62 = vpop.f32.mrf.mxu0 }
0x112f   : > { %v21256_v16 = vadd.f32 %v18730_v62, %v17061_v15 }
0x1130   : > { %v8124_v30 = vpop.f32.mrf.mxu0 }
0x1131   : > { %v8172_v21 = vmul.f32 0.044715, %v21256_v16  ;;  %v21259_v46 = vadd.f32 %v17061_v15, %v8124_v30 }
0x1132   : > { %v18733_v24 = vpop.f32.mrf.mxu0 }
0x1133   : > { %v8180_v61 = vmul.f32 %v8172_v21, %v21256_v16  ;;  %v8171_v40 = vmul.f32 0.044715, %v21259_v46  ;;  %v21263_v39 = vadd.f32 %v18733_v24, %v17061_v15 }
0x1134   : > { %v8134_v29 = vpop.f32.mrf.mxu0 }
0x1135   : > { %v8188_v22 = vmul.f32 %v8180_v61, %v21256_v16  ;;  %v8179_v31 = vmul.f32 %v8171_v40, %v21259_v46  ;;  %v8174_v6 = vmul.f32 0.044715, %v21263_v39  ;;  %v21268_v53 = vadd.f32 %v17061_v15, %v8134_v29 }
0x1136   : > { %v18736_v54 = vpop.f32.mrf.mxu0  ;;  %v8163_v40 = vmul.f32 0.5, %v21259_v46 }
0x1137   : > { %v8196_v14 = vadd.f32 %v8188_v22, %v21256_v16  ;;  %v8187_v11 = vmul.f32 %v8179_v31, %v21259_v46  ;;  %v8182_v51 = vmul.f32 %v8174_v6, %v21263_v39  ;;  %v21273_v38 = vadd.f32 %v18736_v54, %v17061_v15 }
0x1138   : > { %v8173_v3 = vmul.f32 0.044715, %v21268_v53  ;;  %v8144_v47 = vpop.f32.mrf.mxu0  ;;  %v8164_v22 = vmul.f32 0.5, %v21256_v16 }
0x1139   : > { %v8204_v63 = vmul.f32 0.7978846, %v8196_v14  ;;  %v8190_v23 = vmul.f32 %v8182_v51, %v21263_v39  ;;  %v8176_v41 = vmul.f32 0.044715, %v21273_v38  ;;  %v21279_v50 = vadd.f32 %v17061_v15, %v8144_v47 }
0x113a   : > { %v8181_v17 = vmul.f32 %v8173_v3, %v21268_v53  ;;  %v18739_v48 = vpop.f32.mrf.mxu0  ;;  %v8195_v33 = vadd.f32 %v8187_v11, %v21259_v46  ;;  %v8165_v51 = vmul.f32 0.5, %v21268_v53  ;;  %v8166_v47 = vmul.f32 0.5, %v21263_v39 }
0x113b   : > { %19600 = vtanh.f32 %v8204_v63  ;;  %v8198_v28 = vadd.f32 %v8190_v23, %v21263_v39  ;;  %v8184_v1 = vmul.f32 %v8176_v41, %v21273_v38  ;;  %v21284_v59 = vadd.f32 %v18739_v48, %v17061_v15 }
0x113c   : > { %v8189_v57 = vmul.f32 %v8181_v17, %v21268_v53  ;;  %v8175_v45 = vmul.f32 0.044715, %v21279_v50  ;;  %v8154_v9 = vpop.f32.mrf.mxu0  ;;  %v8203_v19 = vmul.f32 0.7978846, %v8195_v33  ;;  %v8167_v17 = vmul.f32 0.5, %v21279_v50 }
0x113d   : > { %v8206_v8 = vmul.f32 0.7978846, %v8198_v28  ;;  %v8192_v12 = vmul.f32 %v8184_v1, %v21273_v38  ;;  %v8178_v56 = vmul.f32 0.044715, %v21284_v59  ;;  %v8155_v44 = vadd.f32 %v17061_v15, %v8154_v9 }
0x113e   : > { %v8183_v0 = vmul.f32 %v8175_v45, %v21279_v50  ;;  %19602 = vtanh.f32 %v8203_v19  ;;  %v8197_v32 = vadd.f32 %v8189_v57, %v21268_v53  ;;  %v8168_v33 = vmul.f32 0.5, %v21273_v38 }
0x113f   : > { %19604 = vtanh.f32 %v8206_v8  ;;  %v8200_v58 = vadd.f32 %v8192_v12, %v21273_v38  ;;  %v8186_v10 = vmul.f32 %v8178_v56, %v21284_v59  ;;  %v8177_v60 = vmul.f32 0.044715, %v8155_v44  ;;  %v17070_v38 = vld [vmem:[%s22944_s16] ss:$0 sm:$0xff] }
0x1140   : > { %v8191_v7 = vmul.f32 %v8183_v0, %v21279_v50  ;;  %v8205_v49 = vmul.f32 0.7978846, %v8197_v32  ;;  %v8169_v57 = vmul.f32 0.5, %v8155_v44  ;;  %v8170_v9 = vmul.f32 0.5, %v21284_v59 }
0x1141   : > { %v8208_v18 = vmul.f32 0.7978846, %v8200_v58  ;;  %v8194_v52 = vmul.f32 %v8186_v10, %v21284_v59  ;;  %v8185_v26 = vmul.f32 %v8177_v60, %v8155_v44 }
0x1142   : > { %19606 = vtanh.f32 %v8205_v49  ;;  %v8199_v2 = vadd.f32 %v8191_v7, %v21279_v50 }
0x1143   : > { %19608 = vtanh.f32 %v8208_v18  ;;  %v8202_v25 = vadd.f32 %v8194_v52, %v21284_v59  ;;  %v8193_v55 = vmul.f32 %v8185_v26, %v8155_v44 }
0x1144   : > { %v8207_v42 = vmul.f32 0.7978846, %v8199_v2 }
0x1145   : > { %v8210_v4 = vmul.f32 0.7978846, %v8202_v25  ;;  %v8201_v15 = vadd.f32 %v8193_v55, %v8155_v44 }
0x1146   : > { %19610 = vtanh.f32 %v8207_v42 }
0x1147   : > { %19612 = vtanh.f32 %v8210_v4  ;;  %v8209_v30 = vmul.f32 0.7978846, %v8201_v15 }
0x1148   : > { %v19601_v62 = vpop.eup %19600 }
0x1149   : > { %19614 = vtanh.f32 %v8209_v30  ;;  %v8220_v24 = vadd.f32 1.0, %v19601_v62 }
0x114b   : > { %v19603_v21 = vpop.eup %19602  ;;  %v8228_v54 = vmul.f32 %v8220_v24, %v8164_v22 }
0x114c   : > { %v19605_v61 = vpop.eup %19604  ;;  %v8219_v29 = vadd.f32 1.0, %v19603_v21 }
0x114d   : > { %v8222_v14 = vadd.f32 1.0, %v19605_v61 }
0x114e   : > { %v8227_v31 = vmul.f32 %v8219_v29, %v8163_v40 }
0x114f   : > { %v19607_v6 = vpop.eup %19606  ;;  %v8230_v23 = vmul.f32 %v8222_v14, %v8166_v47 }
0x1150   : > { %v19609_v11 = vpop.eup %19608  ;;  %18756 = vmatprep.mubr.msk.f32.mxu1 %vm8250_vm3, %v8227_v31  ;;  %v8221_v3 = vadd.f32 1.0, %v19607_v6 }
0x1151   : > { %18757 = vmatmul.mubr.msk.f32.vlgmr.msra.gmra.mxu1 %vm8250_vm3, %v8228_v54  ;;  %v8224_v41 = vadd.f32 1.0, %v19609_v11 }
0x1152   : > { %v8229_v63 = vmul.f32 %v8221_v3, %v8165_v51 }
0x1153   : > { %v19611_v46 = vpop.eup %19610  ;;  %v8232_v1 = vmul.f32 %v8224_v41, %v8168_v33 }
0x1154   : > { %v19613_v16 = vpop.eup %19612  ;;  %18759 = vmatprep.mubr.msk.f32.mxu1 %vm8250_vm3, %v8229_v63  ;;  %v8223_v48 = vadd.f32 1.0, %v19611_v46 }
0x1155   : > { %18760 = vmatmul.mubr.msk.f32.gmra.mxu1 %vm8250_vm3, %v8230_v23  ;;  %v8226_v39 = vadd.f32 1.0, %v19613_v16 }
0x1156   : > { %v8231_v53 = vmul.f32 %v8223_v48, %v8167_v17  ;;  %v19615_v28 = vpop.eup %19614 }
0x1157   : > { %v8225_v45 = vadd.f32 1.0, %v19615_v28  ;;  %v8234_v8 = vmul.f32 %v8226_v39, %v8170_v9 }
0x1158   : > { %18762 = vmatprep.mubr.msk.f32.mxu1 %vm8250_vm3, %v8231_v53 }
0x1159   : > { %18763 = vmatmul.mubr.msk.f32.gmra.mxu1 %vm8250_vm3, %v8232_v1  ;;  %v8233_v19 = vmul.f32 %v8225_v45, %v8169_v57 }
0x115b   : > { %18765 = vmatprep.mubr.msk.f32.mxu1 %vm8250_vm3, %v8233_v19 }
0x115d   : > { %18766 = vmatmul.mubr.msk.f32.gmra.mxu1 %vm8250_vm3, %v8234_v8 }
0x1211   : > { %v18758_v50 = vpop.f32.mrf.mxu1 }
0x1212   : > { %v8347_v12 = vadd.f32 %v18758_v50, %v17070_v38 }
0x1213   : > { %v8341_v56 = vpop.f32.mrf.mxu1 }
0x1214   : > { %v8342_v0 = vadd.f32 %v17070_v38, %v8341_v56  ;;  %v8381_v44 = vadd.f32 %v8347_v12, %v21195_v35 }
0x1215   : > { %v18761_v32 = vpop.f32.mrf.mxu1 }
0x1216   : > { %v8357_v59 = vadd.f32 %v18761_v32, %v17070_v38  ;;  %v8393_v58 = vsel %vm740_vm0, %v8381_v44, 0.0  ;;  %v8380_v10 = vadd.f32 %v8342_v0, %v21192_v27 }
0x1217   : > { %8394 = vadd.xlane.f32.xlu1 %v8393_v58  ;;  %v8351_v7 = vpop.f32.mrf.mxu1 }
0x1218   : > { %v8352_v60 = vadd.f32 %v17070_v38, %v8351_v7  ;;  %v8390_v49 = vsel %vm740_vm0, %v8380_v10, 0.0  ;;  %v8383_v18 = vadd.f32 %v8357_v59, %v21205_v37  ;;  %v17086_v7 = vld [vmem:[%s22964_s0 + $0x98] sm:$0xff] }
0x1219   : > { %8391 = vadd.xlane.f32.xlu0 %v8390_v49  ;;  %v18764_v52 = vpop.f32.mrf.mxu1  ;;  %18768 = vmatprep.subr.mxu0 %v17086_v7  ;;  %v17085_v49 = vld [vmem:[%s22964_s0 + $0x90] sm:$0xff] }
0x121a   : > { %v8367_v26 = vadd.f32 %v18764_v52, %v17070_v38  ;;  %v8399_v2 = vsel %vm740_vm0, %v8383_v18, 0.0  ;;  %v8382_v35 = vadd.f32 %v8352_v60, %v21202_v36  ;;  %v17100_v60 = vld [vmem:[%s22963_s3 + $0x98] sm:$0xff]  ;;  %18769 = vmatpush3.msra.mxu0 %v17086_v7  ;;  %v17084_v52 = vld [vmem:[%s22964_s0 + $0x88] sm:$0xff] }
0x121b   : > { %8400 = vadd.xlane.f32.xlu1 %v8399_v2  ;;  %v8361_v25 = vpop.f32.mrf.mxu1  ;;  %18788 = vmatprep.subr.mxu1 %v17100_v60  ;;  %v17083_v2 = vld [vmem:[%s22964_s0 + $0x80] sm:$0xff]  ;;  %v17112_v7 = vld [vmem:[%s22935_s7 + $0x88] sm:$0xff] }
0x121c   : > { %v8362_v55 = vadd.f32 %v17070_v38, %v8361_v25  ;;  %v8396_v42 = vsel %vm740_vm0, %v8382_v35, 0.0  ;;  %v8385_v27 = vadd.f32 %v8367_v26, %v21215_v34  ;;  %18789 = vmatpush3.msra.mxu1 %v17100_v60  ;;  %18770 = vmatprep.subr.mxu0 %v17085_v49  ;;  %v17098_v26 = vld [vmem:[%s22963_s3 + $0x88] sm:$0xff]  ;;  %v17114_v25 = vld [vmem:[%s22935_s7 + $0x98] sm:$0xff] }
0x121d   : > { %8397 = vadd.xlane.f32.xlu0 %v8396_v42  ;;  %v18767_v4 = vpop.f32.mrf.mxu1  ;;  %18771 = vmatpush3.msra.mxu0 %v17085_v49 }
0x121e   : > { %v8377_v15 = vadd.f32 %v18767_v4, %v17070_v38  ;;  %v8405_v62 = vsel %vm740_vm0, %v8385_v27, 0.0  ;;  %v8384_v37 = vadd.f32 %v8362_v55, %v21212_v5  ;;  %18772 = vmatprep.subr.mxu0 %v17084_v52 }
0x121f   : > { %8406 = vadd.xlane.f32.xlu1 %v8405_v62  ;;  %v8371_v30 = vpop.f32.mrf.mxu1  ;;  %18773 = vmatpush3.msra.mxu0 %v17084_v52 }
0x1220   : > { %v8372_v21 = vadd.f32 %v17070_v38, %v8371_v30  ;;  %v8402_v24 = vsel %vm740_vm0, %v8384_v37, 0.0  ;;  %v8387_v36 = vadd.f32 %v8377_v15, %v21223_v43  ;;  %18774 = vmatprep.subr.mxu0 %v17083_v2 }
0x1221   : > { %8403 = vadd.xlane.f32.xlu0 %v8402_v24  ;;  %18775 = vmatpush3.msra.mxu0 %v17083_v2 }
0x1222   : > { %v8411_v61 = vsel %vm740_vm0, %v8387_v36, 0.0  ;;  %v8386_v40 = vadd.f32 %v8372_v21, %v21221_v13  ;;  %18808 = vmatprep.subr.mxu0 %v17114_v25 }
0x1223   : > { %8412 = vadd.xlane.f32.xlu1 %v8411_v61 }
0x1224   : > { %v8408_v34 = vsel %vm740_vm0, %v8386_v40, 0.0 }
0x1225   : > { %8409 = vadd.xlane.f32.xlu0 %v8408_v34 }
0x12a0   : > { %v8395_v29 = vpop.xlane.xlu1 %8394 }
0x12a1   : > { %v8415_v22 = vmul.f32 0.03125, %v8395_v29 }
0x12a2   : > { %v8392_v31 = vpop.xlane.xlu0 %8391 }
0x12a3   : > { %v21332_v5 = vsub.f32 %v8381_v44, %v8415_v22  ;;  %v8414_v6 = vmul.f32 0.03125, %v8392_v31 }
0x12a4   : > { %v8401_v54 = vpop.xlane.xlu1 %8400 }
0x12a5   : > { %v21334_v14 = vsub.f32 %v8380_v10, %v8414_v6  ;;  %v8417_v11 = vmul.f32 0.03125, %v8401_v54  ;;  %v8431_v43 = vmul.f32 %v21332_v5, %v21332_v5 }
0x12a6   : > { %v8398_v51 = vpop.xlane.xlu0 %8397 }
0x12a7   : > { %v21338_v3 = vsub.f32 %v8383_v18, %v8417_v11  ;;  %v8416_v13 = vmul.f32 0.03125, %v8398_v51  ;;  %v8441_v47 = vsel %vm740_vm0, %v8431_v43, 0.0  ;;  %v8430_v63 = vmul.f32 %v21334_v14, %v21334_v14  ;;  %v17099_v18 = vld [vmem:[%s22963_s3 + $0x90] sm:$0xff] }
0x12a8   : > { %v8407_v46 = vpop.xlane.xlu1 %8406  ;;  %8442 = vadd.xlane.f32.xlu1 %v8441_v47  ;;  %18790 = vmatprep.subr.mxu1 %v17099_v18 }
0x12a9   : > { %v21343_v23 = vsub.f32 %v8382_v35, %v8416_v13  ;;  %v8419_v41 = vmul.f32 0.03125, %v8407_v46  ;;  %v8438_v16 = vsel %vm740_vm0, %v8430_v63, 0.0  ;;  %v8433_v17 = vmul.f32 %v21338_v3, %v21338_v3  ;;  %18791 = vmatpush3.msra.mxu1 %v17099_v18  ;;  %v17097_v35 = vld [vmem:[%s22963_s3 + $0x80] sm:$0xff] }
0x12aa   : > { %8439 = vadd.xlane.f32.xlu0 %v8438_v16  ;;  %v8404_v48 = vpop.xlane.xlu0 %8403  ;;  %18792 = vmatprep.subr.mxu1 %v17098_v26  ;;  %v17079_v46 = vld [vmem:[%s22945_s17] ss:$0 sm:$0xff] }
0x12ab   : > { %v21348_v33 = vsub.f32 %v8385_v27, %v8419_v41  ;;  %v8418_v53 = vmul.f32 0.03125, %v8404_v48  ;;  %v8447_v28 = vsel %vm740_vm0, %v8433_v17, 0.0  ;;  %v8432_v1 = vmul.f32 %v21343_v23, %v21343_v23  ;;  %18793 = vmatpush3.msra.mxu1 %v17098_v26  ;;  %v17111_v26 = vld [vmem:[%s22935_s7 + $0x80] sm:$0xff] }
0x12ac   : > { %8448 = vadd.xlane.f32.xlu1 %v8447_v28  ;;  %v8413_v39 = vpop.xlane.xlu1 %8412  ;;  %18794 = vmatprep.subr.mxu1 %v17097_v35  ;;  %v17080_v28 = vld [vmem:[%s22946_s18] ss:$0 sm:$0xff] }
0x12ad   : > { %v21353_v57 = vsub.f32 %v8384_v37, %v8418_v53  ;;  %v8421_v45 = vmul.f32 0.03125, %v8413_v39  ;;  %v8444_v9 = vsel %vm740_vm0, %v8432_v1, 0.0  ;;  %v8435_v19 = vmul.f32 %v21348_v33, %v21348_v33  ;;  %18795 = vmatpush3.msra.mxu1 %v17097_v35 }
0x12ae   : > { %8445 = vadd.xlane.f32.xlu0 %v8444_v9  ;;  %v8410_v8 = vpop.xlane.xlu0 %8409  ;;  %18828 = vmatprep.subr.mxu1 %v19869_v20 }
0x12af   : > { %v21358_v38 = vsub.f32 %v8387_v36, %v8421_v45  ;;  %v8420_v50 = vmul.f32 0.03125, %v8410_v8  ;;  %v8453_v12 = vsel %vm740_vm0, %v8435_v19, 0.0  ;;  %v8434_v56 = vmul.f32 %v21353_v57, %v21353_v57 }
0x12b0   : > { %8454 = vadd.xlane.f32.xlu1 %v8453_v12 }
0x12b1   : > { %v21363_v0 = vsub.f32 %v8386_v40, %v8420_v50  ;;  %v8450_v44 = vsel %vm740_vm0, %v8434_v56, 0.0  ;;  %v8437_v32 = vmul.f32 %v21358_v38, %v21358_v38 }
0x12b2   : > { %8451 = vadd.xlane.f32.xlu0 %v8450_v44 }
0x12b3   : > { %v8459_v59 = vsel %vm740_vm0, %v8437_v32, 0.0  ;;  %v8436_v58 = vmul.f32 %v21363_v0, %v21363_v0 }
0x12b4   : > { %8460 = vadd.xlane.f32.xlu1 %v8459_v59 }
0x12b5   : > { %v8456_v10 = vsel %vm740_vm0, %v8436_v58, 0.0 }
0x12b6   : > { %8457 = vadd.xlane.f32.xlu0 %v8456_v10 }
0x1331   : > { %v8443_v55 = vpop.xlane.xlu1 %8442 }
0x1332   : > { %v8463_v42 = vmul.f32 0.03125, %v8443_v55  ;;  %v17102_v55 = vld [vmem:[%s22934_s6 + $0x4] ss:$0 sm:$0xff] }
0x1333   : > { %v8440_v27 = vpop.xlane.xlu0 %8439 }
0x1334   : > { %v8471_v4 = vadd.f32 1e-12, %v8463_v42  ;;  %v8462_v15 = vmul.f32 0.03125, %v8440_v27 }
0x1335   : > { %v8449_v62 = vpop.xlane.xlu1 %8448 }
0x1336   : > { %19616 = vrsqrt.f32 %v8471_v4  ;;  %v8470_v37 = vadd.f32 1e-12, %v8462_v15  ;;  %v8465_v30 = vmul.f32 0.03125, %v8449_v62 }
0x1337   : > { %v8446_v21 = vpop.xlane.xlu0 %8445 }
0x1338   : > { %19618 = vrsqrt.f32 %v8470_v37  ;;  %v8473_v24 = vadd.f32 1e-12, %v8465_v30  ;;  %v8464_v36 = vmul.f32 0.03125, %v8446_v21  ;;  %v17088_v37 = vld [vmem:[%s22966_s30 + $0x4] ss:$0 sm:$0xff] }
0x1339   : > { %v8455_v61 = vpop.xlane.xlu1 %8454 }
0x133a   : > { %19620 = vrsqrt.f32 %v8473_v24  ;;  %v8472_v40 = vadd.f32 1e-12, %v8464_v36  ;;  %v8467_v34 = vmul.f32 0.03125, %v8455_v61 }
0x133b   : > { %v8452_v29 = vpop.xlane.xlu0 %8451 }
0x133c   : > { %19622 = vrsqrt.f32 %v8472_v40  ;;  %v8475_v22 = vadd.f32 1e-12, %v8467_v34  ;;  %v8466_v31 = vmul.f32 0.03125, %v8452_v29 }
0x133d   : > { %v8461_v6 = vpop.xlane.xlu1 %8460 }
0x133e   : > { %19624 = vrsqrt.f32 %v8475_v22  ;;  %v8474_v54 = vadd.f32 1e-12, %v8466_v31  ;;  %v8469_v11 = vmul.f32 0.03125, %v8461_v6 }
0x133f   : > { %v8458_v43 = vpop.xlane.xlu0 %8457 }
0x1340   : > { %19626 = vrsqrt.f32 %v8474_v54  ;;  %v8477_v51 = vadd.f32 1e-12, %v8469_v11  ;;  %v8468_v13 = vmul.f32 0.03125, %v8458_v43 }
0x1342   : > { %19628 = vrsqrt.f32 %v8477_v51  ;;  %v8476_v47 = vadd.f32 1e-12, %v8468_v13 }
0x1343   : > { %v19617_v63 = vpop.eup %19616 }
0x1344   : > { %v8487_v41 = vmul.f32 %v19617_v63, %v21332_v5  ;;  %19630 = vrsqrt.f32 %v8476_v47 }
0x1345   : > { %v19619_v16 = vpop.eup %19618 }
0x1346   : > { %v8486_v17 = vmul.f32 %v19619_v16, %v21334_v14  ;;  %v8501_v53 = vmul.f32 %v17079_v46, %v8487_v41 }
0x1347   : > { %v19621_v48 = vpop.eup %19620 }
0x1348   : > { %v8500_v1 = vmul.f32 %v17079_v46, %v8486_v17  ;;  %v8489_v39 = vmul.f32 %v19621_v48, %v21338_v3  ;;  %v21412_v5 = vadd.f32 %v17080_v28, %v8501_v53  ;;  %v17113_v3 = vld [vmem:[%s22935_s7 + $0x90] sm:$0xff] }
0x1349   : > { %v19623_v45 = vpop.eup %19622 }
0x134a   : > { %v21409_v9 = vadd.f32 %v17080_v28, %v8500_v1  ;;  %v8488_v19 = vmul.f32 %v19623_v45, %v21343_v23  ;;  %v8503_v50 = vmul.f32 %v17079_v46, %v8489_v39 }
0x134b   : > { %v19625_v8 = vpop.eup %19624 }
0x134c   : > { %v8502_v12 = vmul.f32 %v17079_v46, %v8488_v19  ;;  %v8491_v14 = vmul.f32 %v19625_v8, %v21348_v33  ;;  %18776 = vmatprep.mubr.msk.f32.mxu0 %vm740_vm0, %v21409_v9  ;;  %18796 = vmatprep.mubr.msk.f32.mxu1 %vm740_vm0, %v21409_v9  ;;  %v21429_v32 = vadd.f32 %v17080_v28, %v8503_v50 }
0x134d   : > { %v19627_v56 = vpop.eup %19626  ;;  %18777 = vmatmul.mubr.msk.f32.vlgmr.msra.gmra.mxu0 %vm740_vm0, %v21412_v5  ;;  %18797 = vmatmul.mubr.msk.f32.vlgmr.msra.gmra.mxu1 %vm740_vm0, %v21412_v5 }
0x134e   : > { %v21426_v23 = vadd.f32 %v17080_v28, %v8502_v12  ;;  %v8490_v33 = vmul.f32 %v19627_v56, %v21353_v57  ;;  %18809 = vmatpush3.msra.mxu0 %v17114_v25  ;;  %v8505_v59 = vmul.f32 %v17079_v46, %v8491_v14 }
0x134f   : > { %v19629_v44 = vpop.eup %19628  ;;  %18810 = vmatprep.subr.mxu0 %v17113_v3 }
0x1350   : > { %v8504_v58 = vmul.f32 %v17079_v46, %v8490_v33  ;;  %v8493_v10 = vmul.f32 %v19629_v44, %v21358_v38  ;;  %18779 = vmatprep.mubr.msk.f32.mxu0 %vm740_vm0, %v21426_v23  ;;  %18799 = vmatprep.mubr.msk.f32.mxu1 %vm740_vm0, %v21426_v23  ;;  %v21446_v49 = vadd.f32 %v17080_v28, %v8505_v59 }
0x1351   : > { %v19631_v57 = vpop.eup %19630  ;;  %18780 = vmatmul.mubr.msk.f32.gmra.mxu0 %vm740_vm0, %v21429_v32  ;;  %18800 = vmatmul.mubr.msk.f32.gmra.mxu1 %vm740_vm0, %v21429_v32 }
0x1352   : > { %v21443_v60 = vadd.f32 %v17080_v28, %v8504_v58  ;;  %v8492_v38 = vmul.f32 %v19631_v57, %v21363_v0  ;;  %18811 = vmatpush3.msra.mxu0 %v17113_v3  ;;  %v8507_v18 = vmul.f32 %v17079_v46, %v8493_v10  ;;  %v21561_v10 = vld [vmem:[%s20209_s29] ss:$0 sm:$0xff] }
0x1353   : > { %18812 = vmatprep.subr.mxu0 %v17112_v7 }
0x1354   : > { %v8506_v52 = vmul.f32 %v17079_v46, %v8492_v38  ;;  %18782 = vmatprep.mubr.msk.f32.mxu0 %vm740_vm0, %v21443_v60  ;;  %18802 = vmatprep.mubr.msk.f32.mxu1 %vm740_vm0, %v21443_v60  ;;  %v21461_v2 = vadd.f32 %v17080_v28, %v8507_v18 }
0x1355   : > { %18783 = vmatmul.mubr.msk.f32.gmra.mxu0 %vm740_vm0, %v21446_v49  ;;  %18803 = vmatmul.mubr.msk.f32.gmra.mxu1 %vm740_vm0, %v21446_v49 }
0x1356   : > { %v21459_v0 = vadd.f32 %v17080_v28, %v8506_v52  ;;  %18813 = vmatpush3.msra.mxu0 %v17112_v7  ;;  %v21524_v28 = vld [vmem:[%s22936_s8 + $0x4] ss:$0 sm:$0xff] }
0x1357   : > { %18814 = vmatprep.subr.mxu0 %v17111_v26 }
0x1358   : > { %18785 = vmatprep.mubr.msk.f32.mxu0 %vm740_vm0, %v21459_v0  ;;  %18805 = vmatprep.mubr.msk.f32.mxu1 %vm740_vm0, %v21459_v0 }
0x1359   : > { %18786 = vmatmul.mubr.msk.f32.gmra.mxu0 %vm740_vm0, %v21461_v2  ;;  %18806 = vmatmul.mubr.msk.f32.gmra.mxu1 %vm740_vm0, %v21461_v2 }
0x135a   : > { %18816 = vmatprep.mubr.msk.f32.mxu0 %vm740_vm0, %v21409_v9  ;;  %18815 = vmatpush3.msra.mxu0 %v17111_v26 }
0x135b   : > { %18830 = vmatprep.mubr.msk.f32.mxu1 %vm19870_vm1, %v19869_v20  ;;  %18838 = vmatprep.subr.mxu0 %v19869_v20 }
0x135d   : > { %18817 = vmatmul.mubr.msk.f32.vlgmr.msra.gmra.mxu0 %vm740_vm0, %v21412_v5 }
0x135e   : > { %18819 = vmatprep.mubr.msk.f32.mxu0 %vm740_vm0, %v21426_v23 }
0x1361   : > { %18820 = vmatmul.mubr.msk.f32.gmra.mxu0 %vm740_vm0, %v21429_v32 }
0x1362   : > { %18822 = vmatprep.mubr.msk.f32.mxu0 %vm740_vm0, %v21443_v60 }
0x1365   : > { %18823 = vmatmul.mubr.msk.f32.gmra.mxu0 %vm740_vm0, %v21446_v49 }
0x1366   : > { %18825 = vmatprep.mubr.msk.f32.mxu0 %vm740_vm0, %v21459_v0 }
0x1369   : > { %18826 = vmatmul.mubr.msk.f32.gmra.mxu0 %vm740_vm0, %v21461_v2 }
0x136a   : > { %18840 = vmatprep.mubr.msk.f32.mxu0 %vm19870_vm1, %v19869_v20 }
0x140d   : > { %v18778_v35 = vpop.f32.mrf.mxu0  ;;  %v18798_v25 = vpop.f32.mrf.mxu1 }
0x140e   : > { %v8765_v36 = vadd.f32 %v18798_v25, %v17102_v55  ;;  %v8647_v29 = vadd.f32 %v18778_v35, %v17088_v37  ;;  %v21568_v35 = vld [vmem:[%s20209_s29 + $0x1] ss:$0 sm:$0xff] }
0x140f   : > { %v8641_v42 = vpop.f32.mrf.mxu0  ;;  %v8759_v27 = vpop.f32.mrf.mxu1 }
0x1410   : > { %v8760_v4 = vadd.f32 %v17102_v55, %v8759_v27  ;;  %v8642_v30 = vadd.f32 %v17088_v37, %v8641_v42 }
0x1411   : > { %v18781_v15 = vpop.f32.mrf.mxu0  ;;  %v18801_v62 = vpop.f32.mrf.mxu1 }
0x1412   : > { %18829 = vmatpush3.xpose.msk.msra.mxu1 %vm1150_vm2, %v8760_v4  ;;  %v8775_v54 = vadd.f32 %v18801_v62, %v17102_v55  ;;  %v8657_v13 = vadd.f32 %v18781_v15, %v17088_v37 }
0x1413   : > { %v8651_v21 = vpop.f32.mrf.mxu0  ;;  %v8769_v24 = vpop.f32.mrf.mxu1  ;;  %18833 = vmatprep.subr.mxu1 %v19869_v20 }
0x1414   : > { %v8770_v61 = vadd.f32 %v17102_v55, %v8769_v24  ;;  %v8652_v22 = vadd.f32 %v17088_v37, %v8651_v21  ;;  %v21578_v21 = vld [vmem:[%s20209_s29 + $0x3] ss:$0 sm:$0xff] }
0x1415   : > { %v18784_v40 = vpop.f32.mrf.mxu0  ;;  %v18804_v34 = vpop.f32.mrf.mxu1  ;;  %18831 = vmatmul.mubr.msk.f32.vlgmr.msra.gmra.mxu1 %vm1150_vm2, %v8642_v30 }
0x1416   : > { %18834 = vmatpush3.xpose.msk.msra.mxu1 %vm1150_vm2, %v8765_v36  ;;  %18839 = vmatpush3.xpose.msk.msra.mxu0 %vm1150_vm2, %v8770_v61  ;;  %v8785_v41 = vadd.f32 %v18804_v34, %v17102_v55  ;;  %v8667_v48 = vadd.f32 %v18784_v40, %v17088_v37  ;;  %v21582_v36 = vld [vmem:[%s20209_s29 + $0x4] ss:$0 sm:$0xff] }
0x1417   : > { %v8661_v31 = vpop.f32.mrf.mxu0  ;;  %v8779_v6 = vpop.f32.mrf.mxu1  ;;  %18835 = vmatprep.mubr.msk.f32.mxu1 %vm19870_vm1, %v19869_v20  ;;  %18843 = vmatprep.subr.mxu1 %v19869_v20 }
0x1418   : > { %v8780_v11 = vadd.f32 %v17102_v55, %v8779_v6  ;;  %18848 = vmatprep.subr.mxu0 %v19869_v20  ;;  %v8662_v47 = vadd.f32 %v17088_v37, %v8661_v31 }
0x1419   : > { %v18787_v43 = vpop.f32.mrf.mxu0  ;;  %v18807_v51 = vpop.f32.mrf.mxu1  ;;  %18836 = vmatmul.mubr.msk.f32.vlgmr.msra.gmra.mxu1 %vm1150_vm2, %v8647_v29  ;;  %18841 = vmatmul.mubr.msk.f32.vlgmr.msra.gmra.mxu0 %vm1150_vm2, %v8652_v22 }
0x141a   : > { %18844 = vmatpush3.xpose.msk.msra.mxu1 %vm1150_vm2, %v8775_v54  ;;  %18849 = vmatpush3.xpose.msk.msra.mxu0 %vm1150_vm2, %v8780_v11  ;;  %v8795_v39 = vadd.f32 %v18807_v51, %v17102_v55  ;;  %v8677_v50 = vadd.f32 %v18787_v43, %v17088_v37  ;;  %v21588_v54 = vld [vmem:[%s20209_s29 + $0x5] ss:$0 sm:$0xff]  ;;  %v21592_v43 = vld [vmem:[%s20209_s29 + $0x6] ss:$0 sm:$0xff] }
0x141b   : > { %v8671_v63 = vpop.f32.mrf.mxu0  ;;  %v8789_v46 = vpop.f32.mrf.mxu1  ;;  %18845 = vmatprep.mubr.msk.f32.mxu1 %vm19870_vm1, %v19869_v20  ;;  %18850 = vmatprep.mubr.msk.f32.mxu0 %vm19870_vm1, %v19869_v20 }
0x141c   : > { %v8790_v16 = vadd.f32 %v17102_v55, %v8789_v46  ;;  %18853 = vmatprep.subr.mxu1 %v19869_v20  ;;  %18858 = vmatprep.subr.mxu0 %v19869_v20  ;;  %v8672_v53 = vadd.f32 %v17088_v37, %v8671_v63  ;;  %v21572_v55 = vld [vmem:[%s20209_s29 + $0x2] ss:$0 sm:$0xff] }
0x141d   : > { %v18818_v17 = vpop.f32.mrf.mxu0  ;;  %18846 = vmatmul.mubr.msk.f32.vlgmr.msra.gmra.mxu1 %vm1150_vm2, %v8657_v13  ;;  %18851 = vmatmul.mubr.msk.f32.vlgmr.msra.gmra.mxu0 %vm1150_vm2, %v8662_v47 }
0x141e   : > { %18854 = vmatpush3.xpose.msk.msra.mxu1 %vm1150_vm2, %v8785_v41  ;;  %18859 = vmatpush3.xpose.msk.msra.mxu0 %vm1150_vm2, %v8790_v16  ;;  %v8883_v14 = vadd.f32 %v18818_v17, %v21524_v28  ;;  %v21598_v16 = vld [vmem:[%s20209_s29 + $0x7] ss:$0 sm:$0xff] }
0x141f   : > { %v8877_v1 = vpop.f32.mrf.mxu0  ;;  %18855 = vmatprep.mubr.msk.f32.mxu1 %vm19870_vm1, %v19869_v20  ;;  %18860 = vmatprep.mubr.msk.f32.mxu0 %vm19870_vm1, %v19869_v20 }
0x1420   : > { %v8878_v45 = vadd.f32 %v21524_v28, %v8877_v1  ;;  %18863 = vmatprep.subr.mxu1 %v19869_v20  ;;  %18868 = vmatprep.subr.mxu0 %v19869_v20 }
0x1421   : > { %v18821_v19 = vpop.f32.mrf.mxu0  ;;  %18856 = vmatmul.mubr.msk.f32.vlgmr.msra.gmra.mxu1 %vm1150_vm2, %v8667_v48  ;;  %18861 = vmatmul.mubr.msk.f32.vlgmr.msra.gmra.mxu0 %vm1150_vm2, %v8672_v53 }
0x1422   : > { %v21536_v8 = vadd.f32 %v18821_v19, %v21524_v28  ;;  %18864 = vmatpush3.xpose.msk.msra.mxu1 %vm1150_vm2, %v8795_v39  ;;  %18869 = vmatpush3.msra.mxu0 %v8878_v45 }
0x1423   : > { %v21539_v12 = vpop.f32.mrf.mxu0  ;;  %18865 = vmatprep.mubr.msk.f32.mxu1 %vm19870_vm1, %v19869_v20  ;;  %18873 = vmatprep.subr.mxu1 %v19869_v20 }
0x1424   : > { %18870 = vmatprep.mubr.msk.f32.mxu0 %vm19870_vm1, %v19869_v20  ;;  %18878 = vmatprep.subr.mxu0 %v19869_v20 }
0x1425   : > { %v18824_v3 = vpop.f32.mrf.mxu0  ;;  %18866 = vmatmul.mubr.msk.f32.vlgmr.msra.gmra.mxu1 %vm1150_vm2, %v8677_v50 }
0x1426   : > { %v21550_v56 = vadd.f32 %v18824_v3, %v21524_v28  ;;  %18874 = vmatpush3.msra.mxu1 %v8883_v14  ;;  %18875 = vmatprep.mubr.msk.f32.mxu1 %vm19870_vm1, %v19869_v20 }
0x1427   : > { %v21554_v33 = vpop.f32.mrf.mxu0  ;;  %18883 = vmatprep.subr.mxu1 %v19869_v20 }
0x1429   : > { %v18827_v44 = vpop.f32.mrf.mxu0 }
0x142a   : > { %v21558_v59 = vadd.f32 %v18827_v44, %v21524_v28 }
0x142b   : > { %v21564_v57 = vpop.f32.mrf.mxu0 }
0x14d5   : > { %v8988_v58 = vpop.f32.mrf.mxu1 }
0x14d6   : > { %v8989_v7 = vadd.f32 %v21561_v10, %v8988_v58 }
0x14d7   : > { %v18832_v38 = vpop.f32.mrf.mxu1 }
0x14d8   : > { %v9524_v18 = vsel %vm1150_vm2, %v8989_v7, -inf }
0x14d9   : > { %9525 = vmax.xlane.f32.xlu0 %v9524_v18  ;;  %v9064_v52 = vpop.f32.mrf.mxu1  ;;  %v9140_v26 = vpop.f32.mrf.mxu0 }
0x14da   : > { %v9065_v25 = vadd.f32 %v21568_v35, %v9064_v52  ;;  %v9141_v42 = vadd.f32 %v21572_v55, %v9140_v26 }
0x14db   : > { %v18837_v27 = vpop.f32.mrf.mxu1  ;;  %v18842_v4 = vpop.f32.mrf.mxu0 }
0x14dc   : > { %v9527_v15 = vsel %vm1150_vm2, %v9065_v25, -inf  ;;  %v9530_v62 = vsel %vm1150_vm2, %v9141_v42, -inf }
0x14dd   : > { %9528 = vmax.xlane.f32.xlu1 %v9527_v15  ;;  %v9216_v37 = vpop.f32.mrf.mxu1  ;;  %9531 = vmax.xlane.f32.xlu0 %v9530_v62  ;;  %v9292_v30 = vpop.f32.mrf.mxu0 }
0x14de   : > { %v9217_v24 = vadd.f32 %v21578_v21, %v9216_v37  ;;  %v9293_v61 = vadd.f32 %v21582_v36, %v9292_v30 }
0x14df   : > { %v18847_v40 = vpop.f32.mrf.mxu1  ;;  %v18852_v34 = vpop.f32.mrf.mxu0 }
0x14e0   : > { %v9533_v29 = vsel %vm1150_vm2, %v9217_v24, -inf  ;;  %v9536_v22 = vsel %vm1150_vm2, %v9293_v61, -inf }
0x14e1   : > { %9534 = vmax.xlane.f32.xlu1 %v9533_v29  ;;  %v9368_v31 = vpop.f32.mrf.mxu1  ;;  %9537 = vmax.xlane.f32.xlu0 %v9536_v22  ;;  %v9444_v6 = vpop.f32.mrf.mxu0 }
0x14e2   : > { %v9369_v11 = vadd.f32 %v21588_v54, %v9368_v31  ;;  %v9445_v51 = vadd.f32 %v21592_v43, %v9444_v6 }
0x14e3   : > { %v18857_v13 = vpop.f32.mrf.mxu1  ;;  %v18862_v47 = vpop.f32.mrf.mxu0 }
0x14e4   : > { %v9539_v63 = vsel %vm1150_vm2, %v9369_v11, -inf  ;;  %v9542_v46 = vsel %vm1150_vm2, %v9445_v51, -inf }
0x14e5   : > { %9540 = vmax.xlane.f32.xlu1 %v9539_v63  ;;  %v9520_v41 = vpop.f32.mrf.mxu1  ;;  %9543 = vmax.xlane.f32.xlu0 %v9542_v46 }
0x14e6   : > { %v9521_v17 = vadd.f32 %v21598_v16, %v9520_v41 }
0x14e7   : > { %v18867_v48 = vpop.f32.mrf.mxu1 }
0x14e8   : > { %v9545_v53 = vsel %vm1150_vm2, %v9521_v17, -inf }
0x14e9   : > { %9546 = vmax.xlane.f32.xlu1 %v9545_v53 }
0x1562   : > { %v9526_v1 = vpop.xlane.xlu0 %9525 }
0x1563   : > { %v9548_v39 = vsub.f32 %v8989_v7, %v9526_v1 }
0x1565   : > { %v9556_v45 = vmul.f32 1.442695, %v9548_v39 }
0x1566   : > { %v9529_v19 = vpop.xlane.xlu1 %9528  ;;  %v9532_v50 = vpop.xlane.xlu0 %9531 }
0x1567   : > { %19632 = vpow2.f32 %v9556_v45  ;;  %v9549_v14 = vsub.f32 %v9065_v25, %v9529_v19  ;;  %v9550_v3 = vsub.f32 %v9141_v42, %v9532_v50 }
0x1569   : > { %v9558_v44 = vmul.f32 1.442695, %v9549_v14  ;;  %v9560_v58 = vmul.f32 1.442695, %v9550_v3 }
0x156a   : > { %v9535_v38 = vpop.xlane.xlu1 %9534  ;;  %v9538_v18 = vpop.xlane.xlu0 %9537 }
0x156b   : > { %19634 = vpow2.f32 %v9558_v44  ;;  %v9551_v52 = vsub.f32 %v9217_v24, %v9535_v38  ;;  %v9552_v26 = vsub.f32 %v9293_v61, %v9538_v18  ;;  %v8888_v38 = vadd.f32 %v21524_v28, %v21539_v12 }
0x156c   : > { %19636 = vpow2.f32 %v9560_v58 }
0x156d   : > { %v9562_v27 = vmul.f32 1.442695, %v9551_v52  ;;  %v9564_v4 = vmul.f32 1.442695, %v9552_v26 }
0x156e   : > { %v9541_v15 = vpop.xlane.xlu1 %9540  ;;  %v9544_v62 = vpop.xlane.xlu0 %9543 }
0x156f   : > { %19638 = vpow2.f32 %v9562_v27  ;;  %v9553_v7 = vsub.f32 %v9369_v11, %v9541_v15  ;;  %v9554_v37 = vsub.f32 %v9445_v51, %v9544_v62  ;;  %v8898_v15 = vadd.f32 %v21524_v28, %v21554_v33 }
0x1570   : > { %19640 = vpow2.f32 %v9564_v4  ;;  %v8908_v33 = vadd.f32 %v21524_v28, %v21564_v57  ;;  %v17161_v28 = vld [vmem:[%s22964_s0 + $0xb8] sm:$0xff] }
0x1571   : > { %v9566_v30 = vmul.f32 1.442695, %v9553_v7  ;;  %v9568_v40 = vmul.f32 1.442695, %v9554_v37 }
0x1572   : > { %v9547_v25 = vpop.xlane.xlu1 %9546 }
0x1573   : > { %19642 = vpow2.f32 %v9566_v30  ;;  %v9555_v42 = vsub.f32 %v9521_v17, %v9547_v25 }
0x1574   : > { %v19633_v34 = vpop.eup %19632  ;;  %19644 = vpow2.f32 %v9568_v40 }
0x1575   : > { %v9570_v29 = vmul.f32 1.442695, %v9555_v42  ;;  %v9572_v24 = vsel %vm1150_vm2, %v19633_v34, 0.0  ;;  %v17160_v42 = vld [vmem:[%s22964_s0 + $0xb0] sm:$0xff] }
0x1576   : > { %9573 = vadd.xlane.f32.xlu0 %v9572_v24  ;;  %v17188_v24 = vld [vmem:[%s22935_s7 + $0xb0] sm:$0xff] }
0x1577   : > { %19646 = vpow2.f32 %v9570_v29  ;;  %v17189_v29 = vld [vmem:[%s22935_s7 + $0xb8] sm:$0xff] }
0x1578   : > { %v19635_v61 = vpop.eup %19634 }
0x1579   : > { %v19637_v22 = vpop.eup %19636  ;;  %v9575_v31 = vsel %vm1150_vm2, %v19635_v61, 0.0 }
0x157a   : > { %9576 = vadd.xlane.f32.xlu1 %v9575_v31  ;;  %v9578_v6 = vsel %vm1150_vm2, %v19637_v22, 0.0  ;;  %v17149_v31 = vld [vmem:[%s22937_s9 + $0x20] sm:$0xff] }
0x157b   : > { %9579 = vadd.xlane.f32.xlu0 %v9578_v6  ;;  %v17175_v6 = vld [vmem:[%s22963_s3 + $0xb8] sm:$0xff] }
0x157c   : > { %v19639_v11 = vpop.eup %19638 }
0x157d   : > { %v19641_v51 = vpop.eup %19640  ;;  %v9581_v13 = vsel %vm1150_vm2, %v19639_v11, 0.0 }
0x157e   : > { %9582 = vadd.xlane.f32.xlu1 %v9581_v13  ;;  %v9584_v47 = vsel %vm1150_vm2, %v19641_v51, 0.0 }
0x157f   : > { %9585 = vadd.xlane.f32.xlu0 %v9584_v47  ;;  %v17174_v47 = vld [vmem:[%s22963_s3 + $0xb0] sm:$0xff] }
0x1580   : > { %v19643_v63 = vpop.eup %19642 }
0x1581   : > { %v19645_v46 = vpop.eup %19644  ;;  %v9587_v41 = vsel %vm1150_vm2, %v19643_v63, 0.0 }
0x1582   : > { %9588 = vadd.xlane.f32.xlu1 %v9587_v41  ;;  %v9590_v17 = vsel %vm1150_vm2, %v19645_v46, 0.0  ;;  %v17173_v41 = vld [vmem:[%s22963_s3 + $0xa8] sm:$0xff] }
0x1583   : > { %9591 = vadd.xlane.f32.xlu0 %v9590_v17 }
0x1584   : > { %v19647_v48 = vpop.eup %19646 }
0x1585   : > { %v9593_v53 = vsel %vm1150_vm2, %v19647_v48, 0.0 }
0x1586   : > { %9594 = vadd.xlane.f32.xlu1 %v9593_v53  ;;  %v17172_v53 = vld [vmem:[%s22963_s3 + $0xa0] sm:$0xff] }
0x15ff   : > { %v9574_v1 = vpop.xlane.xlu0 %9573 }
0x1600   : > { %19648 = vrcp.f32 %v9574_v1 }
0x1603   : > { %v9577_v39 = vpop.xlane.xlu1 %9576 }
0x1604   : > { %19650 = vrcp.f32 %v9577_v39  ;;  %v9580_v45 = vpop.xlane.xlu0 %9579 }
0x1605   : > { %19652 = vrcp.f32 %v9580_v45 }
0x1607   : > { %v9583_v19 = vpop.xlane.xlu1 %9582 }
0x1608   : > { %19654 = vrcp.f32 %v9583_v19  ;;  %v9586_v50 = vpop.xlane.xlu0 %9585 }
0x1609   : > { %19656 = vrcp.f32 %v9586_v50 }
0x160b   : > { %v9589_v14 = vpop.xlane.xlu1 %9588 }
0x160c   : > { %19658 = vrcp.f32 %v9589_v14  ;;  %v9592_v3 = vpop.xlane.xlu0 %9591 }
0x160d   : > { %v19649_v44 = vpop.eup %19648  ;;  %19660 = vrcp.f32 %v9592_v3 }
0x160e   : > { %v9597_v58 = vmul.f32 %v19649_v44, %v19633_v34  ;;  %v17159_v34 = vld [vmem:[%s22964_s0 + $0xa8] sm:$0xff] }
0x160f   : > { %v9595_v18 = vpop.xlane.xlu1 %9594 }
0x1610   : > { %19662 = vrcp.f32 %v9595_v18  ;;  %18871 = vmatmul.mubr.msk.f32.vlgmr.msra.gmra.mxu0 %vm1150_vm2, %v9597_v58 }
0x1611   : > { %v19651_v52 = vpop.eup %19650  ;;  %18879 = vmatpush3.msra.mxu0 %v8888_v38  ;;  %18880 = vmatprep.mubr.msk.f32.mxu0 %vm19870_vm1, %v19869_v20 }
0x1612   : > { %v19653_v26 = vpop.eup %19652  ;;  %v9599_v27 = vmul.f32 %v19651_v52, %v19635_v61  ;;  %18888 = vmatprep.subr.mxu0 %v19869_v20  ;;  %v17187_v61 = vld [vmem:[%s22935_s7 + $0xa8] sm:$0xff] }
0x1613   : > { %v9601_v4 = vmul.f32 %v19653_v26, %v19637_v22  ;;  %v17186_v22 = vld [vmem:[%s22935_s7 + $0xa0] sm:$0xff] }
0x1614   : > { %18876 = vmatmul.mubr.msk.f32.vlgmr.msra.gmra.mxu1 %vm1150_vm2, %v9599_v27 }
0x1615   : > { %v19655_v12 = vpop.eup %19654  ;;  %18881 = vmatmul.mubr.msk.f32.vlgmr.msra.gmra.mxu0 %vm1150_vm2, %v9601_v4  ;;  %18884 = vmatpush3.msra.mxu1 %v21536_v8 }
0x1616   : > { %v19657_v62 = vpop.eup %19656  ;;  %v9603_v7 = vmul.f32 %v19655_v12, %v19639_v11  ;;  %18889 = vmatpush3.msra.mxu0 %v8898_v15  ;;  %18885 = vmatprep.mubr.msk.f32.mxu1 %vm19870_vm1, %v19869_v20 }
0x1617   : > { %v9605_v37 = vmul.f32 %v19657_v62, %v19641_v51  ;;  %18890 = vmatprep.mubr.msk.f32.mxu0 %vm19870_vm1, %v19869_v20  ;;  %18893 = vmatprep.subr.mxu1 %v19869_v20 }
0x1618   : > { %18898 = vmatprep.subr.mxu0 %v19869_v20  ;;  %18886 = vmatmul.mubr.msk.f32.vlgmr.msra.gmra.mxu1 %vm1150_vm2, %v9603_v7 }
0x1619   : > { %v19659_v8 = vpop.eup %19658  ;;  %18891 = vmatmul.mubr.msk.f32.vlgmr.msra.gmra.mxu0 %vm1150_vm2, %v9605_v37  ;;  %18894 = vmatpush3.msra.mxu1 %v21550_v56  ;;  %v21757_v37 = vld [vmem:[%s22936_s8 + $0x5] ss:$0 sm:$0xff] }
0x161a   : > { %v19661_v30 = vpop.eup %19660  ;;  %v9607_v40 = vmul.f32 %v19659_v8, %v19643_v63  ;;  %18899 = vmatpush3.msra.mxu0 %v8908_v33  ;;  %18895 = vmatprep.mubr.msk.f32.mxu1 %vm19870_vm1, %v19869_v20 }
0x161b   : > { %v9609_v25 = vmul.f32 %v19661_v30, %v19645_v46  ;;  %18900 = vmatprep.mubr.msk.f32.mxu0 %vm19870_vm1, %v19869_v20  ;;  %18903 = vmatprep.subr.mxu1 %v19869_v20 }
0x161c   : > { %18896 = vmatmul.mubr.msk.f32.vlgmr.msra.gmra.mxu1 %vm1150_vm2, %v9607_v40  ;;  %18908 = vmatprep.subr.mxu0 %v17149_v31 }
0x161d   : > { %v19663_v57 = vpop.eup %19662  ;;  %18901 = vmatmul.mubr.msk.f32.vlgmr.msra.gmra.mxu0 %vm1150_vm2, %v9609_v25  ;;  %18904 = vmatpush3.msra.mxu1 %v21558_v59  ;;  %v17158_v59 = vld [vmem:[%s22964_s0 + $0xa0] sm:$0xff] }
0x161e   : > { %v9611_v56 = vmul.f32 %v19663_v57, %v19647_v48  ;;  %18905 = vmatprep.mubr.msk.f32.mxu1 %vm19870_vm1, %v19869_v20  ;;  %18922 = vmatprep.subr.mxu1 %v17161_v28 }
0x161f   : > { %18909 = vmatpush3.msra.mxu0 %v17149_v31 }
0x1620   : > { %18906 = vmatmul.mubr.msk.f32.vlgmr.msra.gmra.mxu1 %vm1150_vm2, %v9611_v56  ;;  %18942 = vmatprep.subr.mxu0 %v17175_v6 }
0x1621   : > { %18923 = vmatpush3.msra.mxu1 %v17161_v28  ;;  %18930 = vmatprep.mubr.msk.f32.mxu1 %vm740_vm0, %v21409_v9 }
0x1622   : > { %18924 = vmatprep.subr.mxu1 %v17160_v42 }
0x1623   : > { %18925 = vmatpush3.msra.mxu1 %v17160_v42 }
0x1624   : > { %18926 = vmatprep.subr.mxu1 %v17159_v34 }
0x1625   : > { %18927 = vmatpush3.msra.mxu1 %v17159_v34 }
0x1626   : > { %18928 = vmatprep.subr.mxu1 %v17158_v59 }
0x1627   : > { %18929 = vmatpush3.msra.mxu1 %v17158_v59 }
0x1628   : > { %18931 = vmatmul.mubr.msk.f32.vlgmr.msra.gmra.mxu1 %vm740_vm0, %v21412_v5  ;;  %18962 = vmatprep.subr.mxu1 %v17189_v29 }
0x1629   : > { %18933 = vmatprep.mubr.msk.f32.mxu1 %vm740_vm0, %v21426_v23  ;;  %18963 = vmatpush3.msra.mxu1 %v17189_v29 }
0x162a   : > { %18964 = vmatprep.subr.mxu1 %v17188_v24 }
0x162b   : > { %18965 = vmatpush3.msra.mxu1 %v17188_v24 }
0x162c   : > { %18934 = vmatmul.mubr.msk.f32.gmra.mxu1 %vm740_vm0, %v21429_v32  ;;  %18966 = vmatprep.subr.mxu1 %v17187_v61 }
0x162d   : > { %18936 = vmatprep.mubr.msk.f32.mxu1 %vm740_vm0, %v21443_v60  ;;  %18967 = vmatpush3.msra.mxu1 %v17187_v61 }
0x162e   : > { %18968 = vmatprep.subr.mxu1 %v17186_v22 }
0x162f   : > { %18969 = vmatpush3.msra.mxu1 %v17186_v22 }
0x1630   : > { %18937 = vmatmul.mubr.msk.f32.gmra.mxu1 %vm740_vm0, %v21446_v49  ;;  %18992 = vmatprep.subr.mxu1 %v19869_v20 }
0x1631   : > { %18939 = vmatprep.mubr.msk.f32.mxu1 %vm740_vm0, %v21459_v0 }
0x1634   : > { %18940 = vmatmul.mubr.msk.f32.gmra.mxu1 %vm740_vm0, %v21461_v2 }
0x1635   : > { %18970 = vmatprep.mubr.msk.f32.mxu1 %vm740_vm0, %v21409_v9 }
0x1638   : > { %18971 = vmatmul.mubr.msk.f32.vlgmr.msra.gmra.mxu1 %vm740_vm0, %v21412_v5 }
0x1639   : > { %18973 = vmatprep.mubr.msk.f32.mxu1 %vm740_vm0, %v21426_v23 }
0x163c   : > { %18974 = vmatmul.mubr.msk.f32.gmra.mxu1 %vm740_vm0, %v21429_v32 }
0x163d   : > { %18976 = vmatprep.mubr.msk.f32.mxu1 %vm740_vm0, %v21443_v60 }
0x1640   : > { %18977 = vmatmul.mubr.msk.f32.gmra.mxu1 %vm740_vm0, %v21446_v49 }
0x1641   : > { %18979 = vmatprep.mubr.msk.f32.mxu1 %vm740_vm0, %v21459_v0 }
0x1644   : > { %18980 = vmatmul.mubr.msk.f32.gmra.mxu1 %vm740_vm0, %v21461_v2 }
0x1645   : > { %18994 = vmatprep.mubr.msk.f32.mxu1 %vm19870_vm1, %v19869_v20 }
0x16d0   : > { %v9681_v11 = vpop.f32.mrf.mxu0 }
0x16d1   : > { %18910 = vmatprep.mubr.msk.f32.mxu0 %vm1150_vm2, %v9681_v11 }
0x16d2   : > { %v18872_v51 = vpop.f32.mrf.mxu0 }
0x16d4   : > { %v9754_v13 = vpop.f32.mrf.mxu1 }
0x16d5   : > { %v9827_v63 = vpop.f32.mrf.mxu0  ;;  %18911 = vmatmul.mubr.msk.f32.vlgmr.msra.gmra.mxu0 %vm1150_vm2, %v9754_v13  ;;  %v17177_v13 = vld [vmem:[%s22934_s6 + $0x5] ss:$0 sm:$0xff] }
0x16d6   : > { %v18877_v46 = vpop.f32.mrf.mxu1  ;;  %18913 = vmatprep.mubr.msk.f32.mxu0 %vm1150_vm2, %v9827_v63  ;;  %18943 = vmatpush3.msra.mxu0 %v17175_v6 }
0x16d7   : > { %v18882_v17 = vpop.f32.mrf.mxu0  ;;  %18944 = vmatprep.subr.mxu0 %v17174_v47 }
0x16d8   : > { %v9900_v48 = vpop.f32.mrf.mxu1  ;;  %18945 = vmatpush3.msra.mxu0 %v17174_v47 }
0x16d9   : > { %v9973_v1 = vpop.f32.mrf.mxu0  ;;  %18914 = vmatmul.mubr.msk.f32.gmra.mxu0 %vm1150_vm2, %v9900_v48  ;;  %18946 = vmatprep.subr.mxu0 %v17173_v41 }
0x16da   : > { %v18887_v39 = vpop.f32.mrf.mxu1  ;;  %18916 = vmatprep.mubr.msk.f32.mxu0 %vm1150_vm2, %v9973_v1  ;;  %18947 = vmatpush3.msra.mxu0 %v17173_v41  ;;  %v17163_v41 = vld [vmem:[%s22966_s30 + $0x5] ss:$0 sm:$0xff] }
0x16db   : > { %v18892_v45 = vpop.f32.mrf.mxu0  ;;  %18948 = vmatprep.subr.mxu0 %v17172_v53 }
0x16dc   : > { %v10046_v19 = vpop.f32.mrf.mxu1  ;;  %18949 = vmatpush3.msra.mxu0 %v17172_v53 }
0x16dd   : > { %v10119_v50 = vpop.f32.mrf.mxu0  ;;  %18917 = vmatmul.mubr.msk.f32.gmra.mxu0 %vm1150_vm2, %v10046_v19  ;;  %18982 = vmatprep.subr.mxu0 %v19869_v20 }
0x16de   : > { %v18897_v14 = vpop.f32.mrf.mxu1  ;;  %18919 = vmatprep.mubr.msk.f32.mxu0 %vm1150_vm2, %v10119_v50 }
0x16df   : > { %v18902_v3 = vpop.f32.mrf.mxu0 }
0x16e0   : > { %v10192_v44 = vpop.f32.mrf.mxu1 }
0x16e1   : > { %18920 = vmatmul.mubr.msk.f32.gmra.mxu0 %vm1150_vm2, %v10192_v44 }
0x16e2   : > { %v18907_v58 = vpop.f32.mrf.mxu1  ;;  %18950 = vmatprep.mubr.msk.f32.mxu0 %vm740_vm0, %v21409_v9 }
0x16e5   : > { %18951 = vmatmul.mubr.msk.f32.vlgmr.msra.gmra.mxu0 %vm740_vm0, %v21412_v5 }
0x16e6   : > { %18953 = vmatprep.mubr.msk.f32.mxu0 %vm740_vm0, %v21426_v23 }
0x16e8   : > { %v18932_v38 = vpop.f32.mrf.mxu1 }
0x16e9   : > { %18954 = vmatmul.mubr.msk.f32.gmra.mxu0 %vm740_vm0, %v21429_v32  ;;  %v10420_v45 = vadd.f32 %v18932_v38, %v17163_v41 }
0x16ea   : > { %v10414_v18 = vpop.f32.mrf.mxu1  ;;  %18956 = vmatprep.mubr.msk.f32.mxu0 %vm740_vm0, %v21443_v60 }
0x16eb   : > { %v10415_v17 = vadd.f32 %v17163_v41, %v10414_v18 }
0x16ec   : > { %v18935_v52 = vpop.f32.mrf.mxu1 }
0x16ed   : > { %18957 = vmatmul.mubr.msk.f32.gmra.mxu0 %vm740_vm0, %v21446_v49  ;;  %v10430_v58 = vadd.f32 %v18935_v52, %v17163_v41 }
0x16ee   : > { %v10424_v26 = vpop.f32.mrf.mxu1  ;;  %18959 = vmatprep.mubr.msk.f32.mxu0 %vm740_vm0, %v21459_v0 }
0x16ef   : > { %v10425_v19 = vadd.f32 %v17163_v41, %v10424_v26 }
0x16f0   : > { %v21740_v27 = vpop.f32.mrf.mxu1 }
0x16f1   : > { %18960 = vmatmul.mubr.msk.f32.gmra.mxu0 %vm740_vm0, %v21461_v2  ;;  %v10440_v52 = vadd.f32 %v21740_v27, %v17163_v41 }
0x16f2   : > { %v10434_v4 = vpop.f32.mrf.mxu1  ;;  %18984 = vmatprep.mubr.msk.f32.mxu0 %vm19870_vm1, %v19869_v20 }
0x16f3   : > { %v10435_v38 = vadd.f32 %v17163_v41, %v10434_v4 }
0x16f4   : > { %v21746_v15 = vpop.f32.mrf.mxu1 }
0x16f5   : > { %v10450_v27 = vadd.f32 %v21746_v15, %v17163_v41 }
0x16f6   : > { %v21748_v12 = vpop.f32.mrf.mxu1 }
0x16f7   : > { %v10445_v4 = vadd.f32 %v17163_v41, %v21748_v12 }
0x16f8   : > { %v21750_v62 = vpop.f32.mrf.mxu1 }
0x16f9   : > { %v10656_v12 = vadd.f32 %v21750_v62, %v21757_v37 }
0x16fa   : > { %v21752_v7 = vpop.f32.mrf.mxu1 }
0x16fc   : > { %v18975_v33 = vpop.f32.mrf.mxu1 }
0x16fd   : > { %v21760_v8 = vadd.f32 %v18975_v33, %v21757_v37 }
0x16fe   : > { %v10660_v30 = vpop.f32.mrf.mxu1 }
0x16ff   : > { %v21763_v40 = vadd.f32 %v21757_v37, %v10660_v30  ;;  %v10651_v30 = vadd.f32 %v21757_v37, %v21752_v7 }
0x1700   : > { %v18978_v25 = vpop.f32.mrf.mxu1 }
0x1701   : > { %v21766_v28 = vadd.f32 %v18978_v25, %v21757_v37 }
0x1702   : > { %v10670_v57 = vpop.f32.mrf.mxu1 }
0x1703   : > { %v21769_v56 = vadd.f32 %v21757_v37, %v10670_v57 }
0x1704   : > { %v18981_v42 = vpop.f32.mrf.mxu1 }
0x1705   : > { %v21772_v34 = vadd.f32 %v18981_v42, %v21757_v37 }
0x1706   : > { %v21846_v57 = vpop.f32.mrf.mxu1 }
0x1795   : > { %v21774_v59 = vpop.f32.mrf.mxu0 }
0x1797   : > { %v21776_v29 = vpop.f32.mrf.mxu0 }
0x1799   : > { %v21778_v24 = vpop.f32.mrf.mxu0 }
0x179b   : > { %v21780_v61 = vpop.f32.mrf.mxu0 }
0x179d   : > { %v21782_v22 = vpop.f32.mrf.mxu0 }
0x179f   : > { %v21784_v31 = vpop.f32.mrf.mxu0 }
0x17a1   : > { %v21786_v6 = vpop.f32.mrf.mxu0 }
0x17a3   : > { %v21788_v11 = vpop.f32.mrf.mxu0 }
0x17a5   : > { %v18952_v51 = vpop.f32.mrf.mxu0 }
0x17a6   : > { %v10538_v53 = vadd.f32 %v18952_v51, %v17177_v13 }
0x17a7   : > { %v10532_v47 = vpop.f32.mrf.mxu0 }
0x17a8   : > { %v10533_v63 = vadd.f32 %v17177_v13, %v10532_v47 }
0x17a9   : > { %v18955_v46 = vpop.f32.mrf.mxu0 }
0x17aa   : > { %18983 = vmatpush3.xpose.msk.msra.mxu0 %vm1150_vm2, %v10533_v63  ;;  %v10548_v14 = vadd.f32 %v18955_v46, %v17177_v13 }
0x17ab   : > { %v10542_v48 = vpop.f32.mrf.mxu0  ;;  %18987 = vmatprep.subr.mxu0 %v19869_v20 }
0x17ac   : > { %v10543_v1 = vadd.f32 %v17177_v13, %v10542_v48 }
0x17ad   : > { %v18958_v39 = vpop.f32.mrf.mxu0  ;;  %18985 = vmatmul.mubr.msk.f32.vlgmr.msra.gmra.mxu0 %vm1150_vm2, %v10415_v17 }
0x17ae   : > { %18988 = vmatpush3.xpose.msk.msra.mxu0 %vm1150_vm2, %v10538_v53  ;;  %18993 = vmatpush3.xpose.msk.msra.mxu1 %vm1150_vm2, %v10543_v1  ;;  %v10558_v26 = vadd.f32 %v18958_v39, %v17177_v13 }
0x17af   : > { %v10552_v50 = vpop.f32.mrf.mxu0  ;;  %18989 = vmatprep.mubr.msk.f32.mxu0 %vm19870_vm1, %v19869_v20  ;;  %18997 = vmatprep.subr.mxu0 %v19869_v20 }
0x17b0   : > { %v10553_v3 = vadd.f32 %v17177_v13, %v10552_v50  ;;  %19002 = vmatprep.subr.mxu1 %v19869_v20 }
0x17b1   : > { %v18961_v44 = vpop.f32.mrf.mxu0  ;;  %18990 = vmatmul.mubr.msk.f32.vlgmr.msra.gmra.mxu0 %vm1150_vm2, %v10420_v45  ;;  %18995 = vmatmul.mubr.msk.f32.vlgmr.msra.gmra.mxu1 %vm1150_vm2, %v10425_v19 }
0x17b2   : > { %18998 = vmatpush3.xpose.msk.msra.mxu0 %vm1150_vm2, %v10548_v14  ;;  %19003 = vmatpush3.xpose.msk.msra.mxu1 %vm1150_vm2, %v10553_v3  ;;  %v10568_v25 = vadd.f32 %v18961_v44, %v17177_v13 }
0x17b3   : > { %v10562_v18 = vpop.f32.mrf.mxu0  ;;  %18999 = vmatprep.mubr.msk.f32.mxu0 %vm19870_vm1, %v19869_v20  ;;  %19004 = vmatprep.mubr.msk.f32.mxu1 %vm19870_vm1, %v19869_v20 }
0x17b4   : > { %v10563_v33 = vadd.f32 %v17177_v13, %v10562_v18  ;;  %19007 = vmatprep.subr.mxu0 %v19869_v20  ;;  %19012 = vmatprep.subr.mxu1 %v19869_v20 }
0x17b5   : > { %19000 = vmatmul.mubr.msk.f32.vlgmr.msra.gmra.mxu0 %vm1150_vm2, %v10430_v58  ;;  %19005 = vmatmul.mubr.msk.f32.vlgmr.msra.gmra.mxu1 %vm1150_vm2, %v10435_v38 }
0x17b6   : > { %19008 = vmatpush3.xpose.msk.msra.mxu0 %vm1150_vm2, %v10558_v26  ;;  %19013 = vmatpush3.xpose.msk.msra.mxu1 %vm1150_vm2, %v10563_v33 }
0x17b7   : > { %19009 = vmatprep.mubr.msk.f32.mxu0 %vm19870_vm1, %v19869_v20  ;;  %19014 = vmatprep.mubr.msk.f32.mxu1 %vm19870_vm1, %v19869_v20 }
0x17b8   : > { %19017 = vmatprep.subr.mxu0 %v19869_v20  ;;  %19022 = vmatprep.subr.mxu1 %v19869_v20 }
0x17b9   : > { %19010 = vmatmul.mubr.msk.f32.vlgmr.msra.gmra.mxu0 %vm1150_vm2, %v10440_v52  ;;  %19015 = vmatmul.mubr.msk.f32.vlgmr.msra.gmra.mxu1 %vm1150_vm2, %v10445_v4 }
0x17ba   : > { %19018 = vmatpush3.xpose.msk.msra.mxu0 %vm1150_vm2, %v10568_v25  ;;  %19023 = vmatpush3.msra.mxu1 %v10651_v30 }
0x17bb   : > { %19019 = vmatprep.mubr.msk.f32.mxu0 %vm19870_vm1, %v19869_v20  ;;  %19027 = vmatprep.subr.mxu0 %v19869_v20 }
0x17bc   : > { %19024 = vmatprep.mubr.msk.f32.mxu1 %vm19870_vm1, %v19869_v20  ;;  %19032 = vmatprep.subr.mxu1 %v19869_v20 }
0x17bd   : > { %19020 = vmatmul.mubr.msk.f32.vlgmr.msra.gmra.mxu0 %vm1150_vm2, %v10450_v27 }
0x17be   : > { %19028 = vmatpush3.msra.mxu0 %v10656_v12  ;;  %19029 = vmatprep.mubr.msk.f32.mxu0 %vm19870_vm1, %v19869_v20 }
0x17bf   : > { %19037 = vmatprep.subr.mxu0 %v19869_v20 }
0x186d   : > { %v10761_v15 = vpop.f32.mrf.mxu0 }
0x186e   : > { %v10762_v7 = vadd.f32 %v21561_v10, %v10761_v15 }
0x186f   : > { %v18986_v42 = vpop.f32.mrf.mxu0 }
0x1870   : > { %v11297_v62 = vsel %vm1150_vm2, %v10762_v7, -inf }
0x1871   : > { %v10913_v51 = vpop.f32.mrf.mxu1  ;;  %11298 = vmax.xlane.f32.xlu0 %v11297_v62  ;;  %v10837_v13 = vpop.f32.mrf.mxu0 }
0x1872   : > { %v10914_v47 = vadd.f32 %v21572_v55, %v10913_v51  ;;  %v10838_v63 = vadd.f32 %v21568_v35, %v10837_v13 }
0x1873   : > { %v18991_v46 = vpop.f32.mrf.mxu0  ;;  %v18996_v41 = vpop.f32.mrf.mxu1 }
0x1874   : > { %v11303_v17 = vsel %vm1150_vm2, %v10914_v47, -inf  ;;  %v11300_v48 = vsel %vm1150_vm2, %v10838_v63, -inf }
0x1875   : > { %v11065_v53 = vpop.f32.mrf.mxu1  ;;  %11304 = vmax.xlane.f32.xlu0 %v11303_v17  ;;  %11301 = vmax.xlane.f32.xlu1 %v11300_v48  ;;  %v10989_v10 = vpop.f32.mrf.mxu0 }
0x1876   : > { %v11066_v1 = vadd.f32 %v21582_v36, %v11065_v53  ;;  %v10990_v39 = vadd.f32 %v21578_v21, %v10989_v10 }
0x1877   : > { %v19001_v45 = vpop.f32.mrf.mxu0  ;;  %v19006_v19 = vpop.f32.mrf.mxu1 }
0x1878   : > { %v11309_v55 = vsel %vm1150_vm2, %v11066_v1, -inf  ;;  %v11306_v35 = vsel %vm1150_vm2, %v10990_v39, -inf }
0x1879   : > { %v11217_v50 = vpop.f32.mrf.mxu1  ;;  %11310 = vmax.xlane.f32.xlu0 %v11309_v55  ;;  %11307 = vmax.xlane.f32.xlu1 %v11306_v35  ;;  %v11141_v14 = vpop.f32.mrf.mxu0 }
0x187a   : > { %v11218_v3 = vadd.f32 %v21592_v43, %v11217_v50  ;;  %v11142_v44 = vadd.f32 %v21588_v54, %v11141_v14 }
0x187b   : > { %v19011_v58 = vpop.f32.mrf.mxu0  ;;  %v19016_v38 = vpop.f32.mrf.mxu1 }
0x187c   : > { %v11315_v36 = vsel %vm1150_vm2, %v11218_v3, -inf  ;;  %v11312_v21 = vsel %vm1150_vm2, %v11142_v44, -inf }
0x187d   : > { %11316 = vmax.xlane.f32.xlu0 %v11315_v36  ;;  %11313 = vmax.xlane.f32.xlu1 %v11312_v21  ;;  %v11293_v18 = vpop.f32.mrf.mxu0 }
0x187e   : > { %v11294_v26 = vadd.f32 %v21598_v16, %v11293_v18 }
0x187f   : > { %v19021_v33 = vpop.f32.mrf.mxu0 }
0x1880   : > { %v11318_v52 = vsel %vm1150_vm2, %v11294_v26, -inf }
0x1881   : > { %11319 = vmax.xlane.f32.xlu1 %v11318_v52 }
0x18fa   : > { %v11299_v4 = vpop.xlane.xlu0 %11298 }
0x18fb   : > { %v11321_v30 = vsub.f32 %v10762_v7, %v11299_v4 }
0x18fd   : > { %v11329_v43 = vmul.f32 1.442695, %v11321_v30 }
0x18fe   : > { %v11305_v25 = vpop.xlane.xlu0 %11304  ;;  %v11302_v54 = vpop.xlane.xlu1 %11301 }
0x18ff   : > { %19664 = vpow2.f32 %v11329_v43  ;;  %v11323_v27 = vsub.f32 %v10914_v47, %v11305_v25  ;;  %v11322_v12 = vsub.f32 %v10838_v63, %v11302_v54 }
0x1901   : > { %v11333_v15 = vmul.f32 1.442695, %v11323_v27  ;;  %v11331_v42 = vmul.f32 1.442695, %v11322_v12 }
0x1902   : > { %v11311_v62 = vpop.xlane.xlu0 %11310  ;;  %v11308_v51 = vpop.xlane.xlu1 %11307 }
0x1903   : > { %19666 = vpow2.f32 %v11333_v15  ;;  %v11325_v13 = vsub.f32 %v11066_v1, %v11311_v62  ;;  %v11324_v46 = vsub.f32 %v10990_v39, %v11308_v51 }
0x1904   : > { %19668 = vpow2.f32 %v11331_v42 }
0x1905   : > { %v11337_v16 = vmul.f32 1.442695, %v11325_v13  ;;  %v11335_v41 = vmul.f32 1.442695, %v11324_v46 }
0x1906   : > { %v11317_v17 = vpop.xlane.xlu0 %11316  ;;  %v11314_v48 = vpop.xlane.xlu1 %11313 }
0x1907   : > { %19670 = vpow2.f32 %v11337_v16  ;;  %v11327_v7 = vsub.f32 %v11218_v3, %v11317_v17  ;;  %v11326_v53 = vsub.f32 %v11142_v44, %v11314_v48 }
0x1908   : > { %19672 = vpow2.f32 %v11335_v41 }
0x1909   : > { %v11341_v10 = vmul.f32 1.442695, %v11327_v7  ;;  %v11339_v45 = vmul.f32 1.442695, %v11326_v53 }
0x190a   : > { %v11320_v47 = vpop.xlane.xlu1 %11319 }
0x190b   : > { %19674 = vpow2.f32 %v11341_v10  ;;  %v11328_v63 = vsub.f32 %v11294_v26, %v11320_v47  ;;  %v17234_v47 = vld [vmem:[%s22964_s0 + $0xc8] sm:$0xff] }
0x190c   : > { %v19665_v19 = vpop.eup %19664  ;;  %19676 = vpow2.f32 %v11339_v45  ;;  %v17235_v45 = vld [vmem:[%s22964_s0 + $0xd0] sm:$0xff] }
0x190d   : > { %v11343_v55 = vmul.f32 1.442695, %v11328_v63  ;;  %v11345_v1 = vsel %vm1150_vm2, %v19665_v19, 0.0  ;;  %v17264_v63 = vld [vmem:[%s22935_s7 + $0xd8] sm:$0xff] }
0x190e   : > { %11346 = vadd.xlane.f32.xlu0 %v11345_v1  ;;  %v17261_v1 = vld [vmem:[%s22935_s7 + $0xc0] sm:$0xff] }
0x190f   : > { %19678 = vpow2.f32 %v11343_v55  ;;  %v17262_v55 = vld [vmem:[%s22935_s7 + $0xc8] sm:$0xff] }
0x1910   : > { %v19667_v39 = vpop.eup %19666 }
0x1911   : > { %v19669_v35 = vpop.eup %19668  ;;  %v11351_v50 = vsel %vm1150_vm2, %v19667_v39, 0.0 }
0x1912   : > { %11352 = vadd.xlane.f32.xlu0 %v11351_v50  ;;  %v11348_v14 = vsel %vm1150_vm2, %v19669_v35, 0.0 }
0x1913   : > { %11349 = vadd.xlane.f32.xlu1 %v11348_v14 }
0x1914   : > { %v19671_v3 = vpop.eup %19670 }
0x1915   : > { %v19673_v44 = vpop.eup %19672  ;;  %v11357_v58 = vsel %vm1150_vm2, %v19671_v3, 0.0 }
0x1916   : > { %11358 = vadd.xlane.f32.xlu0 %v11357_v58  ;;  %v11354_v38 = vsel %vm1150_vm2, %v19673_v44, 0.0  ;;  %v17249_v58 = vld [vmem:[%s22963_s3 + $0xd0] sm:$0xff] }
0x1917   : > { %11355 = vadd.xlane.f32.xlu1 %v11354_v38 }
0x1918   : > { %v19675_v36 = vpop.eup %19674 }
0x1919   : > { %v19677_v21 = vpop.eup %19676  ;;  %v11363_v18 = vsel %vm1150_vm2, %v19675_v36, 0.0 }
0x191a   : > { %11364 = vadd.xlane.f32.xlu0 %v11363_v18  ;;  %v11360_v26 = vsel %vm1150_vm2, %v19677_v21, 0.0 }
0x191b   : > { %11361 = vadd.xlane.f32.xlu1 %v11360_v26 }
0x191c   : > { %v19679_v33 = vpop.eup %19678 }
0x191d   : > { %v11366_v52 = vsel %vm1150_vm2, %v19679_v33, 0.0 }
0x191f   : > { %11367 = vadd.xlane.f32.xlu1 %v11366_v52 }
0x1997   : > { %v11347_v4 = vpop.xlane.xlu0 %11346 }
0x1998   : > { %19680 = vrcp.f32 %v11347_v4 }
0x199b   : > { %v11353_v30 = vpop.xlane.xlu0 %11352 }
0x199c   : > { %19682 = vrcp.f32 %v11353_v30  ;;  %v11350_v43 = vpop.xlane.xlu1 %11349 }
0x199d   : > { %19684 = vrcp.f32 %v11350_v43 }
0x199f   : > { %v11359_v25 = vpop.xlane.xlu0 %11358 }
0x19a0   : > { %19686 = vrcp.f32 %v11359_v25  ;;  %v11356_v54 = vpop.xlane.xlu1 %11355 }
0x19a1   : > { %19688 = vrcp.f32 %v11356_v54 }
0x19a3   : > { %v11365_v27 = vpop.xlane.xlu0 %11364 }
0x19a4   : > { %19690 = vrcp.f32 %v11365_v27  ;;  %v11362_v12 = vpop.xlane.xlu1 %11361 }
0x19a5   : > { %v19681_v15 = vpop.eup %19680  ;;  %19692 = vrcp.f32 %v11362_v12 }
0x19a6   : > { %v11370_v42 = vmul.f32 %v19681_v15, %v19665_v19  ;;  %v17263_v19 = vld [vmem:[%s22935_s7 + $0xd0] sm:$0xff] }
0x19a8   : > { %v11368_v62 = vpop.xlane.xlu1 %11367  ;;  %19025 = vmatmul.mubr.msk.f32.vlgmr.msra.gmra.mxu1 %vm1150_vm2, %v11370_v42 }
0x19a9   : > { %v19683_v51 = vpop.eup %19682  ;;  %19694 = vrcp.f32 %v11368_v62  ;;  %19033 = vmatpush3.msra.mxu1 %v21763_v40  ;;  %19034 = vmatprep.mubr.msk.f32.mxu1 %vm19870_vm1, %v19869_v20  ;;  %v10681_v40 = vadd.f32 %v21757_v37, %v21846_v57  ;;  %v17236_v57 = vld [vmem:[%s22964_s0 + $0xd8] sm:$0xff] }
0x19aa   : > { %v19685_v13 = vpop.eup %19684  ;;  %v11374_v46 = vmul.f32 %v19683_v51, %v19667_v39  ;;  %19042 = vmatprep.subr.mxu1 %v19869_v20  ;;  %v17224_v39 = vld [vmem:[%s22937_s9 + $0x28] sm:$0xff] }
0x19ab   : > { %v11372_v16 = vmul.f32 %v19685_v13, %v19669_v35  ;;  %v17250_v35 = vld [vmem:[%s22963_s3 + $0xd8] sm:$0xff] }
0x19ac   : > { %19035 = vmatmul.mubr.msk.f32.vlgmr.msra.gmra.mxu1 %vm1150_vm2, %v11374_v46 }
0x19ad   : > { %v19687_v41 = vpop.eup %19686  ;;  %19030 = vmatmul.mubr.msk.f32.vlgmr.msra.gmra.mxu0 %vm1150_vm2, %v11372_v16  ;;  %19043 = vmatpush3.msra.mxu1 %v21769_v56 }
0x19ae   : > { %v19689_v17 = vpop.eup %19688  ;;  %v11378_v48 = vmul.f32 %v19687_v41, %v19671_v3  ;;  %19038 = vmatpush3.msra.mxu0 %v21760_v8  ;;  %19039 = vmatprep.mubr.msk.f32.mxu0 %vm19870_vm1, %v19869_v20 }
0x19af   : > { %v11376_v7 = vmul.f32 %v19689_v17, %v19673_v44  ;;  %19044 = vmatprep.mubr.msk.f32.mxu1 %vm19870_vm1, %v19869_v20  ;;  %19047 = vmatprep.subr.mxu0 %v19869_v20 }
0x19b0   : > { %19052 = vmatprep.subr.mxu1 %v19869_v20  ;;  %19045 = vmatmul.mubr.msk.f32.vlgmr.msra.gmra.mxu1 %vm1150_vm2, %v11378_v48 }
0x19b1   : > { %v19691_v56 = vpop.eup %19690  ;;  %19040 = vmatmul.mubr.msk.f32.vlgmr.msra.gmra.mxu0 %vm1150_vm2, %v11376_v7  ;;  %19053 = vmatpush3.msra.mxu1 %v10681_v40  ;;  %v22026_v40 = vld [vmem:[%s22936_s8 + $0x6] ss:$0 sm:$0xff] }
0x19b2   : > { %v19693_v8 = vpop.eup %19692  ;;  %v11382_v53 = vmul.f32 %v19691_v56, %v19675_v36  ;;  %19048 = vmatpush3.msra.mxu0 %v21766_v28  ;;  %19049 = vmatprep.mubr.msk.f32.mxu0 %vm19870_vm1, %v19869_v20 }
0x19b3   : > { %v11380_v37 = vmul.f32 %v19693_v8, %v19677_v21  ;;  %19054 = vmatprep.mubr.msk.f32.mxu1 %vm19870_vm1, %v19869_v20  ;;  %19057 = vmatprep.subr.mxu0 %v19869_v20  ;;  %v17248_v21 = vld [vmem:[%s22963_s3 + $0xc8] sm:$0xff] }
0x19b4   : > { %19055 = vmatmul.mubr.msk.f32.vlgmr.msra.gmra.mxu1 %vm1150_vm2, %v11382_v53  ;;  %19062 = vmatprep.subr.mxu1 %v17224_v39 }
0x19b5   : > { %19050 = vmatmul.mubr.msk.f32.vlgmr.msra.gmra.mxu0 %vm1150_vm2, %v11380_v37  ;;  %19063 = vmatpush3.msra.mxu1 %v17224_v39 }
0x19b6   : > { %v19695_v10 = vpop.eup %19694  ;;  %19058 = vmatpush3.msra.mxu0 %v21772_v34  ;;  %19059 = vmatprep.mubr.msk.f32.mxu0 %vm19870_vm1, %v19869_v20  ;;  %v17233_v34 = vld [vmem:[%s22964_s0 + $0xc0] sm:$0xff] }
0x19b7   : > { %v11384_v28 = vmul.f32 %v19695_v10, %v19679_v33  ;;  %19076 = vmatprep.subr.mxu0 %v17236_v57  ;;  %19096 = vmatprep.subr.mxu1 %v17250_v35  ;;  %v17247_v33 = vld [vmem:[%s22963_s3 + $0xc0] sm:$0xff] }
0x19b9   : > { %19060 = vmatmul.mubr.msk.f32.vlgmr.msra.gmra.mxu0 %vm1150_vm2, %v11384_v28 }
0x19ba   : > { %19077 = vmatpush3.msra.mxu0 %v17236_v57  ;;  %19084 = vmatprep.mubr.msk.f32.mxu0 %vm740_vm0, %v21409_v9 }
0x19bb   : > { %19078 = vmatprep.subr.mxu0 %v17235_v45 }
0x19bc   : > { %19079 = vmatpush3.msra.mxu0 %v17235_v45 }
0x19bd   : > { %19080 = vmatprep.subr.mxu0 %v17234_v47 }
0x19be   : > { %19081 = vmatpush3.msra.mxu0 %v17234_v47 }
0x19bf   : > { %19082 = vmatprep.subr.mxu0 %v17233_v34 }
0x19c0   : > { %19083 = vmatpush3.msra.mxu0 %v17233_v34  ;;  %v17082_v34 = vld [vmem:[%s22938_s10 + $0x1] ss:$0 sm:$0xff] }
0x19c1   : > { %19085 = vmatmul.mubr.msk.f32.vlgmr.msra.gmra.mxu0 %vm740_vm0, %v21412_v5  ;;  %19116 = vmatprep.subr.mxu0 %v17264_v63 }
0x19c2   : > { %19087 = vmatprep.mubr.msk.f32.mxu0 %vm740_vm0, %v21426_v23  ;;  %19117 = vmatpush3.msra.mxu0 %v17264_v63  ;;  %v8531_v63 = vadd.f32 %v17082_v34, %v21412_v5 }
0x19c3   : > { %19118 = vmatprep.subr.mxu0 %v17263_v19 }
0x19c4   : > { %19119 = vmatpush3.msra.mxu0 %v17263_v19  ;;  %v10328_v19 = vadd.f32 %v21774_v59, %v8531_v63  ;;  %v8535_v59 = vadd.f32 %v17082_v34, %v21446_v49 }
0x19c5   : > { %19088 = vmatmul.mubr.msk.f32.gmra.mxu0 %vm740_vm0, %v21429_v32  ;;  %19120 = vmatprep.subr.mxu0 %v17262_v55 }
0x19c6   : > { %19090 = vmatprep.mubr.msk.f32.mxu0 %vm740_vm0, %v21443_v60  ;;  %19121 = vmatpush3.msra.mxu0 %v17262_v55  ;;  %v8530_v55 = vadd.f32 %v17082_v34, %v21409_v9 }
0x19c7   : > { %19122 = vmatprep.subr.mxu0 %v17261_v1 }
0x19c8   : > { %19123 = vmatpush3.msra.mxu0 %v17261_v1  ;;  %v10327_v39 = vadd.f32 %v21776_v29, %v8530_v55  ;;  %v10332_v29 = vadd.f32 %v21782_v22, %v8535_v59 }
0x19c9   : > { %19091 = vmatmul.mubr.msk.f32.gmra.mxu0 %vm740_vm0, %v21446_v49  ;;  %19146 = vmatprep.subr.mxu0 %v19869_v20 }
0x19ca   : > { %19093 = vmatprep.mubr.msk.f32.mxu0 %vm740_vm0, %v21459_v0 }
0x19cd   : > { %19094 = vmatmul.mubr.msk.f32.gmra.mxu0 %vm740_vm0, %v21461_v2 }
0x19ce   : > { %19124 = vmatprep.mubr.msk.f32.mxu0 %vm740_vm0, %v21409_v9 }
0x19d1   : > { %19125 = vmatmul.mubr.msk.f32.vlgmr.msra.gmra.mxu0 %vm740_vm0, %v21412_v5 }
0x19d2   : > { %19127 = vmatprep.mubr.msk.f32.mxu0 %vm740_vm0, %v21426_v23 }
0x19d5   : > { %19128 = vmatmul.mubr.msk.f32.gmra.mxu0 %vm740_vm0, %v21429_v32 }
0x19d6   : > { %19130 = vmatprep.mubr.msk.f32.mxu0 %vm740_vm0, %v21443_v60 }
0x19d9   : > { %19131 = vmatmul.mubr.msk.f32.gmra.mxu0 %vm740_vm0, %v21446_v49 }
0x19da   : > { %19133 = vmatprep.mubr.msk.f32.mxu0 %vm740_vm0, %v21459_v0 }
0x19dd   : > { %19134 = vmatmul.mubr.msk.f32.gmra.mxu0 %vm740_vm0, %v21461_v2 }
0x19de   : > { %19148 = vmatprep.mubr.msk.f32.mxu0 %vm19870_vm1, %v19869_v20 }
0x1a68   : > { %v11454_v50 = vpop.f32.mrf.mxu1 }
0x1a69   : > { %19064 = vmatprep.mubr.msk.f32.mxu1 %vm1150_vm2, %v11454_v50 }
0x1a6a   : > { %v19026_v14 = vpop.f32.mrf.mxu1 }
0x1a6c   : > { %v11600_v3 = vpop.f32.mrf.mxu1 }
0x1a6d   : > { %v11527_v44 = vpop.f32.mrf.mxu0 }
0x1a6e   : > { %19065 = vmatmul.mubr.msk.f32.vlgmr.msra.gmra.mxu1 %vm1150_vm2, %v11527_v44  ;;  %v19036_v38 = vpop.f32.mrf.mxu1  ;;  %v8532_v44 = vadd.f32 %v17082_v34, %v21426_v23 }
0x1a6f   : > { %v19031_v36 = vpop.f32.mrf.mxu0  ;;  %19067 = vmatprep.mubr.msk.f32.mxu1 %vm1150_vm2, %v11600_v3  ;;  %19097 = vmatpush3.msra.mxu1 %v17250_v35  ;;  %v8533_v35 = vadd.f32 %v17082_v34, %v21429_v32 }
0x1a70   : > { %v11746_v18 = vpop.f32.mrf.mxu1  ;;  %19098 = vmatprep.subr.mxu1 %v17249_v58  ;;  %v10329_v36 = vadd.f32 %v21780_v61, %v8532_v44 }
0x1a71   : > { %v11673_v26 = vpop.f32.mrf.mxu0  ;;  %19099 = vmatpush3.msra.mxu1 %v17249_v58  ;;  %v10330_v3 = vadd.f32 %v21778_v24, %v8533_v35 }
0x1a72   : > { %19068 = vmatmul.mubr.msk.f32.gmra.mxu1 %vm1150_vm2, %v11673_v26  ;;  %v19046_v52 = vpop.f32.mrf.mxu1  ;;  %19100 = vmatprep.subr.mxu1 %v17248_v21  ;;  %v8534_v26 = vadd.f32 %v17082_v34, %v21443_v60 }
0x1a73   : > { %v19041_v4 = vpop.f32.mrf.mxu0  ;;  %19070 = vmatprep.mubr.msk.f32.mxu1 %vm1150_vm2, %v11746_v18  ;;  %19101 = vmatpush3.msra.mxu1 %v17248_v21 }
0x1a74   : > { %v11892_v30 = vpop.f32.mrf.mxu1  ;;  %19102 = vmatprep.subr.mxu1 %v17247_v33  ;;  %v10331_v24 = vadd.f32 %v21784_v31, %v8534_v26  ;;  %v8537_v4 = vadd.f32 %v17082_v34, %v21461_v2 }
0x1a75   : > { %v11819_v43 = vpop.f32.mrf.mxu0  ;;  %19103 = vmatpush3.msra.mxu1 %v17247_v33 }
0x1a76   : > { %19071 = vmatmul.mubr.msk.f32.gmra.mxu1 %vm1150_vm2, %v11819_v43  ;;  %v19056_v25 = vpop.f32.mrf.mxu1  ;;  %19136 = vmatprep.subr.mxu1 %v19869_v20  ;;  %v10334_v61 = vadd.f32 %v21786_v6, %v8537_v4 }
0x1a77   : > { %v19051_v54 = vpop.f32.mrf.mxu0  ;;  %19073 = vmatprep.mubr.msk.f32.mxu1 %vm1150_vm2, %v11892_v30  ;;  %v8536_v25 = vadd.f32 %v17082_v34, %v21459_v0  ;;  %v17238_v34 = vld [vmem:[%s22966_s30 + $0x6] ss:$0 sm:$0xff] }
0x1a79   : > { %v11965_v27 = vpop.f32.mrf.mxu0  ;;  %v10333_v22 = vadd.f32 %v21788_v11, %v8536_v25 }
0x1a7a   : > { %19074 = vmatmul.mubr.msk.f32.gmra.mxu1 %vm1150_vm2, %v11965_v27 }
0x1a7b   : > { %v19061_v12 = vpop.f32.mrf.mxu0  ;;  %19104 = vmatprep.mubr.msk.f32.mxu1 %vm740_vm0, %v21409_v9 }
0x1a7e   : > { %19105 = vmatmul.mubr.msk.f32.vlgmr.msra.gmra.mxu1 %vm740_vm0, %v21412_v5 }
0x1a7f   : > { %19107 = vmatprep.mubr.msk.f32.mxu1 %vm740_vm0, %v21426_v23 }
0x1a81   : > { %v21991_v15 = vpop.f32.mrf.mxu0 }
0x1a82   : > { %19108 = vmatmul.mubr.msk.f32.gmra.mxu1 %vm740_vm0, %v21429_v32 }
0x1a83   : > { %v21995_v42 = vpop.f32.mrf.mxu0  ;;  %19110 = vmatprep.mubr.msk.f32.mxu1 %vm740_vm0, %v21443_v60 }
0x1a84   : > { %v12188_v11 = vadd.f32 %v17238_v34, %v21995_v42 }
0x1a85   : > { %v21999_v62 = vpop.f32.mrf.mxu0 }
0x1a86   : > { %19111 = vmatmul.mubr.msk.f32.gmra.mxu1 %vm740_vm0, %v21446_v49 }
0x1a87   : > { %v22003_v51 = vpop.f32.mrf.mxu0  ;;  %19113 = vmatprep.mubr.msk.f32.mxu1 %vm740_vm0, %v21459_v0 }
0x1a88   : > { %v12198_v35 = vadd.f32 %v17238_v34, %v22003_v51 }
0x1a89   : > { %v22007_v13 = vpop.f32.mrf.mxu0 }
0x1a8a   : > { %19114 = vmatmul.mubr.msk.f32.gmra.mxu1 %vm740_vm0, %v21461_v2 }
0x1a8b   : > { %v22011_v46 = vpop.f32.mrf.mxu0  ;;  %19138 = vmatprep.mubr.msk.f32.mxu1 %vm19870_vm1, %v19869_v20 }
0x1a8c   : > { %v12208_v51 = vadd.f32 %v17238_v34, %v22011_v46 }
0x1a8d   : > { %v22015_v16 = vpop.f32.mrf.mxu0 }
0x1a8f   : > { %v22017_v41 = vpop.f32.mrf.mxu0 }
0x1a90   : > { %v12218_v46 = vadd.f32 %v17238_v34, %v22017_v41 }
0x1a91   : > { %v22019_v17 = vpop.f32.mrf.mxu0 }
0x1a92   : > { %v12429_v41 = vadd.f32 %v22019_v17, %v22026_v40 }
0x1a93   : > { %v22021_v48 = vpop.f32.mrf.mxu0 }
0x1a95   : > { %v19129_v7 = vpop.f32.mrf.mxu0 }
0x1a96   : > { %v22029_v56 = vadd.f32 %v19129_v7, %v22026_v40 }
0x1a97   : > { %v12433_v8 = vpop.f32.mrf.mxu0 }
0x1a98   : > { %v22032_v53 = vadd.f32 %v22026_v40, %v12433_v8 }
0x1a99   : > { %v19132_v37 = vpop.f32.mrf.mxu0 }
0x1a9a   : > { %v22035_v57 = vadd.f32 %v19132_v37, %v22026_v40  ;;  %v17252_v37 = vld [vmem:[%s22934_s6 + $0x6] ss:$0 sm:$0xff] }
0x1a9b   : > { %v12443_v10 = vpop.f32.mrf.mxu0 }
0x1a9c   : > { %v22038_v28 = vadd.f32 %v22026_v40, %v12443_v10 }
0x1a9d   : > { %v19135_v45 = vpop.f32.mrf.mxu0 }
0x1a9e   : > { %v22041_v47 = vadd.f32 %v19135_v45, %v22026_v40 }
0x1a9f   : > { %v22142_v26 = vpop.f32.mrf.mxu0 }
0x1b2e   : > { %v19066_v1 = vpop.f32.mrf.mxu1 }
0x1b2f   : > { %v22051_v50 = vadd.f32 %v19066_v1, %v10328_v19 }
0x1b30   : > { %v12061_v14 = vpop.f32.mrf.mxu1 }
0x1b31   : > { %v22055_v58 = vadd.f32 %v12061_v14, %v10327_v39  ;;  %v12193_v39 = vadd.f32 %v21991_v15, %v17238_v34  ;;  %v12203_v15 = vadd.f32 %v21999_v62, %v17238_v34  ;;  %v12213_v62 = vadd.f32 %v22007_v13, %v17238_v34 }
0x1b32   : > { %v19069_v38 = vpop.f32.mrf.mxu1  ;;  %v12223_v13 = vadd.f32 %v22015_v16, %v17238_v34  ;;  %v22156_v34 = vld [vmem:[%s20209_s29 + $0x4] ss:$0 sm:$0xff] }
0x1b33   : > { %v22059_v21 = vadd.f32 %v19069_v38, %v10330_v3 }
0x1b34   : > { %v12071_v18 = vpop.f32.mrf.mxu1 }
0x1b35   : > { %v22063_v33 = vadd.f32 %v12071_v18, %v10329_v36  ;;  %v12424_v18 = vadd.f32 %v22026_v40, %v22021_v48  ;;  %v22139_v48 = vld [vmem:[%s20209_s29] ss:$0 sm:$0xff] }
0x1b36   : > { %v19072_v52 = vpop.f32.mrf.mxu1 }
0x1b37   : > { %v22067_v30 = vadd.f32 %v19072_v52, %v10332_v29 }
0x1b38   : > { %v12081_v43 = vpop.f32.mrf.mxu1 }
0x1b39   : > { %v22071_v54 = vadd.f32 %v12081_v43, %v10331_v24 }
0x1b3a   : > { %v19075_v27 = vpop.f32.mrf.mxu1 }
0x1b3b   : > { %v22074_v12 = vadd.f32 %v19075_v27, %v10334_v61  ;;  %v22146_v61 = vld [vmem:[%s20209_s29 + $0x2] ss:$0 sm:$0xff]  ;;  %v22150_v27 = vld [vmem:[%s20209_s29 + $0x1] ss:$0 sm:$0xff] }
0x1b3c   : > { %v12091_v7 = vpop.f32.mrf.mxu1 }
0x1b3d   : > { %v22076_v8 = vadd.f32 %v12091_v7, %v10333_v22 }
0x1b3e   : > { %v19106_v31 = vpop.f32.mrf.mxu1 }
0x1b3f   : > { %v12311_v19 = vadd.f32 %v19106_v31, %v17252_v37 }
0x1b40   : > { %v12305_v10 = vpop.f32.mrf.mxu1 }
0x1b41   : > { %v12306_v45 = vadd.f32 %v17252_v37, %v12305_v10 }
0x1b42   : > { %v19109_v6 = vpop.f32.mrf.mxu1 }
0x1b43   : > { %19137 = vmatpush3.xpose.msk.msra.mxu1 %vm1150_vm2, %v12306_v45  ;;  %v12321_v42 = vadd.f32 %v19109_v6, %v17252_v37 }
0x1b44   : > { %v12315_v63 = vpop.f32.mrf.mxu1  ;;  %19141 = vmatprep.subr.mxu1 %v19869_v20 }
0x1b45   : > { %v12316_v55 = vadd.f32 %v17252_v37, %v12315_v63  ;;  %v22160_v63 = vld [vmem:[%s20209_s29 + $0x3] ss:$0 sm:$0xff] }
0x1b46   : > { %v19112_v1 = vpop.f32.mrf.mxu1  ;;  %19139 = vmatmul.mubr.msk.f32.vlgmr.msra.gmra.mxu1 %vm1150_vm2, %v12188_v11 }
0x1b47   : > { %19142 = vmatpush3.xpose.msk.msra.mxu1 %vm1150_vm2, %v12311_v19  ;;  %19147 = vmatpush3.xpose.msk.msra.mxu0 %vm1150_vm2, %v12316_v55  ;;  %v12331_v36 = vadd.f32 %v19112_v1, %v17252_v37 }
0x1b48   : > { %v12325_v14 = vpop.f32.mrf.mxu1  ;;  %19143 = vmatprep.mubr.msk.f32.mxu1 %vm19870_vm1, %v19869_v20  ;;  %19151 = vmatprep.subr.mxu1 %v19869_v20 }
0x1b49   : > { %v12326_v3 = vadd.f32 %v17252_v37, %v12325_v14  ;;  %19156 = vmatprep.subr.mxu0 %v19869_v20 }
0x1b4a   : > { %v19115_v44 = vpop.f32.mrf.mxu1  ;;  %19144 = vmatmul.mubr.msk.f32.vlgmr.msra.gmra.mxu1 %vm1150_vm2, %v12193_v39  ;;  %19149 = vmatmul.mubr.msk.f32.vlgmr.msra.gmra.mxu0 %vm1150_vm2, %v12198_v35 }
0x1b4b   : > { %19152 = vmatpush3.xpose.msk.msra.mxu1 %vm1150_vm2, %v12321_v42  ;;  %19157 = vmatpush3.xpose.msk.msra.mxu0 %vm1150_vm2, %v12326_v3  ;;  %v12341_v29 = vadd.f32 %v19115_v44, %v17252_v37  ;;  %v22166_v3 = vld [vmem:[%s20209_s29 + $0x6] ss:$0 sm:$0xff] }
0x1b4c   : > { %v12335_v38 = vpop.f32.mrf.mxu1  ;;  %19153 = vmatprep.mubr.msk.f32.mxu1 %vm19870_vm1, %v19869_v20  ;;  %19158 = vmatprep.mubr.msk.f32.mxu0 %vm19870_vm1, %v19869_v20 }
0x1b4d   : > { %v12336_v59 = vadd.f32 %v17252_v37, %v12335_v38  ;;  %19161 = vmatprep.subr.mxu1 %v19869_v20  ;;  %19166 = vmatprep.subr.mxu0 %v19869_v20 }
0x1b4e   : > { %19154 = vmatmul.mubr.msk.f32.vlgmr.msra.gmra.mxu1 %vm1150_vm2, %v12203_v15  ;;  %19159 = vmatmul.mubr.msk.f32.vlgmr.msra.gmra.mxu0 %vm1150_vm2, %v12208_v51  ;;  %v22170_v15 = vld [vmem:[%s20209_s29 + $0x5] ss:$0 sm:$0xff] }
0x1b4f   : > { %19162 = vmatpush3.xpose.msk.msra.mxu1 %vm1150_vm2, %v12331_v36  ;;  %19167 = vmatpush3.xpose.msk.msra.mxu0 %vm1150_vm2, %v12336_v59 }
0x1b50   : > { %19163 = vmatprep.mubr.msk.f32.mxu1 %vm19870_vm1, %v19869_v20  ;;  %19168 = vmatprep.mubr.msk.f32.mxu0 %vm19870_vm1, %v19869_v20 }
0x1b51   : > { %19171 = vmatprep.subr.mxu1 %v19869_v20  ;;  %19176 = vmatprep.subr.mxu0 %v19869_v20 }
0x1b52   : > { %19164 = vmatmul.mubr.msk.f32.vlgmr.msra.gmra.mxu1 %vm1150_vm2, %v12213_v62  ;;  %19169 = vmatmul.mubr.msk.f32.vlgmr.msra.gmra.mxu0 %vm1150_vm2, %v12218_v46 }
0x1b53   : > { %19172 = vmatpush3.xpose.msk.msra.mxu1 %vm1150_vm2, %v12341_v29  ;;  %19177 = vmatpush3.msra.mxu0 %v12424_v18  ;;  %v22176_v18 = vld [vmem:[%s20209_s29 + $0x7] ss:$0 sm:$0xff]  ;;  %s22968_s29 = sshll.u32 %s22973_s5, 3  ;;  %s16765_s5 = sshll.u32 %s22975_s25, 3 }
0x1b54   : > { %19173 = vmatprep.mubr.msk.f32.mxu1 %vm19870_vm1, %v19869_v20  ;;  %19181 = vmatprep.subr.mxu1 %v19869_v20  ;;  %s22725_s27 = scalar_lea.vmem %s22969_s24, %s22968_s29  ;;  %s697_s21 = scalar_lea.vmem %s22970_s26, %s16765_s5 }
0x1b55   : > { %19178 = vmatprep.mubr.msk.f32.mxu0 %vm19870_vm1, %v19869_v20  ;;  %19186 = vmatprep.subr.mxu0 %v19869_v20 }
0x1b56   : > { %19174 = vmatmul.mubr.msk.f32.vlgmr.msra.gmra.mxu1 %vm1150_vm2, %v12223_v13 }
0x1b57   : > { %19182 = vmatpush3.msra.mxu1 %v12429_v41  ;;  %19183 = vmatprep.mubr.msk.f32.mxu1 %vm19870_vm1, %v19869_v20 }
0x1b58   : > { %19191 = vmatprep.subr.mxu1 %v19869_v20 }
0x1c06   : > { %v12534_v16 = vpop.f32.mrf.mxu1 }
0x1c07   : > { %v12535_v17 = vadd.f32 %v22139_v48, %v12534_v16 }
0x1c08   : > { %v19140_v52 = vpop.f32.mrf.mxu1 }
0x1c09   : > { %v13070_v24 = vsel %vm1150_vm2, %v12535_v17, -inf }
0x1c0a   : > { %v12686_v4 = vpop.f32.mrf.mxu0  ;;  %13071 = vmax.xlane.f32.xlu0 %v13070_v24  ;;  %v12610_v43 = vpop.f32.mrf.mxu1 }
0x1c0b   : > { %v12687_v25 = vadd.f32 %v22146_v61, %v12686_v4  ;;  %v12611_v22 = vadd.f32 %v22150_v27, %v12610_v43 }
0x1c0c   : > { %v19145_v7 = vpop.f32.mrf.mxu1  ;;  %v19150_v31 = vpop.f32.mrf.mxu0 }
0x1c0d   : > { %v13076_v37 = vsel %vm1150_vm2, %v12687_v25, -inf  ;;  %v13073_v10 = vsel %vm1150_vm2, %v12611_v22, -inf }
0x1c0e   : > { %v12838_v45 = vpop.f32.mrf.mxu0  ;;  %13077 = vmax.xlane.f32.xlu0 %v13076_v37  ;;  %13074 = vmax.xlane.f32.xlu1 %v13073_v10  ;;  %v12762_v6 = vpop.f32.mrf.mxu1 }
0x1c0f   : > { %v12839_v11 = vadd.f32 %v22156_v34, %v12838_v45  ;;  %v12763_v19 = vadd.f32 %v22160_v63, %v12762_v6 }
0x1c10   : > { %v19155_v55 = vpop.f32.mrf.mxu1  ;;  %v19160_v1 = vpop.f32.mrf.mxu0 }
0x1c11   : > { %v13082_v39 = vsel %vm1150_vm2, %v12839_v11, -inf  ;;  %v13079_v35 = vsel %vm1150_vm2, %v12763_v19, -inf }
0x1c12   : > { %v12990_v14 = vpop.f32.mrf.mxu0  ;;  %13083 = vmax.xlane.f32.xlu0 %v13082_v39  ;;  %13080 = vmax.xlane.f32.xlu1 %v13079_v35  ;;  %v12914_v42 = vpop.f32.mrf.mxu1 }
0x1c13   : > { %v12991_v44 = vadd.f32 %v22166_v3, %v12990_v14  ;;  %v12915_v51 = vadd.f32 %v22170_v15, %v12914_v42 }
0x1c14   : > { %v19165_v38 = vpop.f32.mrf.mxu1  ;;  %v19170_v36 = vpop.f32.mrf.mxu0 }
0x1c15   : > { %v13088_v59 = vsel %vm1150_vm2, %v12991_v44, -inf  ;;  %v13085_v62 = vsel %vm1150_vm2, %v12915_v51, -inf }
0x1c16   : > { %13089 = vmax.xlane.f32.xlu0 %v13088_v59  ;;  %13086 = vmax.xlane.f32.xlu1 %v13085_v62  ;;  %v13066_v46 = vpop.f32.mrf.mxu1 }
0x1c17   : > { %v13067_v29 = vadd.f32 %v22176_v18, %v13066_v46 }
0x1c18   : > { %v19175_v13 = vpop.f32.mrf.mxu1 }
0x1c19   : > { %v13091_v41 = vsel %vm1150_vm2, %v13067_v29, -inf }
0x1c1a   : > { %13092 = vmax.xlane.f32.xlu1 %v13091_v41 }
0x1c93   : > { %v13072_v16 = vpop.xlane.xlu0 %13071 }
0x1c94   : > { %v13094_v52 = vsub.f32 %v12535_v17, %v13072_v16 }
0x1c96   : > { %v13102_v24 = vmul.f32 1.442695, %v13094_v52 }
0x1c97   : > { %v13078_v4 = vpop.xlane.xlu0 %13077  ;;  %v13075_v43 = vpop.xlane.xlu1 %13074 }
0x1c98   : > { %19696 = vpow2.f32 %v13102_v24  ;;  %v13096_v7 = vsub.f32 %v12687_v25, %v13078_v4  ;;  %v13095_v31 = vsub.f32 %v12611_v22, %v13075_v43 }
0x1c9a   : > { %v13106_v37 = vmul.f32 1.442695, %v13096_v7  ;;  %v13104_v10 = vmul.f32 1.442695, %v13095_v31 }
0x1c9b   : > { %v13084_v45 = vpop.xlane.xlu0 %13083  ;;  %v13081_v6 = vpop.xlane.xlu1 %13080 }
0x1c9c   : > { %19698 = vpow2.f32 %v13106_v37  ;;  %v13098_v55 = vsub.f32 %v12839_v11, %v13084_v45  ;;  %v13097_v1 = vsub.f32 %v12763_v19, %v13081_v6 }
0x1c9d   : > { %19700 = vpow2.f32 %v13104_v10 }
0x1c9e   : > { %v13110_v39 = vmul.f32 1.442695, %v13098_v55  ;;  %v13108_v35 = vmul.f32 1.442695, %v13097_v1 }
0x1c9f   : > { %v13090_v14 = vpop.xlane.xlu0 %13089  ;;  %v13087_v42 = vpop.xlane.xlu1 %13086 }
0x1ca0   : > { %19702 = vpow2.f32 %v13110_v39  ;;  %v13100_v17 = vsub.f32 %v12991_v44, %v13090_v14  ;;  %v13099_v38 = vsub.f32 %v12915_v51, %v13087_v42 }
0x1ca1   : > { %19704 = vpow2.f32 %v13108_v35 }
0x1ca2   : > { %v13114_v36 = vmul.f32 1.442695, %v13100_v17  ;;  %v13112_v59 = vmul.f32 1.442695, %v13099_v38 }
0x1ca3   : > { %v13093_v25 = vpop.xlane.xlu1 %13092 }
0x1ca4   : > { %19706 = vpow2.f32 %v13114_v36  ;;  %v13101_v22 = vsub.f32 %v13067_v29, %v13093_v25 }
0x1ca5   : > { %v19697_v62 = vpop.eup %19696  ;;  %19708 = vpow2.f32 %v13112_v59 }
0x1ca6   : > { %v13116_v46 = vmul.f32 1.442695, %v13101_v22  ;;  %v13118_v11 = vsel %vm1150_vm2, %v19697_v62, 0.0 }
0x1ca7   : > { %13119 = vadd.xlane.f32.xlu0 %v13118_v11 }
0x1ca8   : > { %19710 = vpow2.f32 %v13116_v46 }
0x1ca9   : > { %v19699_v19 = vpop.eup %19698 }
0x1caa   : > { %v19701_v13 = vpop.eup %19700  ;;  %v13124_v41 = vsel %vm1150_vm2, %v19699_v19, 0.0 }
0x1cab   : > { %13125 = vadd.xlane.f32.xlu0 %v13124_v41  ;;  %v13121_v44 = vsel %vm1150_vm2, %v19701_v13, 0.0  ;;  %v17310_v41 = vld [vmem:[%s22964_s0 + $0xf0] sm:$0xff] }
0x1cac   : > { %13122 = vadd.xlane.f32.xlu1 %v13121_v44  ;;  %v17309_v44 = vld [vmem:[%s22964_s0 + $0xe8] sm:$0xff] }
0x1cad   : > { %v19703_v51 = vpop.eup %19702 }
0x1cae   : > { %v19705_v16 = vpop.eup %19704  ;;  %v13130_v52 = vsel %vm1150_vm2, %v19703_v51, 0.0 }
0x1caf   : > { %13131 = vadd.xlane.f32.xlu0 %v13130_v52  ;;  %v13127_v29 = vsel %vm1150_vm2, %v19705_v16, 0.0  ;;  %v17337_v52 = vld [vmem:[%s22935_s7 + $0xe8] sm:$0xff] }
0x1cb0   : > { %13128 = vadd.xlane.f32.xlu1 %v13127_v29  ;;  %v17336_v29 = vld [vmem:[%s22935_s7 + $0xe0] sm:$0xff] }
0x1cb1   : > { %v19707_v24 = vpop.eup %19706 }
0x1cb2   : > { %v19709_v4 = vpop.eup %19708  ;;  %v13136_v43 = vsel %vm1150_vm2, %v19707_v24, 0.0 }
0x1cb3   : > { %13137 = vadd.xlane.f32.xlu0 %v13136_v43  ;;  %v13133_v7 = vsel %vm1150_vm2, %v19709_v4, 0.0 }
0x1cb4   : > { %13134 = vadd.xlane.f32.xlu1 %v13133_v7 }
0x1cb5   : > { %v19711_v31 = vpop.eup %19710 }
0x1cb6   : > { %v13139_v37 = vsel %vm1150_vm2, %v19711_v31, 0.0 }
0x1cb8   : > { %13140 = vadd.xlane.f32.xlu1 %v13139_v37 }
0x1d30   : > { %v13120_v10 = vpop.xlane.xlu0 %13119 }
0x1d31   : > { %19712 = vrcp.f32 %v13120_v10  ;;  %v17324_v10 = vld [vmem:[%s22963_s3 + $0xf0] sm:$0xff] }
0x1d34   : > { %v13126_v45 = vpop.xlane.xlu0 %13125 }
0x1d35   : > { %19714 = vrcp.f32 %v13126_v45  ;;  %v13123_v6 = vpop.xlane.xlu1 %13122 }
0x1d36   : > { %19716 = vrcp.f32 %v13123_v6 }
0x1d38   : > { %v13132_v55 = vpop.xlane.xlu0 %13131 }
0x1d39   : > { %19718 = vrcp.f32 %v13132_v55  ;;  %v13129_v1 = vpop.xlane.xlu1 %13128  ;;  %v17323_v55 = vld [vmem:[%s22963_s3 + $0xe8] sm:$0xff] }
0x1d3a   : > { %19720 = vrcp.f32 %v13129_v1 }
0x1d3c   : > { %v13138_v39 = vpop.xlane.xlu0 %13137 }
0x1d3d   : > { %19722 = vrcp.f32 %v13138_v39  ;;  %v13135_v35 = vpop.xlane.xlu1 %13134 }
0x1d3e   : > { %v19713_v14 = vpop.eup %19712  ;;  %19724 = vrcp.f32 %v13135_v35  ;;  %v17322_v35 = vld [vmem:[%s22963_s3 + $0xe0] sm:$0xff] }
0x1d3f   : > { %v13143_v42 = vmul.f32 %v19713_v14, %v19697_v62 }
0x1d41   : > { %v13141_v17 = vpop.xlane.xlu1 %13140  ;;  %19179 = vmatmul.mubr.msk.f32.vlgmr.msra.gmra.mxu0 %vm1150_vm2, %v13143_v42 }
0x1d42   : > { %v19715_v38 = vpop.eup %19714  ;;  %19726 = vrcp.f32 %v13141_v17  ;;  %19187 = vmatpush3.msra.mxu0 %v22032_v53  ;;  %19188 = vmatprep.mubr.msk.f32.mxu0 %vm19870_vm1, %v19869_v20  ;;  %v12454_v53 = vadd.f32 %v22026_v40, %v22142_v26  ;;  %v17311_v26 = vld [vmem:[%s22964_s0 + $0xf8] sm:$0xff] }
0x1d43   : > { %v19717_v36 = vpop.eup %19716  ;;  %v13147_v59 = vmul.f32 %v19715_v38, %v19699_v19  ;;  %19196 = vmatprep.subr.mxu0 %v19869_v20 }
0x1d44   : > { %v13145_v25 = vmul.f32 %v19717_v36, %v19701_v13 }
0x1d45   : > { %19189 = vmatmul.mubr.msk.f32.vlgmr.msra.gmra.mxu0 %vm1150_vm2, %v13147_v59 }
0x1d46   : > { %v19719_v22 = vpop.eup %19718  ;;  %19184 = vmatmul.mubr.msk.f32.vlgmr.msra.gmra.mxu1 %vm1150_vm2, %v13145_v25  ;;  %19197 = vmatpush3.msra.mxu0 %v22038_v28 }
0x1d47   : > { %v19721_v62 = vpop.eup %19720  ;;  %v13151_v46 = vmul.f32 %v19719_v22, %v19703_v51  ;;  %19192 = vmatpush3.msra.mxu1 %v22029_v56  ;;  %19193 = vmatprep.mubr.msk.f32.mxu1 %vm19870_vm1, %v19869_v20  ;;  %v17339_v51 = vld [vmem:[%s22935_s7 + $0xf8] sm:$0xff] }
0x1d48   : > { %v13149_v11 = vmul.f32 %v19721_v62, %v19705_v16  ;;  %19198 = vmatprep.mubr.msk.f32.mxu0 %vm19870_vm1, %v19869_v20  ;;  %19201 = vmatprep.subr.mxu1 %v19869_v20  ;;  %v17338_v16 = vld [vmem:[%s22935_s7 + $0xf0] sm:$0xff] }
0x1d49   : > { %19206 = vmatprep.subr.mxu0 %v19869_v20  ;;  %19199 = vmatmul.mubr.msk.f32.vlgmr.msra.gmra.mxu0 %vm1150_vm2, %v13151_v46 }
0x1d4a   : > { %v19723_v28 = vpop.eup %19722  ;;  %19194 = vmatmul.mubr.msk.f32.vlgmr.msra.gmra.mxu1 %vm1150_vm2, %v13149_v11  ;;  %19207 = vmatpush3.msra.mxu0 %v12454_v53 }
0x1d4b   : > { %v19725_v56 = vpop.eup %19724  ;;  %v13155_v19 = vmul.f32 %v19723_v28, %v19707_v24  ;;  %19202 = vmatpush3.msra.mxu1 %v22035_v57  ;;  %19203 = vmatprep.mubr.msk.f32.mxu1 %vm19870_vm1, %v19869_v20  ;;  %v17299_v24 = vld [vmem:[%s22937_s9 + $0x30] sm:$0xff] }
0x1d4c   : > { %v13153_v40 = vmul.f32 %v19725_v56, %v19709_v4  ;;  %19208 = vmatprep.mubr.msk.f32.mxu0 %vm19870_vm1, %v19869_v20  ;;  %19211 = vmatprep.subr.mxu1 %v19869_v20  ;;  %v17325_v4 = vld [vmem:[%s22963_s3 + $0xf8] sm:$0xff] }
0x1d4d   : > { %19209 = vmatmul.mubr.msk.f32.vlgmr.msra.gmra.mxu0 %vm1150_vm2, %v13155_v19  ;;  %19216 = vmatprep.subr.mxu0 %v17299_v24 }
0x1d4e   : > { %19204 = vmatmul.mubr.msk.f32.vlgmr.msra.gmra.mxu1 %vm1150_vm2, %v13153_v40  ;;  %19217 = vmatpush3.msra.mxu0 %v17299_v24 }
0x1d4f   : > { %v19727_v13 = vpop.eup %19726  ;;  %19212 = vmatpush3.msra.mxu1 %v22041_v47  ;;  %19213 = vmatprep.mubr.msk.f32.mxu1 %vm19870_vm1, %v19869_v20  ;;  %v17308_v47 = vld [vmem:[%s22964_s0 + $0xe0] sm:$0xff] }
0x1d50   : > { %v13157_v57 = vmul.f32 %v19727_v13, %v19711_v31  ;;  %19230 = vmatprep.subr.mxu1 %v17311_v26  ;;  %19250 = vmatprep.subr.mxu0 %v17325_v4 }
0x1d52   : > { %19214 = vmatmul.mubr.msk.f32.vlgmr.msra.gmra.mxu1 %vm1150_vm2, %v13157_v57 }
0x1d53   : > { %19231 = vmatpush3.msra.mxu1 %v17311_v26  ;;  %19238 = vmatprep.mubr.msk.f32.mxu1 %vm740_vm0, %v21409_v9 }
0x1d54   : > { %19232 = vmatprep.subr.mxu1 %v17310_v41 }
0x1d55   : > { %19233 = vmatpush3.msra.mxu1 %v17310_v41 }
0x1d56   : > { %19234 = vmatprep.subr.mxu1 %v17309_v44 }
0x1d57   : > { %19235 = vmatpush3.msra.mxu1 %v17309_v44 }
0x1d58   : > { %19236 = vmatprep.subr.mxu1 %v17308_v47 }
0x1d59   : > { %19237 = vmatpush3.msra.mxu1 %v17308_v47 }
0x1d5a   : > { %19239 = vmatmul.mubr.msk.f32.vlgmr.msra.gmra.mxu1 %vm740_vm0, %v21412_v5  ;;  %19270 = vmatprep.subr.mxu1 %v17339_v51 }
0x1d5b   : > { %19241 = vmatprep.mubr.msk.f32.mxu1 %vm740_vm0, %v21426_v23  ;;  %19271 = vmatpush3.msra.mxu1 %v17339_v51 }
0x1d5c   : > { %19272 = vmatprep.subr.mxu1 %v17338_v16 }
0x1d5d   : > { %19273 = vmatpush3.msra.mxu1 %v17338_v16 }
0x1d5e   : > { %19242 = vmatmul.mubr.msk.f32.gmra.mxu1 %vm740_vm0, %v21429_v32  ;;  %19274 = vmatprep.subr.mxu1 %v17337_v52 }
0x1d5f   : > { %19244 = vmatprep.mubr.msk.f32.mxu1 %vm740_vm0, %v21443_v60  ;;  %19275 = vmatpush3.msra.mxu1 %v17337_v52 }
0x1d60   : > { %19276 = vmatprep.subr.mxu1 %v17336_v29 }
0x1d61   : > { %19277 = vmatpush3.msra.mxu1 %v17336_v29 }
0x1d62   : > { %19245 = vmatmul.mubr.msk.f32.gmra.mxu1 %vm740_vm0, %v21446_v49  ;;  %19300 = vmatprep.subr.mxu1 %v19869_v20 }
0x1d63   : > { %19247 = vmatprep.mubr.msk.f32.mxu1 %vm740_vm0, %v21459_v0 }
0x1d66   : > { %19248 = vmatmul.mubr.msk.f32.gmra.mxu1 %vm740_vm0, %v21461_v2 }
0x1d67   : > { %19278 = vmatprep.mubr.msk.f32.mxu1 %vm740_vm0, %v21409_v9 }
0x1d6a   : > { %19279 = vmatmul.mubr.msk.f32.vlgmr.msra.gmra.mxu1 %vm740_vm0, %v21412_v5 }
0x1d6b   : > { %19281 = vmatprep.mubr.msk.f32.mxu1 %vm740_vm0, %v21426_v23 }
0x1d6e   : > { %19282 = vmatmul.mubr.msk.f32.gmra.mxu1 %vm740_vm0, %v21429_v32 }
0x1d6f   : > { %19284 = vmatprep.mubr.msk.f32.mxu1 %vm740_vm0, %v21443_v60 }
0x1d72   : > { %19285 = vmatmul.mubr.msk.f32.gmra.mxu1 %vm740_vm0, %v21446_v49 }
0x1d73   : > { %19287 = vmatprep.mubr.msk.f32.mxu1 %vm740_vm0, %v21459_v0 }
0x1d76   : > { %19288 = vmatmul.mubr.msk.f32.gmra.mxu1 %vm740_vm0, %v21461_v2 }
0x1d77   : > { %19302 = vmatprep.mubr.msk.f32.mxu1 %vm19870_vm1, %v19869_v20 }
0x1e01   : > { %v13227_v43 = vpop.f32.mrf.mxu0 }
0x1e02   : > { %19218 = vmatprep.mubr.msk.f32.mxu0 %vm1150_vm2, %v13227_v43 }
0x1e03   : > { %v19180_v7 = vpop.f32.mrf.mxu0 }
0x1e05   : > { %v13373_v31 = vpop.f32.mrf.mxu0 }
0x1e06   : > { %v13300_v37 = vpop.f32.mrf.mxu1 }
0x1e07   : > { %19219 = vmatmul.mubr.msk.f32.vlgmr.msra.gmra.mxu0 %vm1150_vm2, %v13300_v37  ;;  %v19190_v45 = vpop.f32.mrf.mxu0 }
0x1e08   : > { %v19185_v6 = vpop.f32.mrf.mxu1  ;;  %19221 = vmatprep.mubr.msk.f32.mxu0 %vm1150_vm2, %v13373_v31  ;;  %19251 = vmatpush3.msra.mxu0 %v17325_v4 }
0x1e09   : > { %v13519_v1 = vpop.f32.mrf.mxu0  ;;  %19252 = vmatprep.subr.mxu0 %v17324_v10 }
0x1e0a   : > { %v13446_v39 = vpop.f32.mrf.mxu1  ;;  %19253 = vmatpush3.msra.mxu0 %v17324_v10 }
0x1e0b   : > { %19222 = vmatmul.mubr.msk.f32.gmra.mxu0 %vm1150_vm2, %v13446_v39  ;;  %v19200_v14 = vpop.f32.mrf.mxu0  ;;  %19254 = vmatprep.subr.mxu0 %v17323_v55 }
0x1e0c   : > { %v19195_v42 = vpop.f32.mrf.mxu1  ;;  %19224 = vmatprep.mubr.msk.f32.mxu0 %vm1150_vm2, %v13519_v1  ;;  %19255 = vmatpush3.msra.mxu0 %v17323_v55 }
0x1e0d   : > { %v13665_v17 = vpop.f32.mrf.mxu0  ;;  %19256 = vmatprep.subr.mxu0 %v17322_v35 }
0x1e0e   : > { %v13592_v38 = vpop.f32.mrf.mxu1  ;;  %19257 = vmatpush3.msra.mxu0 %v17322_v35 }
0x1e0f   : > { %19225 = vmatmul.mubr.msk.f32.gmra.mxu0 %vm1150_vm2, %v13592_v38  ;;  %v19210_v36 = vpop.f32.mrf.mxu0  ;;  %19290 = vmatprep.subr.mxu0 %v19869_v20 }
0x1e10   : > { %v19205_v59 = vpop.f32.mrf.mxu1  ;;  %19227 = vmatprep.mubr.msk.f32.mxu0 %vm1150_vm2, %v13665_v17 }
0x1e12   : > { %v13738_v25 = vpop.f32.mrf.mxu1 }
0x1e13   : > { %19228 = vmatmul.mubr.msk.f32.gmra.mxu0 %vm1150_vm2, %v13738_v25 }
0x1e14   : > { %v19215_v22 = vpop.f32.mrf.mxu1  ;;  %19258 = vmatprep.mubr.msk.f32.mxu0 %vm740_vm0, %v21409_v9 }
0x1e17   : > { %19259 = vmatmul.mubr.msk.f32.vlgmr.msra.gmra.mxu0 %vm740_vm0, %v21412_v5 }
0x1e18   : > { %19261 = vmatprep.mubr.msk.f32.mxu0 %vm740_vm0, %v21426_v23 }
0x1e1a   : > { %v19240_v62 = vpop.f32.mrf.mxu1 }
0x1e1b   : > { %19262 = vmatmul.mubr.msk.f32.gmra.mxu0 %vm740_vm0, %v21429_v32 }
0x1e1c   : > { %v13960_v46 = vpop.f32.mrf.mxu1  ;;  %19264 = vmatprep.mubr.msk.f32.mxu0 %vm740_vm0, %v21443_v60 }
0x1e1e   : > { %v22312_v53 = vpop.f32.mrf.mxu1 }
0x1e1f   : > { %19265 = vmatmul.mubr.msk.f32.gmra.mxu0 %vm740_vm0, %v21446_v49 }
0x1e20   : > { %v13970_v9 = vpop.f32.mrf.mxu1  ;;  %19267 = vmatprep.mubr.msk.f32.mxu0 %vm740_vm0, %v21459_v0  ;;  %v22337_v0 = vld [vmem:[%s22936_s8 + $0x7] ss:$0 sm:$0xff] }
0x1e22   : > { %v22318_v5 = vpop.f32.mrf.mxu1 }
0x1e23   : > { %19268 = vmatmul.mubr.msk.f32.gmra.mxu0 %vm740_vm0, %v21461_v2 }
0x1e24   : > { %v22322_v23 = vpop.f32.mrf.mxu1  ;;  %19292 = vmatprep.mubr.msk.f32.mxu0 %vm19870_vm1, %v19869_v20 }
0x1e26   : > { %v22326_v32 = vpop.f32.mrf.mxu1 }
0x1e28   : > { %v22328_v60 = vpop.f32.mrf.mxu1 }
0x1e2a   : > { %v22330_v11 = vpop.f32.mrf.mxu1 }
0x1e2c   : > { %v22332_v49 = vpop.f32.mrf.mxu1 }
0x1e2e   : > { %v19283_v28 = vpop.f32.mrf.mxu1 }
0x1e2f   : > { %v22340_v2 = vadd.f32 %v19283_v28, %v22337_v0 }
0x1e30   : > { %v14206_v56 = vpop.f32.mrf.mxu1 }
0x1e31   : > { %v22343_v19 = vadd.f32 %v22337_v0, %v14206_v56  ;;  %v14197_v56 = vadd.f32 %v22337_v0, %v22332_v49 }
0x1e32   : > { %v19286_v40 = vpop.f32.mrf.mxu1 }
0x1e33   : > { %v22346_v26 = vadd.f32 %v19286_v40, %v22337_v0 }
0x1e34   : > { %v14216_v13 = vpop.f32.mrf.mxu1 }
0x1e35   : > { %v22349_v57 = vadd.f32 %v22337_v0, %v14216_v13 }
0x1e36   : > { %v19289_v41 = vpop.f32.mrf.mxu1 }
0x1e37   : > { %v22352_v44 = vadd.f32 %v19289_v41, %v22337_v0 }
0x1e38   : > { %v22436_v13 = vpop.f32.mrf.mxu1 }
0x1ec7   : > { %v19220_v47 = vpop.f32.mrf.mxu0 }
0x1ec8   : > { %v22355_v51 = vadd.f32 %v19220_v47, %v22051_v50 }
0x1ec9   : > { %v13834_v16 = vpop.f32.mrf.mxu0 }
0x1eca   : > { %v22358_v52 = vadd.f32 %v13834_v16, %v22055_v58 }
0x1ecb   : > { %v19223_v29 = vpop.f32.mrf.mxu0 }
0x1ecc   : > { %v22361_v24 = vadd.f32 %v19223_v29, %v22059_v21 }
0x1ecd   : > { %v13844_v4 = vpop.f32.mrf.mxu0 }
0x1ece   : > { %v22364_v43 = vadd.f32 %v13844_v4, %v22063_v33  ;;  %v17327_v33 = vld [vmem:[%s22934_s6 + $0x7] ss:$0 sm:$0xff] }
0x1ecf   : > { %v19226_v7 = vpop.f32.mrf.mxu0 }
0x1ed0   : > { %v22367_v31 = vadd.f32 %v19226_v7, %v22067_v30 }
0x1ed1   : > { %v13854_v37 = vpop.f32.mrf.mxu0 }
0x1ed2   : > { %v22370_v50 = vadd.f32 %v13854_v37, %v22071_v54  ;;  %v17313_v54 = vld [vmem:[%s22966_s30 + $0x7] ss:$0 sm:$0xff] }
0x1ed3   : > { %v19229_v10 = vpop.f32.mrf.mxu0  ;;  %v13966_v42 = vadd.f32 %v19240_v62, %v17313_v54  ;;  %v13971_v17 = vadd.f32 %v17313_v54, %v13970_v9  ;;  %v13976_v22 = vadd.f32 %v22312_v53, %v17313_v54  ;;  %v13981_v62 = vadd.f32 %v17313_v54, %v22322_v23 }
0x1ed4   : > { %v22373_v58 = vadd.f32 %v19229_v10, %v22074_v12  ;;  %v13961_v12 = vadd.f32 %v17313_v54, %v13960_v46  ;;  %v13986_v53 = vadd.f32 %v22318_v5, %v17313_v54  ;;  %v13991_v23 = vadd.f32 %v17313_v54, %v22328_v60 }
0x1ed5   : > { %v13864_v45 = vpop.f32.mrf.mxu0  ;;  %v13996_v5 = vadd.f32 %v22326_v32, %v17313_v54  ;;  %v14202_v60 = vadd.f32 %v22330_v11, %v22337_v0 }
0x1ed6   : > { %v22376_v21 = vadd.f32 %v13864_v45, %v22076_v8 }
0x1ed7   : > { %v19260_v6 = vpop.f32.mrf.mxu0 }
0x1ed8   : > { %v14084_v8 = vadd.f32 %v19260_v6, %v17327_v33 }
0x1ed9   : > { %v14078_v55 = vpop.f32.mrf.mxu0 }
0x1eda   : > { %v14079_v30 = vadd.f32 %v17327_v33, %v14078_v55 }
0x1edb   : > { %v19263_v1 = vpop.f32.mrf.mxu0 }
0x1edc   : > { %19291 = vmatpush3.xpose.msk.msra.mxu0 %vm1150_vm2, %v14079_v30  ;;  %v14094_v36 = vadd.f32 %v19263_v1, %v17327_v33 }
0x1edd   : > { %v14088_v39 = vpop.f32.mrf.mxu0  ;;  %19295 = vmatprep.subr.mxu0 %v19869_v20 }
0x1ede   : > { %v14089_v35 = vadd.f32 %v17327_v33, %v14088_v39 }
0x1edf   : > { %v19266_v14 = vpop.f32.mrf.mxu0  ;;  %19293 = vmatmul.mubr.msk.f32.vlgmr.msra.gmra.mxu0 %vm1150_vm2, %v13961_v12 }
0x1ee0   : > { %19296 = vmatpush3.xpose.msk.msra.mxu0 %vm1150_vm2, %v14084_v8  ;;  %19301 = vmatpush3.xpose.msk.msra.mxu1 %vm1150_vm2, %v14089_v35  ;;  %v14104_v9 = vadd.f32 %v19266_v14, %v17327_v33 }
0x1ee1   : > { %v14098_v38 = vpop.f32.mrf.mxu0  ;;  %19297 = vmatprep.mubr.msk.f32.mxu0 %vm19870_vm1, %v19869_v20  ;;  %19305 = vmatprep.subr.mxu0 %v19869_v20 }
0x1ee2   : > { %v14099_v59 = vadd.f32 %v17327_v33, %v14098_v38  ;;  %19310 = vmatprep.subr.mxu1 %v19869_v20 }
0x1ee3   : > { %v19269_v25 = vpop.f32.mrf.mxu0  ;;  %19298 = vmatmul.mubr.msk.f32.vlgmr.msra.gmra.mxu0 %vm1150_vm2, %v13966_v42  ;;  %19303 = vmatmul.mubr.msk.f32.vlgmr.msra.gmra.mxu1 %vm1150_vm2, %v13971_v17 }
0x1ee4   : > { %19306 = vmatpush3.xpose.msk.msra.mxu0 %vm1150_vm2, %v14094_v36  ;;  %19311 = vmatpush3.xpose.msk.msra.mxu1 %vm1150_vm2, %v14099_v59  ;;  %v14114_v40 = vadd.f32 %v19269_v25, %v17327_v33 }
0x1ee5   : > { %v14108_v46 = vpop.f32.mrf.mxu0  ;;  %19307 = vmatprep.mubr.msk.f32.mxu0 %vm19870_vm1, %v19869_v20  ;;  %19312 = vmatprep.mubr.msk.f32.mxu1 %vm19870_vm1, %v19869_v20 }
0x1ee6   : > { %v14109_v28 = vadd.f32 %v17327_v33, %v14108_v46  ;;  %19315 = vmatprep.subr.mxu0 %v19869_v20  ;;  %19320 = vmatprep.subr.mxu1 %v19869_v20 }
0x1ee7   : > { %19308 = vmatmul.mubr.msk.f32.vlgmr.msra.gmra.mxu0 %vm1150_vm2, %v13976_v22  ;;  %19313 = vmatmul.mubr.msk.f32.vlgmr.msra.gmra.mxu1 %vm1150_vm2, %v13981_v62 }
0x1ee8   : > { %19316 = vmatpush3.xpose.msk.msra.mxu0 %vm1150_vm2, %v14104_v9  ;;  %19321 = vmatpush3.xpose.msk.msra.mxu1 %vm1150_vm2, %v14109_v28 }
0x1ee9   : > { %19317 = vmatprep.mubr.msk.f32.mxu0 %vm19870_vm1, %v19869_v20  ;;  %19322 = vmatprep.mubr.msk.f32.mxu1 %vm19870_vm1, %v19869_v20 }
0x1eea   : > { %19325 = vmatprep.subr.mxu0 %v19869_v20  ;;  %19330 = vmatprep.subr.mxu1 %v19869_v20 }
0x1eeb   : > { %19318 = vmatmul.mubr.msk.f32.vlgmr.msra.gmra.mxu0 %vm1150_vm2, %v13986_v53  ;;  %19323 = vmatmul.mubr.msk.f32.vlgmr.msra.gmra.mxu1 %vm1150_vm2, %v13991_v23 }
0x1eec   : > { %19326 = vmatpush3.xpose.msk.msra.mxu0 %vm1150_vm2, %v14114_v40  ;;  %19331 = vmatpush3.msra.mxu1 %v14197_v56 }
0x1eed   : > { %19327 = vmatprep.mubr.msk.f32.mxu0 %vm19870_vm1, %v19869_v20  ;;  %19335 = vmatprep.subr.mxu0 %v19869_v20 }
0x1eee   : > { %19332 = vmatprep.mubr.msk.f32.mxu1 %vm19870_vm1, %v19869_v20  ;;  %19340 = vmatprep.subr.mxu1 %v19869_v20 }
0x1eef   : > { %19328 = vmatmul.mubr.msk.f32.vlgmr.msra.gmra.mxu0 %vm1150_vm2, %v13996_v5 }
0x1ef0   : > { %19336 = vmatpush3.msra.mxu0 %v14202_v60  ;;  %19337 = vmatprep.mubr.msk.f32.mxu0 %vm19870_vm1, %v19869_v20 }
0x1ef1   : > { %19345 = vmatprep.subr.mxu0 %v19869_v20 }
0x1f9f   : > { %v14307_v32 = vpop.f32.mrf.mxu0 }
0x1fa0   : > { %v14308_v49 = vadd.f32 %v22139_v48, %v14307_v32 }
0x1fa1   : > { %v19294_v41 = vpop.f32.mrf.mxu0 }
0x1fa2   : > { %v14843_v11 = vsel %vm1150_vm2, %v14308_v49, -inf }
0x1fa3   : > { %v14459_v47 = vpop.f32.mrf.mxu1  ;;  %14844 = vmax.xlane.f32.xlu0 %v14843_v11  ;;  %v14383_v16 = vpop.f32.mrf.mxu0 }
0x1fa4   : > { %v14460_v29 = vadd.f32 %v22146_v61, %v14459_v47  ;;  %v14384_v4 = vadd.f32 %v22150_v27, %v14383_v16 }
0x1fa5   : > { %v19299_v7 = vpop.f32.mrf.mxu0  ;;  %v19304_v37 = vpop.f32.mrf.mxu1 }
0x1fa6   : > { %v14849_v10 = vsel %vm1150_vm2, %v14460_v29, -inf  ;;  %v14846_v45 = vsel %vm1150_vm2, %v14384_v4, -inf }
0x1fa7   : > { %v14611_v6 = vpop.f32.mrf.mxu1  ;;  %14850 = vmax.xlane.f32.xlu0 %v14849_v10  ;;  %14847 = vmax.xlane.f32.xlu1 %v14846_v45  ;;  %v14535_v48 = vpop.f32.mrf.mxu0 }
0x1fa8   : > { %v14612_v33 = vadd.f32 %v22156_v34, %v14611_v6  ;;  %v14536_v55 = vadd.f32 %v22160_v63, %v14535_v48 }
0x1fa9   : > { %v19309_v30 = vpop.f32.mrf.mxu0  ;;  %v19314_v1 = vpop.f32.mrf.mxu1 }
0x1faa   : > { %v14855_v61 = vsel %vm1150_vm2, %v14612_v33, -inf  ;;  %v14852_v27 = vsel %vm1150_vm2, %v14536_v55, -inf }
0x1fab   : > { %v14763_v54 = vpop.f32.mrf.mxu1  ;;  %14856 = vmax.xlane.f32.xlu0 %v14855_v61  ;;  %14853 = vmax.xlane.f32.xlu1 %v14852_v27  ;;  %v14687_v12 = vpop.f32.mrf.mxu0 }
0x1fac   : > { %v14764_v39 = vadd.f32 %v22166_v3, %v14763_v54  ;;  %v14688_v8 = vadd.f32 %v22170_v15, %v14687_v12 }
0x1fad   : > { %v19319_v35 = vpop.f32.mrf.mxu0  ;;  %v19324_v14 = vpop.f32.mrf.mxu1 }
0x1fae   : > { %v14861_v34 = vsel %vm1150_vm2, %v14764_v39, -inf  ;;  %v14858_v63 = vsel %vm1150_vm2, %v14688_v8, -inf }
0x1faf   : > { %14862 = vmax.xlane.f32.xlu0 %v14861_v34  ;;  %14859 = vmax.xlane.f32.xlu1 %v14858_v63  ;;  %v14839_v42 = vpop.f32.mrf.mxu0 }
0x1fb0   : > { %v14840_v17 = vadd.f32 %v22176_v18, %v14839_v42 }
0x1fb1   : > { %v19329_v38 = vpop.f32.mrf.mxu0 }
0x1fb2   : > { %v14864_v36 = vsel %vm1150_vm2, %v14840_v17, -inf }
0x1fb3   : > { %14865 = vmax.xlane.f32.xlu1 %v14864_v36 }
0x202c   : > { %v14845_v59 = vpop.xlane.xlu0 %14844 }
0x202d   : > { %v14867_v25 = vsub.f32 %v14308_v49, %v14845_v59 }
0x202f   : > { %v14875_v3 = vmul.f32 1.442695, %v14867_v25 }
0x2030   : > { %v14851_v22 = vpop.xlane.xlu0 %14850  ;;  %v14848_v15 = vpop.xlane.xlu1 %14847 }
0x2031   : > { %19728 = vpow2.f32 %v14875_v3  ;;  %v14869_v62 = vsub.f32 %v14460_v29, %v14851_v22  ;;  %v14868_v46 = vsub.f32 %v14384_v4, %v14848_v15 }
0x2033   : > { %v14879_v9 = vmul.f32 1.442695, %v14869_v62  ;;  %v14877_v28 = vmul.f32 1.442695, %v14868_v46 }
0x2034   : > { %v14857_v53 = vpop.xlane.xlu0 %14856  ;;  %v14854_v23 = vpop.xlane.xlu1 %14853 }
0x2035   : > { %19730 = vpow2.f32 %v14879_v9  ;;  %v14871_v56 = vsub.f32 %v14612_v33, %v14857_v53  ;;  %v14870_v40 = vsub.f32 %v14536_v55, %v14854_v23 }
0x2036   : > { %19732 = vpow2.f32 %v14877_v28 }
0x2037   : > { %v14883_v18 = vmul.f32 1.442695, %v14871_v56  ;;  %v14881_v5 = vmul.f32 1.442695, %v14870_v40  ;;  %v17374_v56 = vld [vmem:[%s22937_s9 + $0x38] sm:$0xff] }
0x2038   : > { %v14863_v60 = vpop.xlane.xlu0 %14862  ;;  %v14860_v32 = vpop.xlane.xlu1 %14859 }
0x2039   : > { %19734 = vpow2.f32 %v14883_v18  ;;  %v14873_v49 = vsub.f32 %v14764_v39, %v14863_v60  ;;  %v14872_v41 = vsub.f32 %v14688_v8, %v14860_v32 }
0x203a   : > { %19736 = vpow2.f32 %v14881_v5 }
0x203b   : > { %v14887_v11 = vmul.f32 1.442695, %v14873_v49  ;;  %v14885_v47 = vmul.f32 1.442695, %v14872_v41 }
0x203c   : > { %v14866_v16 = vpop.xlane.xlu1 %14865 }
0x203d   : > { %19738 = vpow2.f32 %v14887_v11  ;;  %v14874_v29 = vsub.f32 %v14840_v17, %v14866_v16 }
0x203e   : > { %v19729_v4 = vpop.eup %19728  ;;  %19740 = vpow2.f32 %v14885_v47 }
0x203f   : > { %v14889_v7 = vmul.f32 1.442695, %v14874_v29  ;;  %v14891_v37 = vsel %vm1150_vm2, %v19729_v4, 0.0 }
0x2040   : > { %14892 = vadd.xlane.f32.xlu0 %v14891_v37 }
0x2041   : > { %19742 = vpow2.f32 %v14889_v7 }
0x2042   : > { %v19731_v10 = vpop.eup %19730 }
0x2043   : > { %v19733_v45 = vpop.eup %19732  ;;  %v14897_v6 = vsel %vm1150_vm2, %v19731_v10, 0.0 }
0x2044   : > { %14898 = vadd.xlane.f32.xlu0 %v14897_v6  ;;  %v14894_v48 = vsel %vm1150_vm2, %v19733_v45, 0.0 }
0x2045   : > { %14895 = vadd.xlane.f32.xlu1 %v14894_v48 }
0x2046   : > { %v19735_v33 = vpop.eup %19734 }
0x2047   : > { %v19737_v55 = vpop.eup %19736  ;;  %v14903_v30 = vsel %vm1150_vm2, %v19735_v33, 0.0 }
0x2048   : > { %14904 = vadd.xlane.f32.xlu0 %v14903_v30  ;;  %v14900_v1 = vsel %vm1150_vm2, %v19737_v55, 0.0 }
0x2049   : > { %14901 = vadd.xlane.f32.xlu1 %v14900_v1 }
0x204a   : > { %v19739_v61 = vpop.eup %19738 }
0x204b   : > { %v19741_v27 = vpop.eup %19740  ;;  %v14909_v54 = vsel %vm1150_vm2, %v19739_v61, 0.0 }
0x204c   : > { %14910 = vadd.xlane.f32.xlu0 %v14909_v54  ;;  %v14906_v12 = vsel %vm1150_vm2, %v19741_v27, 0.0 }
0x204d   : > { %14907 = vadd.xlane.f32.xlu1 %v14906_v12 }
0x204e   : > { %v19743_v39 = vpop.eup %19742 }
0x204f   : > { %v14912_v8 = vsel %vm1150_vm2, %v19743_v39, 0.0 }
0x2051   : > { %14913 = vadd.xlane.f32.xlu1 %v14912_v8 }
0x20c9   : > { %v14893_v35 = vpop.xlane.xlu0 %14892 }
0x20ca   : > { %19744 = vrcp.f32 %v14893_v35 }
0x20cd   : > { %v14899_v14 = vpop.xlane.xlu0 %14898 }
0x20ce   : > { %19746 = vrcp.f32 %v14899_v14  ;;  %v14896_v34 = vpop.xlane.xlu1 %14895 }
0x20cf   : > { %19748 = vrcp.f32 %v14896_v34 }
0x20d1   : > { %v14905_v63 = vpop.xlane.xlu0 %14904 }
0x20d2   : > { %19750 = vrcp.f32 %v14905_v63  ;;  %v14902_v42 = vpop.xlane.xlu1 %14901 }
0x20d3   : > { %19752 = vrcp.f32 %v14902_v42 }
0x20d5   : > { %v14911_v17 = vpop.xlane.xlu0 %14910 }
0x20d6   : > { %19754 = vrcp.f32 %v14911_v17  ;;  %v14908_v38 = vpop.xlane.xlu1 %14907 }
0x20d7   : > { %v19745_v36 = vpop.eup %19744  ;;  %19756 = vrcp.f32 %v14908_v38 }
0x20d8   : > { %v14916_v59 = vmul.f32 %v19745_v36, %v19729_v4 }
0x20da   : > { %v14914_v25 = vpop.xlane.xlu1 %14913  ;;  %19333 = vmatmul.mubr.msk.f32.vlgmr.msra.gmra.mxu1 %vm1150_vm2, %v14916_v59 }
0x20db   : > { %v19747_v3 = vpop.eup %19746  ;;  %19758 = vrcp.f32 %v14914_v25  ;;  %19341 = vmatpush3.msra.mxu1 %v22343_v19  ;;  %19342 = vmatprep.mubr.msk.f32.mxu1 %vm19870_vm1, %v19869_v20  ;;  %v14227_v19 = vadd.f32 %v22337_v0, %v22436_v13 }
0x20dc   : > { %v19749_v22 = vpop.eup %19748  ;;  %v14920_v15 = vmul.f32 %v19747_v3, %v19731_v10  ;;  %19350 = vmatprep.subr.mxu1 %v19869_v20 }
0x20dd   : > { %v14918_v62 = vmul.f32 %v19749_v22, %v19733_v45 }
0x20de   : > { %19343 = vmatmul.mubr.msk.f32.vlgmr.msra.gmra.mxu1 %vm1150_vm2, %v14920_v15 }
0x20df   : > { %v19751_v46 = vpop.eup %19750  ;;  %19338 = vmatmul.mubr.msk.f32.vlgmr.msra.gmra.mxu0 %vm1150_vm2, %v14918_v62  ;;  %19351 = vmatpush3.msra.mxu1 %v22349_v57 }
0x20e0   : > { %v19753_v9 = vpop.eup %19752  ;;  %v14924_v28 = vmul.f32 %v19751_v46, %v19735_v33  ;;  %19346 = vmatpush3.msra.mxu0 %v22340_v2  ;;  %19347 = vmatprep.mubr.msk.f32.mxu0 %vm19870_vm1, %v19869_v20 }
0x20e1   : > { %v14922_v53 = vmul.f32 %v19753_v9, %v19737_v55  ;;  %19352 = vmatprep.mubr.msk.f32.mxu1 %vm19870_vm1, %v19869_v20  ;;  %19355 = vmatprep.subr.mxu0 %v19869_v20 }
0x20e2   : > { %19360 = vmatprep.subr.mxu1 %v19869_v20  ;;  %19353 = vmatmul.mubr.msk.f32.vlgmr.msra.gmra.mxu1 %vm1150_vm2, %v14924_v28 }
0x20e3   : > { %v19755_v57 = vpop.eup %19754  ;;  %19348 = vmatmul.mubr.msk.f32.vlgmr.msra.gmra.mxu0 %vm1150_vm2, %v14922_v53  ;;  %19361 = vmatpush3.msra.mxu1 %v14227_v19 }
0x20e4   : > { %v19757_v2 = vpop.eup %19756  ;;  %v14928_v23 = vmul.f32 %v19755_v57, %v19739_v61  ;;  %19356 = vmatpush3.msra.mxu0 %v22346_v26  ;;  %19357 = vmatprep.mubr.msk.f32.mxu0 %vm19870_vm1, %v19869_v20 }
0x20e5   : > { %v14926_v0 = vmul.f32 %v19757_v2, %v19741_v27  ;;  %19362 = vmatprep.mubr.msk.f32.mxu1 %vm19870_vm1, %v19869_v20  ;;  %19365 = vmatprep.subr.mxu0 %v19869_v20 }
0x20e6   : > { %19363 = vmatmul.mubr.msk.f32.vlgmr.msra.gmra.mxu1 %vm1150_vm2, %v14928_v23  ;;  %19370 = vmatprep.subr.mxu1 %v17374_v56 }
0x20e7   : > { %19358 = vmatmul.mubr.msk.f32.vlgmr.msra.gmra.mxu0 %vm1150_vm2, %v14926_v0  ;;  %19371 = vmatpush3.msra.mxu1 %v17374_v56 }
0x20e8   : > { %v19759_v13 = vpop.eup %19758  ;;  %19366 = vmatpush3.msra.mxu0 %v22352_v44  ;;  %19367 = vmatprep.mubr.msk.f32.mxu0 %vm19870_vm1, %v19869_v20 }
0x20e9   : > { %v14930_v26 = vmul.f32 %v19759_v13, %v19743_v39 }
0x20eb   : > { %19368 = vmatmul.mubr.msk.f32.vlgmr.msra.gmra.mxu0 %vm1150_vm2, %v14930_v26 }
0x219a   : > { %v15000_v40 = vpop.f32.mrf.mxu1 }
0x219b   : > { %19372 = vmatprep.mubr.msk.f32.mxu1 %vm1150_vm2, %v15000_v40 }
0x219c   : > { %v19334_v18 = vpop.f32.mrf.mxu1 }
0x219e   : > { %v15146_v5 = vpop.f32.mrf.mxu1 }
0x219f   : > { %v15073_v60 = vpop.f32.mrf.mxu0 }
0x21a0   : > { %19373 = vmatmul.mubr.msk.f32.vlgmr.msra.gmra.mxu1 %vm1150_vm2, %v15073_v60  ;;  %v19344_v44 = vpop.f32.mrf.mxu1 }
0x21a1   : > { %v19339_v32 = vpop.f32.mrf.mxu0  ;;  %19375 = vmatprep.mubr.msk.f32.mxu1 %vm1150_vm2, %v15146_v5 }
0x21a2   : > { %v15292_v49 = vpop.f32.mrf.mxu1 }
0x21a3   : > { %v15219_v41 = vpop.f32.mrf.mxu0 }
0x21a4   : > { %19376 = vmatmul.mubr.msk.f32.gmra.mxu1 %vm1150_vm2, %v15219_v41  ;;  %v19354_v11 = vpop.f32.mrf.mxu1 }
0x21a5   : > { %v19349_v47 = vpop.f32.mrf.mxu0  ;;  %19378 = vmatprep.mubr.msk.f32.mxu1 %vm1150_vm2, %v15292_v49 }
0x21a6   : > { %v15438_v16 = vpop.f32.mrf.mxu1 }
0x21a7   : > { %v15365_v29 = vpop.f32.mrf.mxu0 }
0x21a8   : > { %19379 = vmatmul.mubr.msk.f32.gmra.mxu1 %vm1150_vm2, %v15365_v29  ;;  %v19364_v4 = vpop.f32.mrf.mxu1 }
0x21a9   : > { %v19359_v7 = vpop.f32.mrf.mxu0  ;;  %19381 = vmatprep.mubr.msk.f32.mxu1 %vm1150_vm2, %v15438_v16 }
0x21ab   : > { %v15511_v37 = vpop.f32.mrf.mxu0 }
0x21ac   : > { %19382 = vmatmul.mubr.msk.f32.gmra.mxu1 %vm1150_vm2, %v15511_v37 }
0x21ad   : > { %v19369_v10 = vpop.f32.mrf.mxu0 }
0x2260   : > { %v19374_v45 = vpop.f32.mrf.mxu1 }
0x2261   : > { %v15647_v6 = vadd.f32 %v19374_v45, %v22355_v51 }
0x2262   : > { %v15607_v48 = vpop.f32.mrf.mxu1 }
0x2263   : > { %v15646_v33 = vadd.f32 %v15607_v48, %v22358_v52  ;;  %v15661_v55 = vsel %vm740_vm0, %v15647_v6, 0.0  ;;  %v17389_v48 = vld [vmem:[%s22941_s13 + $0x30] sm:$0xff] }
0x2264   : > { %15662 = vadd.xlane.f32.xlu1 %v15661_v55  ;;  %v19377_v30 = vpop.f32.mrf.mxu1  ;;  %v17387_v55 = vld [vmem:[%s22941_s13 + $0x20] sm:$0xff] }
0x2265   : > { %v15649_v1 = vadd.f32 %v19377_v30, %v22361_v24  ;;  %v15658_v61 = vsel %vm740_vm0, %v15646_v33, 0.0 }
0x2266   : > { %15659 = vadd.xlane.f32.xlu0 %v15658_v61  ;;  %v15617_v27 = vpop.f32.mrf.mxu1 }
0x2267   : > { %v15648_v54 = vadd.f32 %v15617_v27, %v22364_v43  ;;  %v15667_v12 = vsel %vm740_vm0, %v15649_v1, 0.0 }
0x2268   : > { %15668 = vadd.xlane.f32.xlu1 %v15667_v12  ;;  %v19380_v39 = vpop.f32.mrf.mxu1 }
0x2269   : > { %v15651_v51 = vadd.f32 %v19380_v39, %v22367_v31  ;;  %v15664_v52 = vsel %vm740_vm0, %v15648_v54, 0.0 }
0x226a   : > { %15665 = vadd.xlane.f32.xlu0 %v15664_v52  ;;  %v15627_v8 = vpop.f32.mrf.mxu1 }
0x226b   : > { %v15650_v35 = vadd.f32 %v15627_v8, %v22370_v50  ;;  %v15673_v24 = vsel %vm740_vm0, %v15651_v51, 0.0 }
0x226c   : > { %15674 = vadd.xlane.f32.xlu1 %v15673_v24  ;;  %v19383_v14 = vpop.f32.mrf.mxu1 }
0x226d   : > { %v15653_v34 = vadd.f32 %v19383_v14, %v22373_v58  ;;  %v15670_v43 = vsel %vm740_vm0, %v15650_v35, 0.0 }
0x226e   : > { %15671 = vadd.xlane.f32.xlu0 %v15670_v43  ;;  %v15637_v63 = vpop.f32.mrf.mxu1 }
0x226f   : > { %v15652_v42 = vadd.f32 %v15637_v63, %v22376_v21  ;;  %v15679_v31 = vsel %vm740_vm0, %v15653_v34, 0.0 }
0x2270   : > { %15680 = vadd.xlane.f32.xlu1 %v15679_v31 }
0x2271   : > { %v15676_v17 = vsel %vm740_vm0, %v15652_v42, 0.0 }
0x2272   : > { %15677 = vadd.xlane.f32.xlu0 %v15676_v17 }
0x22ed   : > { %v15663_v38 = vpop.xlane.xlu1 %15662 }
0x22ee   : > { %v15683_v50 = vmul.f32 0.03125, %v15663_v38 }
0x22ef   : > { %v15660_v36 = vpop.xlane.xlu0 %15659 }
0x22f0   : > { %v22519_v59 = vsub.f32 %v15647_v6, %v15683_v50  ;;  %v15682_v25 = vmul.f32 0.03125, %v15660_v36  ;;  %v17390_v6 = vld [vmem:[%s22941_s13 + $0x38] sm:$0xff] }
0x22f1   : > { %v15669_v3 = vpop.xlane.xlu1 %15668  ;;  %19384 = vmatprep.subr.mxu0 %v17390_v6 }
0x22f2   : > { %v22521_v58 = vsub.f32 %v15646_v33, %v15682_v25  ;;  %v15685_v22 = vmul.f32 0.03125, %v15669_v3  ;;  %v15699_v15 = vmul.f32 %v22519_v59, %v22519_v59  ;;  %19385 = vmatpush3.msra.mxu0 %v17390_v6  ;;  %v17388_v33 = vld [vmem:[%s22941_s13 + $0x28] sm:$0xff]  ;;  %v17407_v6 = vld [vmem:[%s22943_s15 + $0x70] sm:$0xff] }
0x22f3   : > { %v15666_v21 = vpop.xlane.xlu0 %15665  ;;  %19386 = vmatprep.subr.mxu0 %v17389_v48 }
0x22f4   : > { %v22525_v62 = vsub.f32 %v15649_v1, %v15685_v22  ;;  %v15684_v46 = vmul.f32 0.03125, %v15666_v21  ;;  %v15709_v9 = vsel %vm740_vm0, %v15699_v15, 0.0  ;;  %v15698_v28 = vmul.f32 %v22521_v58, %v22521_v58  ;;  %19387 = vmatpush3.msra.mxu0 %v17389_v48  ;;  %v17385_v15 = vld [vmem:[%s22939_s11 + $0x1] ss:$0 sm:$0xff]  ;;  %v17406_v48 = vld [vmem:[%s22943_s15 + $0x68] sm:$0xff] }
0x22f5   : > { %v15675_v19 = vpop.xlane.xlu1 %15674  ;;  %15710 = vadd.xlane.f32.xlu1 %v15709_v9  ;;  %19388 = vmatprep.subr.mxu0 %v17388_v33 }
0x22f6   : > { %v22530_v53 = vsub.f32 %v15648_v54, %v15684_v46  ;;  %v15687_v57 = vmul.f32 0.03125, %v15675_v19  ;;  %v15706_v2 = vsel %vm740_vm0, %v15698_v28, 0.0  ;;  %v15701_v23 = vmul.f32 %v22525_v62, %v22525_v62  ;;  %19389 = vmatpush3.msra.mxu0 %v17388_v33  ;;  %v17405_v33 = vld [vmem:[%s22943_s15 + $0x60] sm:$0xff] }
0x22f7   : > { %v15672_v0 = vpop.xlane.xlu0 %15671  ;;  %15707 = vadd.xlane.f32.xlu0 %v15706_v2  ;;  %19390 = vmatprep.subr.mxu0 %v17387_v55  ;;  %v17386_v2 = vld [vmem:[%s22940_s12 + $0x1] ss:$0 sm:$0xff] }
0x22f8   : > { %v22535_v13 = vsub.f32 %v15651_v51, %v15687_v57  ;;  %v15686_v26 = vmul.f32 0.03125, %v15672_v0  ;;  %v15715_v56 = vsel %vm740_vm0, %v15701_v23, 0.0  ;;  %v15700_v40 = vmul.f32 %v22530_v53, %v22530_v53  ;;  %19391 = vmatpush3.msra.mxu0 %v17387_v55  ;;  %v17404_v55 = vld [vmem:[%s22943_s15 + $0x58] sm:$0xff] }
0x22f9   : > { %15716 = vadd.xlane.f32.xlu1 %v15715_v56  ;;  %v15681_v18 = vpop.xlane.xlu1 %15680  ;;  %19432 = vmatprep.subr.mxu0 %v19869_v20 }
0x22fa   : > { %v22540_v5 = vsub.f32 %v15650_v35, %v15686_v26  ;;  %v15689_v60 = vmul.f32 0.03125, %v15681_v18  ;;  %v15712_v44 = vsel %vm740_vm0, %v15700_v40, 0.0  ;;  %v15703_v32 = vmul.f32 %v22535_v13, %v22535_v13 }
0x22fb   : > { %15713 = vadd.xlane.f32.xlu0 %v15712_v44  ;;  %v15678_v49 = vpop.xlane.xlu0 %15677 }
0x22fc   : > { %v22545_v41 = vsub.f32 %v15653_v34, %v15689_v60  ;;  %v15688_v11 = vmul.f32 0.03125, %v15678_v49  ;;  %v15721_v47 = vsel %vm740_vm0, %v15703_v32, 0.0  ;;  %v15702_v16 = vmul.f32 %v22540_v5, %v22540_v5 }
0x22fd   : > { %15722 = vadd.xlane.f32.xlu1 %v15721_v47 }
0x22fe   : > { %v22550_v29 = vsub.f32 %v15652_v42, %v15688_v11  ;;  %v15718_v4 = vsel %vm740_vm0, %v15702_v16, 0.0  ;;  %v15705_v7 = vmul.f32 %v22545_v41, %v22545_v41 }
0x22ff   : > { %15719 = vadd.xlane.f32.xlu0 %v15718_v4 }
0x2300   : > { %v15727_v37 = vsel %vm740_vm0, %v15705_v7, 0.0  ;;  %v15704_v10 = vmul.f32 %v22550_v29, %v22550_v29 }
0x2301   : > { %15728 = vadd.xlane.f32.xlu1 %v15727_v37 }
0x2302   : > { %v15724_v45 = vsel %vm740_vm0, %v15704_v10, 0.0 }
0x2303   : > { %15725 = vadd.xlane.f32.xlu0 %v15724_v45 }
0x237e   : > { %v15711_v30 = vpop.xlane.xlu1 %15710 }
0x237f   : > { %v15731_v1 = vmul.f32 0.03125, %v15711_v30  ;;  %v17403_v30 = vld [vmem:[%s22943_s15 + $0x50] sm:$0xff] }
0x2380   : > { %v15708_v61 = vpop.xlane.xlu0 %15707 }
0x2381   : > { %v15739_v27 = vadd.f32 1e-12, %v15731_v1  ;;  %v15730_v54 = vmul.f32 0.03125, %v15708_v61  ;;  %v17402_v1 = vld [vmem:[%s22943_s15 + $0x48] sm:$0xff]  ;;  %v17401_v61 = vld [vmem:[%s22943_s15 + $0x40] sm:$0xff] }
0x2382   : > { %v15717_v12 = vpop.xlane.xlu1 %15716 }
0x2383   : > { %19760 = vrsqrt.f32 %v15739_v27  ;;  %v15738_v39 = vadd.f32 1e-12, %v15730_v54  ;;  %v15733_v51 = vmul.f32 0.03125, %v15717_v12  ;;  %v17392_v27 = vld [vmem:[%s22942_s14 + $0x1] ss:$0 sm:$0xff] }
0x2384   : > { %v15714_v52 = vpop.xlane.xlu0 %15713 }
0x2385   : > { %19762 = vrsqrt.f32 %v15738_v39  ;;  %v15741_v8 = vadd.f32 1e-12, %v15733_v51  ;;  %v15732_v35 = vmul.f32 0.03125, %v15714_v52 }
0x2386   : > { %v15723_v24 = vpop.xlane.xlu1 %15722 }
0x2387   : > { %19764 = vrsqrt.f32 %v15741_v8  ;;  %v15740_v14 = vadd.f32 1e-12, %v15732_v35  ;;  %v15735_v34 = vmul.f32 0.03125, %v15723_v24 }
0x2388   : > { %v15720_v43 = vpop.xlane.xlu0 %15719 }
0x2389   : > { %19766 = vrsqrt.f32 %v15740_v14  ;;  %v15743_v63 = vadd.f32 1e-12, %v15735_v34  ;;  %v15734_v42 = vmul.f32 0.03125, %v15720_v43 }
0x238a   : > { %v15729_v31 = vpop.xlane.xlu1 %15728 }
0x238b   : > { %19768 = vrsqrt.f32 %v15743_v63  ;;  %v15742_v17 = vadd.f32 1e-12, %v15734_v42  ;;  %v15737_v38 = vmul.f32 0.03125, %v15729_v31 }
0x238c   : > { %v15726_v50 = vpop.xlane.xlu0 %15725 }
0x238d   : > { %19770 = vrsqrt.f32 %v15742_v17  ;;  %v15745_v36 = vadd.f32 1e-12, %v15737_v38  ;;  %v15736_v25 = vmul.f32 0.03125, %v15726_v50 }
0x238f   : > { %19772 = vrsqrt.f32 %v15745_v36  ;;  %v15744_v3 = vadd.f32 1e-12, %v15736_v25 }
0x2390   : > { %v19761_v22 = vpop.eup %19760 }
0x2391   : > { %v15755_v21 = vmul.f32 %v19761_v22, %v22519_v59  ;;  %19774 = vrsqrt.f32 %v15744_v3 }
0x2392   : > { %v19763_v46 = vpop.eup %19762 }
0x2393   : > { %v15754_v9 = vmul.f32 %v19763_v46, %v22521_v58  ;;  %v15769_v19 = vmul.f32 %v17385_v15, %v15755_v21 }
0x2394   : > { %v19765_v28 = vpop.eup %19764 }
0x2395   : > { %v15757_v57 = vmul.f32 %v19765_v28, %v22525_v62  ;;  %v15768_v23 = vmul.f32 %v17385_v15, %v15754_v9  ;;  %v22584_v59 = vadd.f32 %v17386_v2, %v15769_v19 }
0x2396   : > { %v19767_v0 = vpop.eup %19766 }
0x2397   : > { %v22581_v26 = vadd.f32 %v17386_v2, %v15768_v23  ;;  %v15756_v56 = vmul.f32 %v19767_v0, %v22530_v53  ;;  %v15771_v18 = vmul.f32 %v17385_v15, %v15757_v57 }
0x2398   : > { %v19769_v40 = vpop.eup %19768 }
0x2399   : > { %v15759_v58 = vmul.f32 %v19769_v40, %v22535_v13  ;;  %19392 = vmatprep.mubr.msk.f32.mxu0 %vm740_vm0, %v22581_v26  ;;  %v15770_v62 = vmul.f32 %v17385_v15, %v15756_v56  ;;  %v22594_v53 = vadd.f32 %v17386_v2, %v15771_v18 }
0x239a   : > { %v19771_v60 = vpop.eup %19770  ;;  %19393 = vmatmul.mubr.msk.f32.vlgmr.msra.gmra.mxu0 %vm740_vm0, %v22584_v59 }
0x239b   : > { %v22591_v44 = vadd.f32 %v17386_v2, %v15770_v62  ;;  %v15758_v32 = vmul.f32 %v19771_v60, %v22540_v5  ;;  %v15773_v11 = vmul.f32 %v17385_v15, %v15759_v58 }
0x239c   : > { %v19773_v49 = vpop.eup %19772 }
0x239d   : > { %v15761_v47 = vmul.f32 %v19773_v49, %v22545_v41  ;;  %19395 = vmatprep.mubr.msk.f32.mxu0 %vm740_vm0, %v22591_v44  ;;  %v15772_v13 = vmul.f32 %v17385_v15, %v15758_v32  ;;  %v22604_v37 = vadd.f32 %v17386_v2, %v15773_v11 }
0x239e   : > { %v19775_v16 = vpop.eup %19774  ;;  %19396 = vmatmul.mubr.msk.f32.gmra.mxu0 %vm740_vm0, %v22594_v53 }
0x239f   : > { %v22601_v4 = vadd.f32 %v17386_v2, %v15772_v13  ;;  %v15760_v7 = vmul.f32 %v19775_v16, %v22550_v29  ;;  %v15775_v5 = vmul.f32 %v17385_v15, %v15761_v47  ;;  %v17408_v29 = vld [vmem:[%s22943_s15 + $0x78] sm:$0xff] }
0x23a0   : > { %19404 = vmatprep.subr.mxu1 %v17408_v29 }
0x23a1   : > { %19398 = vmatprep.mubr.msk.f32.mxu0 %vm740_vm0, %v22601_v4  ;;  %v15774_v10 = vmul.f32 %v17385_v15, %v15760_v7  ;;  %v22612_v45 = vadd.f32 %v17386_v2, %v15775_v5  ;;  %19405 = vmatpush3.msra.mxu1 %v17408_v29 }
0x23a2   : > { %19399 = vmatmul.mubr.msk.f32.gmra.mxu0 %vm740_vm0, %v22604_v37  ;;  %19406 = vmatprep.subr.mxu1 %v17407_v6 }
0x23a3   : > { %v22610_v41 = vadd.f32 %v17386_v2, %v15774_v10  ;;  %19407 = vmatpush3.msra.mxu1 %v17407_v6 }
0x23a4   : > { %19408 = vmatprep.subr.mxu1 %v17406_v48 }
0x23a5   : > { %19401 = vmatprep.mubr.msk.f32.mxu0 %vm740_vm0, %v22610_v41  ;;  %19409 = vmatpush3.msra.mxu1 %v17406_v48 }
0x23a6   : > { %19402 = vmatmul.mubr.msk.f32.gmra.mxu0 %vm740_vm0, %v22612_v45  ;;  %19410 = vmatprep.subr.mxu1 %v17405_v33 }
0x23a7   : > { %19440 = vmatprep.mubr.msk.f32.mxu0 %vm19870_vm1, %v19869_v20  ;;  %19411 = vmatpush3.msra.mxu1 %v17405_v33 }
0x23a8   : > { %19412 = vmatprep.subr.mxu1 %v17404_v55 }
0x23a9   : > { %19413 = vmatpush3.msra.mxu1 %v17404_v55 }
0x23aa   : > { %19414 = vmatprep.subr.mxu1 %v17403_v30 }
0x23ab   : > { %19415 = vmatpush3.msra.mxu1 %v17403_v30 }
0x23ac   : > { %19416 = vmatprep.subr.mxu1 %v17402_v1 }
0x23ad   : > { %19417 = vmatpush3.msra.mxu1 %v17402_v1 }
0x23ae   : > { %19418 = vmatprep.subr.mxu1 %v17401_v61 }
0x23af   : > { %19419 = vmatpush3.msra.mxu1 %v17401_v61 }
0x245a   : > { %v19394_v54 = vpop.f32.mrf.mxu0 }
0x245b   : > { %v22647_v12 = vadd.f32 %v19394_v54, %v17392_v27 }
0x245c   : > { %v15893_v39 = vpop.f32.mrf.mxu0 }
0x245d   : > { %v15941_v51 = vmul.f32 0.044715, %v22647_v12  ;;  %v22650_v52 = vadd.f32 %v17392_v27, %v15893_v39 }
0x245e   : > { %v19397_v8 = vpop.f32.mrf.mxu0 }
0x245f   : > { %v15949_v35 = vmul.f32 %v15941_v51, %v22647_v12  ;;  %v15940_v24 = vmul.f32 0.044715, %v22650_v52  ;;  %v22654_v14 = vadd.f32 %v19397_v8, %v17392_v27 }
0x2460   : > { %v15903_v34 = vpop.f32.mrf.mxu0 }
0x2461   : > { %v15957_v43 = vmul.f32 %v15949_v35, %v22647_v12  ;;  %v15948_v63 = vmul.f32 %v15940_v24, %v22650_v52  ;;  %v15943_v42 = vmul.f32 0.044715, %v22654_v14  ;;  %v22659_v31 = vadd.f32 %v17392_v27, %v15903_v34 }
0x2462   : > { %v19400_v17 = vpop.f32.mrf.mxu0  ;;  %v15932_v24 = vmul.f32 0.5, %v22650_v52 }
0x2463   : > { %v15965_v38 = vadd.f32 %v15957_v43, %v22647_v12  ;;  %v15956_v50 = vmul.f32 %v15948_v63, %v22650_v52  ;;  %v15951_v36 = vmul.f32 %v15943_v42, %v22654_v14  ;;  %v22664_v25 = vadd.f32 %v19400_v17, %v17392_v27 }
0x2464   : > { %v15942_v3 = vmul.f32 0.044715, %v22659_v31  ;;  %v15913_v22 = vpop.f32.mrf.mxu0  ;;  %v15933_v43 = vmul.f32 0.5, %v22647_v12 }
0x2465   : > { %v15973_v15 = vmul.f32 0.7978846, %v15965_v38  ;;  %v15964_v21 = vadd.f32 %v15956_v50, %v22650_v52  ;;  %v15959_v46 = vmul.f32 %v15951_v36, %v22654_v14  ;;  %v15945_v28 = vmul.f32 0.044715, %v22664_v25 }
0x2466   : > { %v15950_v9 = vmul.f32 %v15942_v3, %v22659_v31  ;;  %v15914_v19 = vadd.f32 %v17392_v27, %v15913_v22  ;;  %v19403_v57 = vpop.f32.mrf.mxu0  ;;  %v15934_v50 = vmul.f32 0.5, %v22659_v31  ;;  %v15935_v22 = vmul.f32 0.5, %v22654_v14 }
0x2467   : > { %19776 = vtanh.f32 %v15973_v15  ;;  %v15967_v2 = vadd.f32 %v15959_v46, %v22654_v14  ;;  %v22672_v23 = vadd.f32 %v19403_v57, %v17392_v27  ;;  %v15972_v0 = vmul.f32 0.7978846, %v15964_v21 }
0x2468   : > { %v15958_v56 = vmul.f32 %v15950_v9, %v22659_v31  ;;  %v15953_v40 = vmul.f32 %v15945_v28, %v22664_v25  ;;  %v15944_v18 = vmul.f32 0.044715, %v15914_v19  ;;  %v15923_v58 = vpop.f32.mrf.mxu0  ;;  %v15936_v12 = vmul.f32 0.5, %v15914_v19 }
0x2469   : > { %v15975_v62 = vmul.f32 0.7978846, %v15967_v2  ;;  %v15947_v60 = vmul.f32 0.044715, %v22672_v23  ;;  %v15924_v32 = vadd.f32 %v17392_v27, %v15923_v58  ;;  %19778 = vtanh.f32 %v15972_v0 }
0x246a   : > { %v15966_v49 = vadd.f32 %v15958_v56, %v22659_v31  ;;  %v15961_v11 = vmul.f32 %v15953_v40, %v22664_v25  ;;  %v15952_v47 = vmul.f32 %v15944_v18, %v15914_v19  ;;  %v15937_v57 = vmul.f32 0.5, %v22664_v25 }
0x246b   : > { %19780 = vtanh.f32 %v15975_v62  ;;  %v15955_v13 = vmul.f32 %v15947_v60, %v22672_v23  ;;  %v15946_v16 = vmul.f32 0.044715, %v15924_v32  ;;  %v15938_v56 = vmul.f32 0.5, %v15924_v32  ;;  %v17410_v62 = vld [vmem:[%s22944_s16 + $0x1] ss:$0 sm:$0xff] }
0x246c   : > { %v15969_v7 = vadd.f32 %v15961_v11, %v22664_v25  ;;  %v15960_v5 = vmul.f32 %v15952_v47, %v15914_v19  ;;  %v15974_v10 = vmul.f32 0.7978846, %v15966_v49  ;;  %v15939_v18 = vmul.f32 0.5, %v22672_v23 }
0x246d   : > { %v15963_v29 = vmul.f32 %v15955_v13, %v22672_v23  ;;  %v15954_v6 = vmul.f32 %v15946_v16, %v15924_v32  ;;  %v19871_v25 = vmov 0  }
0x246e   : > { %v15977_v48 = vmul.f32 0.7978846, %v15969_v7  ;;  %v15968_v33 = vadd.f32 %v15960_v5, %v15914_v19  ;;  %19782 = vtanh.f32 %v15974_v10  ;;  %19455 = vset.pattern.permute.xlu1 %v19871_v25  ;;  %19454 = vset.pattern.permute.xlu0 %v19871_v25 }
0x246f   : > { %v15971_v55 = vadd.f32 %v15963_v29, %v22672_v23  ;;  %v15962_v30 = vmul.f32 %v15954_v6, %v15924_v32 }
0x2470   : > { %19784 = vtanh.f32 %v15977_v48  ;;  %v15976_v1 = vmul.f32 0.7978846, %v15968_v33 }
0x2471   : > { %v15979_v61 = vmul.f32 0.7978846, %v15971_v55  ;;  %v15970_v27 = vadd.f32 %v15962_v30, %v15924_v32 }
0x2472   : > { %19786 = vtanh.f32 %v15976_v1 }
0x2473   : > { %19788 = vtanh.f32 %v15979_v61  ;;  %v15978_v54 = vmul.f32 0.7978846, %v15970_v27 }
0x2474   : > { %v19777_v39 = vpop.eup %19776 }
0x2475   : > { %19790 = vtanh.f32 %v15978_v54  ;;  %v15989_v8 = vadd.f32 1.0, %v19777_v39  ;;  %v16294_v39 = vld [vmem:[%s22725_s27] sm:$0xff] }
0x2476   : > { %v19779_v51 = vpop.eup %19778 }
0x2477   : > { %v15988_v34 = vadd.f32 1.0, %v19779_v51  ;;  %v15997_v17 = vmul.f32 %v15989_v8, %v15933_v43  ;;  %v16295_v43 = vld [vmem:[%s22725_s27 + $0x8] sm:$0xff] }
0x2478   : > { %v19781_v35 = vpop.eup %19780 }
0x2479   : > { %v15996_v63 = vmul.f32 %v15988_v34, %v15932_v24  ;;  %v15991_v38 = vadd.f32 1.0, %v19781_v35 }
0x247b   : > { %v19783_v42 = vpop.eup %19782  ;;  %19420 = vmatprep.mubr.msk.f32.mxu1 %vm8250_vm3, %v15996_v63  ;;  %v15999_v52 = vmul.f32 %v15991_v38, %v15935_v22 }
0x247c   : > { %v15990_v36 = vadd.f32 1.0, %v19783_v42  ;;  %19421 = vmatmul.mubr.msk.f32.vlgmr.msra.gmra.mxu1 %vm8250_vm3, %v15997_v17  ;;  %v16414_v42 = vsel %vm16406_vm4, %v16295_v43, 0.0 }
0x247d   : > { %v19785_v3 = vpop.eup %19784  ;;  %v16415_v17 = vrot.slane %v16414_v42, 4 }
0x247e   : > { %v15998_v15 = vmul.f32 %v15990_v36, %v15934_v50  ;;  %v15993_v46 = vadd.f32 1.0, %v19785_v3  ;;  %v16296_v36 = vld [vmem:[%s22725_s27 + $0x10] sm:$0xff] }
0x247f   : > { %v19787_v21 = vpop.eup %19786  ;;  %v16416_v50 = vadd.f32 %v16415_v17, %v16414_v42  ;;  %v16421_v3 = vsel %vm16406_vm4, %v16296_v36, 0.0 }
0x2480   : > { %v19789_v9 = vpop.eup %19788  ;;  %19423 = vmatprep.mubr.msk.f32.mxu1 %vm8250_vm3, %v15998_v15  ;;  %v15992_v28 = vadd.f32 1.0, %v19787_v21  ;;  %v16001_v0 = vmul.f32 %v15993_v46, %v15937_v57  ;;  %v16422_v15 = vrot.slane %v16421_v3, 4  ;;  %v16298_v57 = vld [vmem:[%s22725_s27 + $0x20] sm:$0xff] }
0x2481   : > { %19424 = vmatmul.mubr.msk.f32.gmra.mxu1 %vm8250_vm3, %v15999_v52  ;;  %v15995_v40 = vadd.f32 1.0, %v19789_v9  ;;  %v16417_v22 = vrot.slane %v16416_v50, 2  ;;  %v16297_v52 = vld [vmem:[%s22725_s27 + $0x18] sm:$0xff] }
0x2482   : > { %v19791_v31 = vpop.eup %19790  ;;  %v16000_v2 = vmul.f32 %v15992_v28, %v15936_v12  ;;  %v16423_v9 = vadd.f32 %v16422_v15, %v16421_v3  ;;  %v16428_v28 = vsel %vm16406_vm4, %v16297_v52, 0.0 }
0x2483   : > { %v15994_v14 = vadd.f32 1.0, %v19791_v31  ;;  %v16003_v19 = vmul.f32 %v15995_v40, %v15939_v18  ;;  %v16418_v46 = vadd.f32 %v16417_v22, %v16416_v50  ;;  %v16299_v40 = vld [vmem:[%s22725_s27 + $0x28] sm:$0xff] }
0x2484   : > { %19426 = vmatprep.mubr.msk.f32.mxu1 %vm8250_vm3, %v16000_v2  ;;  %v16424_v31 = vrot.slane %v16423_v9, 2 }
0x2485   : > { %19427 = vmatmul.mubr.msk.f32.gmra.mxu1 %vm8250_vm3, %v16001_v0  ;;  %v16002_v58 = vmul.f32 %v15994_v14, %v15938_v56  ;;  %v16419_v0 = vrot.slane %v16418_v46, 1  ;;  %v16429_v56 = vrot.slane %v16428_v28, 4  ;;  %v16435_v14 = vsel %vm16406_vm4, %v16298_v57, 0.0 }
0x2486   : > { %v16425_v18 = vadd.f32 %v16424_v31, %v16423_v9 }
0x2487   : > { %19429 = vmatprep.mubr.msk.f32.mxu1 %vm8250_vm3, %v16002_v58  ;;  %v22763_v58 = vadd.f32 %v16419_v0, %v16418_v46 }
0x2489   : > { %19430 = vmatmul.mubr.msk.f32.gmra.mxu1 %vm8250_vm3, %v16003_v19  ;;  %v16430_v19 = vadd.f32 %v16429_v56, %v16428_v28  ;;  %vm16464_vm8 = vcmp.gt.f32.partialorder %v22763_v58, 0.0 }
0x253c   : > { %v19422_v60 = vpop.f32.mrf.mxu1 }
0x253d   : > { %v16117_v32 = vadd.f32 %v19422_v60, %v17410_v62  ;;  %v16442_v60 = vsel %vm16406_vm4, %v16299_v40, 0.0 }
0x253e   : > { %v16111_v23 = vpop.f32.mrf.mxu1 }
0x253f   : > { %v22703_v49 = vadd.f32 %v16117_v32, %v22584_v59  ;;  %v16112_v11 = vadd.f32 %v17410_v62, %v16111_v23  ;;  %v16431_v32 = vrot.slane %v16430_v19, 2  ;;  %v16426_v23 = vrot.slane %v16425_v18, 1 }
0x2541   : > { %v19425_v47 = vpop.f32.mrf.mxu1  ;;  %v22706_v13 = vadd.f32 %v16112_v11, %v22581_v26  ;;  %v16165_v7 = vsel %vm740_vm0, %v22703_v49, 0.0 }
0x2542   : > { %v16127_v16 = vadd.f32 %v19425_v47, %v17410_v62  ;;  %16166 = vadd.xlane.f32.xlu1 %v16165_v7  ;;  %v16443_v47 = vrot.slane %v16442_v60, 4  ;;  %v16432_v7 = vadd.f32 %v16431_v32, %v16430_v19  ;;  %v16301_v32 = vld [vmem:[%s22725_s27 + $0x38] sm:$0xff] }
0x2543   : > { %v16121_v5 = vpop.f32.mrf.mxu1  ;;  %v16162_v59 = vsel %vm740_vm0, %v22706_v13, 0.0 }
0x2544   : > { %v22711_v10 = vadd.f32 %v16127_v16, %v22594_v53  ;;  %v16122_v29 = vadd.f32 %v17410_v62, %v16121_v5  ;;  %16163 = vadd.xlane.f32.xlu0 %v16162_v59  ;;  %v16300_v16 = vld [vmem:[%s22725_s27 + $0x30] sm:$0xff]  ;;  %v22768_v5 = vadd.f32 %v16426_v23, %v16425_v18  ;;  %v16444_v59 = vadd.f32 %v16443_v47, %v16442_v60 }
0x2545   : > { %v19428_v6 = vpop.f32.mrf.mxu1 }
0x2546   : > { %v22716_v48 = vadd.f32 %v16122_v29, %v22591_v44  ;;  %v16137_v26 = vadd.f32 %v19428_v6, %v17410_v62  ;;  %v16171_v33 = vsel %vm740_vm0, %v22711_v10, 0.0  ;;  %vm16465_vm6 = vcmp.gt.f32.partialorder %v22768_v5, 0.0 }
0x2547   : > { %16172 = vadd.xlane.f32.xlu1 %v16171_v33  ;;  %v16131_v55 = vpop.f32.mrf.mxu1  ;;  %v16445_v33 = vrot.slane %v16444_v59, 2 }
0x2548   : > { %v22728_v53 = vadd.f32 %v16137_v26, %v22604_v37  ;;  %v16132_v30 = vadd.f32 %v17410_v62, %v16131_v55  ;;  %v16168_v44 = vsel %vm740_vm0, %v22716_v48, 0.0  ;;  %v16433_v26 = vrot.slane %v16432_v7, 1 }
0x2549   : > { %16169 = vadd.xlane.f32.xlu0 %v16168_v44  ;;  %v19431_v1 = vpop.f32.mrf.mxu1  ;;  %v16446_v44 = vadd.f32 %v16445_v33, %v16444_v59 }
0x254a   : > { %v22733_v61 = vadd.f32 %v16132_v30, %v22601_v4  ;;  %v16147_v27 = vadd.f32 %v19431_v1, %v17410_v62  ;;  %v16177_v54 = vsel %vm740_vm0, %v22728_v53, 0.0  ;;  %v16407_v4 = vsel %vm16406_vm4, %v16294_v39, 0.0 }
0x254b   : > { %16178 = vadd.xlane.f32.xlu1 %v16177_v54  ;;  %v16141_v51 = vpop.f32.mrf.mxu1  ;;  %v16408_v63 = vrot.slane %v16407_v4, 4  ;;  %v22771_v55 = vadd.f32 %v16433_v26, %v16432_v7 }
0x254c   : > { %v22739_v37 = vadd.f32 %v16147_v27, %v22612_v45  ;;  %v16142_v8 = vadd.f32 %v17410_v62, %v16141_v51  ;;  %v16174_v35 = vsel %vm740_vm0, %v22733_v61, 0.0  ;;  %v16436_v62 = vrot.slane %v16435_v14, 4 }
0x254d   : > { %16175 = vadd.xlane.f32.xlu0 %v16174_v35  ;;  %v16409_v38 = vadd.f32 %v16408_v63, %v16407_v4  ;;  %v16447_v27 = vrot.slane %v16446_v44, 1  ;;  %vm16466_vm10 = vcmp.gt.f32.partialorder %v22771_v55, 0.0 }
0x254e   : > { %v22745_v24 = vadd.f32 %v16142_v8, %v22610_v41  ;;  %v16183_v34 = vsel %vm740_vm0, %v22739_v37, 0.0  ;;  %v16437_v11 = vadd.f32 %v16436_v62, %v16435_v14 }
0x254f   : > { %16184 = vadd.xlane.f32.xlu1 %v16183_v34  ;;  %v16410_v41 = vrot.slane %v16409_v38, 2  ;;  %v22777_v54 = vadd.f32 %v16447_v27, %v16446_v44  ;;  %v16529_v27 = vsel %vm16465_vm6, 1, %v19871_v25 }
0x2550   : > { %v16180_v45 = vsel %vm740_vm0, %v22745_v24, 0.0  ;;  %v16438_v29 = vrot.slane %v16437_v11, 2 }
0x2551   : > { %16181 = vadd.xlane.f32.xlu0 %v16180_v45  ;;  %v16411_v21 = vadd.f32 %v16410_v41, %v16409_v38  ;;  %vm16468_vm11 = vcmp.gt.f32.partialorder %v22777_v54, 0.0 }
0x2552   : > { %v16439_v6 = vadd.f32 %v16438_v29, %v16437_v11 }
0x2553   : > { %v16412_v12 = vrot.slane %v16411_v21, 1 }
0x2554   : > { %v16440_v30 = vrot.slane %v16439_v6, 1 }
0x2555   : > { %v22758_v2 = vadd.f32 %v16412_v12, %v16411_v21 }
0x2556   : > { %v22774_v1 = vadd.f32 %v16440_v30, %v16439_v6 }
0x2557   : > { %vm16463_vm5 = vcmp.gt.f32.partialorder %v22758_v2, 0.0 }
0x2558   : > { %v16527_v30 = vsel %vm16463_vm5, 1, %v19871_v25  ;;  %vm16467_vm7 = vcmp.gt.f32.partialorder %v22774_v1, 0.0  ;;  %vm16598_vm5 = vcmask 1043459  }
0x2560   : > { %16309 = vperm.xlu1 %19455, %v16295_v43  }
0x2564   : > { %16314 = vperm.xlu1 %19455, %v16296_v36   ;;  %v16449_v36 = vsel %vm16406_vm4, %v16300_v16, 0.0 }
0x2565   : > { %v16450_v12 = vrot.slane %v16449_v36, 4 }
0x2567   : > { %16304 = vperm.xlu0 %19454, %v16294_v39  }
0x2568   : > { %16473 = vperm.xlu1 %19455, %v22758_v2   ;;  %v16528_v2 = vsel %vm16464_vm8, 1, %v19871_v25  ;;  %vm16602_vm8 = vcmask 1045509  }
0x256b   : > { %16329 = vperm.xlu0 %19454, %v16299_v40  }
0x256c   : > { %16478 = vperm.xlu1 %19455, %v22763_v58  }
0x256f   : > { %16334 = vperm.xlu0 %19454, %v16300_v16   ;;  %v16456_v16 = vsel %vm16406_vm4, %v16301_v32, 0.0 }
0x2570   : > { %16319 = vperm.xlu1 %19455, %v16297_v52  }
0x2574   : > { %16483 = vperm.xlu1 %19455, %v22768_v5  }
0x2578   : > { %16324 = vperm.xlu1 %19455, %v16298_v57  }
0x257c   : > { %16488 = vperm.xlu1 %19455, %v22771_v55   ;;  %v16577_v55 = vld [vmem:[%s22947_s19 + $0x10] sm:$0xff] }
0x2580   : > { %16493 = vperm.xlu1 %19455, %v22774_v1   ;;  %v16530_v1 = vsel %vm16466_vm10, 1, %v19871_v25 }
0x2584   : > { %16498 = vperm.xlu1 %19455, %v22777_v54   ;;  %v16576_v54 = vld [vmem:[%s22947_s19 + $0x8] sm:$0xff] }
0x25cb   : > { %v16167_v39 = vpop.xlane.xlu1 %16166 }
0x25cc   : > { %v16187_v51 = vmul.f32 0.03125, %v16167_v39 }
0x25cd   : > { %v16164_v8 = vpop.xlane.xlu0 %16163 }
0x25ce   : > { %v22781_v35 = vsub.f32 %v22703_v49, %v16187_v51  ;;  %v16186_v4 = vmul.f32 0.03125, %v16164_v8  ;;  %v16531_v51 = vsel %vm16467_vm7, 1, %v19871_v25  ;;  %v16532_v8 = vsel %vm16468_vm11, 1, %v19871_v25 }
0x25cf   : > { %vm16600_vm7 = vcmask 1044484   ;;  %vm16604_vm11 = vcmask 1046534  }
0x25d0   : > { %v16173_v34 = vpop.xlane.xlu1 %16172  ;;  %v22784_v43 = vsub.f32 %v22706_v13, %v16186_v4  ;;  %v16203_v63 = vmul.f32 %v22781_v35, %v22781_v35  ;;  %v16578_v4 = vld [vmem:[%s22947_s19 + $0x18] sm:$0xff] }
0x25d1   : > { %v16189_v45 = vmul.f32 0.03125, %v16173_v34  ;;  %19433 = vmatpush3.msra.mxu0 %v16578_v4 }
0x25d2   : > { %v16170_v42 = vpop.xlane.xlu0 %16169  ;;  %v16213_v50 = vsel %vm740_vm0, %v16203_v63, 0.0  ;;  %v16202_v49 = vmul.f32 %v22784_v43, %v22784_v43  ;;  %19434 = vmatprep.subr.mxu0 %v19869_v20 }
0x25d3   : > { %v22789_v17 = vsub.f32 %v22711_v10, %v16189_v45  ;;  %v16188_v38 = vmul.f32 0.03125, %v16170_v42  ;;  %16214 = vadd.xlane.f32.xlu1 %v16213_v50  ;;  %19435 = vmatpush3.msra.mxu0 %v16577_v55 }
0x25d4   : > { %v16179_v41 = vpop.xlane.xlu1 %16178  ;;  %v16210_v22 = vsel %vm740_vm0, %v16202_v49, 0.0  ;;  %19436 = vmatprep.subr.mxu0 %v19869_v20 }
0x25d5   : > { %v22796_v13 = vsub.f32 %v22716_v48, %v16188_v38  ;;  %v16191_v3 = vmul.f32 0.03125, %v16179_v41  ;;  %v16205_v10 = vmul.f32 %v22789_v17, %v22789_v17  ;;  %16211 = vadd.xlane.f32.xlu0 %v16210_v22  ;;  %19437 = vmatpush3.msra.mxu0 %v16576_v54 }
0x25d6   : > { %v16176_v15 = vpop.xlane.xlu0 %16175  ;;  %19438 = vmatprep.subr.mxu0 %v19869_v20 }
0x25d7   : > { %v22802_v21 = vsub.f32 %v22728_v53, %v16191_v3  ;;  %v16190_v52 = vmul.f32 0.03125, %v16176_v15  ;;  %v16219_v46 = vsel %vm740_vm0, %v16205_v10, 0.0  ;;  %v16204_v9 = vmul.f32 %v22796_v13, %v22796_v13 }
0x25d8   : > { %16220 = vadd.xlane.f32.xlu1 %v16219_v46  ;;  %v16185_v48 = vpop.xlane.xlu1 %16184 }
0x25d9   : > { %v22808_v28 = vsub.f32 %v22733_v61, %v16190_v52  ;;  %v16193_v57 = vmul.f32 0.03125, %v16185_v48  ;;  %v16216_v31 = vsel %vm740_vm0, %v16204_v9, 0.0  ;;  %v16207_v53 = vmul.f32 %v22802_v21, %v22802_v21 }
0x25da   : > { %16217 = vadd.xlane.f32.xlu0 %v16216_v31  ;;  %v16182_v0 = vpop.xlane.xlu0 %16181  ;;  %v16451_v61 = vadd.f32 %v16450_v12, %v16449_v36 }
0x25db   : > { %v22814_v56 = vsub.f32 %v22739_v37, %v16193_v57  ;;  %v16192_v14 = vmul.f32 0.03125, %v16182_v0  ;;  %v16225_v40 = vsel %vm740_vm0, %v16207_v53, 0.0  ;;  %v16206_v18 = vmul.f32 %v22808_v28, %v22808_v28 }
0x25dc   : > { %16226 = vadd.xlane.f32.xlu1 %v16225_v40  ;;  %v16452_v11 = vrot.slane %v16451_v61, 2  ;;  %v16310_v34 = vpop.permute.xlu1 %16309 }
0x25dd   : > { %v22820_v19 = vsub.f32 %v22745_v24, %v16192_v14  ;;  %v16222_v62 = vsel %vm740_vm0, %v16206_v18, 0.0  ;;  %v16209_v60 = vmul.f32 %v22814_v56, %v22814_v56  ;;  %v16457_v24 = vrot.slane %v16456_v16, 4 }
0x25de   : > { %16223 = vadd.xlane.f32.xlu0 %v16222_v62  ;;  %v16453_v7 = vadd.f32 %v16452_v11, %v16451_v61 }
0x25df   : > { %v16231_v37 = vsel %vm740_vm0, %v16209_v60, 0.0  ;;  %v16208_v23 = vmul.f32 %v22820_v19, %v22820_v19  ;;  %v16458_v29 = vadd.f32 %v16457_v24, %v16456_v16 }
0x25e0   : > { %16232 = vadd.xlane.f32.xlu1 %v16231_v37  ;;  %v16454_v59 = vrot.slane %v16453_v7, 1  ;;  %v22860_v45 = vpop.permute.xlu1 %16314 }
0x25e1   : > { %v16228_v47 = vsel %vm740_vm0, %v16208_v23, 0.0  ;;  %v16459_v6 = vrot.slane %v16458_v29, 2 }
0x25e2   : > { %16229 = vadd.xlane.f32.xlu0 %v16228_v47  ;;  %v16455_v26 = vadd.f32 %v16454_v59, %v16453_v7  ;;  %v16305_v41 = vpop.permute.xlu0 %16304  ;;  %v17421_v59 = vld [vmem:[%s22945_s17 + $0x1] ss:$0 sm:$0xff] }
0x25e3   : > { %v16460_v33 = vadd.f32 %v16459_v6, %v16458_v29 }
0x25e4   : > { %vm16469_vm9 = vcmp.gt.f32.partialorder %v16455_v26, 0.0  ;;  %v16474_v63 = vpop.permute.xlu1 %16473 }
0x25e5   : > { %v16461_v44 = vrot.slane %v16460_v33, 1  ;;  %v16533_v5 = vsel %vm16469_vm9, 1, %v19871_v25 }
0x25e6   : > { %v22868_v22 = vpop.permute.xlu0 %16329 }
0x25e7   : > { %v16462_v39 = vadd.f32 %v16461_v44, %v16460_v33  ;;  %v22881_v33 = vld [vmem:[%s22946_s18 + $0x1] ss:$0 sm:$0xff] }
0x25e8   : > { %v16479_v42 = vpop.permute.xlu1 %16478 }
0x25e9   : > { %vm16470_vm12 = vcmp.gt.f32.partialorder %v16462_v39, 0.0 }
0x25ea   : > { %v16534_v58 = vsel %vm16470_vm12, 1, %v19871_v25  ;;  %v16575_v25 = vld [vmem:[%s22947_s19] sm:$0xff]  ;;  %v22872_v20 = vpop.permute.xlu0 %16334  ;;  %vm16606_vm12 = vcmask 1047559  }
0x25eb   : > { %19439 = vmatpush3.msra.mxu0 %v16575_v25 }
0x25ec   : > { %v22862_v38 = vpop.permute.xlu1 %16319 }
0x25f0   : > { %v16484_v50 = vpop.permute.xlu1 %16483 }
0x25f1   : > { %16503 = vperm.xlu1 %19455, %v16455_v26  }
0x25f4   : > { %v22864_v49 = vpop.permute.xlu1 %16324 }
0x25f5   : > { %16536 = vperm.xlu1 %19455, %v16527_v30  }
0x25f8   : > { %16339 = vperm.xlu0 %19454, %v16301_v32   ;;  %v16489_v36 = vpop.permute.xlu1 %16488 }
0x25f9   : > { %16542 = vperm.xlu1 %19455, %v16529_v27  }
0x25fc   : > { %16508 = vperm.xlu0 %19454, %v16462_v39   ;;  %v22866_v3 = vpop.permute.xlu1 %16493 }
0x25fd   : > { %16548 = vperm.xlu1 %19455, %v16531_v51  }
0x2600   : > { %16539 = vperm.xlu0 %19454, %v16528_v2   ;;  %v22870_v10 = vpop.permute.xlu1 %16498 }
0x2601   : > { %16554 = vperm.xlu1 %19455, %v16533_v5  }
0x2604   : > { %16545 = vperm.xlu0 %19454, %v16530_v1  }
0x2608   : > { %16551 = vperm.xlu0 %19454, %v16532_v8  }
0x260c   : > { %16557 = vperm.xlu0 %19454, %v16534_v58  }
0x265c   : > { %v16215_v15 = vpop.xlane.xlu1 %16214 }
0x265d   : > { %v16235_v52 = vmul.f32 0.03125, %v16215_v15 }
0x265e   : > { %v16212_v46 = vpop.xlane.xlu0 %16211 }
0x265f   : > { %v16243_v9 = vadd.f32 1e-12, %v16235_v52  ;;  %v16234_v12 = vmul.f32 0.03125, %v16212_v46 }
0x2661   : > { %v16221_v48 = vpop.xlane.xlu1 %16220  ;;  %19792 = vrsqrt.f32 %v16243_v9  ;;  %v16242_v57 = vadd.f32 1e-12, %v16234_v12 }
0x2662   : > { %v16237_v31 = vmul.f32 0.03125, %v16221_v48 }
0x2663   : > { %v16218_v53 = vpop.xlane.xlu0 %16217  ;;  %19794 = vrsqrt.f32 %v16242_v57 }
0x2664   : > { %v16245_v0 = vadd.f32 1e-12, %v16237_v31  ;;  %v16236_v14 = vmul.f32 0.03125, %v16218_v53 }
0x2665   : > { %v16227_v40 = vpop.xlane.xlu1 %16226 }
0x2666   : > { %19796 = vrsqrt.f32 %v16245_v0  ;;  %v16244_v18 = vadd.f32 1e-12, %v16236_v14  ;;  %v16239_v61 = vmul.f32 0.03125, %v16227_v40 }
0x2667   : > { %v16224_v62 = vpop.xlane.xlu0 %16223 }
0x2668   : > { %19798 = vrsqrt.f32 %v16244_v18  ;;  %v16247_v60 = vadd.f32 1e-12, %v16239_v61  ;;  %v16238_v32 = vmul.f32 0.03125, %v16224_v62 }
0x2669   : > { %v16233_v37 = vpop.xlane.xlu1 %16232 }
0x266a   : > { %19800 = vrsqrt.f32 %v16247_v60  ;;  %v16246_v23 = vadd.f32 1e-12, %v16238_v32  ;;  %v16241_v11 = vmul.f32 0.03125, %v16233_v37 }
0x266b   : > { %v16230_v47 = vpop.xlane.xlu0 %16229 }
0x266c   : > { %19802 = vrsqrt.f32 %v16246_v23  ;;  %v16249_v16 = vadd.f32 1e-12, %v16241_v11  ;;  %v16240_v24 = vmul.f32 0.03125, %v16230_v47 }
0x266d   : > { %v16504_v52 = vpop.permute.xlu1 %16503 }
0x266e   : > { %19804 = vrsqrt.f32 %v16249_v16  ;;  %v16248_v7 = vadd.f32 1e-12, %v16240_v24  ;;  %v19793_v29 = vpop.eup %19792 }
0x266f   : > { %v16259_v6 = vmul.f32 %v19793_v29, %v22781_v35 }
0x2670   : > { %19806 = vrsqrt.f32 %v16248_v7  ;;  %v19795_v26 = vpop.eup %19794 }
0x2671   : > { %v16258_v30 = vmul.f32 %v19795_v26, %v22784_v43  ;;  %v16273_v44 = vmul.f32 %v17421_v59, %v16259_v6  ;;  %19808 = vrcp.f32 %v16474_v63  ;;  %v16537_v61 = vpop.permute.xlu1 %16536 }
0x2672   : > { %19810 = vrcp.f32 %v16479_v42  ;;  %vm16559_vm15 = vcmp.eq.s32.totalorder %v16537_v61, 1 }
0x2673   : > { %v19797_v27 = vpop.eup %19796  ;;  %v16272_v51 = vmul.f32 %v17421_v59, %v16258_v30  ;;  %v16287_v2 = vadd.f32 %v22881_v33, %v16273_v44  ;;  %v16340_v8 = vpop.permute.xlu0 %16339  ;;  %19812 = vrcp.f32 %v16484_v50 }
0x2674   : > { %v16261_v39 = vmul.f32 %v19797_v27, %v22789_v17  ;;  %19814 = vrcp.f32 %v16489_v36 }
0x2675   : > { %v19799_v5 = vpop.eup %19798  ;;  %v16286_v1 = vadd.f32 %v22881_v33, %v16272_v51  ;;  %v16343_v58 = vmul.f32 %v16310_v34, %v16287_v2  ;;  %19816 = vrcp.f32 %v22866_v3 }
0x2676   : > { %v16260_v35 = vmul.f32 %v19799_v5, %v22796_v13  ;;  %v16275_v55 = vmul.f32 %v17421_v59, %v16261_v39  ;;  %19818 = vrcp.f32 %v22870_v10 }
0x2677   : > { %v19801_v4 = vpop.eup %19800  ;;  %v16342_v54 = vmul.f32 %v16305_v41, %v16286_v1  ;;  %v16357_v15 = vsel %vm740_vm0, %v16343_v58, 0.0  ;;  %v16509_v3 = vpop.permute.xlu0 %16508  ;;  %19820 = vrcp.f32 %v16504_v52 }
0x2678   : > { %v16263_v43 = vmul.f32 %v19801_v4, %v22802_v21  ;;  %v16274_v25 = vmul.f32 %v17421_v59, %v16260_v35  ;;  %v16289_v63 = vadd.f32 %v22881_v33, %v16275_v55  ;;  %v16358_v21 = vrot.slane %v16357_v15, 4  ;;  %v16543_v4 = vpop.permute.xlu1 %16542 }
0x2679   : > { %v19803_v17 = vpop.eup %19802  ;;  %v16350_v34 = vsel %vm740_vm0, %v16342_v54, 0.0  ;;  %19822 = vrcp.f32 %v16509_v3  ;;  %vm16561_vm1 = vcmp.eq.s32.totalorder %v16543_v4, 1 }
0x267a   : > { %v16262_v13 = vmul.f32 %v19803_v17, %v22808_v28  ;;  %v16288_v42 = vadd.f32 %v22881_v33, %v16274_v25  ;;  %v16351_v46 = vrot.slane %v16350_v34, 4  ;;  %v16345_v41 = vmul.f32 %v22862_v38, %v16289_v63 }
0x267b   : > { %v19805_v50 = vpop.eup %19804  ;;  %v16277_v9 = vmul.f32 %v17421_v59, %v16263_v43  ;;  %v16359_v31 = vadd.f32 %v16358_v21, %v16357_v15  ;;  %v16540_v24 = vpop.permute.xlu0 %16539 }
0x267c   : > { %v16265_v36 = vmul.f32 %v19805_v50, %v22814_v56  ;;  %v16344_v12 = vmul.f32 %v22860_v45, %v16288_v42  ;;  %v16276_v48 = vmul.f32 %v17421_v59, %v16262_v13  ;;  %v16352_v57 = vadd.f32 %v16351_v46, %v16350_v34 }
0x267d   : > { %v19807_v28 = vpop.eup %19806  ;;  %v16371_v53 = vsel %vm740_vm0, %v16345_v41, 0.0  ;;  %v16360_v56 = vrot.slane %v16359_v31, 2  ;;  %v16291_v45 = vadd.f32 %v22881_v33, %v16277_v9  ;;  %vm16560_vm3 = vcmp.eq.s32.totalorder %v16540_v24, 1 }
0x267e   : > { %v16264_v0 = vmul.f32 %v19807_v28, %v22820_v19  ;;  %v16279_v14 = vmul.f32 %v17421_v59, %v16265_v36  ;;  %v16364_v38 = vsel %vm740_vm0, %v16344_v12, 0.0  ;;  %v16290_v40 = vadd.f32 %v22881_v33, %v16276_v48  ;;  %v19809_v6 = vpop.eup %19808 }
0x267f   : > { %v16353_v10 = vrot.slane %v16352_v57, 2  ;;  %v16365_v18 = vrot.slane %v16364_v38, 4  ;;  %v16372_v37 = vrot.slane %v16371_v53, 4  ;;  %v16361_v19 = vadd.f32 %v16360_v56, %v16359_v31  ;;  %v19811_v39 = vpop.eup %19810  ;;  %v16546_v34 = vpop.permute.xlu0 %16545 }
0x2680   : > { %v16293_v62 = vadd.f32 %v22881_v33, %v16279_v14  ;;  %v16346_v60 = vmul.f32 %v22864_v49, %v16290_v40  ;;  %v16278_v32 = vmul.f32 %v17421_v59, %v16264_v0  ;;  %v16347_v2 = vmul.f32 %v22868_v22, %v16291_v45  ;;  %v19813_v5 = vpop.eup %19812  ;;  %v16549_v0 = vpop.permute.xlu1 %16548 }
0x2681   : > { %v16354_v23 = vadd.f32 %v16353_v10, %v16352_v57  ;;  %v16366_v11 = vadd.f32 %v16365_v18, %v16364_v38  ;;  %v16373_v29 = vadd.f32 %v16372_v37, %v16371_v53  ;;  %v16362_v27 = vrot.slane %v16361_v19, 1 }
0x2682   : > { %v16349_v47 = vmul.f32 %v16340_v8, %v16293_v62  ;;  %v16378_v16 = vsel %vm740_vm0, %v16346_v60, 0.0  ;;  %v16292_v7 = vadd.f32 %v22881_v33, %v16278_v32  ;;  %v19815_v33 = vpop.eup %19814  ;;  %v16385_v25 = vsel %vm740_vm0, %v16347_v2, 0.0 }
0x2683   : > { %v16355_v26 = vrot.slane %v16354_v23, 1  ;;  %v16367_v30 = vrot.slane %v16366_v11, 2  ;;  %v16379_v44 = vrot.slane %v16378_v16, 4  ;;  %v16374_v51 = vrot.slane %v16373_v29, 2  ;;  %v19817_v17 = vpop.eup %19816  ;;  %v16552_v37 = vpop.permute.xlu0 %16551 }
0x2684   : > { %v16399_v49 = vsel %vm740_vm0, %v16349_v47, 0.0  ;;  %v16348_v59 = vmul.f32 %v22872_v20, %v16292_v7  ;;  %v16363_v55 = vadd.f32 %v16362_v27, %v16361_v19  ;;  %v16386_v42 = vrot.slane %v16385_v25, 4  ;;  %v19819_v50 = vpop.eup %19818  ;;  %v16555_v24 = vpop.permute.xlu1 %16554 }
0x2685   : > { %v16356_v35 = vadd.f32 %v16355_v26, %v16354_v23  ;;  %v16400_v1 = vrot.slane %v16399_v49, 4  ;;  %v16368_v8 = vadd.f32 %v16367_v30, %v16366_v11  ;;  %v16380_v58 = vadd.f32 %v16379_v44, %v16378_v16  ;;  %v19821_v9 = vpop.eup %19820 }
0x2686   : > { %v16392_v43 = vsel %vm740_vm0, %v16348_v59, 0.0  ;;  %v16375_v54 = vadd.f32 %v16374_v51, %v16373_v29  ;;  %v16514_v36 = vmul.f32 %v19811_v39, %v16363_v55  ;;  %v16387_v48 = vadd.f32 %v16386_v42, %v16385_v25  ;;  %v19823_v56 = vpop.eup %19822 }
0x2687   : > { %v16401_v15 = vadd.f32 %v16400_v1, %v16399_v49  ;;  %v16369_v63 = vrot.slane %v16368_v8, 1  ;;  %v16381_v20 = vrot.slane %v16380_v58, 2  ;;  %v16512_v13 = vmul.f32 %v19809_v6, %v16356_v35  ;;  %v16558_v59 = vpop.permute.xlu0 %16557 }
0x2688   : > { %v16393_v22 = vrot.slane %v16392_v43, 4  ;;  %v16376_v52 = vrot.slane %v16375_v54, 1  ;;  %v16388_v38 = vrot.slane %v16387_v48, 2  ;;  %v16568_v45 = vsel %vm16560_vm3, %v16514_v36, 0.0 }
0x2689   : > { %v16402_v46 = vrot.slane %v16401_v15, 2  ;;  %v16370_v21 = vadd.f32 %v16369_v63, %v16368_v8  ;;  %v16382_v41 = vadd.f32 %v16381_v20, %v16380_v58  ;;  %v16567_v53 = vsel %vm16559_vm15, %v16512_v13, 0.0  ;;  %v17423_v58 = vld [vmem:[%s22948_s20] ss:$0 sm:$0xff] }
0x268a   : > { %v16394_v12 = vadd.f32 %v16393_v22, %v16392_v43  ;;  %v16377_v3 = vadd.f32 %v16376_v52, %v16375_v54  ;;  %v16389_v32 = vadd.f32 %v16388_v38, %v16387_v48  ;;  %vm16563_vm4 = vcmp.eq.s32.totalorder %v16549_v0, 1 }
0x268b   : > { %v16403_v28 = vadd.f32 %v16402_v46, %v16401_v15  ;;  %v16516_v57 = vmul.f32 %v19813_v5, %v16370_v21  ;;  %v16383_v31 = vrot.slane %v16382_v41, 1  ;;  %v16595_v61 = vsel %vm16594_vm13, %v16568_v45, %v16567_v53 }
0x268c   : > { %v16395_v14 = vrot.slane %v16394_v12, 2  ;;  %v16518_v60 = vmul.f32 %v19815_v33, %v16377_v3  ;;  %v16390_v47 = vrot.slane %v16389_v32, 1  ;;  %vm16562_vm6 = vcmp.eq.s32.totalorder %v16546_v34, 1 }
0x268d   : > { %v16569_v40 = vsel %vm16561_vm1, %v16516_v57, 0.0  ;;  %v16384_v10 = vadd.f32 %v16383_v31, %v16382_v41  ;;  %v16404_v18 = vrot.slane %v16403_v28, 1  ;;  %vm16565_vm9 = vcmp.eq.s32.totalorder %v16555_v24, 1 }
0x268e   : > { %v16396_v62 = vadd.f32 %v16395_v14, %v16394_v12  ;;  %v16597_v19 = vsel %vm16596_vm14, %v16569_v40, %v16595_v61  ;;  %v16570_v6 = vsel %vm16562_vm6, %v16518_v60, 0.0  ;;  %v16391_v26 = vadd.f32 %v16390_v47, %v16389_v32 }
0x268f   : > { %v16520_v23 = vmul.f32 %v19817_v17, %v16384_v10  ;;  %v16405_v16 = vadd.f32 %v16404_v18, %v16403_v28  ;;  %v16599_v30 = vsel %vm16598_vm5, %v16570_v6, %v16597_v19  ;;  %vm16564_vm10 = vcmp.eq.s32.totalorder %v16552_v37, 1 }
0x2690   : > { %v16397_v11 = vrot.slane %v16396_v62, 1  ;;  %v16522_v27 = vmul.f32 %v19819_v50, %v16391_v26  ;;  %vm16566_vm13 = vcmp.eq.s32.totalorder %v16558_v59, 1 }
0x2691   : > { %v16571_v7 = vsel %vm16563_vm4, %v16520_v23, 0.0  ;;  %v16526_v49 = vmul.f32 %v19823_v56, %v16405_v16 }
0x2692   : > { %v16398_v29 = vadd.f32 %v16397_v11, %v16396_v62  ;;  %v16601_v39 = vsel %vm16600_vm7, %v16571_v7, %v16599_v30  ;;  %v16572_v2 = vsel %vm16564_vm10, %v16522_v27, 0.0 }
0x2693   : > { %v16603_v5 = vsel %vm16602_vm8, %v16572_v2, %v16601_v39  ;;  %v16574_v1 = vsel %vm16566_vm13, %v16526_v49, 0.0 }
0x2694   : > { %v16524_v44 = vmul.f32 %v19821_v9, %v16398_v29 }
0x2696   : > { %v16573_v51 = vsel %vm16565_vm9, %v16524_v44, 0.0 }
0x2697   : > { %v16605_v35 = vsel %vm16604_vm11, %v16573_v51, %v16603_v5 }
0x2698   : > { %v16607_v8 = vsel %vm16606_vm12, %v16574_v1, %v16605_v35 }
0x2699   : > { %19441 = vmatmul.mubr.msk.f32.vlgmr.msra.gmra.mxu0 %vm740_vm0, %v16607_v8 }
0x2759   : > { %v16676_v33 = vpop.f32.mrf.mxu0 }
0x275a   : > { %v16677_v4 = vadd.f32 %v17423_v58, %v16676_v33 }
0x275b   : > { %v19442_v55 = vpop.f32.mrf.mxu0 }
0x275c   : > { %16680 = vst.msk [vmem:[%s697_s21] sm:$0xff] %vm1150_vm2, %v16677_v4 }
0x275d PF: > { %s22971_s29 = sld [smem:[#allocation2_spill]] }
0x2763   : > { %s31_s2 = sadd.s32 1, %s22971_s29  }
0x2764   : > { %p28_p5 = scmp.ge.s32.totalorder %s31_s2, 4  }
0x2766   :  { %30 = sbr.rel (!%p28_p5) target bundleno = 8 (0x8), region = 198 }

</bundles_post_ra>
